<compile_context>
chip_gen: v7x
topology: tpu7x:2x2x1
jax: 0.10.0
libtpu: 0.0.40
codegen_flags: <defaults>
</compile_context>

<pallas_src>
import jax
import jax.numpy as jnp
from jax import lax
from jax.experimental import pallas as pl
from jax.experimental.pallas import tpu as pltpu

LEAKY_SLOPE = 0.2
BN_EPS = 1e-5
LANE = 128                      # lane-dense channel padding target
_TAPS = ((0, 0), (0, 1), (1, 0), (1, 1))


def _round_up(v, m):
    return ((v + m - 1) // m) * m


# ----------------------------- Pallas kernels -----------------------------

def conv_bn_act_kernel(x_ref, w_ref, b_ref, g_ref, beta_ref, o_ref):
    # x_ref : (N, Hs, Ws, Cs)   padded + space-to-depth'd input
    # w_ref : (4, Cs, CO)       packed block-tap weights, tap = dh*2 + dw
    # b/g/beta : (1, CO)        conv bias, BN gamma, BN beta (zero padded)
    # o_ref : (N, OH, OW, CO)
    n, oh, ow, co = o_ref.shape
    w = w_ref[...].astype(jnp.bfloat16)
    bias = b_ref[...]

    ssum = jnp.zeros((1, co), jnp.float32)
    ssq = jnp.zeros((1, co), jnp.float32)

    # Pass 1: fused im2col conv (4 block taps, bf16 MXU, f32 accumulate),
    # stage pre-BN rows in o_ref and accumulate batch statistics.
    for i in range(n):
        for h in range(oh):
            row = jnp.zeros((ow, co), jnp.float32)
            for t, (dh, dw) in enumerate(_TAPS):
                xt = x_ref[i, h + dh, dw:dw + ow, :].astype(jnp.bfloat16)
                row = row + jnp.dot(xt, w[t],
                                    preferred_element_type=jnp.float32)
            row = row + bias
            ssum = ssum + jnp.sum(row, axis=0, keepdims=True)
            ssq = ssq + jnp.sum(row * row, axis=0, keepdims=True)
            o_ref[i, h] = row

    # Pass 2: training-mode BatchNorm (biased batch stats over N*OH*OW, like
    # a freshly-built PyTorch module) + LeakyReLU, written back in place.
    inv_m = 1.0 / float(n * oh * ow)
    mean = ssum * inv_m
    var = ssq * inv_m - mean * mean
    scale = g_ref[...] * lax.rsqrt(var + BN_EPS)
    shift = beta_ref[...] - mean * scale
    for i in range(n):
        for h in range(oh):
            y = o_ref[i, h] * scale + shift
            o_ref[i, h] = jnp.where(y > 0, y, LEAKY_SLOPE * y)


def conv_act_linear_kernel(x_ref, w_ref, b_ref, lw_ref, lb_ref, o_ref):
    # Last conv block (no BN, no act) + Flatten + LeakyReLU + Linear.
    # x_ref : (N, Hs, Ws, Cs); w_ref : (4, Cs, C); b_ref : (1, C)
    # lw_ref: (OH, OW, C, O)   linear weight pre-permuted to NHWC order
    # lb_ref: (1, O);  o_ref : (N, O)
    n = o_ref.shape[0]
    oh, ow, c, o = lw_ref.shape
    w = w_ref[...].astype(jnp.bfloat16)
    bias = b_ref[...]
    lbias = lb_ref[...]

    for i in range(n):
        out_row = jnp.zeros((1, o), jnp.float32)
        for h in range(oh):
            row = jnp.zeros((ow, c), jnp.float32)
            for t, (dh, dw) in enumerate(_TAPS):
                xt = x_ref[i, h + dh, dw:dw + ow, :].astype(jnp.bfloat16)
                row = row + jnp.dot(xt, w[t],
                                    preferred_element_type=jnp.float32)
            row = row + bias
            row = jnp.where(row > 0, row, LEAKY_SLOPE * row).astype(jnp.bfloat16)
            for wc in range(ow):
                out_row = out_row + jnp.dot(
                    row[wc:wc + 1, :], lw_ref[h, wc].astype(jnp.bfloat16),
                    preferred_element_type=jnp.float32)
        o_ref[i:i + 1, :] = (out_row + lbias).astype(o_ref.dtype)


# --------------------------- pallas_call wrappers --------------------------

def conv_bn_act(x_s2d, w_packed, b, g, beta, oh, ow):
    n, hs, ws, cs = x_s2d.shape
    cout_pad = w_packed.shape[-1]
    n_tiles = cout_pad // LANE
    m = n * oh * ow
    flops = 2 * m * (4 * cs) * cout_pad + 10 * m * cout_pad
    bytes_accessed = 4 * (x_s2d.size + w_packed.size + 3 * cout_pad
                          + m * cout_pad)
    return pl.pallas_call(
        conv_bn_act_kernel,
        out_shape=jax.ShapeDtypeStruct((n, oh, ow, cout_pad), jnp.float32),
        grid=(n_tiles,),
        in_specs=[
            pl.BlockSpec((n, hs, ws, cs), lambda j: (0, 0, 0, 0)),
            pl.BlockSpec((4, cs, LANE), lambda j: (0, 0, j)),
            pl.BlockSpec((1, LANE), lambda j: (0, j)),
            pl.BlockSpec((1, LANE), lambda j: (0, j)),
            pl.BlockSpec((1, LANE), lambda j: (0, j)),
        ],
        out_specs=pl.BlockSpec((n, oh, ow, LANE), lambda j: (0, 0, 0, j)),
        compiler_params=pltpu.CompilerParams(
            dimension_semantics=("parallel",),
            vmem_limit_bytes=32 * 1024 * 1024),
        cost_estimate=pl.CostEstimate(flops=int(flops), transcendentals=0,
                                      bytes_accessed=int(bytes_accessed)),
    )(x_s2d, w_packed, b.reshape(1, cout_pad), g.reshape(1, cout_pad),
      beta.reshape(1, cout_pad))


def conv_act_linear(x_s2d, w_packed, b, lw, lb, oh, ow):
    n, hs, ws, cs = x_s2d.shape
    cpad = w_packed.shape[-1]
    opad = lw.shape[-1]
    n_tiles = opad // LANE
    m = n * oh * ow
    flops = 2 * m * (4 * cs) * cpad + 2 * n * (oh * ow * cpad) * opad
    bytes_accessed = 4 * (x_s2d.size + w_packed.size + cpad + lw.size
                          + opad + n * opad)
    return pl.pallas_call(
        conv_act_linear_kernel,
        out_shape=jax.ShapeDtypeStruct((n, opad), jnp.float32),
        grid=(n_tiles,),
        in_specs=[
            pl.BlockSpec((n, hs, ws, cs), lambda j: (0, 0, 0, 0)),
            pl.BlockSpec((4, cs, cpad), lambda j: (0, 0, 0)),
            pl.BlockSpec((1, cpad), lambda j: (0, 0)),
            pl.BlockSpec((oh, ow, cpad, LANE), lambda j: (0, 0, 0, j)),
            pl.BlockSpec((1, LANE), lambda j: (0, j)),
        ],
        out_specs=pl.BlockSpec((n, LANE), lambda j: (0, j)),
        compiler_params=pltpu.CompilerParams(
            dimension_semantics=("parallel",),
            vmem_limit_bytes=32 * 1024 * 1024),
        cost_estimate=pl.CostEstimate(flops=int(flops), transcendentals=0,
                                      bytes_accessed=int(bytes_accessed)),
    )(x_s2d, w_packed, b.reshape(1, cpad), lw, lb.reshape(1, opad))


# ------------------------------- JAX glue ----------------------------------

def _pad_and_s2d(x):
    # (N, H, W, C) -> zero-pad by 2 (PyTorch padding=2; +1 trailing row/col to
    # make the padded extent even, never read by a valid output) and
    # space-to-depth by 2 so the stride-2 ks=4 conv becomes a stride-1 ks=2
    # conv.  Channel packing order: (ph, pw, c).  Pure layout, 1x traffic.
    n, h, w, c = x.shape
    hp = h + 4 + (h % 2)
    wp = w + 4 + (w % 2)
    xp = jnp.pad(x, ((0, 0), (2, hp - h - 2), (2, wp - w - 2), (0, 0)))
    xs = xp.reshape(n, hp // 2, 2, wp // 2, 2, c)
    xs = xs.transpose(0, 1, 3, 2, 4, 5)
    return xs.reshape(n, hp // 2, wp // 2, 4 * c)


def _pack_conv_weight(w, cin_pad, cout_pad):
    # (4, 4, Cin, Cout) -> (4 block taps, 4*cin_pad, cout_pad); tap = dh*2+dw,
    # input-channel order (ph, pw, c), matching _pad_and_s2d.
    ks = w.shape[0]
    assert ks == 4
    cin, cout = w.shape[2], w.shape[3]
    wp = jnp.zeros((ks, ks, cin_pad, cout_pad), w.dtype)
    wp = wp.at[:, :, :cin, :cout].set(w)
    wp = wp.reshape(2, 2, 2, 2, cin_pad, cout_pad)   # (dh, ph, dw, pw, c, o)
    wp = wp.transpose(0, 2, 1, 3, 4, 5)              # (dh, dw, ph, pw, c, o)
    return wp.reshape(4, 4 * cin_pad, cout_pad)


def _pad_vec(v, n_pad):
    return jnp.pad(v, (0, n_pad - v.shape[0]))


def init_params(key, channel_sizes, out_size, ks, s, input_hw):
    params = {"conv_w": [], "conv_b": [], "bn_g": [], "bn_b": []}
    h, w = input_hw
    p = ks // 2
    for l in range(len(channel_sizes) - 1):
        cin, cout = channel_sizes[l], channel_sizes[l + 1]
        key, k1, k2 = jax.random.split(key, 3)
        # Stored as (KH, KW, Cin, Cout) == PyTorch (Cout,Cin,KH,KW) transposed.
        params["conv_w"].append(
            0.1 * jax.random.normal(k1, (ks, ks, cin, cout), jnp.float32))
        params["conv_b"].append(
            0.1 * jax.random.normal(k2, (cout,), jnp.float32))
        params["bn_g"].append(jnp.ones((cout,), jnp.float32))
        params["bn_b"].append(jnp.zeros((cout,), jnp.float32))
        h = (h + 2 * p - ks) // s + 1
        w = (w + 2 * p - ks) // s + 1
    flat_size = channel_sizes[-1] * h * w
    key, k1, k2 = jax.random.split(key, 3)
    # Stored as (flat_size, out_size), flat index in PyTorch (C, H, W) order.
    params["lin_w"] = 0.05 * jax.random.normal(k1, (flat_size, out_size),
                                               jnp.float32)
    params["lin_b"] = 0.05 * jax.random.normal(k2, (out_size,), jnp.float32)
    return params


def pack_params(params, channel_sizes, out_size, ks, s, input_hw):
    # One-time conversion of module parameters into the padded / tap-packed
    # layouts the kernels consume (lane-dense channels, NHWC linear weight).
    assert ks == 4 and s == 2, "packing specialized to ConvToFlat defaults"
    h, w = input_hw
    p = ks // 2
    n_conv = len(channel_sizes) - 1
    cin0_pad = _round_up(channel_sizes[0], 32)    # 4*cin0_pad is lane aligned
    packed = {"conv_w": [], "conv_b": [], "bn_g": [], "bn_b": [],
              "out_hw": [], "cin0_pad": cin0_pad, "out_size": out_size}
    cin_carry = cin0_pad
    for l in range(n_conv):
        cout = channel_sizes[l + 1]
        cout_pad = _round_up(cout, LANE)
        packed["conv_w"].append(
            _pack_conv_weight(params["conv_w"][l], cin_carry, cout_pad))
        packed["conv_b"].append(_pad_vec(params["conv_b"][l], cout_pad))
        packed["bn_g"].append(_pad_vec(params["bn_g"][l], cout_pad))
        packed["bn_b"].append(_pad_vec(params["bn_b"][l], cout_pad))
        h = (h + 2 * p - ks) // s + 1
        w = (w + 2 * p - ks) // s + 1
        packed["out_hw"].append((h, w))
        cin_carry = cout_pad
    # PyTorch nn.Flatten uses NCHW (C, H, W) order; pre-permute the rows of
    # lin_w to the kernel's NHWC activation order and zero-pad channels/out.
    c_last = channel_sizes[-1]
    opad = _round_up(out_size, LANE)
    lw = params["lin_w"].reshape(c_last, h, w, out_size).transpose(1, 2, 0, 3)
    lw = jnp.pad(lw, ((0, 0), (0, 0), (0, cin_carry - c_last),
                      (0, opad - out_size)))
    packed["lin_w"] = lw
    packed["lin_b"] = _pad_vec(params["lin_b"], opad)
    return packed


def conv_to_flat_forward(x_nchw, packed):
    x = jnp.transpose(x_nchw, (0, 2, 3, 1))                  # NCHW -> NHWC
    cin0 = x.shape[-1]
    x = jnp.pad(x, ((0, 0), (0, 0), (0, 0), (0, packed["cin0_pad"] - cin0)))
    n_conv = len(packed["conv_w"])
    for l in range(n_conv - 1):                              # conv + BN + act
        oh, ow = packed["out_hw"][l]
        x = conv_bn_act(_pad_and_s2d(x), packed["conv_w"][l],
                        packed["conv_b"][l], packed["bn_g"][l],
                        packed["bn_b"][l], oh, ow)
    oh, ow = packed["out_hw"][-1]                            # last conv + head
    out = conv_act_linear(_pad_and_s2d(x), packed["conv_w"][-1],
                          packed["conv_b"][-1], packed["lin_w"],
                          packed["lin_b"], oh, ow)
    return out[:, :packed["out_size"]]


# ------------------------------ reference ----------------------------------

def _im2col(x_nhwc, ks, s, p):
    n, h, w, c = x_nhwc.shape
    xp = jnp.pad(x_nhwc, ((0, 0), (p, p), (p, p), (0, 0)))
    oh = (h + 2 * p - ks) // s + 1
    ow = (w + 2 * p - ks) // s + 1
    cols = []
    for kh in range(ks):
        for kw in range(ks):
            cols.append(xp[:, kh:kh + (oh - 1) * s + 1:s,
                           kw:kw + (ow - 1) * s + 1:s, :])
    patches = jnp.stack(cols, axis=3)
    return patches.reshape(n * oh * ow, ks * ks * c), (n, oh, ow)


def reference_forward(x_nchw, params, ks, s):
    # Pure-jnp mirror of the module math (same bf16-input / f32-accumulate
    # matmul precision as the kernels).
    x = jnp.transpose(x_nchw, (0, 2, 3, 1))
    n_layers = len(params["conv_w"])
    for l in range(n_layers):
        w = params["conv_w"][l]
        cin, cout = w.shape[2], w.shape[3]
        patches, (n, oh, ow) = _im2col(x, ks, s, ks // 2)
        y = jnp.dot(patches.astype(jnp.bfloat16),
                    w.reshape(ks * ks * cin, cout).astype(jnp.bfloat16),
                    preferred_element_type=jnp.float32) + params["conv_b"][l]
        if l != n_layers - 1:
            mean = y.mean(0, keepdims=True)
            var = ((y - mean) ** 2).mean(0, keepdims=True)
            y = (y - mean) / jnp.sqrt(var + BN_EPS)
            y = y * params["bn_g"][l] + params["bn_b"][l]
            y = jnp.where(y > 0, y, LEAKY_SLOPE * y)
        x = y.reshape(n, oh, ow, cout)
    flat = jnp.transpose(x, (0, 3, 1, 2)).reshape(x.shape[0], -1)
    h = jnp.where(flat > 0, flat, LEAKY_SLOPE * flat)
    return jnp.dot(h.astype(jnp.bfloat16),
                   params["lin_w"].astype(jnp.bfloat16),
                   preferred_element_type=jnp.float32) + params["lin_b"]


if __name__ == "__main__":
    key = jax.random.PRNGKey(0)
    channel_sizes = [4, 8, 8]          # ConvToFlat(channel_sizes, out_size, 4, 2)
    out_size = 32
    ks, s = 4, 2
    n, h, w = 2, 16, 16

    key, kx, kp = jax.random.split(key, 3)
    x = jax.random.normal(kx, (n, channel_sizes[0], h, w), jnp.float32)
    params = init_params(kp, channel_sizes, out_size, ks, s, (h, w))
    packed = pack_params(params, channel_sizes, out_size, ks, s, (h, w))

    out = conv_to_flat_forward(x, packed)
    out = jax.block_until_ready(out)

    ref = jax.block_until_ready(reference_forward(x, params, ks, s))
    assert out.shape == (n, out_size), out.shape
    assert bool(jnp.all(jnp.isfinite(out)))
    max_err = float(jnp.max(jnp.abs(out - ref)))
    assert bool(jnp.allclose(out, ref, rtol=1e-3, atol=1e-3)), max_err
    print("KERNEL_OK")
</pallas_src>

<mosaic_0001>
module attributes {stable_mosaic.version = 11 : i64} {
  func.func @conv_bn_act_kernel(%arg0: i32, %arg1: memref<2x10x10x128xf32, #tpu.memory_space<vmem>>, %arg2: memref<4x128x128xf32, #tpu.memory_space<vmem>>, %arg3: memref<1x128xf32, #tpu.memory_space<vmem>>, %arg4: memref<1x128xf32, #tpu.memory_space<vmem>>, %arg5: memref<1x128xf32, #tpu.memory_space<vmem>>, %arg6: memref<2x9x9x128xf32, #tpu.memory_space<vmem>>) attributes {dimension_semantics = [#tpu.dimension_semantics<parallel>], iteration_bounds = array<i64: 1>, scalar_prefetch = 0 : i64, scratch_operands = 0 : i64, tpu.core_type = #tpu.core_type<tc>, window_params = [{pipeline_mode = #tpu.pipeline_mode<synchronous>, transform_indices = @transform_0, window_bounds = array<i64: 2, 10, 10, 128>}, {transform_indices = @transform_1, window_bounds = array<i64: 4, 128, 128>}, {transform_indices = @transform_2, window_bounds = array<i64: 1, 128>}, {transform_indices = @transform_3, window_bounds = array<i64: 1, 128>}, {transform_indices = @transform_4, window_bounds = array<i64: 1, 128>}, {transform_indices = @transform_5, window_bounds = array<i64: 2, 9, 9, 128>}]} {
    %c0 = arith.constant 0 : index
    %c0_0 = arith.constant 0 : index
    %c0_1 = arith.constant 0 : index
    %0 = vector.load %arg2[%c0, %c0_0, %c0_1] : memref<4x128x128xf32, #tpu.memory_space<vmem>>, vector<4x128x128xf32>
    %1 = arith.truncf %0 : vector<4x128x128xf32> to vector<4x128x128xbf16>
    %c0_2 = arith.constant 0 : index
    %c0_3 = arith.constant 0 : index
    %2 = vector.load %arg3[%c0_2, %c0_3] : memref<1x128xf32, #tpu.memory_space<vmem>>, vector<1x128xf32>
    %cst = arith.constant 0.000000e+00 : f32
    %3 = vector.broadcast %cst : f32 to vector<1x128xf32>
    %cst_4 = arith.constant 0.000000e+00 : f32
    %4 = vector.broadcast %cst_4 : f32 to vector<1x128xf32>
    %cst_5 = arith.constant 0.000000e+00 : f32
    %5 = vector.broadcast %cst_5 : f32 to vector<9x128xf32>
    %c0_6 = arith.constant 0 : index
    %c0_7 = arith.constant 0 : index
    %c0_8 = arith.constant 0 : index
    %c0_9 = arith.constant 0 : index
    %6 = vector.load %arg1[%c0_6, %c0_7, %c0_8, %c0_9] : memref<2x10x10x128xf32, #tpu.memory_space<vmem>>, vector<1x1x9x128xf32>
    %7 = vector.shape_cast %6 : vector<1x1x9x128xf32> to vector<9x128xf32>
    %8 = arith.truncf %7 : vector<9x128xf32> to vector<9x128xbf16>
    %9 = vector.extract_strided_slice %1 {offsets = [0, 0, 0], sizes = [1, 128, 128], strides = [1, 1, 1]} : vector<4x128x128xbf16> to vector<1x128x128xbf16>
    %10 = vector.shape_cast %9 : vector<1x128x128xbf16> to vector<128x128xbf16>
    %cst_10 = arith.constant dense<0.000000e+00> : vector<9x128xf32>
    %11 = tpu.matmul %8, %10, %cst_10 {dimension_numbers = #tpu.dot_dimension_numbers<[1], [0], [0], [1], [0, 0, 1, 1], [], []>} : vector<9x128xbf16>, vector<128x128xbf16>, vector<9x128xf32> -> vector<9x128xf32>
    %12 = arith.addf %5, %11 : vector<9x128xf32>
    %c0_11 = arith.constant 0 : index
    %c0_12 = arith.constant 0 : index
    %c1 = arith.constant 1 : index
    %c0_13 = arith.constant 0 : index
    %13 = vector.load %arg1[%c0_11, %c0_12, %c1, %c0_13] : memref<2x10x10x128xf32, #tpu.memory_space<vmem>>, vector<1x1x9x128xf32>
    %14 = vector.shape_cast %13 : vector<1x1x9x128xf32> to vector<9x128xf32>
    %15 = arith.truncf %14 : vector<9x128xf32> to vector<9x128xbf16>
    %16 = vector.extract_strided_slice %1 {offsets = [1, 0, 0], sizes = [1, 128, 128], strides = [1, 1, 1]} : vector<4x128x128xbf16> to vector<1x128x128xbf16>
    %17 = vector.shape_cast %16 : vector<1x128x128xbf16> to vector<128x128xbf16>
    %cst_14 = arith.constant dense<0.000000e+00> : vector<9x128xf32>
    %18 = tpu.matmul %15, %17, %cst_14 {dimension_numbers = #tpu.dot_dimension_numbers<[1], [0], [0], [1], [0, 0, 1, 1], [], []>} : vector<9x128xbf16>, vector<128x128xbf16>, vector<9x128xf32> -> vector<9x128xf32>
    %19 = arith.addf %12, %18 : vector<9x128xf32>
    %c0_15 = arith.constant 0 : index
    %c1_16 = arith.constant 1 : index
    %c0_17 = arith.constant 0 : index
    %c0_18 = arith.constant 0 : index
    %20 = vector.load %arg1[%c0_15, %c1_16, %c0_17, %c0_18] : memref<2x10x10x128xf32, #tpu.memory_space<vmem>>, vector<1x1x9x128xf32>
    %21 = vector.shape_cast %20 : vector<1x1x9x128xf32> to vector<9x128xf32>
    %22 = arith.truncf %21 : vector<9x128xf32> to vector<9x128xbf16>
    %23 = vector.extract_strided_slice %1 {offsets = [2, 0, 0], sizes = [1, 128, 128], strides = [1, 1, 1]} : vector<4x128x128xbf16> to vector<1x128x128xbf16>
    %24 = vector.shape_cast %23 : vector<1x128x128xbf16> to vector<128x128xbf16>
    %cst_19 = arith.constant dense<0.000000e+00> : vector<9x128xf32>
    %25 = tpu.matmul %22, %24, %cst_19 {dimension_numbers = #tpu.dot_dimension_numbers<[1], [0], [0], [1], [0, 0, 1, 1], [], []>} : vector<9x128xbf16>, vector<128x128xbf16>, vector<9x128xf32> -> vector<9x128xf32>
    %26 = arith.addf %19, %25 : vector<9x128xf32>
    %c0_20 = arith.constant 0 : index
    %c1_21 = arith.constant 1 : index
    %c1_22 = arith.constant 1 : index
    %c0_23 = arith.constant 0 : index
    %27 = vector.load %arg1[%c0_20, %c1_21, %c1_22, %c0_23] : memref<2x10x10x128xf32, #tpu.memory_space<vmem>>, vector<1x1x9x128xf32>
    %28 = vector.shape_cast %27 : vector<1x1x9x128xf32> to vector<9x128xf32>
    %29 = arith.truncf %28 : vector<9x128xf32> to vector<9x128xbf16>
    %30 = vector.extract_strided_slice %1 {offsets = [3, 0, 0], sizes = [1, 128, 128], strides = [1, 1, 1]} : vector<4x128x128xbf16> to vector<1x128x128xbf16>
    %31 = vector.shape_cast %30 : vector<1x128x128xbf16> to vector<128x128xbf16>
    %cst_24 = arith.constant dense<0.000000e+00> : vector<9x128xf32>
    %32 = tpu.matmul %29, %31, %cst_24 {dimension_numbers = #tpu.dot_dimension_numbers<[1], [0], [0], [1], [0, 0, 1, 1], [], []>} : vector<9x128xbf16>, vector<128x128xbf16>, vector<9x128xf32> -> vector<9x128xf32>
    %33 = arith.addf %26, %32 : vector<9x128xf32>
    %34 = vector.broadcast %2 : vector<1x128xf32> to vector<9x128xf32>
    %35 = arith.addf %33, %34 : vector<9x128xf32>
    %cst_25 = arith.constant dense<0.000000e+00> : vector<128xf32>
    %36 = vector.multi_reduction <add>, %35, %cst_25 [0] : vector<9x128xf32> to vector<128xf32>
    %37 = vector.shape_cast %36 : vector<128xf32> to vector<1x128xf32>
    %38 = arith.addf %3, %37 : vector<1x128xf32>
    %39 = arith.mulf %35, %35 : vector<9x128xf32>
    %cst_26 = arith.constant dense<0.000000e+00> : vector<128xf32>
    %40 = vector.multi_reduction <add>, %39, %cst_26 [0] : vector<9x128xf32> to vector<128xf32>
    %41 = vector.shape_cast %40 : vector<128xf32> to vector<1x128xf32>
    %42 = arith.addf %4, %41 : vector<1x128xf32>
    %c0_27 = arith.constant 0 : index
    %c0_28 = arith.constant 0 : index
    %c0_29 = arith.constant 0 : index
    %c0_30 = arith.constant 0 : index
    %43 = vector.load %arg6[%c0_27, %c0_28, %c0_29, %c0_30] : memref<2x9x9x128xf32, #tpu.memory_space<vmem>>, vector<1x1x9x128xf32>
    %44 = vector.shape_cast %43 : vector<1x1x9x128xf32> to vector<9x128xf32>
    %45 = vector.shape_cast %35 : vector<9x128xf32> to vector<1x1x9x128xf32>
    tpu.vector_store %arg6[%c0_27, %c0_28, %c0_29, %c0_30], %45 {strides = array<i32>} : memref<2x9x9x128xf32, #tpu.memory_space<vmem>>, vector<1x1x9x128xf32>,
    %cst_31 = arith.constant 0.000000e+00 : f32
    %46 = vector.broadcast %cst_31 : f32 to vector<9x128xf32>
    %c0_32 = arith.constant 0 : index
    %c1_33 = arith.constant 1 : index
    %c0_34 = arith.constant 0 : index
    %c0_35 = arith.constant 0 : index
    %47 = vector.load %arg1[%c0_32, %c1_33, %c0_34, %c0_35] : memref<2x10x10x128xf32, #tpu.memory_space<vmem>>, vector<1x1x9x128xf32>
    %48 = vector.shape_cast %47 : vector<1x1x9x128xf32> to vector<9x128xf32>
    %49 = arith.truncf %48 : vector<9x128xf32> to vector<9x128xbf16>
    %50 = vector.extract_strided_slice %1 {offsets = [0, 0, 0], sizes = [1, 128, 128], strides = [1, 1, 1]} : vector<4x128x128xbf16> to vector<1x128x128xbf16>
    %51 = vector.shape_cast %50 : vector<1x128x128xbf16> to vector<128x128xbf16>
    %cst_36 = arith.constant dense<0.000000e+00> : vector<9x128xf32>
    %52 = tpu.matmul %49, %51, %cst_36 {dimension_numbers = #tpu.dot_dimension_numbers<[1], [0], [0], [1], [0, 0, 1, 1], [], []>} : vector<9x128xbf16>, vector<128x128xbf16>, vector<9x128xf32> -> vector<9x128xf32>
    %53 = arith.addf %46, %52 : vector<9x128xf32>
    %c0_37 = arith.constant 0 : index
    %c1_38 = arith.constant 1 : index
    %c1_39 = arith.constant 1 : index
    %c0_40 = arith.constant 0 : index
    %54 = vector.load %arg1[%c0_37, %c1_38, %c1_39, %c0_40] : memref<2x10x10x128xf32, #tpu.memory_space<vmem>>, vector<1x1x9x128xf32>
    %55 = vector.shape_cast %54 : vector<1x1x9x128xf32> to vector<9x128xf32>
    %56 = arith.truncf %55 : vector<9x128xf32> to vector<9x128xbf16>
    %57 = vector.extract_strided_slice %1 {offsets = [1, 0, 0], sizes = [1, 128, 128], strides = [1, 1, 1]} : vector<4x128x128xbf16> to vector<1x128x128xbf16>
    %58 = vector.shape_cast %57 : vector<1x128x128xbf16> to vector<128x128xbf16>
    %cst_41 = arith.constant dense<0.000000e+00> : vector<9x128xf32>
    %59 = tpu.matmul %56, %58, %cst_41 {dimension_numbers = #tpu.dot_dimension_numbers<[1], [0], [0], [1], [0, 0, 1, 1], [], []>} : vector<9x128xbf16>, vector<128x128xbf16>, vector<9x128xf32> -> vector<9x128xf32>
    %60 = arith.addf %53, %59 : vector<9x128xf32>
    %c0_42 = arith.constant 0 : index
    %c2 = arith.constant 2 : index
    %c0_43 = arith.constant 0 : index
    %c0_44 = arith.constant 0 : index
    %61 = vector.load %arg1[%c0_42, %c2, %c0_43, %c0_44] : memref<2x10x10x128xf32, #tpu.memory_space<vmem>>, vector<1x1x9x128xf32>
    %62 = vector.shape_cast %61 : vector<1x1x9x128xf32> to vector<9x128xf32>
    %63 = arith.truncf %62 : vector<9x128xf32> to vector<9x128xbf16>
    %64 = vector.extract_strided_slice %1 {offsets = [2, 0, 0], sizes = [1, 128, 128], strides = [1, 1, 1]} : vector<4x128x128xbf16> to vector<1x128x128xbf16>
    %65 = vector.shape_cast %64 : vector<1x128x128xbf16> to vector<128x128xbf16>
    %cst_45 = arith.constant dense<0.000000e+00> : vector<9x128xf32>
    %66 = tpu.matmul %63, %65, %cst_45 {dimension_numbers = #tpu.dot_dimension_numbers<[1], [0], [0], [1], [0, 0, 1, 1], [], []>} : vector<9x128xbf16>, vector<128x128xbf16>, vector<9x128xf32> -> vector<9x128xf32>
    %67 = arith.addf %60, %66 : vector<9x128xf32>
    %c0_46 = arith.constant 0 : index
    %c2_47 = arith.constant 2 : index
    %c1_48 = arith.constant 1 : index
    %c0_49 = arith.constant 0 : index
    %68 = vector.load %arg1[%c0_46, %c2_47, %c1_48, %c0_49] : memref<2x10x10x128xf32, #tpu.memory_space<vmem>>, vector<1x1x9x128xf32>
    %69 = vector.shape_cast %68 : vector<1x1x9x128xf32> to vector<9x128xf32>
    %70 = arith.truncf %69 : vector<9x128xf32> to vector<9x128xbf16>
    %71 = vector.extract_strided_slice %1 {offsets = [3, 0, 0], sizes = [1, 128, 128], strides = [1, 1, 1]} : vector<4x128x128xbf16> to vector<1x128x128xbf16>
    %72 = vector.shape_cast %71 : vector<1x128x128xbf16> to vector<128x128xbf16>
    %cst_50 = arith.constant dense<0.000000e+00> : vector<9x128xf32>
    %73 = tpu.matmul %70, %72, %cst_50 {dimension_numbers = #tpu.dot_dimension_numbers<[1], [0], [0], [1], [0, 0, 1, 1], [], []>} : vector<9x128xbf16>, vector<128x128xbf16>, vector<9x128xf32> -> vector<9x128xf32>
    %74 = arith.addf %67, %73 : vector<9x128xf32>
    %75 = vector.broadcast %2 : vector<1x128xf32> to vector<9x128xf32>
    %76 = arith.addf %74, %75 : vector<9x128xf32>
    %cst_51 = arith.constant dense<0.000000e+00> : vector<128xf32>
    %77 = vector.multi_reduction <add>, %76, %cst_51 [0] : vector<9x128xf32> to vector<128xf32>
    %78 = vector.shape_cast %77 : vector<128xf32> to vector<1x128xf32>
    %79 = arith.addf %38, %78 : vector<1x128xf32>
    %80 = arith.mulf %76, %76 : vector<9x128xf32>
    %cst_52 = arith.constant dense<0.000000e+00> : vector<128xf32>
    %81 = vector.multi_reduction <add>, %80, %cst_52 [0] : vector<9x128xf32> to vector<128xf32>
    %82 = vector.shape_cast %81 : vector<128xf32> to vector<1x128xf32>
    %83 = arith.addf %42, %82 : vector<1x128xf32>
    %c0_53 = arith.constant 0 : index
    %c1_54 = arith.constant 1 : index
    %c0_55 = arith.constant 0 : index
    %c0_56 = arith.constant 0 : index
    %84 = vector.load %arg6[%c0_53, %c1_54, %c0_55, %c0_56] : memref<2x9x9x128xf32, #tpu.memory_space<vmem>>, vector<1x1x9x128xf32>
    %85 = vector.shape_cast %84 : vector<1x1x9x128xf32> to vector<9x128xf32>
    %86 = vector.shape_cast %76 : vector<9x128xf32> to vector<1x1x9x128xf32>
    tpu.vector_store %arg6[%c0_53, %c1_54, %c0_55, %c0_56], %86 {strides = array<i32>} : memref<2x9x9x128xf32, #tpu.memory_space<vmem>>, vector<1x1x9x128xf32>,
    %cst_57 = arith.constant 0.000000e+00 : f32
    %87 = vector.broadcast %cst_57 : f32 to vector<9x128xf32>
    %c0_58 = arith.constant 0 : index
    %c2_59 = arith.constant 2 : index
    %c0_60 = arith.constant 0 : index
    %c0_61 = arith.constant 0 : index
    %88 = vector.load %arg1[%c0_58, %c2_59, %c0_60, %c0_61] : memref<2x10x10x128xf32, #tpu.memory_space<vmem>>, vector<1x1x9x128xf32>
    %89 = vector.shape_cast %88 : vector<1x1x9x128xf32> to vector<9x128xf32>
    %90 = arith.truncf %89 : vector<9x128xf32> to vector<9x128xbf16>
    %91 = vector.extract_strided_slice %1 {offsets = [0, 0, 0], sizes = [1, 128, 128], strides = [1, 1, 1]} : vector<4x128x128xbf16> to vector<1x128x128xbf16>
    %92 = vector.shape_cast %91 : vector<1x128x128xbf16> to vector<128x128xbf16>
    %cst_62 = arith.constant dense<0.000000e+00> : vector<9x128xf32>
    %93 = tpu.matmul %90, %92, %cst_62 {dimension_numbers = #tpu.dot_dimension_numbers<[1], [0], [0], [1], [0, 0, 1, 1], [], []>} : vector<9x128xbf16>, vector<128x128xbf16>, vector<9x128xf32> -> vector<9x128xf32>
    %94 = arith.addf %87, %93 : vector<9x128xf32>
    %c0_63 = arith.constant 0 : index
    %c2_64 = arith.constant 2 : index
    %c1_65 = arith.constant 1 : index
    %c0_66 = arith.constant 0 : index
    %95 = vector.load %arg1[%c0_63, %c2_64, %c1_65, %c0_66] : memref<2x10x10x128xf32, #tpu.memory_space<vmem>>, vector<1x1x9x128xf32>
    %96 = vector.shape_cast %95 : vector<1x1x9x128xf32> to vector<9x128xf32>
    %97 = arith.truncf %96 : vector<9x128xf32> to vector<9x128xbf16>
    %98 = vector.extract_strided_slice %1 {offsets = [1, 0, 0], sizes = [1, 128, 128], strides = [1, 1, 1]} : vector<4x128x128xbf16> to vector<1x128x128xbf16>
    %99 = vector.shape_cast %98 : vector<1x128x128xbf16> to vector<128x128xbf16>
    %cst_67 = arith.constant dense<0.000000e+00> : vector<9x128xf32>
    %100 = tpu.matmul %97, %99, %cst_67 {dimension_numbers = #tpu.dot_dimension_numbers<[1], [0], [0], [1], [0, 0, 1, 1], [], []>} : vector<9x128xbf16>, vector<128x128xbf16>, vector<9x128xf32> -> vector<9x128xf32>
    %101 = arith.addf %94, %100 : vector<9x128xf32>
    %c0_68 = arith.constant 0 : index
    %c3 = arith.constant 3 : index
    %c0_69 = arith.constant 0 : index
    %c0_70 = arith.constant 0 : index
    %102 = vector.load %arg1[%c0_68, %c3, %c0_69, %c0_70] : memref<2x10x10x128xf32, #tpu.memory_space<vmem>>, vector<1x1x9x128xf32>
    %103 = vector.shape_cast %102 : vector<1x1x9x128xf32> to vector<9x128xf32>
    %104 = arith.truncf %103 : vector<9x128xf32> to vector<9x128xbf16>
    %105 = vector.extract_strided_slice %1 {offsets = [2, 0, 0], sizes = [1, 128, 128], strides = [1, 1, 1]} : vector<4x128x128xbf16> to vector<1x128x128xbf16>
    %106 = vector.shape_cast %105 : vector<1x128x128xbf16> to vector<128x128xbf16>
    %cst_71 = arith.constant dense<0.000000e+00> : vector<9x128xf32>
    %107 = tpu.matmul %104, %106, %cst_71 {dimension_numbers = #tpu.dot_dimension_numbers<[1], [0], [0], [1], [0, 0, 1, 1], [], []>} : vector<9x128xbf16>, vector<128x128xbf16>, vector<9x128xf32> -> vector<9x128xf32>
    %108 = arith.addf %101, %107 : vector<9x128xf32>
    %c0_72 = arith.constant 0 : index
    %c3_73 = arith.constant 3 : index
    %c1_74 = arith.constant 1 : index
    %c0_75 = arith.constant 0 : index
    %109 = vector.load %arg1[%c0_72, %c3_73, %c1_74, %c0_75] : memref<2x10x10x128xf32, #tpu.memory_space<vmem>>, vector<1x1x9x128xf32>
    %110 = vector.shape_cast %109 : vector<1x1x9x128xf32> to vector<9x128xf32>
    %111 = arith.truncf %110 : vector<9x128xf32> to vector<9x128xbf16>
    %112 = vector.extract_strided_slice %1 {offsets = [3, 0, 0], sizes = [1, 128, 128], strides = [1, 1, 1]} : vector<4x128x128xbf16> to vector<1x128x128xbf16>
    %113 = vector.shape_cast %112 : vector<1x128x128xbf16> to vector<128x128xbf16>
    %cst_76 = arith.constant dense<0.000000e+00> : vector<9x128xf32>
    %114 = tpu.matmul %111, %113, %cst_76 {dimension_numbers = #tpu.dot_dimension_numbers<[1], [0], [0], [1], [0, 0, 1, 1], [], []>} : vector<9x128xbf16>, vector<128x128xbf16>, vector<9x128xf32> -> vector<9x128xf32>
    %115 = arith.addf %108, %114 : vector<9x128xf32>
    %116 = vector.broadcast %2 : vector<1x128xf32> to vector<9x128xf32>
    %117 = arith.addf %115, %116 : vector<9x128xf32>
    %cst_77 = arith.constant dense<0.000000e+00> : vector<128xf32>
    %118 = vector.multi_reduction <add>, %117, %cst_77 [0] : vector<9x128xf32> to vector<128xf32>
    %119 = vector.shape_cast %118 : vector<128xf32> to vector<1x128xf32>
    %120 = arith.addf %79, %119 : vector<1x128xf32>
    %121 = arith.mulf %117, %117 : vector<9x128xf32>
    %cst_78 = arith.constant dense<0.000000e+00> : vector<128xf32>
    %122 = vector.multi_reduction <add>, %121, %cst_78 [0] : vector<9x128xf32> to vector<128xf32>
    %123 = vector.shape_cast %122 : vector<128xf32> to vector<1x128xf32>
    %124 = arith.addf %83, %123 : vector<1x128xf32>
    %c0_79 = arith.constant 0 : index
    %c2_80 = arith.constant 2 : index
    %c0_81 = arith.constant 0 : index
    %c0_82 = arith.constant 0 : index
    %125 = vector.load %arg6[%c0_79, %c2_80, %c0_81, %c0_82] : memref<2x9x9x128xf32, #tpu.memory_space<vmem>>, vector<1x1x9x128xf32>
    %126 = vector.shape_cast %125 : vector<1x1x9x128xf32> to vector<9x128xf32>
    %127 = vector.shape_cast %117 : vector<9x128xf32> to vector<1x1x9x128xf32>
    tpu.vector_store %arg6[%c0_79, %c2_80, %c0_81, %c0_82], %127 {strides = array<i32>} : memref<2x9x9x128xf32, #tpu.memory_space<vmem>>, vector<1x1x9x128xf32>,
    %cst_83 = arith.constant 0.000000e+00 : f32
    %128 = vector.broadcast %cst_83 : f32 to vector<9x128xf32>
    %c0_84 = arith.constant 0 : index
    %c3_85 = arith.constant 3 : index
    %c0_86 = arith.constant 0 : index
    %c0_87 = arith.constant 0 : index
    %129 = vector.load %arg1[%c0_84, %c3_85, %c0_86, %c0_87] : memref<2x10x10x128xf32, #tpu.memory_space<vmem>>, vector<1x1x9x128xf32>
    %130 = vector.shape_cast %129 : vector<1x1x9x128xf32> to vector<9x128xf32>
    %131 = arith.truncf %130 : vector<9x128xf32> to vector<9x128xbf16>
    %132 = vector.extract_strided_slice %1 {offsets = [0, 0, 0], sizes = [1, 128, 128], strides = [1, 1, 1]} : vector<4x128x128xbf16> to vector<1x128x128xbf16>
    %133 = vector.shape_cast %132 : vector<1x128x128xbf16> to vector<128x128xbf16>
    %cst_88 = arith.constant dense<0.000000e+00> : vector<9x128xf32>
    %134 = tpu.matmul %131, %133, %cst_88 {dimension_numbers = #tpu.dot_dimension_numbers<[1], [0], [0], [1], [0, 0, 1, 1], [], []>} : vector<9x128xbf16>, vector<128x128xbf16>, vector<9x128xf32> -> vector<9x128xf32>
    %135 = arith.addf %128, %134 : vector<9x128xf32>
    %c0_89 = arith.constant 0 : index
    %c3_90 = arith.constant 3 : index
    %c1_91 = arith.constant 1 : index
    %c0_92 = arith.constant 0 : index
    %136 = vector.load %arg1[%c0_89, %c3_90, %c1_91, %c0_92] : memref<2x10x10x128xf32, #tpu.memory_space<vmem>>, vector<1x1x9x128xf32>
    %137 = vector.shape_cast %136 : vector<1x1x9x128xf32> to vector<9x128xf32>
    %138 = arith.truncf %137 : vector<9x128xf32> to vector<9x128xbf16>
    %139 = vector.extract_strided_slice %1 {offsets = [1, 0, 0], sizes = [1, 128, 128], strides = [1, 1, 1]} : vector<4x128x128xbf16> to vector<1x128x128xbf16>
    %140 = vector.shape_cast %139 : vector<1x128x128xbf16> to vector<128x128xbf16>
    %cst_93 = arith.constant dense<0.000000e+00> : vector<9x128xf32>
    %141 = tpu.matmul %138, %140, %cst_93 {dimension_numbers = #tpu.dot_dimension_numbers<[1], [0], [0], [1], [0, 0, 1, 1], [], []>} : vector<9x128xbf16>, vector<128x128xbf16>, vector<9x128xf32> -> vector<9x128xf32>
    %142 = arith.addf %135, %141 : vector<9x128xf32>
    %c0_94 = arith.constant 0 : index
    %c4 = arith.constant 4 : index
    %c0_95 = arith.constant 0 : index
    %c0_96 = arith.constant 0 : index
    %143 = vector.load %arg1[%c0_94, %c4, %c0_95, %c0_96] : memref<2x10x10x128xf32, #tpu.memory_space<vmem>>, vector<1x1x9x128xf32>
    %144 = vector.shape_cast %143 : vector<1x1x9x128xf32> to vector<9x128xf32>
    %145 = arith.truncf %144 : vector<9x128xf32> to vector<9x128xbf16>
    %146 = vector.extract_strided_slice %1 {offsets = [2, 0, 0], sizes = [1, 128, 128], strides = [1, 1, 1]} : vector<4x128x128xbf16> to vector<1x128x128xbf16>
    %147 = vector.shape_cast %146 : vector<1x128x128xbf16> to vector<128x128xbf16>
    %cst_97 = arith.constant dense<0.000000e+00> : vector<9x128xf32>
    %148 = tpu.matmul %145, %147, %cst_97 {dimension_numbers = #tpu.dot_dimension_numbers<[1], [0], [0], [1], [0, 0, 1, 1], [], []>} : vector<9x128xbf16>, vector<128x128xbf16>, vector<9x128xf32> -> vector<9x128xf32>
    %149 = arith.addf %142, %148 : vector<9x128xf32>
    %c0_98 = arith.constant 0 : index
    %c4_99 = arith.constant 4 : index
    %c1_100 = arith.constant 1 : index
    %c0_101 = arith.constant 0 : index
    %150 = vector.load %arg1[%c0_98, %c4_99, %c1_100, %c0_101] : memref<2x10x10x128xf32, #tpu.memory_space<vmem>>, vector<1x1x9x128xf32>
    %151 = vector.shape_cast %150 : vector<1x1x9x128xf32> to vector<9x128xf32>
    %152 = arith.truncf %151 : vector<9x128xf32> to vector<9x128xbf16>
    %153 = vector.extract_strided_slice %1 {offsets = [3, 0, 0], sizes = [1, 128, 128], strides = [1, 1, 1]} : vector<4x128x128xbf16> to vector<1x128x128xbf16>
    %154 = vector.shape_cast %153 : vector<1x128x128xbf16> to vector<128x128xbf16>
    %cst_102 = arith.constant dense<0.000000e+00> : vector<9x128xf32>
    %155 = tpu.matmul %152, %154, %cst_102 {dimension_numbers = #tpu.dot_dimension_numbers<[1], [0], [0], [1], [0, 0, 1, 1], [], []>} : vector<9x128xbf16>, vector<128x128xbf16>, vector<9x128xf32> -> vector<9x128xf32>
    %156 = arith.addf %149, %155 : vector<9x128xf32>
    %157 = vector.broadcast %2 : vector<1x128xf32> to vector<9x128xf32>
    %158 = arith.addf %156, %157 : vector<9x128xf32>
    %cst_103 = arith.constant dense<0.000000e+00> : vector<128xf32>
    %159 = vector.multi_reduction <add>, %158, %cst_103 [0] : vector<9x128xf32> to vector<128xf32>
    %160 = vector.shape_cast %159 : vector<128xf32> to vector<1x128xf32>
    %161 = arith.addf %120, %160 : vector<1x128xf32>
    %162 = arith.mulf %158, %158 : vector<9x128xf32>
    %cst_104 = arith.constant dense<0.000000e+00> : vector<128xf32>
    %163 = vector.multi_reduction <add>, %162, %cst_104 [0] : vector<9x128xf32> to vector<128xf32>
    %164 = vector.shape_cast %163 : vector<128xf32> to vector<1x128xf32>
    %165 = arith.addf %124, %164 : vector<1x128xf32>
    %c0_105 = arith.constant 0 : index
    %c3_106 = arith.constant 3 : index
    %c0_107 = arith.constant 0 : index
    %c0_108 = arith.constant 0 : index
    %166 = vector.load %arg6[%c0_105, %c3_106, %c0_107, %c0_108] : memref<2x9x9x128xf32, #tpu.memory_space<vmem>>, vector<1x1x9x128xf32>
    %167 = vector.shape_cast %166 : vector<1x1x9x128xf32> to vector<9x128xf32>
    %168 = vector.shape_cast %158 : vector<9x128xf32> to vector<1x1x9x128xf32>
    tpu.vector_store %arg6[%c0_105, %c3_106, %c0_107, %c0_108], %168 {strides = array<i32>} : memref<2x9x9x128xf32, #tpu.memory_space<vmem>>, vector<1x1x9x128xf32>,
    %cst_109 = arith.constant 0.000000e+00 : f32
    %169 = vector.broadcast %cst_109 : f32 to vector<9x128xf32>
    %c0_110 = arith.constant 0 : index
    %c4_111 = arith.constant 4 : index
    %c0_112 = arith.constant 0 : index
    %c0_113 = arith.constant 0 : index
    %170 = vector.load %arg1[%c0_110, %c4_111, %c0_112, %c0_113] : memref<2x10x10x128xf32, #tpu.memory_space<vmem>>, vector<1x1x9x128xf32>
    %171 = vector.shape_cast %170 : vector<1x1x9x128xf32> to vector<9x128xf32>
    %172 = arith.truncf %171 : vector<9x128xf32> to vector<9x128xbf16>
    %173 = vector.extract_strided_slice %1 {offsets = [0, 0, 0], sizes = [1, 128, 128], strides = [1, 1, 1]} : vector<4x128x128xbf16> to vector<1x128x128xbf16>
    %174 = vector.shape_cast %173 : vector<1x128x128xbf16> to vector<128x128xbf16>
    %cst_114 = arith.constant dense<0.000000e+00> : vector<9x128xf32>
    %175 = tpu.matmul %172, %174, %cst_114 {dimension_numbers = #tpu.dot_dimension_numbers<[1], [0], [0], [1], [0, 0, 1, 1], [], []>} : vector<9x128xbf16>, vector<128x128xbf16>, vector<9x128xf32> -> vector<9x128xf32>
    %176 = arith.addf %169, %175 : vector<9x128xf32>
    %c0_115 = arith.constant 0 : index
    %c4_116 = arith.constant 4 : index
    %c1_117 = arith.constant 1 : index
    %c0_118 = arith.constant 0 : index
    %177 = vector.load %arg1[%c0_115, %c4_116, %c1_117, %c0_118] : memref<2x10x10x128xf32, #tpu.memory_space<vmem>>, vector<1x1x9x128xf32>
    %178 = vector.shape_cast %177 : vector<1x1x9x128xf32> to vector<9x128xf32>
    %179 = arith.truncf %178 : vector<9x128xf32> to vector<9x128xbf16>
    %180 = vector.extract_strided_slice %1 {offsets = [1, 0, 0], sizes = [1, 128, 128], strides = [1, 1, 1]} : vector<4x128x128xbf16> to vector<1x128x128xbf16>
    %181 = vector.shape_cast %180 : vector<1x128x128xbf16> to vector<128x128xbf16>
    %cst_119 = arith.constant dense<0.000000e+00> : vector<9x128xf32>
    %182 = tpu.matmul %179, %181, %cst_119 {dimension_numbers = #tpu.dot_dimension_numbers<[1], [0], [0], [1], [0, 0, 1, 1], [], []>} : vector<9x128xbf16>, vector<128x128xbf16>, vector<9x128xf32> -> vector<9x128xf32>
    %183 = arith.addf %176, %182 : vector<9x128xf32>
    %c0_120 = arith.constant 0 : index
    %c5 = arith.constant 5 : index
    %c0_121 = arith.constant 0 : index
    %c0_122 = arith.constant 0 : index
    %184 = vector.load %arg1[%c0_120, %c5, %c0_121, %c0_122] : memref<2x10x10x128xf32, #tpu.memory_space<vmem>>, vector<1x1x9x128xf32>
    %185 = vector.shape_cast %184 : vector<1x1x9x128xf32> to vector<9x128xf32>
    %186 = arith.truncf %185 : vector<9x128xf32> to vector<9x128xbf16>
    %187 = vector.extract_strided_slice %1 {offsets = [2, 0, 0], sizes = [1, 128, 128], strides = [1, 1, 1]} : vector<4x128x128xbf16> to vector<1x128x128xbf16>
    %188 = vector.shape_cast %187 : vector<1x128x128xbf16> to vector<128x128xbf16>
    %cst_123 = arith.constant dense<0.000000e+00> : vector<9x128xf32>
    %189 = tpu.matmul %186, %188, %cst_123 {dimension_numbers = #tpu.dot_dimension_numbers<[1], [0], [0], [1], [0, 0, 1, 1], [], []>} : vector<9x128xbf16>, vector<128x128xbf16>, vector<9x128xf32> -> vector<9x128xf32>
    %190 = arith.addf %183, %189 : vector<9x128xf32>
    %c0_124 = arith.constant 0 : index
    %c5_125 = arith.constant 5 : index
    %c1_126 = arith.constant 1 : index
    %c0_127 = arith.constant 0 : index
    %191 = vector.load %arg1[%c0_124, %c5_125, %c1_126, %c0_127] : memref<2x10x10x128xf32, #tpu.memory_space<vmem>>, vector<1x1x9x128xf32>
    %192 = vector.shape_cast %191 : vector<1x1x9x128xf32> to vector<9x128xf32>
    %193 = arith.truncf %192 : vector<9x128xf32> to vector<9x128xbf16>
    %194 = vector.extract_strided_slice %1 {offsets = [3, 0, 0], sizes = [1, 128, 128], strides = [1, 1, 1]} : vector<4x128x128xbf16> to vector<1x128x128xbf16>
    %195 = vector.shape_cast %194 : vector<1x128x128xbf16> to vector<128x128xbf16>
    %cst_128 = arith.constant dense<0.000000e+00> : vector<9x128xf32>
    %196 = tpu.matmul %193, %195, %cst_128 {dimension_numbers = #tpu.dot_dimension_numbers<[1], [0], [0], [1], [0, 0, 1, 1], [], []>} : vector<9x128xbf16>, vector<128x128xbf16>, vector<9x128xf32> -> vector<9x128xf32>
    %197 = arith.addf %190, %196 : vector<9x128xf32>
    %198 = vector.broadcast %2 : vector<1x128xf32> to vector<9x128xf32>
    %199 = arith.addf %197, %198 : vector<9x128xf32>
    %cst_129 = arith.constant dense<0.000000e+00> : vector<128xf32>
    %200 = vector.multi_reduction <add>, %199, %cst_129 [0] : vector<9x128xf32> to vector<128xf32>
    %201 = vector.shape_cast %200 : vector<128xf32> to vector<1x128xf32>
    %202 = arith.addf %161, %201 : vector<1x128xf32>
    %203 = arith.mulf %199, %199 : vector<9x128xf32>
    %cst_130 = arith.constant dense<0.000000e+00> : vector<128xf32>
    %204 = vector.multi_reduction <add>, %203, %cst_130 [0] : vector<9x128xf32> to vector<128xf32>
    %205 = vector.shape_cast %204 : vector<128xf32> to vector<1x128xf32>
    %206 = arith.addf %165, %205 : vector<1x128xf32>
    %c0_131 = arith.constant 0 : index
    %c4_132 = arith.constant 4 : index
    %c0_133 = arith.constant 0 : index
    %c0_134 = arith.constant 0 : index
    %207 = vector.load %arg6[%c0_131, %c4_132, %c0_133, %c0_134] : memref<2x9x9x128xf32, #tpu.memory_space<vmem>>, vector<1x1x9x128xf32>
    %208 = vector.shape_cast %207 : vector<1x1x9x128xf32> to vector<9x128xf32>
    %209 = vector.shape_cast %199 : vector<9x128xf32> to vector<1x1x9x128xf32>
    tpu.vector_store %arg6[%c0_131, %c4_132, %c0_133, %c0_134], %209 {strides = array<i32>} : memref<2x9x9x128xf32, #tpu.memory_space<vmem>>, vector<1x1x9x128xf32>,
    %cst_135 = arith.constant 0.000000e+00 : f32
    %210 = vector.broadcast %cst_135 : f32 to vector<9x128xf32>
    %c0_136 = arith.constant 0 : index
    %c5_137 = arith.constant 5 : index
    %c0_138 = arith.constant 0 : index
    %c0_139 = arith.constant 0 : index
    %211 = vector.load %arg1[%c0_136, %c5_137, %c0_138, %c0_139] : memref<2x10x10x128xf32, #tpu.memory_space<vmem>>, vector<1x1x9x128xf32>
    %212 = vector.shape_cast %211 : vector<1x1x9x128xf32> to vector<9x128xf32>
    %213 = arith.truncf %212 : vector<9x128xf32> to vector<9x128xbf16>
    %214 = vector.extract_strided_slice %1 {offsets = [0, 0, 0], sizes = [1, 128, 128], strides = [1, 1, 1]} : vector<4x128x128xbf16> to vector<1x128x128xbf16>
    %215 = vector.shape_cast %214 : vector<1x128x128xbf16> to vector<128x128xbf16>
    %cst_140 = arith.constant dense<0.000000e+00> : vector<9x128xf32>
    %216 = tpu.matmul %213, %215, %cst_140 {dimension_numbers = #tpu.dot_dimension_numbers<[1], [0], [0], [1], [0, 0, 1, 1], [], []>} : vector<9x128xbf16>, vector<128x128xbf16>, vector<9x128xf32> -> vector<9x128xf32>
    %217 = arith.addf %210, %216 : vector<9x128xf32>
    %c0_141 = arith.constant 0 : index
    %c5_142 = arith.constant 5 : index
    %c1_143 = arith.constant 1 : index
    %c0_144 = arith.constant 0 : index
    %218 = vector.load %arg1[%c0_141, %c5_142, %c1_143, %c0_144] : memref<2x10x10x128xf32, #tpu.memory_space<vmem>>, vector<1x1x9x128xf32>
    %219 = vector.shape_cast %218 : vector<1x1x9x128xf32> to vector<9x128xf32>
    %220 = arith.truncf %219 : vector<9x128xf32> to vector<9x128xbf16>
    %221 = vector.extract_strided_slice %1 {offsets = [1, 0, 0], sizes = [1, 128, 128], strides = [1, 1, 1]} : vector<4x128x128xbf16> to vector<1x128x128xbf16>
    %222 = vector.shape_cast %221 : vector<1x128x128xbf16> to vector<128x128xbf16>
    %cst_145 = arith.constant dense<0.000000e+00> : vector<9x128xf32>
    %223 = tpu.matmul %220, %222, %cst_145 {dimension_numbers = #tpu.dot_dimension_numbers<[1], [0], [0], [1], [0, 0, 1, 1], [], []>} : vector<9x128xbf16>, vector<128x128xbf16>, vector<9x128xf32> -> vector<9x128xf32>
    %224 = arith.addf %217, %223 : vector<9x128xf32>
    %c0_146 = arith.constant 0 : index
    %c6 = arith.constant 6 : index
    %c0_147 = arith.constant 0 : index
    %c0_148 = arith.constant 0 : index
    %225 = vector.load %arg1[%c0_146, %c6, %c0_147, %c0_148] : memref<2x10x10x128xf32, #tpu.memory_space<vmem>>, vector<1x1x9x128xf32>
    %226 = vector.shape_cast %225 : vector<1x1x9x128xf32> to vector<9x128xf32>
    %227 = arith.truncf %226 : vector<9x128xf32> to vector<9x128xbf16>
    %228 = vector.extract_strided_slice %1 {offsets = [2, 0, 0], sizes = [1, 128, 128], strides = [1, 1, 1]} : vector<4x128x128xbf16> to vector<1x128x128xbf16>
    %229 = vector.shape_cast %228 : vector<1x128x128xbf16> to vector<128x128xbf16>
    %cst_149 = arith.constant dense<0.000000e+00> : vector<9x128xf32>
    %230 = tpu.matmul %227, %229, %cst_149 {dimension_numbers = #tpu.dot_dimension_numbers<[1], [0], [0], [1], [0, 0, 1, 1], [], []>} : vector<9x128xbf16>, vector<128x128xbf16>, vector<9x128xf32> -> vector<9x128xf32>
    %231 = arith.addf %224, %230 : vector<9x128xf32>
    %c0_150 = arith.constant 0 : index
    %c6_151 = arith.constant 6 : index
    %c1_152 = arith.constant 1 : index
    %c0_153 = arith.constant 0 : index
    %232 = vector.load %arg1[%c0_150, %c6_151, %c1_152, %c0_153] : memref<2x10x10x128xf32, #tpu.memory_space<vmem>>, vector<1x1x9x128xf32>
    %233 = vector.shape_cast %232 : vector<1x1x9x128xf32> to vector<9x128xf32>
    %234 = arith.truncf %233 : vector<9x128xf32> to vector<9x128xbf16>
    %235 = vector.extract_strided_slice %1 {offsets = [3, 0, 0], sizes = [1, 128, 128], strides = [1, 1, 1]} : vector<4x128x128xbf16> to vector<1x128x128xbf16>
    %236 = vector.shape_cast %235 : vector<1x128x128xbf16> to vector<128x128xbf16>
    %cst_154 = arith.constant dense<0.000000e+00> : vector<9x128xf32>
    %237 = tpu.matmul %234, %236, %cst_154 {dimension_numbers = #tpu.dot_dimension_numbers<[1], [0], [0], [1], [0, 0, 1, 1], [], []>} : vector<9x128xbf16>, vector<128x128xbf16>, vector<9x128xf32> -> vector<9x128xf32>
    %238 = arith.addf %231, %237 : vector<9x128xf32>
    %239 = vector.broadcast %2 : vector<1x128xf32> to vector<9x128xf32>
    %240 = arith.addf %238, %239 : vector<9x128xf32>
    %cst_155 = arith.constant dense<0.000000e+00> : vector<128xf32>
    %241 = vector.multi_reduction <add>, %240, %cst_155 [0] : vector<9x128xf32> to vector<128xf32>
    %242 = vector.shape_cast %241 : vector<128xf32> to vector<1x128xf32>
    %243 = arith.addf %202, %242 : vector<1x128xf32>
    %244 = arith.mulf %240, %240 : vector<9x128xf32>
    %cst_156 = arith.constant dense<0.000000e+00> : vector<128xf32>
    %245 = vector.multi_reduction <add>, %244, %cst_156 [0] : vector<9x128xf32> to vector<128xf32>
    %246 = vector.shape_cast %245 : vector<128xf32> to vector<1x128xf32>
    %247 = arith.addf %206, %246 : vector<1x128xf32>
    %c0_157 = arith.constant 0 : index
    %c5_158 = arith.constant 5 : index
    %c0_159 = arith.constant 0 : index
    %c0_160 = arith.constant 0 : index
    %248 = vector.load %arg6[%c0_157, %c5_158, %c0_159, %c0_160] : memref<2x9x9x128xf32, #tpu.memory_space<vmem>>, vector<1x1x9x128xf32>
    %249 = vector.shape_cast %248 : vector<1x1x9x128xf32> to vector<9x128xf32>
    %250 = vector.shape_cast %240 : vector<9x128xf32> to vector<1x1x9x128xf32>
    tpu.vector_store %arg6[%c0_157, %c5_158, %c0_159, %c0_160], %250 {strides = array<i32>} : memref<2x9x9x128xf32, #tpu.memory_space<vmem>>, vector<1x1x9x128xf32>,
    %cst_161 = arith.constant 0.000000e+00 : f32
    %251 = vector.broadcast %cst_161 : f32 to vector<9x128xf32>
    %c0_162 = arith.constant 0 : index
    %c6_163 = arith.constant 6 : index
    %c0_164 = arith.constant 0 : index
    %c0_165 = arith.constant 0 : index
    %252 = vector.load %arg1[%c0_162, %c6_163, %c0_164, %c0_165] : memref<2x10x10x128xf32, #tpu.memory_space<vmem>>, vector<1x1x9x128xf32>
    %253 = vector.shape_cast %252 : vector<1x1x9x128xf32> to vector<9x128xf32>
    %254 = arith.truncf %253 : vector<9x128xf32> to vector<9x128xbf16>
    %255 = vector.extract_strided_slice %1 {offsets = [0, 0, 0], sizes = [1, 128, 128], strides = [1, 1, 1]} : vector<4x128x128xbf16> to vector<1x128x128xbf16>
    %256 = vector.shape_cast %255 : vector<1x128x128xbf16> to vector<128x128xbf16>
    %cst_166 = arith.constant dense<0.000000e+00> : vector<9x128xf32>
    %257 = tpu.matmul %254, %256, %cst_166 {dimension_numbers = #tpu.dot_dimension_numbers<[1], [0], [0], [1], [0, 0, 1, 1], [], []>} : vector<9x128xbf16>, vector<128x128xbf16>, vector<9x128xf32> -> vector<9x128xf32>
    %258 = arith.addf %251, %257 : vector<9x128xf32>
    %c0_167 = arith.constant 0 : index
    %c6_168 = arith.constant 6 : index
    %c1_169 = arith.constant 1 : index
    %c0_170 = arith.constant 0 : index
    %259 = vector.load %arg1[%c0_167, %c6_168, %c1_169, %c0_170] : memref<2x10x10x128xf32, #tpu.memory_space<vmem>>, vector<1x1x9x128xf32>
    %260 = vector.shape_cast %259 : vector<1x1x9x128xf32> to vector<9x128xf32>
    %261 = arith.truncf %260 : vector<9x128xf32> to vector<9x128xbf16>
    %262 = vector.extract_strided_slice %1 {offsets = [1, 0, 0], sizes = [1, 128, 128], strides = [1, 1, 1]} : vector<4x128x128xbf16> to vector<1x128x128xbf16>
    %263 = vector.shape_cast %262 : vector<1x128x128xbf16> to vector<128x128xbf16>
    %cst_171 = arith.constant dense<0.000000e+00> : vector<9x128xf32>
    %264 = tpu.matmul %261, %263, %cst_171 {dimension_numbers = #tpu.dot_dimension_numbers<[1], [0], [0], [1], [0, 0, 1, 1], [], []>} : vector<9x128xbf16>, vector<128x128xbf16>, vector<9x128xf32> -> vector<9x128xf32>
    %265 = arith.addf %258, %264 : vector<9x128xf32>
    %c0_172 = arith.constant 0 : index
    %c7 = arith.constant 7 : index
    %c0_173 = arith.constant 0 : index
    %c0_174 = arith.constant 0 : index
    %266 = vector.load %arg1[%c0_172, %c7, %c0_173, %c0_174] : memref<2x10x10x128xf32, #tpu.memory_space<vmem>>, vector<1x1x9x128xf32>
    %267 = vector.shape_cast %266 : vector<1x1x9x128xf32> to vector<9x128xf32>
    %268 = arith.truncf %267 : vector<9x128xf32> to vector<9x128xbf16>
    %269 = vector.extract_strided_slice %1 {offsets = [2, 0, 0], sizes = [1, 128, 128], strides = [1, 1, 1]} : vector<4x128x128xbf16> to vector<1x128x128xbf16>
    %270 = vector.shape_cast %269 : vector<1x128x128xbf16> to vector<128x128xbf16>
    %cst_175 = arith.constant dense<0.000000e+00> : vector<9x128xf32>
    %271 = tpu.matmul %268, %270, %cst_175 {dimension_numbers = #tpu.dot_dimension_numbers<[1], [0], [0], [1], [0, 0, 1, 1], [], []>} : vector<9x128xbf16>, vector<128x128xbf16>, vector<9x128xf32> -> vector<9x128xf32>
    %272 = arith.addf %265, %271 : vector<9x128xf32>
    %c0_176 = arith.constant 0 : index
    %c7_177 = arith.constant 7 : index
    %c1_178 = arith.constant 1 : index
    %c0_179 = arith.constant 0 : index
    %273 = vector.load %arg1[%c0_176, %c7_177, %c1_178, %c0_179] : memref<2x10x10x128xf32, #tpu.memory_space<vmem>>, vector<1x1x9x128xf32>
    %274 = vector.shape_cast %273 : vector<1x1x9x128xf32> to vector<9x128xf32>
    %275 = arith.truncf %274 : vector<9x128xf32> to vector<9x128xbf16>
    %276 = vector.extract_strided_slice %1 {offsets = [3, 0, 0], sizes = [1, 128, 128], strides = [1, 1, 1]} : vector<4x128x128xbf16> to vector<1x128x128xbf16>
    %277 = vector.shape_cast %276 : vector<1x128x128xbf16> to vector<128x128xbf16>
    %cst_180 = arith.constant dense<0.000000e+00> : vector<9x128xf32>
    %278 = tpu.matmul %275, %277, %cst_180 {dimension_numbers = #tpu.dot_dimension_numbers<[1], [0], [0], [1], [0, 0, 1, 1], [], []>} : vector<9x128xbf16>, vector<128x128xbf16>, vector<9x128xf32> -> vector<9x128xf32>
    %279 = arith.addf %272, %278 : vector<9x128xf32>
    %280 = vector.broadcast %2 : vector<1x128xf32> to vector<9x128xf32>
    %281 = arith.addf %279, %280 : vector<9x128xf32>
    %cst_181 = arith.constant dense<0.000000e+00> : vector<128xf32>
    %282 = vector.multi_reduction <add>, %281, %cst_181 [0] : vector<9x128xf32> to vector<128xf32>
    %283 = vector.shape_cast %282 : vector<128xf32> to vector<1x128xf32>
    %284 = arith.addf %243, %283 : vector<1x128xf32>
    %285 = arith.mulf %281, %281 : vector<9x128xf32>
    %cst_182 = arith.constant dense<0.000000e+00> : vector<128xf32>
    %286 = vector.multi_reduction <add>, %285, %cst_182 [0] : vector<9x128xf32> to vector<128xf32>
    %287 = vector.shape_cast %286 : vector<128xf32> to vector<1x128xf32>
    %288 = arith.addf %247, %287 : vector<1x128xf32>
    %c0_183 = arith.constant 0 : index
    %c6_184 = arith.constant 6 : index
    %c0_185 = arith.constant 0 : index
    %c0_186 = arith.constant 0 : index
    %289 = vector.load %arg6[%c0_183, %c6_184, %c0_185, %c0_186] : memref<2x9x9x128xf32, #tpu.memory_space<vmem>>, vector<1x1x9x128xf32>
    %290 = vector.shape_cast %289 : vector<1x1x9x128xf32> to vector<9x128xf32>
    %291 = vector.shape_cast %281 : vector<9x128xf32> to vector<1x1x9x128xf32>
    tpu.vector_store %arg6[%c0_183, %c6_184, %c0_185, %c0_186], %291 {strides = array<i32>} : memref<2x9x9x128xf32, #tpu.memory_space<vmem>>, vector<1x1x9x128xf32>,
    %cst_187 = arith.constant 0.000000e+00 : f32
    %292 = vector.broadcast %cst_187 : f32 to vector<9x128xf32>
    %c0_188 = arith.constant 0 : index
    %c7_189 = arith.constant 7 : index
    %c0_190 = arith.constant 0 : index
    %c0_191 = arith.constant 0 : index
    %293 = vector.load %arg1[%c0_188, %c7_189, %c0_190, %c0_191] : memref<2x10x10x128xf32, #tpu.memory_space<vmem>>, vector<1x1x9x128xf32>
    %294 = vector.shape_cast %293 : vector<1x1x9x128xf32> to vector<9x128xf32>
    %295 = arith.truncf %294 : vector<9x128xf32> to vector<9x128xbf16>
    %296 = vector.extract_strided_slice %1 {offsets = [0, 0, 0], sizes = [1, 128, 128], strides = [1, 1, 1]} : vector<4x128x128xbf16> to vector<1x128x128xbf16>
    %297 = vector.shape_cast %296 : vector<1x128x128xbf16> to vector<128x128xbf16>
    %cst_192 = arith.constant dense<0.000000e+00> : vector<9x128xf32>
    %298 = tpu.matmul %295, %297, %cst_192 {dimension_numbers = #tpu.dot_dimension_numbers<[1], [0], [0], [1], [0, 0, 1, 1], [], []>} : vector<9x128xbf16>, vector<128x128xbf16>, vector<9x128xf32> -> vector<9x128xf32>
    %299 = arith.addf %292, %298 : vector<9x128xf32>
    %c0_193 = arith.constant 0 : index
    %c7_194 = arith.constant 7 : index
    %c1_195 = arith.constant 1 : index
    %c0_196 = arith.constant 0 : index
    %300 = vector.load %arg1[%c0_193, %c7_194, %c1_195, %c0_196] : memref<2x10x10x128xf32, #tpu.memory_space<vmem>>, vector<1x1x9x128xf32>
    %301 = vector.shape_cast %300 : vector<1x1x9x128xf32> to vector<9x128xf32>
    %302 = arith.truncf %301 : vector<9x128xf32> to vector<9x128xbf16>
    %303 = vector.extract_strided_slice %1 {offsets = [1, 0, 0], sizes = [1, 128, 128], strides = [1, 1, 1]} : vector<4x128x128xbf16> to vector<1x128x128xbf16>
    %304 = vector.shape_cast %303 : vector<1x128x128xbf16> to vector<128x128xbf16>
    %cst_197 = arith.constant dense<0.000000e+00> : vector<9x128xf32>
    %305 = tpu.matmul %302, %304, %cst_197 {dimension_numbers = #tpu.dot_dimension_numbers<[1], [0], [0], [1], [0, 0, 1, 1], [], []>} : vector<9x128xbf16>, vector<128x128xbf16>, vector<9x128xf32> -> vector<9x128xf32>
    %306 = arith.addf %299, %305 : vector<9x128xf32>
    %c0_198 = arith.constant 0 : index
    %c8 = arith.constant 8 : index
    %c0_199 = arith.constant 0 : index
    %c0_200 = arith.constant 0 : index
    %307 = vector.load %arg1[%c0_198, %c8, %c0_199, %c0_200] : memref<2x10x10x128xf32, #tpu.memory_space<vmem>>, vector<1x1x9x128xf32>
    %308 = vector.shape_cast %307 : vector<1x1x9x128xf32> to vector<9x128xf32>
    %309 = arith.truncf %308 : vector<9x128xf32> to vector<9x128xbf16>
    %310 = vector.extract_strided_slice %1 {offsets = [2, 0, 0], sizes = [1, 128, 128], strides = [1, 1, 1]} : vector<4x128x128xbf16> to vector<1x128x128xbf16>
    %311 = vector.shape_cast %310 : vector<1x128x128xbf16> to vector<128x128xbf16>
    %cst_201 = arith.constant dense<0.000000e+00> : vector<9x128xf32>
    %312 = tpu.matmul %309, %311, %cst_201 {dimension_numbers = #tpu.dot_dimension_numbers<[1], [0], [0], [1], [0, 0, 1, 1], [], []>} : vector<9x128xbf16>, vector<128x128xbf16>, vector<9x128xf32> -> vector<9x128xf32>
    %313 = arith.addf %306, %312 : vector<9x128xf32>
    %c0_202 = arith.constant 0 : index
    %c8_203 = arith.constant 8 : index
    %c1_204 = arith.constant 1 : index
    %c0_205 = arith.constant 0 : index
    %314 = vector.load %arg1[%c0_202, %c8_203, %c1_204, %c0_205] : memref<2x10x10x128xf32, #tpu.memory_space<vmem>>, vector<1x1x9x128xf32>
    %315 = vector.shape_cast %314 : vector<1x1x9x128xf32> to vector<9x128xf32>
    %316 = arith.truncf %315 : vector<9x128xf32> to vector<9x128xbf16>
    %317 = vector.extract_strided_slice %1 {offsets = [3, 0, 0], sizes = [1, 128, 128], strides = [1, 1, 1]} : vector<4x128x128xbf16> to vector<1x128x128xbf16>
    %318 = vector.shape_cast %317 : vector<1x128x128xbf16> to vector<128x128xbf16>
    %cst_206 = arith.constant dense<0.000000e+00> : vector<9x128xf32>
    %319 = tpu.matmul %316, %318, %cst_206 {dimension_numbers = #tpu.dot_dimension_numbers<[1], [0], [0], [1], [0, 0, 1, 1], [], []>} : vector<9x128xbf16>, vector<128x128xbf16>, vector<9x128xf32> -> vector<9x128xf32>
    %320 = arith.addf %313, %319 : vector<9x128xf32>
    %321 = vector.broadcast %2 : vector<1x128xf32> to vector<9x128xf32>
    %322 = arith.addf %320, %321 : vector<9x128xf32>
    %cst_207 = arith.constant dense<0.000000e+00> : vector<128xf32>
    %323 = vector.multi_reduction <add>, %322, %cst_207 [0] : vector<9x128xf32> to vector<128xf32>
    %324 = vector.shape_cast %323 : vector<128xf32> to vector<1x128xf32>
    %325 = arith.addf %284, %324 : vector<1x128xf32>
    %326 = arith.mulf %322, %322 : vector<9x128xf32>
    %cst_208 = arith.constant dense<0.000000e+00> : vector<128xf32>
    %327 = vector.multi_reduction <add>, %326, %cst_208 [0] : vector<9x128xf32> to vector<128xf32>
    %328 = vector.shape_cast %327 : vector<128xf32> to vector<1x128xf32>
    %329 = arith.addf %288, %328 : vector<1x128xf32>
    %c0_209 = arith.constant 0 : index
    %c7_210 = arith.constant 7 : index
    %c0_211 = arith.constant 0 : index
    %c0_212 = arith.constant 0 : index
    %330 = vector.load %arg6[%c0_209, %c7_210, %c0_211, %c0_212] : memref<2x9x9x128xf32, #tpu.memory_space<vmem>>, vector<1x1x9x128xf32>
    %331 = vector.shape_cast %330 : vector<1x1x9x128xf32> to vector<9x128xf32>
    %332 = vector.shape_cast %322 : vector<9x128xf32> to vector<1x1x9x128xf32>
    tpu.vector_store %arg6[%c0_209, %c7_210, %c0_211, %c0_212], %332 {strides = array<i32>} : memref<2x9x9x128xf32, #tpu.memory_space<vmem>>, vector<1x1x9x128xf32>,
    %cst_213 = arith.constant 0.000000e+00 : f32
    %333 = vector.broadcast %cst_213 : f32 to vector<9x128xf32>
    %c0_214 = arith.constant 0 : index
    %c8_215 = arith.constant 8 : index
    %c0_216 = arith.constant 0 : index
    %c0_217 = arith.constant 0 : index
    %334 = vector.load %arg1[%c0_214, %c8_215, %c0_216, %c0_217] : memref<2x10x10x128xf32, #tpu.memory_space<vmem>>, vector<1x1x9x128xf32>
    %335 = vector.shape_cast %334 : vector<1x1x9x128xf32> to vector<9x128xf32>
    %336 = arith.truncf %335 : vector<9x128xf32> to vector<9x128xbf16>
    %337 = vector.extract_strided_slice %1 {offsets = [0, 0, 0], sizes = [1, 128, 128], strides = [1, 1, 1]} : vector<4x128x128xbf16> to vector<1x128x128xbf16>
    %338 = vector.shape_cast %337 : vector<1x128x128xbf16> to vector<128x128xbf16>
    %cst_218 = arith.constant dense<0.000000e+00> : vector<9x128xf32>
    %339 = tpu.matmul %336, %338, %cst_218 {dimension_numbers = #tpu.dot_dimension_numbers<[1], [0], [0], [1], [0, 0, 1, 1], [], []>} : vector<9x128xbf16>, vector<128x128xbf16>, vector<9x128xf32> -> vector<9x128xf32>
    %340 = arith.addf %333, %339 : vector<9x128xf32>
    %c0_219 = arith.constant 0 : index
    %c8_220 = arith.constant 8 : index
    %c1_221 = arith.constant 1 : index
    %c0_222 = arith.constant 0 : index
    %341 = vector.load %arg1[%c0_219, %c8_220, %c1_221, %c0_222] : memref<2x10x10x128xf32, #tpu.memory_space<vmem>>, vector<1x1x9x128xf32>
    %342 = vector.shape_cast %341 : vector<1x1x9x128xf32> to vector<9x128xf32>
    %343 = arith.truncf %342 : vector<9x128xf32> to vector<9x128xbf16>
    %344 = vector.extract_strided_slice %1 {offsets = [1, 0, 0], sizes = [1, 128, 128], strides = [1, 1, 1]} : vector<4x128x128xbf16> to vector<1x128x128xbf16>
    %345 = vector.shape_cast %344 : vector<1x128x128xbf16> to vector<128x128xbf16>
    %cst_223 = arith.constant dense<0.000000e+00> : vector<9x128xf32>
    %346 = tpu.matmul %343, %345, %cst_223 {dimension_numbers = #tpu.dot_dimension_numbers<[1], [0], [0], [1], [0, 0, 1, 1], [], []>} : vector<9x128xbf16>, vector<128x128xbf16>, vector<9x128xf32> -> vector<9x128xf32>
    %347 = arith.addf %340, %346 : vector<9x128xf32>
    %c0_224 = arith.constant 0 : index
    %c9 = arith.constant 9 : index
    %c0_225 = arith.constant 0 : index
    %c0_226 = arith.constant 0 : index
    %348 = vector.load %arg1[%c0_224, %c9, %c0_225, %c0_226] : memref<2x10x10x128xf32, #tpu.memory_space<vmem>>, vector<1x1x9x128xf32>
    %349 = vector.shape_cast %348 : vector<1x1x9x128xf32> to vector<9x128xf32>
    %350 = arith.truncf %349 : vector<9x128xf32> to vector<9x128xbf16>
    %351 = vector.extract_strided_slice %1 {offsets = [2, 0, 0], sizes = [1, 128, 128], strides = [1, 1, 1]} : vector<4x128x128xbf16> to vector<1x128x128xbf16>
    %352 = vector.shape_cast %351 : vector<1x128x128xbf16> to vector<128x128xbf16>
    %cst_227 = arith.constant dense<0.000000e+00> : vector<9x128xf32>
    %353 = tpu.matmul %350, %352, %cst_227 {dimension_numbers = #tpu.dot_dimension_numbers<[1], [0], [0], [1], [0, 0, 1, 1], [], []>} : vector<9x128xbf16>, vector<128x128xbf16>, vector<9x128xf32> -> vector<9x128xf32>
    %354 = arith.addf %347, %353 : vector<9x128xf32>
    %c0_228 = arith.constant 0 : index
    %c9_229 = arith.constant 9 : index
    %c1_230 = arith.constant 1 : index
    %c0_231 = arith.constant 0 : index
    %355 = vector.load %arg1[%c0_228, %c9_229, %c1_230, %c0_231] : memref<2x10x10x128xf32, #tpu.memory_space<vmem>>, vector<1x1x9x128xf32>
    %356 = vector.shape_cast %355 : vector<1x1x9x128xf32> to vector<9x128xf32>
    %357 = arith.truncf %356 : vector<9x128xf32> to vector<9x128xbf16>
    %358 = vector.extract_strided_slice %1 {offsets = [3, 0, 0], sizes = [1, 128, 128], strides = [1, 1, 1]} : vector<4x128x128xbf16> to vector<1x128x128xbf16>
    %359 = vector.shape_cast %358 : vector<1x128x128xbf16> to vector<128x128xbf16>
    %cst_232 = arith.constant dense<0.000000e+00> : vector<9x128xf32>
    %360 = tpu.matmul %357, %359, %cst_232 {dimension_numbers = #tpu.dot_dimension_numbers<[1], [0], [0], [1], [0, 0, 1, 1], [], []>} : vector<9x128xbf16>, vector<128x128xbf16>, vector<9x128xf32> -> vector<9x128xf32>
    %361 = arith.addf %354, %360 : vector<9x128xf32>
    %362 = vector.broadcast %2 : vector<1x128xf32> to vector<9x128xf32>
    %363 = arith.addf %361, %362 : vector<9x128xf32>
    %cst_233 = arith.constant dense<0.000000e+00> : vector<128xf32>
    %364 = vector.multi_reduction <add>, %363, %cst_233 [0] : vector<9x128xf32> to vector<128xf32>
    %365 = vector.shape_cast %364 : vector<128xf32> to vector<1x128xf32>
    %366 = arith.addf %325, %365 : vector<1x128xf32>
    %367 = arith.mulf %363, %363 : vector<9x128xf32>
    %cst_234 = arith.constant dense<0.000000e+00> : vector<128xf32>
    %368 = vector.multi_reduction <add>, %367, %cst_234 [0] : vector<9x128xf32> to vector<128xf32>
    %369 = vector.shape_cast %368 : vector<128xf32> to vector<1x128xf32>
    %370 = arith.addf %329, %369 : vector<1x128xf32>
    %c0_235 = arith.constant 0 : index
    %c8_236 = arith.constant 8 : index
    %c0_237 = arith.constant 0 : index
    %c0_238 = arith.constant 0 : index
    %371 = vector.load %arg6[%c0_235, %c8_236, %c0_237, %c0_238] : memref<2x9x9x128xf32, #tpu.memory_space<vmem>>, vector<1x1x9x128xf32>
    %372 = vector.shape_cast %371 : vector<1x1x9x128xf32> to vector<9x128xf32>
    %373 = vector.shape_cast %363 : vector<9x128xf32> to vector<1x1x9x128xf32>
    tpu.vector_store %arg6[%c0_235, %c8_236, %c0_237, %c0_238], %373 {strides = array<i32>} : memref<2x9x9x128xf32, #tpu.memory_space<vmem>>, vector<1x1x9x128xf32>,
    %cst_239 = arith.constant 0.000000e+00 : f32
    %374 = vector.broadcast %cst_239 : f32 to vector<9x128xf32>
    %c1_240 = arith.constant 1 : index
    %c0_241 = arith.constant 0 : index
    %c0_242 = arith.constant 0 : index
    %c0_243 = arith.constant 0 : index
    %375 = vector.load %arg1[%c1_240, %c0_241, %c0_242, %c0_243] : memref<2x10x10x128xf32, #tpu.memory_space<vmem>>, vector<1x1x9x128xf32>
    %376 = vector.shape_cast %375 : vector<1x1x9x128xf32> to vector<9x128xf32>
    %377 = arith.truncf %376 : vector<9x128xf32> to vector<9x128xbf16>
    %378 = vector.extract_strided_slice %1 {offsets = [0, 0, 0], sizes = [1, 128, 128], strides = [1, 1, 1]} : vector<4x128x128xbf16> to vector<1x128x128xbf16>
    %379 = vector.shape_cast %378 : vector<1x128x128xbf16> to vector<128x128xbf16>
    %cst_244 = arith.constant dense<0.000000e+00> : vector<9x128xf32>
    %380 = tpu.matmul %377, %379, %cst_244 {dimension_numbers = #tpu.dot_dimension_numbers<[1], [0], [0], [1], [0, 0, 1, 1], [], []>} : vector<9x128xbf16>, vector<128x128xbf16>, vector<9x128xf32> -> vector<9x128xf32>
    %381 = arith.addf %374, %380 : vector<9x128xf32>
    %c1_245 = arith.constant 1 : index
    %c0_246 = arith.constant 0 : index
    %c1_247 = arith.constant 1 : index
    %c0_248 = arith.constant 0 : index
    %382 = vector.load %arg1[%c1_245, %c0_246, %c1_247, %c0_248] : memref<2x10x10x128xf32, #tpu.memory_space<vmem>>, vector<1x1x9x128xf32>
    %383 = vector.shape_cast %382 : vector<1x1x9x128xf32> to vector<9x128xf32>
    %384 = arith.truncf %383 : vector<9x128xf32> to vector<9x128xbf16>
    %385 = vector.extract_strided_slice %1 {offsets = [1, 0, 0], sizes = [1, 128, 128], strides = [1, 1, 1]} : vector<4x128x128xbf16> to vector<1x128x128xbf16>
    %386 = vector.shape_cast %385 : vector<1x128x128xbf16> to vector<128x128xbf16>
    %cst_249 = arith.constant dense<0.000000e+00> : vector<9x128xf32>
    %387 = tpu.matmul %384, %386, %cst_249 {dimension_numbers = #tpu.dot_dimension_numbers<[1], [0], [0], [1], [0, 0, 1, 1], [], []>} : vector<9x128xbf16>, vector<128x128xbf16>, vector<9x128xf32> -> vector<9x128xf32>
    %388 = arith.addf %381, %387 : vector<9x128xf32>
    %c1_250 = arith.constant 1 : index
    %c1_251 = arith.constant 1 : index
    %c0_252 = arith.constant 0 : index
    %c0_253 = arith.constant 0 : index
    %389 = vector.load %arg1[%c1_250, %c1_251, %c0_252, %c0_253] : memref<2x10x10x128xf32, #tpu.memory_space<vmem>>, vector<1x1x9x128xf32>
    %390 = vector.shape_cast %389 : vector<1x1x9x128xf32> to vector<9x128xf32>
    %391 = arith.truncf %390 : vector<9x128xf32> to vector<9x128xbf16>
    %392 = vector.extract_strided_slice %1 {offsets = [2, 0, 0], sizes = [1, 128, 128], strides = [1, 1, 1]} : vector<4x128x128xbf16> to vector<1x128x128xbf16>
    %393 = vector.shape_cast %392 : vector<1x128x128xbf16> to vector<128x128xbf16>
    %cst_254 = arith.constant dense<0.000000e+00> : vector<9x128xf32>
    %394 = tpu.matmul %391, %393, %cst_254 {dimension_numbers = #tpu.dot_dimension_numbers<[1], [0], [0], [1], [0, 0, 1, 1], [], []>} : vector<9x128xbf16>, vector<128x128xbf16>, vector<9x128xf32> -> vector<9x128xf32>
    %395 = arith.addf %388, %394 : vector<9x128xf32>
    %c1_255 = arith.constant 1 : index
    %c1_256 = arith.constant 1 : index
    %c1_257 = arith.constant 1 : index
    %c0_258 = arith.constant 0 : index
    %396 = vector.load %arg1[%c1_255, %c1_256, %c1_257, %c0_258] : memref<2x10x10x128xf32, #tpu.memory_space<vmem>>, vector<1x1x9x128xf32>
    %397 = vector.shape_cast %396 : vector<1x1x9x128xf32> to vector<9x128xf32>
    %398 = arith.truncf %397 : vector<9x128xf32> to vector<9x128xbf16>
    %399 = vector.extract_strided_slice %1 {offsets = [3, 0, 0], sizes = [1, 128, 128], strides = [1, 1, 1]} : vector<4x128x128xbf16> to vector<1x128x128xbf16>
    %400 = vector.shape_cast %399 : vector<1x128x128xbf16> to vector<128x128xbf16>
    %cst_259 = arith.constant dense<0.000000e+00> : vector<9x128xf32>
    %401 = tpu.matmul %398, %400, %cst_259 {dimension_numbers = #tpu.dot_dimension_numbers<[1], [0], [0], [1], [0, 0, 1, 1], [], []>} : vector<9x128xbf16>, vector<128x128xbf16>, vector<9x128xf32> -> vector<9x128xf32>
    %402 = arith.addf %395, %401 : vector<9x128xf32>
    %403 = vector.broadcast %2 : vector<1x128xf32> to vector<9x128xf32>
    %404 = arith.addf %402, %403 : vector<9x128xf32>
    %cst_260 = arith.constant dense<0.000000e+00> : vector<128xf32>
    %405 = vector.multi_reduction <add>, %404, %cst_260 [0] : vector<9x128xf32> to vector<128xf32>
    %406 = vector.shape_cast %405 : vector<128xf32> to vector<1x128xf32>
    %407 = arith.addf %366, %406 : vector<1x128xf32>
    %408 = arith.mulf %404, %404 : vector<9x128xf32>
    %cst_261 = arith.constant dense<0.000000e+00> : vector<128xf32>
    %409 = vector.multi_reduction <add>, %408, %cst_261 [0] : vector<9x128xf32> to vector<128xf32>
    %410 = vector.shape_cast %409 : vector<128xf32> to vector<1x128xf32>
    %411 = arith.addf %370, %410 : vector<1x128xf32>
    %c1_262 = arith.constant 1 : index
    %c0_263 = arith.constant 0 : index
    %c0_264 = arith.constant 0 : index
    %c0_265 = arith.constant 0 : index
    %412 = vector.load %arg6[%c1_262, %c0_263, %c0_264, %c0_265] : memref<2x9x9x128xf32, #tpu.memory_space<vmem>>, vector<1x1x9x128xf32>
    %413 = vector.shape_cast %412 : vector<1x1x9x128xf32> to vector<9x128xf32>
    %414 = vector.shape_cast %404 : vector<9x128xf32> to vector<1x1x9x128xf32>
    tpu.vector_store %arg6[%c1_262, %c0_263, %c0_264, %c0_265], %414 {strides = array<i32>} : memref<2x9x9x128xf32, #tpu.memory_space<vmem>>, vector<1x1x9x128xf32>,
    %cst_266 = arith.constant 0.000000e+00 : f32
    %415 = vector.broadcast %cst_266 : f32 to vector<9x128xf32>
    %c1_267 = arith.constant 1 : index
    %c1_268 = arith.constant 1 : index
    %c0_269 = arith.constant 0 : index
    %c0_270 = arith.constant 0 : index
    %416 = vector.load %arg1[%c1_267, %c1_268, %c0_269, %c0_270] : memref<2x10x10x128xf32, #tpu.memory_space<vmem>>, vector<1x1x9x128xf32>
    %417 = vector.shape_cast %416 : vector<1x1x9x128xf32> to vector<9x128xf32>
    %418 = arith.truncf %417 : vector<9x128xf32> to vector<9x128xbf16>
    %419 = vector.extract_strided_slice %1 {offsets = [0, 0, 0], sizes = [1, 128, 128], strides = [1, 1, 1]} : vector<4x128x128xbf16> to vector<1x128x128xbf16>
    %420 = vector.shape_cast %419 : vector<1x128x128xbf16> to vector<128x128xbf16>
    %cst_271 = arith.constant dense<0.000000e+00> : vector<9x128xf32>
    %421 = tpu.matmul %418, %420, %cst_271 {dimension_numbers = #tpu.dot_dimension_numbers<[1], [0], [0], [1], [0, 0, 1, 1], [], []>} : vector<9x128xbf16>, vector<128x128xbf16>, vector<9x128xf32> -> vector<9x128xf32>
    %422 = arith.addf %415, %421 : vector<9x128xf32>
    %c1_272 = arith.constant 1 : index
    %c1_273 = arith.constant 1 : index
    %c1_274 = arith.constant 1 : index
    %c0_275 = arith.constant 0 : index
    %423 = vector.load %arg1[%c1_272, %c1_273, %c1_274, %c0_275] : memref<2x10x10x128xf32, #tpu.memory_space<vmem>>, vector<1x1x9x128xf32>
    %424 = vector.shape_cast %423 : vector<1x1x9x128xf32> to vector<9x128xf32>
    %425 = arith.truncf %424 : vector<9x128xf32> to vector<9x128xbf16>
    %426 = vector.extract_strided_slice %1 {offsets = [1, 0, 0], sizes = [1, 128, 128], strides = [1, 1, 1]} : vector<4x128x128xbf16> to vector<1x128x128xbf16>
    %427 = vector.shape_cast %426 : vector<1x128x128xbf16> to vector<128x128xbf16>
    %cst_276 = arith.constant dense<0.000000e+00> : vector<9x128xf32>
    %428 = tpu.matmul %425, %427, %cst_276 {dimension_numbers = #tpu.dot_dimension_numbers<[1], [0], [0], [1], [0, 0, 1, 1], [], []>} : vector<9x128xbf16>, vector<128x128xbf16>, vector<9x128xf32> -> vector<9x128xf32>
    %429 = arith.addf %422, %428 : vector<9x128xf32>
    %c1_277 = arith.constant 1 : index
    %c2_278 = arith.constant 2 : index
    %c0_279 = arith.constant 0 : index
    %c0_280 = arith.constant 0 : index
    %430 = vector.load %arg1[%c1_277, %c2_278, %c0_279, %c0_280] : memref<2x10x10x128xf32, #tpu.memory_space<vmem>>, vector<1x1x9x128xf32>
    %431 = vector.shape_cast %430 : vector<1x1x9x128xf32> to vector<9x128xf32>
    %432 = arith.truncf %431 : vector<9x128xf32> to vector<9x128xbf16>
    %433 = vector.extract_strided_slice %1 {offsets = [2, 0, 0], sizes = [1, 128, 128], strides = [1, 1, 1]} : vector<4x128x128xbf16> to vector<1x128x128xbf16>
    %434 = vector.shape_cast %433 : vector<1x128x128xbf16> to vector<128x128xbf16>
    %cst_281 = arith.constant dense<0.000000e+00> : vector<9x128xf32>
    %435 = tpu.matmul %432, %434, %cst_281 {dimension_numbers = #tpu.dot_dimension_numbers<[1], [0], [0], [1], [0, 0, 1, 1], [], []>} : vector<9x128xbf16>, vector<128x128xbf16>, vector<9x128xf32> -> vector<9x128xf32>
    %436 = arith.addf %429, %435 : vector<9x128xf32>
    %c1_282 = arith.constant 1 : index
    %c2_283 = arith.constant 2 : index
    %c1_284 = arith.constant 1 : index
    %c0_285 = arith.constant 0 : index
    %437 = vector.load %arg1[%c1_282, %c2_283, %c1_284, %c0_285] : memref<2x10x10x128xf32, #tpu.memory_space<vmem>>, vector<1x1x9x128xf32>
    %438 = vector.shape_cast %437 : vector<1x1x9x128xf32> to vector<9x128xf32>
    %439 = arith.truncf %438 : vector<9x128xf32> to vector<9x128xbf16>
    %440 = vector.extract_strided_slice %1 {offsets = [3, 0, 0], sizes = [1, 128, 128], strides = [1, 1, 1]} : vector<4x128x128xbf16> to vector<1x128x128xbf16>
    %441 = vector.shape_cast %440 : vector<1x128x128xbf16> to vector<128x128xbf16>
    %cst_286 = arith.constant dense<0.000000e+00> : vector<9x128xf32>
    %442 = tpu.matmul %439, %441, %cst_286 {dimension_numbers = #tpu.dot_dimension_numbers<[1], [0], [0], [1], [0, 0, 1, 1], [], []>} : vector<9x128xbf16>, vector<128x128xbf16>, vector<9x128xf32> -> vector<9x128xf32>
    %443 = arith.addf %436, %442 : vector<9x128xf32>
    %444 = vector.broadcast %2 : vector<1x128xf32> to vector<9x128xf32>
    %445 = arith.addf %443, %444 : vector<9x128xf32>
    %cst_287 = arith.constant dense<0.000000e+00> : vector<128xf32>
    %446 = vector.multi_reduction <add>, %445, %cst_287 [0] : vector<9x128xf32> to vector<128xf32>
    %447 = vector.shape_cast %446 : vector<128xf32> to vector<1x128xf32>
    %448 = arith.addf %407, %447 : vector<1x128xf32>
    %449 = arith.mulf %445, %445 : vector<9x128xf32>
    %cst_288 = arith.constant dense<0.000000e+00> : vector<128xf32>
    %450 = vector.multi_reduction <add>, %449, %cst_288 [0] : vector<9x128xf32> to vector<128xf32>
    %451 = vector.shape_cast %450 : vector<128xf32> to vector<1x128xf32>
    %452 = arith.addf %411, %451 : vector<1x128xf32>
    %c1_289 = arith.constant 1 : index
    %c1_290 = arith.constant 1 : index
    %c0_291 = arith.constant 0 : index
    %c0_292 = arith.constant 0 : index
    %453 = vector.load %arg6[%c1_289, %c1_290, %c0_291, %c0_292] : memref<2x9x9x128xf32, #tpu.memory_space<vmem>>, vector<1x1x9x128xf32>
    %454 = vector.shape_cast %453 : vector<1x1x9x128xf32> to vector<9x128xf32>
    %455 = vector.shape_cast %445 : vector<9x128xf32> to vector<1x1x9x128xf32>
    tpu.vector_store %arg6[%c1_289, %c1_290, %c0_291, %c0_292], %455 {strides = array<i32>} : memref<2x9x9x128xf32, #tpu.memory_space<vmem>>, vector<1x1x9x128xf32>,
    %cst_293 = arith.constant 0.000000e+00 : f32
    %456 = vector.broadcast %cst_293 : f32 to vector<9x128xf32>
    %c1_294 = arith.constant 1 : index
    %c2_295 = arith.constant 2 : index
    %c0_296 = arith.constant 0 : index
    %c0_297 = arith.constant 0 : index
    %457 = vector.load %arg1[%c1_294, %c2_295, %c0_296, %c0_297] : memref<2x10x10x128xf32, #tpu.memory_space<vmem>>, vector<1x1x9x128xf32>
    %458 = vector.shape_cast %457 : vector<1x1x9x128xf32> to vector<9x128xf32>
    %459 = arith.truncf %458 : vector<9x128xf32> to vector<9x128xbf16>
    %460 = vector.extract_strided_slice %1 {offsets = [0, 0, 0], sizes = [1, 128, 128], strides = [1, 1, 1]} : vector<4x128x128xbf16> to vector<1x128x128xbf16>
    %461 = vector.shape_cast %460 : vector<1x128x128xbf16> to vector<128x128xbf16>
    %cst_298 = arith.constant dense<0.000000e+00> : vector<9x128xf32>
    %462 = tpu.matmul %459, %461, %cst_298 {dimension_numbers = #tpu.dot_dimension_numbers<[1], [0], [0], [1], [0, 0, 1, 1], [], []>} : vector<9x128xbf16>, vector<128x128xbf16>, vector<9x128xf32> -> vector<9x128xf32>
    %463 = arith.addf %456, %462 : vector<9x128xf32>
    %c1_299 = arith.constant 1 : index
    %c2_300 = arith.constant 2 : index
    %c1_301 = arith.constant 1 : index
    %c0_302 = arith.constant 0 : index
    %464 = vector.load %arg1[%c1_299, %c2_300, %c1_301, %c0_302] : memref<2x10x10x128xf32, #tpu.memory_space<vmem>>, vector<1x1x9x128xf32>
    %465 = vector.shape_cast %464 : vector<1x1x9x128xf32> to vector<9x128xf32>
    %466 = arith.truncf %465 : vector<9x128xf32> to vector<9x128xbf16>
    %467 = vector.extract_strided_slice %1 {offsets = [1, 0, 0], sizes = [1, 128, 128], strides = [1, 1, 1]} : vector<4x128x128xbf16> to vector<1x128x128xbf16>
    %468 = vector.shape_cast %467 : vector<1x128x128xbf16> to vector<128x128xbf16>
    %cst_303 = arith.constant dense<0.000000e+00> : vector<9x128xf32>
    %469 = tpu.matmul %466, %468, %cst_303 {dimension_numbers = #tpu.dot_dimension_numbers<[1], [0], [0], [1], [0, 0, 1, 1], [], []>} : vector<9x128xbf16>, vector<128x128xbf16>, vector<9x128xf32> -> vector<9x128xf32>
    %470 = arith.addf %463, %469 : vector<9x128xf32>
    %c1_304 = arith.constant 1 : index
    %c3_305 = arith.constant 3 : index
    %c0_306 = arith.constant 0 : index
    %c0_307 = arith.constant 0 : index
    %471 = vector.load %arg1[%c1_304, %c3_305, %c0_306, %c0_307] : memref<2x10x10x128xf32, #tpu.memory_space<vmem>>, vector<1x1x9x128xf32>
    %472 = vector.shape_cast %471 : vector<1x1x9x128xf32> to vector<9x128xf32>
    %473 = arith.truncf %472 : vector<9x128xf32> to vector<9x128xbf16>
    %474 = vector.extract_strided_slice %1 {offsets = [2, 0, 0], sizes = [1, 128, 128], strides = [1, 1, 1]} : vector<4x128x128xbf16> to vector<1x128x128xbf16>
    %475 = vector.shape_cast %474 : vector<1x128x128xbf16> to vector<128x128xbf16>
    %cst_308 = arith.constant dense<0.000000e+00> : vector<9x128xf32>
    %476 = tpu.matmul %473, %475, %cst_308 {dimension_numbers = #tpu.dot_dimension_numbers<[1], [0], [0], [1], [0, 0, 1, 1], [], []>} : vector<9x128xbf16>, vector<128x128xbf16>, vector<9x128xf32> -> vector<9x128xf32>
    %477 = arith.addf %470, %476 : vector<9x128xf32>
    %c1_309 = arith.constant 1 : index
    %c3_310 = arith.constant 3 : index
    %c1_311 = arith.constant 1 : index
    %c0_312 = arith.constant 0 : index
    %478 = vector.load %arg1[%c1_309, %c3_310, %c1_311, %c0_312] : memref<2x10x10x128xf32, #tpu.memory_space<vmem>>, vector<1x1x9x128xf32>
    %479 = vector.shape_cast %478 : vector<1x1x9x128xf32> to vector<9x128xf32>
    %480 = arith.truncf %479 : vector<9x128xf32> to vector<9x128xbf16>
    %481 = vector.extract_strided_slice %1 {offsets = [3, 0, 0], sizes = [1, 128, 128], strides = [1, 1, 1]} : vector<4x128x128xbf16> to vector<1x128x128xbf16>
    %482 = vector.shape_cast %481 : vector<1x128x128xbf16> to vector<128x128xbf16>
    %cst_313 = arith.constant dense<0.000000e+00> : vector<9x128xf32>
    %483 = tpu.matmul %480, %482, %cst_313 {dimension_numbers = #tpu.dot_dimension_numbers<[1], [0], [0], [1], [0, 0, 1, 1], [], []>} : vector<9x128xbf16>, vector<128x128xbf16>, vector<9x128xf32> -> vector<9x128xf32>
    %484 = arith.addf %477, %483 : vector<9x128xf32>
    %485 = vector.broadcast %2 : vector<1x128xf32> to vector<9x128xf32>
    %486 = arith.addf %484, %485 : vector<9x128xf32>
    %cst_314 = arith.constant dense<0.000000e+00> : vector<128xf32>
    %487 = vector.multi_reduction <add>, %486, %cst_314 [0] : vector<9x128xf32> to vector<128xf32>
    %488 = vector.shape_cast %487 : vector<128xf32> to vector<1x128xf32>
    %489 = arith.addf %448, %488 : vector<1x128xf32>
    %490 = arith.mulf %486, %486 : vector<9x128xf32>
    %cst_315 = arith.constant dense<0.000000e+00> : vector<128xf32>
    %491 = vector.multi_reduction <add>, %490, %cst_315 [0] : vector<9x128xf32> to vector<128xf32>
    %492 = vector.shape_cast %491 : vector<128xf32> to vector<1x128xf32>
    %493 = arith.addf %452, %492 : vector<1x128xf32>
    %c1_316 = arith.constant 1 : index
    %c2_317 = arith.constant 2 : index
    %c0_318 = arith.constant 0 : index
    %c0_319 = arith.constant 0 : index
    %494 = vector.load %arg6[%c1_316, %c2_317, %c0_318, %c0_319] : memref<2x9x9x128xf32, #tpu.memory_space<vmem>>, vector<1x1x9x128xf32>
    %495 = vector.shape_cast %494 : vector<1x1x9x128xf32> to vector<9x128xf32>
    %496 = vector.shape_cast %486 : vector<9x128xf32> to vector<1x1x9x128xf32>
    tpu.vector_store %arg6[%c1_316, %c2_317, %c0_318, %c0_319], %496 {strides = array<i32>} : memref<2x9x9x128xf32, #tpu.memory_space<vmem>>, vector<1x1x9x128xf32>,
    %cst_320 = arith.constant 0.000000e+00 : f32
    %497 = vector.broadcast %cst_320 : f32 to vector<9x128xf32>
    %c1_321 = arith.constant 1 : index
    %c3_322 = arith.constant 3 : index
    %c0_323 = arith.constant 0 : index
    %c0_324 = arith.constant 0 : index
    %498 = vector.load %arg1[%c1_321, %c3_322, %c0_323, %c0_324] : memref<2x10x10x128xf32, #tpu.memory_space<vmem>>, vector<1x1x9x128xf32>
    %499 = vector.shape_cast %498 : vector<1x1x9x128xf32> to vector<9x128xf32>
    %500 = arith.truncf %499 : vector<9x128xf32> to vector<9x128xbf16>
    %501 = vector.extract_strided_slice %1 {offsets = [0, 0, 0], sizes = [1, 128, 128], strides = [1, 1, 1]} : vector<4x128x128xbf16> to vector<1x128x128xbf16>
    %502 = vector.shape_cast %501 : vector<1x128x128xbf16> to vector<128x128xbf16>
    %cst_325 = arith.constant dense<0.000000e+00> : vector<9x128xf32>
    %503 = tpu.matmul %500, %502, %cst_325 {dimension_numbers = #tpu.dot_dimension_numbers<[1], [0], [0], [1], [0, 0, 1, 1], [], []>} : vector<9x128xbf16>, vector<128x128xbf16>, vector<9x128xf32> -> vector<9x128xf32>
    %504 = arith.addf %497, %503 : vector<9x128xf32>
    %c1_326 = arith.constant 1 : index
    %c3_327 = arith.constant 3 : index
    %c1_328 = arith.constant 1 : index
    %c0_329 = arith.constant 0 : index
    %505 = vector.load %arg1[%c1_326, %c3_327, %c1_328, %c0_329] : memref<2x10x10x128xf32, #tpu.memory_space<vmem>>, vector<1x1x9x128xf32>
    %506 = vector.shape_cast %505 : vector<1x1x9x128xf32> to vector<9x128xf32>
    %507 = arith.truncf %506 : vector<9x128xf32> to vector<9x128xbf16>
    %508 = vector.extract_strided_slice %1 {offsets = [1, 0, 0], sizes = [1, 128, 128], strides = [1, 1, 1]} : vector<4x128x128xbf16> to vector<1x128x128xbf16>
    %509 = vector.shape_cast %508 : vector<1x128x128xbf16> to vector<128x128xbf16>
    %cst_330 = arith.constant dense<0.000000e+00> : vector<9x128xf32>
    %510 = tpu.matmul %507, %509, %cst_330 {dimension_numbers = #tpu.dot_dimension_numbers<[1], [0], [0], [1], [0, 0, 1, 1], [], []>} : vector<9x128xbf16>, vector<128x128xbf16>, vector<9x128xf32> -> vector<9x128xf32>
    %511 = arith.addf %504, %510 : vector<9x128xf32>
    %c1_331 = arith.constant 1 : index
    %c4_332 = arith.constant 4 : index
    %c0_333 = arith.constant 0 : index
    %c0_334 = arith.constant 0 : index
    %512 = vector.load %arg1[%c1_331, %c4_332, %c0_333, %c0_334] : memref<2x10x10x128xf32, #tpu.memory_space<vmem>>, vector<1x1x9x128xf32>
    %513 = vector.shape_cast %512 : vector<1x1x9x128xf32> to vector<9x128xf32>
    %514 = arith.truncf %513 : vector<9x128xf32> to vector<9x128xbf16>
    %515 = vector.extract_strided_slice %1 {offsets = [2, 0, 0], sizes = [1, 128, 128], strides = [1, 1, 1]} : vector<4x128x128xbf16> to vector<1x128x128xbf16>
    %516 = vector.shape_cast %515 : vector<1x128x128xbf16> to vector<128x128xbf16>
    %cst_335 = arith.constant dense<0.000000e+00> : vector<9x128xf32>
    %517 = tpu.matmul %514, %516, %cst_335 {dimension_numbers = #tpu.dot_dimension_numbers<[1], [0], [0], [1], [0, 0, 1, 1], [], []>} : vector<9x128xbf16>, vector<128x128xbf16>, vector<9x128xf32> -> vector<9x128xf32>
    %518 = arith.addf %511, %517 : vector<9x128xf32>
    %c1_336 = arith.constant 1 : index
    %c4_337 = arith.constant 4 : index
    %c1_338 = arith.constant 1 : index
    %c0_339 = arith.constant 0 : index
    %519 = vector.load %arg1[%c1_336, %c4_337, %c1_338, %c0_339] : memref<2x10x10x128xf32, #tpu.memory_space<vmem>>, vector<1x1x9x128xf32>
    %520 = vector.shape_cast %519 : vector<1x1x9x128xf32> to vector<9x128xf32>
    %521 = arith.truncf %520 : vector<9x128xf32> to vector<9x128xbf16>
    %522 = vector.extract_strided_slice %1 {offsets = [3, 0, 0], sizes = [1, 128, 128], strides = [1, 1, 1]} : vector<4x128x128xbf16> to vector<1x128x128xbf16>
    %523 = vector.shape_cast %522 : vector<1x128x128xbf16> to vector<128x128xbf16>
    %cst_340 = arith.constant dense<0.000000e+00> : vector<9x128xf32>
    %524 = tpu.matmul %521, %523, %cst_340 {dimension_numbers = #tpu.dot_dimension_numbers<[1], [0], [0], [1], [0, 0, 1, 1], [], []>} : vector<9x128xbf16>, vector<128x128xbf16>, vector<9x128xf32> -> vector<9x128xf32>
    %525 = arith.addf %518, %524 : vector<9x128xf32>
    %526 = vector.broadcast %2 : vector<1x128xf32> to vector<9x128xf32>
    %527 = arith.addf %525, %526 : vector<9x128xf32>
    %cst_341 = arith.constant dense<0.000000e+00> : vector<128xf32>
    %528 = vector.multi_reduction <add>, %527, %cst_341 [0] : vector<9x128xf32> to vector<128xf32>
    %529 = vector.shape_cast %528 : vector<128xf32> to vector<1x128xf32>
    %530 = arith.addf %489, %529 : vector<1x128xf32>
    %531 = arith.mulf %527, %527 : vector<9x128xf32>
    %cst_342 = arith.constant dense<0.000000e+00> : vector<128xf32>
    %532 = vector.multi_reduction <add>, %531, %cst_342 [0] : vector<9x128xf32> to vector<128xf32>
    %533 = vector.shape_cast %532 : vector<128xf32> to vector<1x128xf32>
    %534 = arith.addf %493, %533 : vector<1x128xf32>
    %c1_343 = arith.constant 1 : index
    %c3_344 = arith.constant 3 : index
    %c0_345 = arith.constant 0 : index
    %c0_346 = arith.constant 0 : index
    %535 = vector.load %arg6[%c1_343, %c3_344, %c0_345, %c0_346] : memref<2x9x9x128xf32, #tpu.memory_space<vmem>>, vector<1x1x9x128xf32>
    %536 = vector.shape_cast %535 : vector<1x1x9x128xf32> to vector<9x128xf32>
    %537 = vector.shape_cast %527 : vector<9x128xf32> to vector<1x1x9x128xf32>
    tpu.vector_store %arg6[%c1_343, %c3_344, %c0_345, %c0_346], %537 {strides = array<i32>} : memref<2x9x9x128xf32, #tpu.memory_space<vmem>>, vector<1x1x9x128xf32>,
    %cst_347 = arith.constant 0.000000e+00 : f32
    %538 = vector.broadcast %cst_347 : f32 to vector<9x128xf32>
    %c1_348 = arith.constant 1 : index
    %c4_349 = arith.constant 4 : index
    %c0_350 = arith.constant 0 : index
    %c0_351 = arith.constant 0 : index
    %539 = vector.load %arg1[%c1_348, %c4_349, %c0_350, %c0_351] : memref<2x10x10x128xf32, #tpu.memory_space<vmem>>, vector<1x1x9x128xf32>
    %540 = vector.shape_cast %539 : vector<1x1x9x128xf32> to vector<9x128xf32>
    %541 = arith.truncf %540 : vector<9x128xf32> to vector<9x128xbf16>
    %542 = vector.extract_strided_slice %1 {offsets = [0, 0, 0], sizes = [1, 128, 128], strides = [1, 1, 1]} : vector<4x128x128xbf16> to vector<1x128x128xbf16>
    %543 = vector.shape_cast %542 : vector<1x128x128xbf16> to vector<128x128xbf16>
    %cst_352 = arith.constant dense<0.000000e+00> : vector<9x128xf32>
    %544 = tpu.matmul %541, %543, %cst_352 {dimension_numbers = #tpu.dot_dimension_numbers<[1], [0], [0], [1], [0, 0, 1, 1], [], []>} : vector<9x128xbf16>, vector<128x128xbf16>, vector<9x128xf32> -> vector<9x128xf32>
    %545 = arith.addf %538, %544 : vector<9x128xf32>
    %c1_353 = arith.constant 1 : index
    %c4_354 = arith.constant 4 : index
    %c1_355 = arith.constant 1 : index
    %c0_356 = arith.constant 0 : index
    %546 = vector.load %arg1[%c1_353, %c4_354, %c1_355, %c0_356] : memref<2x10x10x128xf32, #tpu.memory_space<vmem>>, vector<1x1x9x128xf32>
    %547 = vector.shape_cast %546 : vector<1x1x9x128xf32> to vector<9x128xf32>
    %548 = arith.truncf %547 : vector<9x128xf32> to vector<9x128xbf16>
    %549 = vector.extract_strided_slice %1 {offsets = [1, 0, 0], sizes = [1, 128, 128], strides = [1, 1, 1]} : vector<4x128x128xbf16> to vector<1x128x128xbf16>
    %550 = vector.shape_cast %549 : vector<1x128x128xbf16> to vector<128x128xbf16>
    %cst_357 = arith.constant dense<0.000000e+00> : vector<9x128xf32>
    %551 = tpu.matmul %548, %550, %cst_357 {dimension_numbers = #tpu.dot_dimension_numbers<[1], [0], [0], [1], [0, 0, 1, 1], [], []>} : vector<9x128xbf16>, vector<128x128xbf16>, vector<9x128xf32> -> vector<9x128xf32>
    %552 = arith.addf %545, %551 : vector<9x128xf32>
    %c1_358 = arith.constant 1 : index
    %c5_359 = arith.constant 5 : index
    %c0_360 = arith.constant 0 : index
    %c0_361 = arith.constant 0 : index
    %553 = vector.load %arg1[%c1_358, %c5_359, %c0_360, %c0_361] : memref<2x10x10x128xf32, #tpu.memory_space<vmem>>, vector<1x1x9x128xf32>
    %554 = vector.shape_cast %553 : vector<1x1x9x128xf32> to vector<9x128xf32>
    %555 = arith.truncf %554 : vector<9x128xf32> to vector<9x128xbf16>
    %556 = vector.extract_strided_slice %1 {offsets = [2, 0, 0], sizes = [1, 128, 128], strides = [1, 1, 1]} : vector<4x128x128xbf16> to vector<1x128x128xbf16>
    %557 = vector.shape_cast %556 : vector<1x128x128xbf16> to vector<128x128xbf16>
    %cst_362 = arith.constant dense<0.000000e+00> : vector<9x128xf32>
    %558 = tpu.matmul %555, %557, %cst_362 {dimension_numbers = #tpu.dot_dimension_numbers<[1], [0], [0], [1], [0, 0, 1, 1], [], []>} : vector<9x128xbf16>, vector<128x128xbf16>, vector<9x128xf32> -> vector<9x128xf32>
    %559 = arith.addf %552, %558 : vector<9x128xf32>
    %c1_363 = arith.constant 1 : index
    %c5_364 = arith.constant 5 : index
    %c1_365 = arith.constant 1 : index
    %c0_366 = arith.constant 0 : index
    %560 = vector.load %arg1[%c1_363, %c5_364, %c1_365, %c0_366] : memref<2x10x10x128xf32, #tpu.memory_space<vmem>>, vector<1x1x9x128xf32>
    %561 = vector.shape_cast %560 : vector<1x1x9x128xf32> to vector<9x128xf32>
    %562 = arith.truncf %561 : vector<9x128xf32> to vector<9x128xbf16>
    %563 = vector.extract_strided_slice %1 {offsets = [3, 0, 0], sizes = [1, 128, 128], strides = [1, 1, 1]} : vector<4x128x128xbf16> to vector<1x128x128xbf16>
    %564 = vector.shape_cast %563 : vector<1x128x128xbf16> to vector<128x128xbf16>
    %cst_367 = arith.constant dense<0.000000e+00> : vector<9x128xf32>
    %565 = tpu.matmul %562, %564, %cst_367 {dimension_numbers = #tpu.dot_dimension_numbers<[1], [0], [0], [1], [0, 0, 1, 1], [], []>} : vector<9x128xbf16>, vector<128x128xbf16>, vector<9x128xf32> -> vector<9x128xf32>
    %566 = arith.addf %559, %565 : vector<9x128xf32>
    %567 = vector.broadcast %2 : vector<1x128xf32> to vector<9x128xf32>
    %568 = arith.addf %566, %567 : vector<9x128xf32>
    %cst_368 = arith.constant dense<0.000000e+00> : vector<128xf32>
    %569 = vector.multi_reduction <add>, %568, %cst_368 [0] : vector<9x128xf32> to vector<128xf32>
    %570 = vector.shape_cast %569 : vector<128xf32> to vector<1x128xf32>
    %571 = arith.addf %530, %570 : vector<1x128xf32>
    %572 = arith.mulf %568, %568 : vector<9x128xf32>
    %cst_369 = arith.constant dense<0.000000e+00> : vector<128xf32>
    %573 = vector.multi_reduction <add>, %572, %cst_369 [0] : vector<9x128xf32> to vector<128xf32>
    %574 = vector.shape_cast %573 : vector<128xf32> to vector<1x128xf32>
    %575 = arith.addf %534, %574 : vector<1x128xf32>
    %c1_370 = arith.constant 1 : index
    %c4_371 = arith.constant 4 : index
    %c0_372 = arith.constant 0 : index
    %c0_373 = arith.constant 0 : index
    %576 = vector.load %arg6[%c1_370, %c4_371, %c0_372, %c0_373] : memref<2x9x9x128xf32, #tpu.memory_space<vmem>>, vector<1x1x9x128xf32>
    %577 = vector.shape_cast %576 : vector<1x1x9x128xf32> to vector<9x128xf32>
    %578 = vector.shape_cast %568 : vector<9x128xf32> to vector<1x1x9x128xf32>
    tpu.vector_store %arg6[%c1_370, %c4_371, %c0_372, %c0_373], %578 {strides = array<i32>} : memref<2x9x9x128xf32, #tpu.memory_space<vmem>>, vector<1x1x9x128xf32>,
    %cst_374 = arith.constant 0.000000e+00 : f32
    %579 = vector.broadcast %cst_374 : f32 to vector<9x128xf32>
    %c1_375 = arith.constant 1 : index
    %c5_376 = arith.constant 5 : index
    %c0_377 = arith.constant 0 : index
    %c0_378 = arith.constant 0 : index
    %580 = vector.load %arg1[%c1_375, %c5_376, %c0_377, %c0_378] : memref<2x10x10x128xf32, #tpu.memory_space<vmem>>, vector<1x1x9x128xf32>
    %581 = vector.shape_cast %580 : vector<1x1x9x128xf32> to vector<9x128xf32>
    %582 = arith.truncf %581 : vector<9x128xf32> to vector<9x128xbf16>
    %583 = vector.extract_strided_slice %1 {offsets = [0, 0, 0], sizes = [1, 128, 128], strides = [1, 1, 1]} : vector<4x128x128xbf16> to vector<1x128x128xbf16>
    %584 = vector.shape_cast %583 : vector<1x128x128xbf16> to vector<128x128xbf16>
    %cst_379 = arith.constant dense<0.000000e+00> : vector<9x128xf32>
    %585 = tpu.matmul %582, %584, %cst_379 {dimension_numbers = #tpu.dot_dimension_numbers<[1], [0], [0], [1], [0, 0, 1, 1], [], []>} : vector<9x128xbf16>, vector<128x128xbf16>, vector<9x128xf32> -> vector<9x128xf32>
    %586 = arith.addf %579, %585 : vector<9x128xf32>
    %c1_380 = arith.constant 1 : index
    %c5_381 = arith.constant 5 : index
    %c1_382 = arith.constant 1 : index
    %c0_383 = arith.constant 0 : index
    %587 = vector.load %arg1[%c1_380, %c5_381, %c1_382, %c0_383] : memref<2x10x10x128xf32, #tpu.memory_space<vmem>>, vector<1x1x9x128xf32>
    %588 = vector.shape_cast %587 : vector<1x1x9x128xf32> to vector<9x128xf32>
    %589 = arith.truncf %588 : vector<9x128xf32> to vector<9x128xbf16>
    %590 = vector.extract_strided_slice %1 {offsets = [1, 0, 0], sizes = [1, 128, 128], strides = [1, 1, 1]} : vector<4x128x128xbf16> to vector<1x128x128xbf16>
    %591 = vector.shape_cast %590 : vector<1x128x128xbf16> to vector<128x128xbf16>
    %cst_384 = arith.constant dense<0.000000e+00> : vector<9x128xf32>
    %592 = tpu.matmul %589, %591, %cst_384 {dimension_numbers = #tpu.dot_dimension_numbers<[1], [0], [0], [1], [0, 0, 1, 1], [], []>} : vector<9x128xbf16>, vector<128x128xbf16>, vector<9x128xf32> -> vector<9x128xf32>
    %593 = arith.addf %586, %592 : vector<9x128xf32>
    %c1_385 = arith.constant 1 : index
    %c6_386 = arith.constant 6 : index
    %c0_387 = arith.constant 0 : index
    %c0_388 = arith.constant 0 : index
    %594 = vector.load %arg1[%c1_385, %c6_386, %c0_387, %c0_388] : memref<2x10x10x128xf32, #tpu.memory_space<vmem>>, vector<1x1x9x128xf32>
    %595 = vector.shape_cast %594 : vector<1x1x9x128xf32> to vector<9x128xf32>
    %596 = arith.truncf %595 : vector<9x128xf32> to vector<9x128xbf16>
    %597 = vector.extract_strided_slice %1 {offsets = [2, 0, 0], sizes = [1, 128, 128], strides = [1, 1, 1]} : vector<4x128x128xbf16> to vector<1x128x128xbf16>
    %598 = vector.shape_cast %597 : vector<1x128x128xbf16> to vector<128x128xbf16>
    %cst_389 = arith.constant dense<0.000000e+00> : vector<9x128xf32>
    %599 = tpu.matmul %596, %598, %cst_389 {dimension_numbers = #tpu.dot_dimension_numbers<[1], [0], [0], [1], [0, 0, 1, 1], [], []>} : vector<9x128xbf16>, vector<128x128xbf16>, vector<9x128xf32> -> vector<9x128xf32>
    %600 = arith.addf %593, %599 : vector<9x128xf32>
    %c1_390 = arith.constant 1 : index
    %c6_391 = arith.constant 6 : index
    %c1_392 = arith.constant 1 : index
    %c0_393 = arith.constant 0 : index
    %601 = vector.load %arg1[%c1_390, %c6_391, %c1_392, %c0_393] : memref<2x10x10x128xf32, #tpu.memory_space<vmem>>, vector<1x1x9x128xf32>
    %602 = vector.shape_cast %601 : vector<1x1x9x128xf32> to vector<9x128xf32>
    %603 = arith.truncf %602 : vector<9x128xf32> to vector<9x128xbf16>
    %604 = vector.extract_strided_slice %1 {offsets = [3, 0, 0], sizes = [1, 128, 128], strides = [1, 1, 1]} : vector<4x128x128xbf16> to vector<1x128x128xbf16>
    %605 = vector.shape_cast %604 : vector<1x128x128xbf16> to vector<128x128xbf16>
    %cst_394 = arith.constant dense<0.000000e+00> : vector<9x128xf32>
    %606 = tpu.matmul %603, %605, %cst_394 {dimension_numbers = #tpu.dot_dimension_numbers<[1], [0], [0], [1], [0, 0, 1, 1], [], []>} : vector<9x128xbf16>, vector<128x128xbf16>, vector<9x128xf32> -> vector<9x128xf32>
    %607 = arith.addf %600, %606 : vector<9x128xf32>
    %608 = vector.broadcast %2 : vector<1x128xf32> to vector<9x128xf32>
    %609 = arith.addf %607, %608 : vector<9x128xf32>
    %cst_395 = arith.constant dense<0.000000e+00> : vector<128xf32>
    %610 = vector.multi_reduction <add>, %609, %cst_395 [0] : vector<9x128xf32> to vector<128xf32>
    %611 = vector.shape_cast %610 : vector<128xf32> to vector<1x128xf32>
    %612 = arith.addf %571, %611 : vector<1x128xf32>
    %613 = arith.mulf %609, %609 : vector<9x128xf32>
    %cst_396 = arith.constant dense<0.000000e+00> : vector<128xf32>
    %614 = vector.multi_reduction <add>, %613, %cst_396 [0] : vector<9x128xf32> to vector<128xf32>
    %615 = vector.shape_cast %614 : vector<128xf32> to vector<1x128xf32>
    %616 = arith.addf %575, %615 : vector<1x128xf32>
    %c1_397 = arith.constant 1 : index
    %c5_398 = arith.constant 5 : index
    %c0_399 = arith.constant 0 : index
    %c0_400 = arith.constant 0 : index
    %617 = vector.load %arg6[%c1_397, %c5_398, %c0_399, %c0_400] : memref<2x9x9x128xf32, #tpu.memory_space<vmem>>, vector<1x1x9x128xf32>
    %618 = vector.shape_cast %617 : vector<1x1x9x128xf32> to vector<9x128xf32>
    %619 = vector.shape_cast %609 : vector<9x128xf32> to vector<1x1x9x128xf32>
    tpu.vector_store %arg6[%c1_397, %c5_398, %c0_399, %c0_400], %619 {strides = array<i32>} : memref<2x9x9x128xf32, #tpu.memory_space<vmem>>, vector<1x1x9x128xf32>,
    %cst_401 = arith.constant 0.000000e+00 : f32
    %620 = vector.broadcast %cst_401 : f32 to vector<9x128xf32>
    %c1_402 = arith.constant 1 : index
    %c6_403 = arith.constant 6 : index
    %c0_404 = arith.constant 0 : index
    %c0_405 = arith.constant 0 : index
    %621 = vector.load %arg1[%c1_402, %c6_403, %c0_404, %c0_405] : memref<2x10x10x128xf32, #tpu.memory_space<vmem>>, vector<1x1x9x128xf32>
    %622 = vector.shape_cast %621 : vector<1x1x9x128xf32> to vector<9x128xf32>
    %623 = arith.truncf %622 : vector<9x128xf32> to vector<9x128xbf16>
    %624 = vector.extract_strided_slice %1 {offsets = [0, 0, 0], sizes = [1, 128, 128], strides = [1, 1, 1]} : vector<4x128x128xbf16> to vector<1x128x128xbf16>
    %625 = vector.shape_cast %624 : vector<1x128x128xbf16> to vector<128x128xbf16>
    %cst_406 = arith.constant dense<0.000000e+00> : vector<9x128xf32>
    %626 = tpu.matmul %623, %625, %cst_406 {dimension_numbers = #tpu.dot_dimension_numbers<[1], [0], [0], [1], [0, 0, 1, 1], [], []>} : vector<9x128xbf16>, vector<128x128xbf16>, vector<9x128xf32> -> vector<9x128xf32>
    %627 = arith.addf %620, %626 : vector<9x128xf32>
    %c1_407 = arith.constant 1 : index
    %c6_408 = arith.constant 6 : index
    %c1_409 = arith.constant 1 : index
    %c0_410 = arith.constant 0 : index
    %628 = vector.load %arg1[%c1_407, %c6_408, %c1_409, %c0_410] : memref<2x10x10x128xf32, #tpu.memory_space<vmem>>, vector<1x1x9x128xf32>
    %629 = vector.shape_cast %628 : vector<1x1x9x128xf32> to vector<9x128xf32>
    %630 = arith.truncf %629 : vector<9x128xf32> to vector<9x128xbf16>
    %631 = vector.extract_strided_slice %1 {offsets = [1, 0, 0], sizes = [1, 128, 128], strides = [1, 1, 1]} : vector<4x128x128xbf16> to vector<1x128x128xbf16>
    %632 = vector.shape_cast %631 : vector<1x128x128xbf16> to vector<128x128xbf16>
    %cst_411 = arith.constant dense<0.000000e+00> : vector<9x128xf32>
    %633 = tpu.matmul %630, %632, %cst_411 {dimension_numbers = #tpu.dot_dimension_numbers<[1], [0], [0], [1], [0, 0, 1, 1], [], []>} : vector<9x128xbf16>, vector<128x128xbf16>, vector<9x128xf32> -> vector<9x128xf32>
    %634 = arith.addf %627, %633 : vector<9x128xf32>
    %c1_412 = arith.constant 1 : index
    %c7_413 = arith.constant 7 : index
    %c0_414 = arith.constant 0 : index
    %c0_415 = arith.constant 0 : index
    %635 = vector.load %arg1[%c1_412, %c7_413, %c0_414, %c0_415] : memref<2x10x10x128xf32, #tpu.memory_space<vmem>>, vector<1x1x9x128xf32>
    %636 = vector.shape_cast %635 : vector<1x1x9x128xf32> to vector<9x128xf32>
    %637 = arith.truncf %636 : vector<9x128xf32> to vector<9x128xbf16>
    %638 = vector.extract_strided_slice %1 {offsets = [2, 0, 0], sizes = [1, 128, 128], strides = [1, 1, 1]} : vector<4x128x128xbf16> to vector<1x128x128xbf16>
    %639 = vector.shape_cast %638 : vector<1x128x128xbf16> to vector<128x128xbf16>
    %cst_416 = arith.constant dense<0.000000e+00> : vector<9x128xf32>
    %640 = tpu.matmul %637, %639, %cst_416 {dimension_numbers = #tpu.dot_dimension_numbers<[1], [0], [0], [1], [0, 0, 1, 1], [], []>} : vector<9x128xbf16>, vector<128x128xbf16>, vector<9x128xf32> -> vector<9x128xf32>
    %641 = arith.addf %634, %640 : vector<9x128xf32>
    %c1_417 = arith.constant 1 : index
    %c7_418 = arith.constant 7 : index
    %c1_419 = arith.constant 1 : index
    %c0_420 = arith.constant 0 : index
    %642 = vector.load %arg1[%c1_417, %c7_418, %c1_419, %c0_420] : memref<2x10x10x128xf32, #tpu.memory_space<vmem>>, vector<1x1x9x128xf32>
    %643 = vector.shape_cast %642 : vector<1x1x9x128xf32> to vector<9x128xf32>
    %644 = arith.truncf %643 : vector<9x128xf32> to vector<9x128xbf16>
    %645 = vector.extract_strided_slice %1 {offsets = [3, 0, 0], sizes = [1, 128, 128], strides = [1, 1, 1]} : vector<4x128x128xbf16> to vector<1x128x128xbf16>
    %646 = vector.shape_cast %645 : vector<1x128x128xbf16> to vector<128x128xbf16>
    %cst_421 = arith.constant dense<0.000000e+00> : vector<9x128xf32>
    %647 = tpu.matmul %644, %646, %cst_421 {dimension_numbers = #tpu.dot_dimension_numbers<[1], [0], [0], [1], [0, 0, 1, 1], [], []>} : vector<9x128xbf16>, vector<128x128xbf16>, vector<9x128xf32> -> vector<9x128xf32>
    %648 = arith.addf %641, %647 : vector<9x128xf32>
    %649 = vector.broadcast %2 : vector<1x128xf32> to vector<9x128xf32>
    %650 = arith.addf %648, %649 : vector<9x128xf32>
    %cst_422 = arith.constant dense<0.000000e+00> : vector<128xf32>
    %651 = vector.multi_reduction <add>, %650, %cst_422 [0] : vector<9x128xf32> to vector<128xf32>
    %652 = vector.shape_cast %651 : vector<128xf32> to vector<1x128xf32>
    %653 = arith.addf %612, %652 : vector<1x128xf32>
    %654 = arith.mulf %650, %650 : vector<9x128xf32>
    %cst_423 = arith.constant dense<0.000000e+00> : vector<128xf32>
    %655 = vector.multi_reduction <add>, %654, %cst_423 [0] : vector<9x128xf32> to vector<128xf32>
    %656 = vector.shape_cast %655 : vector<128xf32> to vector<1x128xf32>
    %657 = arith.addf %616, %656 : vector<1x128xf32>
    %c1_424 = arith.constant 1 : index
    %c6_425 = arith.constant 6 : index
    %c0_426 = arith.constant 0 : index
    %c0_427 = arith.constant 0 : index
    %658 = vector.load %arg6[%c1_424, %c6_425, %c0_426, %c0_427] : memref<2x9x9x128xf32, #tpu.memory_space<vmem>>, vector<1x1x9x128xf32>
    %659 = vector.shape_cast %658 : vector<1x1x9x128xf32> to vector<9x128xf32>
    %660 = vector.shape_cast %650 : vector<9x128xf32> to vector<1x1x9x128xf32>
    tpu.vector_store %arg6[%c1_424, %c6_425, %c0_426, %c0_427], %660 {strides = array<i32>} : memref<2x9x9x128xf32, #tpu.memory_space<vmem>>, vector<1x1x9x128xf32>,
    %cst_428 = arith.constant 0.000000e+00 : f32
    %661 = vector.broadcast %cst_428 : f32 to vector<9x128xf32>
    %c1_429 = arith.constant 1 : index
    %c7_430 = arith.constant 7 : index
    %c0_431 = arith.constant 0 : index
    %c0_432 = arith.constant 0 : index
    %662 = vector.load %arg1[%c1_429, %c7_430, %c0_431, %c0_432] : memref<2x10x10x128xf32, #tpu.memory_space<vmem>>, vector<1x1x9x128xf32>
    %663 = vector.shape_cast %662 : vector<1x1x9x128xf32> to vector<9x128xf32>
    %664 = arith.truncf %663 : vector<9x128xf32> to vector<9x128xbf16>
    %665 = vector.extract_strided_slice %1 {offsets = [0, 0, 0], sizes = [1, 128, 128], strides = [1, 1, 1]} : vector<4x128x128xbf16> to vector<1x128x128xbf16>
    %666 = vector.shape_cast %665 : vector<1x128x128xbf16> to vector<128x128xbf16>
    %cst_433 = arith.constant dense<0.000000e+00> : vector<9x128xf32>
    %667 = tpu.matmul %664, %666, %cst_433 {dimension_numbers = #tpu.dot_dimension_numbers<[1], [0], [0], [1], [0, 0, 1, 1], [], []>} : vector<9x128xbf16>, vector<128x128xbf16>, vector<9x128xf32> -> vector<9x128xf32>
    %668 = arith.addf %661, %667 : vector<9x128xf32>
    %c1_434 = arith.constant 1 : index
    %c7_435 = arith.constant 7 : index
    %c1_436 = arith.constant 1 : index
    %c0_437 = arith.constant 0 : index
    %669 = vector.load %arg1[%c1_434, %c7_435, %c1_436, %c0_437] : memref<2x10x10x128xf32, #tpu.memory_space<vmem>>, vector<1x1x9x128xf32>
    %670 = vector.shape_cast %669 : vector<1x1x9x128xf32> to vector<9x128xf32>
    %671 = arith.truncf %670 : vector<9x128xf32> to vector<9x128xbf16>
    %672 = vector.extract_strided_slice %1 {offsets = [1, 0, 0], sizes = [1, 128, 128], strides = [1, 1, 1]} : vector<4x128x128xbf16> to vector<1x128x128xbf16>
    %673 = vector.shape_cast %672 : vector<1x128x128xbf16> to vector<128x128xbf16>
    %cst_438 = arith.constant dense<0.000000e+00> : vector<9x128xf32>
    %674 = tpu.matmul %671, %673, %cst_438 {dimension_numbers = #tpu.dot_dimension_numbers<[1], [0], [0], [1], [0, 0, 1, 1], [], []>} : vector<9x128xbf16>, vector<128x128xbf16>, vector<9x128xf32> -> vector<9x128xf32>
    %675 = arith.addf %668, %674 : vector<9x128xf32>
    %c1_439 = arith.constant 1 : index
    %c8_440 = arith.constant 8 : index
    %c0_441 = arith.constant 0 : index
    %c0_442 = arith.constant 0 : index
    %676 = vector.load %arg1[%c1_439, %c8_440, %c0_441, %c0_442] : memref<2x10x10x128xf32, #tpu.memory_space<vmem>>, vector<1x1x9x128xf32>
    %677 = vector.shape_cast %676 : vector<1x1x9x128xf32> to vector<9x128xf32>
    %678 = arith.truncf %677 : vector<9x128xf32> to vector<9x128xbf16>
    %679 = vector.extract_strided_slice %1 {offsets = [2, 0, 0], sizes = [1, 128, 128], strides = [1, 1, 1]} : vector<4x128x128xbf16> to vector<1x128x128xbf16>
    %680 = vector.shape_cast %679 : vector<1x128x128xbf16> to vector<128x128xbf16>
    %cst_443 = arith.constant dense<0.000000e+00> : vector<9x128xf32>
    %681 = tpu.matmul %678, %680, %cst_443 {dimension_numbers = #tpu.dot_dimension_numbers<[1], [0], [0], [1], [0, 0, 1, 1], [], []>} : vector<9x128xbf16>, vector<128x128xbf16>, vector<9x128xf32> -> vector<9x128xf32>
    %682 = arith.addf %675, %681 : vector<9x128xf32>
    %c1_444 = arith.constant 1 : index
    %c8_445 = arith.constant 8 : index
    %c1_446 = arith.constant 1 : index
    %c0_447 = arith.constant 0 : index
    %683 = vector.load %arg1[%c1_444, %c8_445, %c1_446, %c0_447] : memref<2x10x10x128xf32, #tpu.memory_space<vmem>>, vector<1x1x9x128xf32>
    %684 = vector.shape_cast %683 : vector<1x1x9x128xf32> to vector<9x128xf32>
    %685 = arith.truncf %684 : vector<9x128xf32> to vector<9x128xbf16>
    %686 = vector.extract_strided_slice %1 {offsets = [3, 0, 0], sizes = [1, 128, 128], strides = [1, 1, 1]} : vector<4x128x128xbf16> to vector<1x128x128xbf16>
    %687 = vector.shape_cast %686 : vector<1x128x128xbf16> to vector<128x128xbf16>
    %cst_448 = arith.constant dense<0.000000e+00> : vector<9x128xf32>
    %688 = tpu.matmul %685, %687, %cst_448 {dimension_numbers = #tpu.dot_dimension_numbers<[1], [0], [0], [1], [0, 0, 1, 1], [], []>} : vector<9x128xbf16>, vector<128x128xbf16>, vector<9x128xf32> -> vector<9x128xf32>
    %689 = arith.addf %682, %688 : vector<9x128xf32>
    %690 = vector.broadcast %2 : vector<1x128xf32> to vector<9x128xf32>
    %691 = arith.addf %689, %690 : vector<9x128xf32>
    %cst_449 = arith.constant dense<0.000000e+00> : vector<128xf32>
    %692 = vector.multi_reduction <add>, %691, %cst_449 [0] : vector<9x128xf32> to vector<128xf32>
    %693 = vector.shape_cast %692 : vector<128xf32> to vector<1x128xf32>
    %694 = arith.addf %653, %693 : vector<1x128xf32>
    %695 = arith.mulf %691, %691 : vector<9x128xf32>
    %cst_450 = arith.constant dense<0.000000e+00> : vector<128xf32>
    %696 = vector.multi_reduction <add>, %695, %cst_450 [0] : vector<9x128xf32> to vector<128xf32>
    %697 = vector.shape_cast %696 : vector<128xf32> to vector<1x128xf32>
    %698 = arith.addf %657, %697 : vector<1x128xf32>
    %c1_451 = arith.constant 1 : index
    %c7_452 = arith.constant 7 : index
    %c0_453 = arith.constant 0 : index
    %c0_454 = arith.constant 0 : index
    %699 = vector.load %arg6[%c1_451, %c7_452, %c0_453, %c0_454] : memref<2x9x9x128xf32, #tpu.memory_space<vmem>>, vector<1x1x9x128xf32>
    %700 = vector.shape_cast %699 : vector<1x1x9x128xf32> to vector<9x128xf32>
    %701 = vector.shape_cast %691 : vector<9x128xf32> to vector<1x1x9x128xf32>
    tpu.vector_store %arg6[%c1_451, %c7_452, %c0_453, %c0_454], %701 {strides = array<i32>} : memref<2x9x9x128xf32, #tpu.memory_space<vmem>>, vector<1x1x9x128xf32>,
    %cst_455 = arith.constant 0.000000e+00 : f32
    %702 = vector.broadcast %cst_455 : f32 to vector<9x128xf32>
    %c1_456 = arith.constant 1 : index
    %c8_457 = arith.constant 8 : index
    %c0_458 = arith.constant 0 : index
    %c0_459 = arith.constant 0 : index
    %703 = vector.load %arg1[%c1_456, %c8_457, %c0_458, %c0_459] : memref<2x10x10x128xf32, #tpu.memory_space<vmem>>, vector<1x1x9x128xf32>
    %704 = vector.shape_cast %703 : vector<1x1x9x128xf32> to vector<9x128xf32>
    %705 = arith.truncf %704 : vector<9x128xf32> to vector<9x128xbf16>
    %706 = vector.extract_strided_slice %1 {offsets = [0, 0, 0], sizes = [1, 128, 128], strides = [1, 1, 1]} : vector<4x128x128xbf16> to vector<1x128x128xbf16>
    %707 = vector.shape_cast %706 : vector<1x128x128xbf16> to vector<128x128xbf16>
    %cst_460 = arith.constant dense<0.000000e+00> : vector<9x128xf32>
    %708 = tpu.matmul %705, %707, %cst_460 {dimension_numbers = #tpu.dot_dimension_numbers<[1], [0], [0], [1], [0, 0, 1, 1], [], []>} : vector<9x128xbf16>, vector<128x128xbf16>, vector<9x128xf32> -> vector<9x128xf32>
    %709 = arith.addf %702, %708 : vector<9x128xf32>
    %c1_461 = arith.constant 1 : index
    %c8_462 = arith.constant 8 : index
    %c1_463 = arith.constant 1 : index
    %c0_464 = arith.constant 0 : index
    %710 = vector.load %arg1[%c1_461, %c8_462, %c1_463, %c0_464] : memref<2x10x10x128xf32, #tpu.memory_space<vmem>>, vector<1x1x9x128xf32>
    %711 = vector.shape_cast %710 : vector<1x1x9x128xf32> to vector<9x128xf32>
    %712 = arith.truncf %711 : vector<9x128xf32> to vector<9x128xbf16>
    %713 = vector.extract_strided_slice %1 {offsets = [1, 0, 0], sizes = [1, 128, 128], strides = [1, 1, 1]} : vector<4x128x128xbf16> to vector<1x128x128xbf16>
    %714 = vector.shape_cast %713 : vector<1x128x128xbf16> to vector<128x128xbf16>
    %cst_465 = arith.constant dense<0.000000e+00> : vector<9x128xf32>
    %715 = tpu.matmul %712, %714, %cst_465 {dimension_numbers = #tpu.dot_dimension_numbers<[1], [0], [0], [1], [0, 0, 1, 1], [], []>} : vector<9x128xbf16>, vector<128x128xbf16>, vector<9x128xf32> -> vector<9x128xf32>
    %716 = arith.addf %709, %715 : vector<9x128xf32>
    %c1_466 = arith.constant 1 : index
    %c9_467 = arith.constant 9 : index
    %c0_468 = arith.constant 0 : index
    %c0_469 = arith.constant 0 : index
    %717 = vector.load %arg1[%c1_466, %c9_467, %c0_468, %c0_469] : memref<2x10x10x128xf32, #tpu.memory_space<vmem>>, vector<1x1x9x128xf32>
    %718 = vector.shape_cast %717 : vector<1x1x9x128xf32> to vector<9x128xf32>
    %719 = arith.truncf %718 : vector<9x128xf32> to vector<9x128xbf16>
    %720 = vector.extract_strided_slice %1 {offsets = [2, 0, 0], sizes = [1, 128, 128], strides = [1, 1, 1]} : vector<4x128x128xbf16> to vector<1x128x128xbf16>
    %721 = vector.shape_cast %720 : vector<1x128x128xbf16> to vector<128x128xbf16>
    %cst_470 = arith.constant dense<0.000000e+00> : vector<9x128xf32>
    %722 = tpu.matmul %719, %721, %cst_470 {dimension_numbers = #tpu.dot_dimension_numbers<[1], [0], [0], [1], [0, 0, 1, 1], [], []>} : vector<9x128xbf16>, vector<128x128xbf16>, vector<9x128xf32> -> vector<9x128xf32>
    %723 = arith.addf %716, %722 : vector<9x128xf32>
    %c1_471 = arith.constant 1 : index
    %c9_472 = arith.constant 9 : index
    %c1_473 = arith.constant 1 : index
    %c0_474 = arith.constant 0 : index
    %724 = vector.load %arg1[%c1_471, %c9_472, %c1_473, %c0_474] : memref<2x10x10x128xf32, #tpu.memory_space<vmem>>, vector<1x1x9x128xf32>
    %725 = vector.shape_cast %724 : vector<1x1x9x128xf32> to vector<9x128xf32>
    %726 = arith.truncf %725 : vector<9x128xf32> to vector<9x128xbf16>
    %727 = vector.extract_strided_slice %1 {offsets = [3, 0, 0], sizes = [1, 128, 128], strides = [1, 1, 1]} : vector<4x128x128xbf16> to vector<1x128x128xbf16>
    %728 = vector.shape_cast %727 : vector<1x128x128xbf16> to vector<128x128xbf16>
    %cst_475 = arith.constant dense<0.000000e+00> : vector<9x128xf32>
    %729 = tpu.matmul %726, %728, %cst_475 {dimension_numbers = #tpu.dot_dimension_numbers<[1], [0], [0], [1], [0, 0, 1, 1], [], []>} : vector<9x128xbf16>, vector<128x128xbf16>, vector<9x128xf32> -> vector<9x128xf32>
    %730 = arith.addf %723, %729 : vector<9x128xf32>
    %731 = vector.broadcast %2 : vector<1x128xf32> to vector<9x128xf32>
    %732 = arith.addf %730, %731 : vector<9x128xf32>
    %cst_476 = arith.constant dense<0.000000e+00> : vector<128xf32>
    %733 = vector.multi_reduction <add>, %732, %cst_476 [0] : vector<9x128xf32> to vector<128xf32>
    %734 = vector.shape_cast %733 : vector<128xf32> to vector<1x128xf32>
    %735 = arith.addf %694, %734 : vector<1x128xf32>
    %736 = arith.mulf %732, %732 : vector<9x128xf32>
    %cst_477 = arith.constant dense<0.000000e+00> : vector<128xf32>
    %737 = vector.multi_reduction <add>, %736, %cst_477 [0] : vector<9x128xf32> to vector<128xf32>
    %738 = vector.shape_cast %737 : vector<128xf32> to vector<1x128xf32>
    %739 = arith.addf %698, %738 : vector<1x128xf32>
    %c1_478 = arith.constant 1 : index
    %c8_479 = arith.constant 8 : index
    %c0_480 = arith.constant 0 : index
    %c0_481 = arith.constant 0 : index
    %740 = vector.load %arg6[%c1_478, %c8_479, %c0_480, %c0_481] : memref<2x9x9x128xf32, #tpu.memory_space<vmem>>, vector<1x1x9x128xf32>
    %741 = vector.shape_cast %740 : vector<1x1x9x128xf32> to vector<9x128xf32>
    %742 = vector.shape_cast %732 : vector<9x128xf32> to vector<1x1x9x128xf32>
    tpu.vector_store %arg6[%c1_478, %c8_479, %c0_480, %c0_481], %742 {strides = array<i32>} : memref<2x9x9x128xf32, #tpu.memory_space<vmem>>, vector<1x1x9x128xf32>,
    %cst_482 = arith.constant 0.00617283955 : f32
    %743 = vector.broadcast %cst_482 : f32 to vector<1x128xf32>
    %744 = arith.mulf %735, %743 : vector<1x128xf32>
    %cst_483 = arith.constant 0.00617283955 : f32
    %745 = vector.broadcast %cst_483 : f32 to vector<1x128xf32>
    %746 = arith.mulf %739, %745 : vector<1x128xf32>
    %747 = arith.mulf %744, %744 : vector<1x128xf32>
    %748 = arith.subf %746, %747 : vector<1x128xf32>
    %c0_484 = arith.constant 0 : index
    %c0_485 = arith.constant 0 : index
    %749 = vector.load %arg4[%c0_484, %c0_485] : memref<1x128xf32, #tpu.memory_space<vmem>>, vector<1x128xf32>
    %cst_486 = arith.constant 9.99999974E-6 : f32
    %750 = vector.broadcast %cst_486 : f32 to vector<1x128xf32>
    %751 = arith.addf %748, %750 : vector<1x128xf32>
    %752 = math.rsqrt %751 : vector<1x128xf32>
    %753 = arith.mulf %749, %752 : vector<1x128xf32>
    %c0_487 = arith.constant 0 : index
    %c0_488 = arith.constant 0 : index
    %754 = vector.load %arg5[%c0_487, %c0_488] : memref<1x128xf32, #tpu.memory_space<vmem>>, vector<1x128xf32>
    %755 = arith.mulf %744, %753 : vector<1x128xf32>
    %756 = arith.subf %754, %755 : vector<1x128xf32>
    %c0_489 = arith.constant 0 : index
    %c0_490 = arith.constant 0 : index
    %c0_491 = arith.constant 0 : index
    %c0_492 = arith.constant 0 : index
    %757 = vector.load %arg6[%c0_489, %c0_490, %c0_491, %c0_492] : memref<2x9x9x128xf32, #tpu.memory_space<vmem>>, vector<1x1x9x128xf32>
    %758 = vector.shape_cast %757 : vector<1x1x9x128xf32> to vector<9x128xf32>
    %759 = vector.broadcast %753 : vector<1x128xf32> to vector<9x128xf32>
    %760 = arith.mulf %758, %759 : vector<9x128xf32>
    %761 = vector.broadcast %756 : vector<1x128xf32> to vector<9x128xf32>
    %762 = arith.addf %760, %761 : vector<9x128xf32>
    %cst_493 = arith.constant 0.000000e+00 : f32
    %763 = vector.broadcast %cst_493 : f32 to vector<9x128xf32>
    %764 = arith.cmpf ogt, %762, %763 : vector<9x128xf32>
    %cst_494 = arith.constant 2.000000e-01 : f32
    %765 = vector.broadcast %cst_494 : f32 to vector<9x128xf32>
    %766 = arith.mulf %765, %762 : vector<9x128xf32>
    %767 = arith.select %764, %762, %766 : vector<9x128xi1>, vector<9x128xf32>
    %c0_495 = arith.constant 0 : index
    %c0_496 = arith.constant 0 : index
    %c0_497 = arith.constant 0 : index
    %c0_498 = arith.constant 0 : index
    %768 = vector.load %arg6[%c0_495, %c0_496, %c0_497, %c0_498] : memref<2x9x9x128xf32, #tpu.memory_space<vmem>>, vector<1x1x9x128xf32>
    %769 = vector.shape_cast %768 : vector<1x1x9x128xf32> to vector<9x128xf32>
    %770 = vector.shape_cast %767 : vector<9x128xf32> to vector<1x1x9x128xf32>
    tpu.vector_store %arg6[%c0_495, %c0_496, %c0_497, %c0_498], %770 {strides = array<i32>} : memref<2x9x9x128xf32, #tpu.memory_space<vmem>>, vector<1x1x9x128xf32>,
    %c0_499 = arith.constant 0 : index
    %c1_500 = arith.constant 1 : index
    %c0_501 = arith.constant 0 : index
    %c0_502 = arith.constant 0 : index
    %771 = vector.load %arg6[%c0_499, %c1_500, %c0_501, %c0_502] : memref<2x9x9x128xf32, #tpu.memory_space<vmem>>, vector<1x1x9x128xf32>
    %772 = vector.shape_cast %771 : vector<1x1x9x128xf32> to vector<9x128xf32>
    %773 = vector.broadcast %753 : vector<1x128xf32> to vector<9x128xf32>
    %774 = arith.mulf %772, %773 : vector<9x128xf32>
    %775 = vector.broadcast %756 : vector<1x128xf32> to vector<9x128xf32>
    %776 = arith.addf %774, %775 : vector<9x128xf32>
    %cst_503 = arith.constant 0.000000e+00 : f32
    %777 = vector.broadcast %cst_503 : f32 to vector<9x128xf32>
    %778 = arith.cmpf ogt, %776, %777 : vector<9x128xf32>
    %cst_504 = arith.constant 2.000000e-01 : f32
    %779 = vector.broadcast %cst_504 : f32 to vector<9x128xf32>
    %780 = arith.mulf %779, %776 : vector<9x128xf32>
    %781 = arith.select %778, %776, %780 : vector<9x128xi1>, vector<9x128xf32>
    %c0_505 = arith.constant 0 : index
    %c1_506 = arith.constant 1 : index
    %c0_507 = arith.constant 0 : index
    %c0_508 = arith.constant 0 : index
    %782 = vector.load %arg6[%c0_505, %c1_506, %c0_507, %c0_508] : memref<2x9x9x128xf32, #tpu.memory_space<vmem>>, vector<1x1x9x128xf32>
    %783 = vector.shape_cast %782 : vector<1x1x9x128xf32> to vector<9x128xf32>
    %784 = vector.shape_cast %781 : vector<9x128xf32> to vector<1x1x9x128xf32>
    tpu.vector_store %arg6[%c0_505, %c1_506, %c0_507, %c0_508], %784 {strides = array<i32>} : memref<2x9x9x128xf32, #tpu.memory_space<vmem>>, vector<1x1x9x128xf32>,
    %c0_509 = arith.constant 0 : index
    %c2_510 = arith.constant 2 : index
    %c0_511 = arith.constant 0 : index
    %c0_512 = arith.constant 0 : index
    %785 = vector.load %arg6[%c0_509, %c2_510, %c0_511, %c0_512] : memref<2x9x9x128xf32, #tpu.memory_space<vmem>>, vector<1x1x9x128xf32>
    %786 = vector.shape_cast %785 : vector<1x1x9x128xf32> to vector<9x128xf32>
    %787 = vector.broadcast %753 : vector<1x128xf32> to vector<9x128xf32>
    %788 = arith.mulf %786, %787 : vector<9x128xf32>
    %789 = vector.broadcast %756 : vector<1x128xf32> to vector<9x128xf32>
    %790 = arith.addf %788, %789 : vector<9x128xf32>
    %cst_513 = arith.constant 0.000000e+00 : f32
    %791 = vector.broadcast %cst_513 : f32 to vector<9x128xf32>
    %792 = arith.cmpf ogt, %790, %791 : vector<9x128xf32>
    %cst_514 = arith.constant 2.000000e-01 : f32
    %793 = vector.broadcast %cst_514 : f32 to vector<9x128xf32>
    %794 = arith.mulf %793, %790 : vector<9x128xf32>
    %795 = arith.select %792, %790, %794 : vector<9x128xi1>, vector<9x128xf32>
    %c0_515 = arith.constant 0 : index
    %c2_516 = arith.constant 2 : index
    %c0_517 = arith.constant 0 : index
    %c0_518 = arith.constant 0 : index
    %796 = vector.load %arg6[%c0_515, %c2_516, %c0_517, %c0_518] : memref<2x9x9x128xf32, #tpu.memory_space<vmem>>, vector<1x1x9x128xf32>
    %797 = vector.shape_cast %796 : vector<1x1x9x128xf32> to vector<9x128xf32>
    %798 = vector.shape_cast %795 : vector<9x128xf32> to vector<1x1x9x128xf32>
    tpu.vector_store %arg6[%c0_515, %c2_516, %c0_517, %c0_518], %798 {strides = array<i32>} : memref<2x9x9x128xf32, #tpu.memory_space<vmem>>, vector<1x1x9x128xf32>,
    %c0_519 = arith.constant 0 : index
    %c3_520 = arith.constant 3 : index
    %c0_521 = arith.constant 0 : index
    %c0_522 = arith.constant 0 : index
    %799 = vector.load %arg6[%c0_519, %c3_520, %c0_521, %c0_522] : memref<2x9x9x128xf32, #tpu.memory_space<vmem>>, vector<1x1x9x128xf32>
    %800 = vector.shape_cast %799 : vector<1x1x9x128xf32> to vector<9x128xf32>
    %801 = vector.broadcast %753 : vector<1x128xf32> to vector<9x128xf32>
    %802 = arith.mulf %800, %801 : vector<9x128xf32>
    %803 = vector.broadcast %756 : vector<1x128xf32> to vector<9x128xf32>
    %804 = arith.addf %802, %803 : vector<9x128xf32>
    %cst_523 = arith.constant 0.000000e+00 : f32
    %805 = vector.broadcast %cst_523 : f32 to vector<9x128xf32>
    %806 = arith.cmpf ogt, %804, %805 : vector<9x128xf32>
    %cst_524 = arith.constant 2.000000e-01 : f32
    %807 = vector.broadcast %cst_524 : f32 to vector<9x128xf32>
    %808 = arith.mulf %807, %804 : vector<9x128xf32>
    %809 = arith.select %806, %804, %808 : vector<9x128xi1>, vector<9x128xf32>
    %c0_525 = arith.constant 0 : index
    %c3_526 = arith.constant 3 : index
    %c0_527 = arith.constant 0 : index
    %c0_528 = arith.constant 0 : index
    %810 = vector.load %arg6[%c0_525, %c3_526, %c0_527, %c0_528] : memref<2x9x9x128xf32, #tpu.memory_space<vmem>>, vector<1x1x9x128xf32>
    %811 = vector.shape_cast %810 : vector<1x1x9x128xf32> to vector<9x128xf32>
    %812 = vector.shape_cast %809 : vector<9x128xf32> to vector<1x1x9x128xf32>
    tpu.vector_store %arg6[%c0_525, %c3_526, %c0_527, %c0_528], %812 {strides = array<i32>} : memref<2x9x9x128xf32, #tpu.memory_space<vmem>>, vector<1x1x9x128xf32>,
    %c0_529 = arith.constant 0 : index
    %c4_530 = arith.constant 4 : index
    %c0_531 = arith.constant 0 : index
    %c0_532 = arith.constant 0 : index
    %813 = vector.load %arg6[%c0_529, %c4_530, %c0_531, %c0_532] : memref<2x9x9x128xf32, #tpu.memory_space<vmem>>, vector<1x1x9x128xf32>
    %814 = vector.shape_cast %813 : vector<1x1x9x128xf32> to vector<9x128xf32>
    %815 = vector.broadcast %753 : vector<1x128xf32> to vector<9x128xf32>
    %816 = arith.mulf %814, %815 : vector<9x128xf32>
    %817 = vector.broadcast %756 : vector<1x128xf32> to vector<9x128xf32>
    %818 = arith.addf %816, %817 : vector<9x128xf32>
    %cst_533 = arith.constant 0.000000e+00 : f32
    %819 = vector.broadcast %cst_533 : f32 to vector<9x128xf32>
    %820 = arith.cmpf ogt, %818, %819 : vector<9x128xf32>
    %cst_534 = arith.constant 2.000000e-01 : f32
    %821 = vector.broadcast %cst_534 : f32 to vector<9x128xf32>
    %822 = arith.mulf %821, %818 : vector<9x128xf32>
    %823 = arith.select %820, %818, %822 : vector<9x128xi1>, vector<9x128xf32>
    %c0_535 = arith.constant 0 : index
    %c4_536 = arith.constant 4 : index
    %c0_537 = arith.constant 0 : index
    %c0_538 = arith.constant 0 : index
    %824 = vector.load %arg6[%c0_535, %c4_536, %c0_537, %c0_538] : memref<2x9x9x128xf32, #tpu.memory_space<vmem>>, vector<1x1x9x128xf32>
    %825 = vector.shape_cast %824 : vector<1x1x9x128xf32> to vector<9x128xf32>
    %826 = vector.shape_cast %823 : vector<9x128xf32> to vector<1x1x9x128xf32>
    tpu.vector_store %arg6[%c0_535, %c4_536, %c0_537, %c0_538], %826 {strides = array<i32>} : memref<2x9x9x128xf32, #tpu.memory_space<vmem>>, vector<1x1x9x128xf32>,
    %c0_539 = arith.constant 0 : index
    %c5_540 = arith.constant 5 : index
    %c0_541 = arith.constant 0 : index
    %c0_542 = arith.constant 0 : index
    %827 = vector.load %arg6[%c0_539, %c5_540, %c0_541, %c0_542] : memref<2x9x9x128xf32, #tpu.memory_space<vmem>>, vector<1x1x9x128xf32>
    %828 = vector.shape_cast %827 : vector<1x1x9x128xf32> to vector<9x128xf32>
    %829 = vector.broadcast %753 : vector<1x128xf32> to vector<9x128xf32>
    %830 = arith.mulf %828, %829 : vector<9x128xf32>
    %831 = vector.broadcast %756 : vector<1x128xf32> to vector<9x128xf32>
    %832 = arith.addf %830, %831 : vector<9x128xf32>
    %cst_543 = arith.constant 0.000000e+00 : f32
    %833 = vector.broadcast %cst_543 : f32 to vector<9x128xf32>
    %834 = arith.cmpf ogt, %832, %833 : vector<9x128xf32>
    %cst_544 = arith.constant 2.000000e-01 : f32
    %835 = vector.broadcast %cst_544 : f32 to vector<9x128xf32>
    %836 = arith.mulf %835, %832 : vector<9x128xf32>
    %837 = arith.select %834, %832, %836 : vector<9x128xi1>, vector<9x128xf32>
    %c0_545 = arith.constant 0 : index
    %c5_546 = arith.constant 5 : index
    %c0_547 = arith.constant 0 : index
    %c0_548 = arith.constant 0 : index
    %838 = vector.load %arg6[%c0_545, %c5_546, %c0_547, %c0_548] : memref<2x9x9x128xf32, #tpu.memory_space<vmem>>, vector<1x1x9x128xf32>
    %839 = vector.shape_cast %838 : vector<1x1x9x128xf32> to vector<9x128xf32>
    %840 = vector.shape_cast %837 : vector<9x128xf32> to vector<1x1x9x128xf32>
    tpu.vector_store %arg6[%c0_545, %c5_546, %c0_547, %c0_548], %840 {strides = array<i32>} : memref<2x9x9x128xf32, #tpu.memory_space<vmem>>, vector<1x1x9x128xf32>,
    %c0_549 = arith.constant 0 : index
    %c6_550 = arith.constant 6 : index
    %c0_551 = arith.constant 0 : index
    %c0_552 = arith.constant 0 : index
    %841 = vector.load %arg6[%c0_549, %c6_550, %c0_551, %c0_552] : memref<2x9x9x128xf32, #tpu.memory_space<vmem>>, vector<1x1x9x128xf32>
    %842 = vector.shape_cast %841 : vector<1x1x9x128xf32> to vector<9x128xf32>
    %843 = vector.broadcast %753 : vector<1x128xf32> to vector<9x128xf32>
    %844 = arith.mulf %842, %843 : vector<9x128xf32>
    %845 = vector.broadcast %756 : vector<1x128xf32> to vector<9x128xf32>
    %846 = arith.addf %844, %845 : vector<9x128xf32>
    %cst_553 = arith.constant 0.000000e+00 : f32
    %847 = vector.broadcast %cst_553 : f32 to vector<9x128xf32>
    %848 = arith.cmpf ogt, %846, %847 : vector<9x128xf32>
    %cst_554 = arith.constant 2.000000e-01 : f32
    %849 = vector.broadcast %cst_554 : f32 to vector<9x128xf32>
    %850 = arith.mulf %849, %846 : vector<9x128xf32>
    %851 = arith.select %848, %846, %850 : vector<9x128xi1>, vector<9x128xf32>
    %c0_555 = arith.constant 0 : index
    %c6_556 = arith.constant 6 : index
    %c0_557 = arith.constant 0 : index
    %c0_558 = arith.constant 0 : index
    %852 = vector.load %arg6[%c0_555, %c6_556, %c0_557, %c0_558] : memref<2x9x9x128xf32, #tpu.memory_space<vmem>>, vector<1x1x9x128xf32>
    %853 = vector.shape_cast %852 : vector<1x1x9x128xf32> to vector<9x128xf32>
    %854 = vector.shape_cast %851 : vector<9x128xf32> to vector<1x1x9x128xf32>
    tpu.vector_store %arg6[%c0_555, %c6_556, %c0_557, %c0_558], %854 {strides = array<i32>} : memref<2x9x9x128xf32, #tpu.memory_space<vmem>>, vector<1x1x9x128xf32>,
    %c0_559 = arith.constant 0 : index
    %c7_560 = arith.constant 7 : index
    %c0_561 = arith.constant 0 : index
    %c0_562 = arith.constant 0 : index
    %855 = vector.load %arg6[%c0_559, %c7_560, %c0_561, %c0_562] : memref<2x9x9x128xf32, #tpu.memory_space<vmem>>, vector<1x1x9x128xf32>
    %856 = vector.shape_cast %855 : vector<1x1x9x128xf32> to vector<9x128xf32>
    %857 = vector.broadcast %753 : vector<1x128xf32> to vector<9x128xf32>
    %858 = arith.mulf %856, %857 : vector<9x128xf32>
    %859 = vector.broadcast %756 : vector<1x128xf32> to vector<9x128xf32>
    %860 = arith.addf %858, %859 : vector<9x128xf32>
    %cst_563 = arith.constant 0.000000e+00 : f32
    %861 = vector.broadcast %cst_563 : f32 to vector<9x128xf32>
    %862 = arith.cmpf ogt, %860, %861 : vector<9x128xf32>
    %cst_564 = arith.constant 2.000000e-01 : f32
    %863 = vector.broadcast %cst_564 : f32 to vector<9x128xf32>
    %864 = arith.mulf %863, %860 : vector<9x128xf32>
    %865 = arith.select %862, %860, %864 : vector<9x128xi1>, vector<9x128xf32>
    %c0_565 = arith.constant 0 : index
    %c7_566 = arith.constant 7 : index
    %c0_567 = arith.constant 0 : index
    %c0_568 = arith.constant 0 : index
    %866 = vector.load %arg6[%c0_565, %c7_566, %c0_567, %c0_568] : memref<2x9x9x128xf32, #tpu.memory_space<vmem>>, vector<1x1x9x128xf32>
    %867 = vector.shape_cast %866 : vector<1x1x9x128xf32> to vector<9x128xf32>
    %868 = vector.shape_cast %865 : vector<9x128xf32> to vector<1x1x9x128xf32>
    tpu.vector_store %arg6[%c0_565, %c7_566, %c0_567, %c0_568], %868 {strides = array<i32>} : memref<2x9x9x128xf32, #tpu.memory_space<vmem>>, vector<1x1x9x128xf32>,
    %c0_569 = arith.constant 0 : index
    %c8_570 = arith.constant 8 : index
    %c0_571 = arith.constant 0 : index
    %c0_572 = arith.constant 0 : index
    %869 = vector.load %arg6[%c0_569, %c8_570, %c0_571, %c0_572] : memref<2x9x9x128xf32, #tpu.memory_space<vmem>>, vector<1x1x9x128xf32>
    %870 = vector.shape_cast %869 : vector<1x1x9x128xf32> to vector<9x128xf32>
    %871 = vector.broadcast %753 : vector<1x128xf32> to vector<9x128xf32>
    %872 = arith.mulf %870, %871 : vector<9x128xf32>
    %873 = vector.broadcast %756 : vector<1x128xf32> to vector<9x128xf32>
    %874 = arith.addf %872, %873 : vector<9x128xf32>
    %cst_573 = arith.constant 0.000000e+00 : f32
    %875 = vector.broadcast %cst_573 : f32 to vector<9x128xf32>
    %876 = arith.cmpf ogt, %874, %875 : vector<9x128xf32>
    %cst_574 = arith.constant 2.000000e-01 : f32
    %877 = vector.broadcast %cst_574 : f32 to vector<9x128xf32>
    %878 = arith.mulf %877, %874 : vector<9x128xf32>
    %879 = arith.select %876, %874, %878 : vector<9x128xi1>, vector<9x128xf32>
    %c0_575 = arith.constant 0 : index
    %c8_576 = arith.constant 8 : index
    %c0_577 = arith.constant 0 : index
    %c0_578 = arith.constant 0 : index
    %880 = vector.load %arg6[%c0_575, %c8_576, %c0_577, %c0_578] : memref<2x9x9x128xf32, #tpu.memory_space<vmem>>, vector<1x1x9x128xf32>
    %881 = vector.shape_cast %880 : vector<1x1x9x128xf32> to vector<9x128xf32>
    %882 = vector.shape_cast %879 : vector<9x128xf32> to vector<1x1x9x128xf32>
    tpu.vector_store %arg6[%c0_575, %c8_576, %c0_577, %c0_578], %882 {strides = array<i32>} : memref<2x9x9x128xf32, #tpu.memory_space<vmem>>, vector<1x1x9x128xf32>,
    %c1_579 = arith.constant 1 : index
    %c0_580 = arith.constant 0 : index
    %c0_581 = arith.constant 0 : index
    %c0_582 = arith.constant 0 : index
    %883 = vector.load %arg6[%c1_579, %c0_580, %c0_581, %c0_582] : memref<2x9x9x128xf32, #tpu.memory_space<vmem>>, vector<1x1x9x128xf32>
    %884 = vector.shape_cast %883 : vector<1x1x9x128xf32> to vector<9x128xf32>
    %885 = vector.broadcast %753 : vector<1x128xf32> to vector<9x128xf32>
    %886 = arith.mulf %884, %885 : vector<9x128xf32>
    %887 = vector.broadcast %756 : vector<1x128xf32> to vector<9x128xf32>
    %888 = arith.addf %886, %887 : vector<9x128xf32>
    %cst_583 = arith.constant 0.000000e+00 : f32
    %889 = vector.broadcast %cst_583 : f32 to vector<9x128xf32>
    %890 = arith.cmpf ogt, %888, %889 : vector<9x128xf32>
    %cst_584 = arith.constant 2.000000e-01 : f32
    %891 = vector.broadcast %cst_584 : f32 to vector<9x128xf32>
    %892 = arith.mulf %891, %888 : vector<9x128xf32>
    %893 = arith.select %890, %888, %892 : vector<9x128xi1>, vector<9x128xf32>
    %c1_585 = arith.constant 1 : index
    %c0_586 = arith.constant 0 : index
    %c0_587 = arith.constant 0 : index
    %c0_588 = arith.constant 0 : index
    %894 = vector.load %arg6[%c1_585, %c0_586, %c0_587, %c0_588] : memref<2x9x9x128xf32, #tpu.memory_space<vmem>>, vector<1x1x9x128xf32>
    %895 = vector.shape_cast %894 : vector<1x1x9x128xf32> to vector<9x128xf32>
    %896 = vector.shape_cast %893 : vector<9x128xf32> to vector<1x1x9x128xf32>
    tpu.vector_store %arg6[%c1_585, %c0_586, %c0_587, %c0_588], %896 {strides = array<i32>} : memref<2x9x9x128xf32, #tpu.memory_space<vmem>>, vector<1x1x9x128xf32>,
    %c1_589 = arith.constant 1 : index
    %c1_590 = arith.constant 1 : index
    %c0_591 = arith.constant 0 : index
    %c0_592 = arith.constant 0 : index
    %897 = vector.load %arg6[%c1_589, %c1_590, %c0_591, %c0_592] : memref<2x9x9x128xf32, #tpu.memory_space<vmem>>, vector<1x1x9x128xf32>
    %898 = vector.shape_cast %897 : vector<1x1x9x128xf32> to vector<9x128xf32>
    %899 = vector.broadcast %753 : vector<1x128xf32> to vector<9x128xf32>
    %900 = arith.mulf %898, %899 : vector<9x128xf32>
    %901 = vector.broadcast %756 : vector<1x128xf32> to vector<9x128xf32>
    %902 = arith.addf %900, %901 : vector<9x128xf32>
    %cst_593 = arith.constant 0.000000e+00 : f32
    %903 = vector.broadcast %cst_593 : f32 to vector<9x128xf32>
    %904 = arith.cmpf ogt, %902, %903 : vector<9x128xf32>
    %cst_594 = arith.constant 2.000000e-01 : f32
    %905 = vector.broadcast %cst_594 : f32 to vector<9x128xf32>
    %906 = arith.mulf %905, %902 : vector<9x128xf32>
    %907 = arith.select %904, %902, %906 : vector<9x128xi1>, vector<9x128xf32>
    %c1_595 = arith.constant 1 : index
    %c1_596 = arith.constant 1 : index
    %c0_597 = arith.constant 0 : index
    %c0_598 = arith.constant 0 : index
    %908 = vector.load %arg6[%c1_595, %c1_596, %c0_597, %c0_598] : memref<2x9x9x128xf32, #tpu.memory_space<vmem>>, vector<1x1x9x128xf32>
    %909 = vector.shape_cast %908 : vector<1x1x9x128xf32> to vector<9x128xf32>
    %910 = vector.shape_cast %907 : vector<9x128xf32> to vector<1x1x9x128xf32>
    tpu.vector_store %arg6[%c1_595, %c1_596, %c0_597, %c0_598], %910 {strides = array<i32>} : memref<2x9x9x128xf32, #tpu.memory_space<vmem>>, vector<1x1x9x128xf32>,
    %c1_599 = arith.constant 1 : index
    %c2_600 = arith.constant 2 : index
    %c0_601 = arith.constant 0 : index
    %c0_602 = arith.constant 0 : index
    %911 = vector.load %arg6[%c1_599, %c2_600, %c0_601, %c0_602] : memref<2x9x9x128xf32, #tpu.memory_space<vmem>>, vector<1x1x9x128xf32>
    %912 = vector.shape_cast %911 : vector<1x1x9x128xf32> to vector<9x128xf32>
    %913 = vector.broadcast %753 : vector<1x128xf32> to vector<9x128xf32>
    %914 = arith.mulf %912, %913 : vector<9x128xf32>
    %915 = vector.broadcast %756 : vector<1x128xf32> to vector<9x128xf32>
    %916 = arith.addf %914, %915 : vector<9x128xf32>
    %cst_603 = arith.constant 0.000000e+00 : f32
    %917 = vector.broadcast %cst_603 : f32 to vector<9x128xf32>
    %918 = arith.cmpf ogt, %916, %917 : vector<9x128xf32>
    %cst_604 = arith.constant 2.000000e-01 : f32
    %919 = vector.broadcast %cst_604 : f32 to vector<9x128xf32>
    %920 = arith.mulf %919, %916 : vector<9x128xf32>
    %921 = arith.select %918, %916, %920 : vector<9x128xi1>, vector<9x128xf32>
    %c1_605 = arith.constant 1 : index
    %c2_606 = arith.constant 2 : index
    %c0_607 = arith.constant 0 : index
    %c0_608 = arith.constant 0 : index
    %922 = vector.load %arg6[%c1_605, %c2_606, %c0_607, %c0_608] : memref<2x9x9x128xf32, #tpu.memory_space<vmem>>, vector<1x1x9x128xf32>
    %923 = vector.shape_cast %922 : vector<1x1x9x128xf32> to vector<9x128xf32>
    %924 = vector.shape_cast %921 : vector<9x128xf32> to vector<1x1x9x128xf32>
    tpu.vector_store %arg6[%c1_605, %c2_606, %c0_607, %c0_608], %924 {strides = array<i32>} : memref<2x9x9x128xf32, #tpu.memory_space<vmem>>, vector<1x1x9x128xf32>,
    %c1_609 = arith.constant 1 : index
    %c3_610 = arith.constant 3 : index
    %c0_611 = arith.constant 0 : index
    %c0_612 = arith.constant 0 : index
    %925 = vector.load %arg6[%c1_609, %c3_610, %c0_611, %c0_612] : memref<2x9x9x128xf32, #tpu.memory_space<vmem>>, vector<1x1x9x128xf32>
    %926 = vector.shape_cast %925 : vector<1x1x9x128xf32> to vector<9x128xf32>
    %927 = vector.broadcast %753 : vector<1x128xf32> to vector<9x128xf32>
    %928 = arith.mulf %926, %927 : vector<9x128xf32>
    %929 = vector.broadcast %756 : vector<1x128xf32> to vector<9x128xf32>
    %930 = arith.addf %928, %929 : vector<9x128xf32>
    %cst_613 = arith.constant 0.000000e+00 : f32
    %931 = vector.broadcast %cst_613 : f32 to vector<9x128xf32>
    %932 = arith.cmpf ogt, %930, %931 : vector<9x128xf32>
    %cst_614 = arith.constant 2.000000e-01 : f32
    %933 = vector.broadcast %cst_614 : f32 to vector<9x128xf32>
    %934 = arith.mulf %933, %930 : vector<9x128xf32>
    %935 = arith.select %932, %930, %934 : vector<9x128xi1>, vector<9x128xf32>
    %c1_615 = arith.constant 1 : index
    %c3_616 = arith.constant 3 : index
    %c0_617 = arith.constant 0 : index
    %c0_618 = arith.constant 0 : index
    %936 = vector.load %arg6[%c1_615, %c3_616, %c0_617, %c0_618] : memref<2x9x9x128xf32, #tpu.memory_space<vmem>>, vector<1x1x9x128xf32>
    %937 = vector.shape_cast %936 : vector<1x1x9x128xf32> to vector<9x128xf32>
    %938 = vector.shape_cast %935 : vector<9x128xf32> to vector<1x1x9x128xf32>
    tpu.vector_store %arg6[%c1_615, %c3_616, %c0_617, %c0_618], %938 {strides = array<i32>} : memref<2x9x9x128xf32, #tpu.memory_space<vmem>>, vector<1x1x9x128xf32>,
    %c1_619 = arith.constant 1 : index
    %c4_620 = arith.constant 4 : index
    %c0_621 = arith.constant 0 : index
    %c0_622 = arith.constant 0 : index
    %939 = vector.load %arg6[%c1_619, %c4_620, %c0_621, %c0_622] : memref<2x9x9x128xf32, #tpu.memory_space<vmem>>, vector<1x1x9x128xf32>
    %940 = vector.shape_cast %939 : vector<1x1x9x128xf32> to vector<9x128xf32>
    %941 = vector.broadcast %753 : vector<1x128xf32> to vector<9x128xf32>
    %942 = arith.mulf %940, %941 : vector<9x128xf32>
    %943 = vector.broadcast %756 : vector<1x128xf32> to vector<9x128xf32>
    %944 = arith.addf %942, %943 : vector<9x128xf32>
    %cst_623 = arith.constant 0.000000e+00 : f32
    %945 = vector.broadcast %cst_623 : f32 to vector<9x128xf32>
    %946 = arith.cmpf ogt, %944, %945 : vector<9x128xf32>
    %cst_624 = arith.constant 2.000000e-01 : f32
    %947 = vector.broadcast %cst_624 : f32 to vector<9x128xf32>
    %948 = arith.mulf %947, %944 : vector<9x128xf32>
    %949 = arith.select %946, %944, %948 : vector<9x128xi1>, vector<9x128xf32>
    %c1_625 = arith.constant 1 : index
    %c4_626 = arith.constant 4 : index
    %c0_627 = arith.constant 0 : index
    %c0_628 = arith.constant 0 : index
    %950 = vector.load %arg6[%c1_625, %c4_626, %c0_627, %c0_628] : memref<2x9x9x128xf32, #tpu.memory_space<vmem>>, vector<1x1x9x128xf32>
    %951 = vector.shape_cast %950 : vector<1x1x9x128xf32> to vector<9x128xf32>
    %952 = vector.shape_cast %949 : vector<9x128xf32> to vector<1x1x9x128xf32>
    tpu.vector_store %arg6[%c1_625, %c4_626, %c0_627, %c0_628], %952 {strides = array<i32>} : memref<2x9x9x128xf32, #tpu.memory_space<vmem>>, vector<1x1x9x128xf32>,
    %c1_629 = arith.constant 1 : index
    %c5_630 = arith.constant 5 : index
    %c0_631 = arith.constant 0 : index
    %c0_632 = arith.constant 0 : index
    %953 = vector.load %arg6[%c1_629, %c5_630, %c0_631, %c0_632] : memref<2x9x9x128xf32, #tpu.memory_space<vmem>>, vector<1x1x9x128xf32>
    %954 = vector.shape_cast %953 : vector<1x1x9x128xf32> to vector<9x128xf32>
    %955 = vector.broadcast %753 : vector<1x128xf32> to vector<9x128xf32>
    %956 = arith.mulf %954, %955 : vector<9x128xf32>
    %957 = vector.broadcast %756 : vector<1x128xf32> to vector<9x128xf32>
    %958 = arith.addf %956, %957 : vector<9x128xf32>
    %cst_633 = arith.constant 0.000000e+00 : f32
    %959 = vector.broadcast %cst_633 : f32 to vector<9x128xf32>
    %960 = arith.cmpf ogt, %958, %959 : vector<9x128xf32>
    %cst_634 = arith.constant 2.000000e-01 : f32
    %961 = vector.broadcast %cst_634 : f32 to vector<9x128xf32>
    %962 = arith.mulf %961, %958 : vector<9x128xf32>
    %963 = arith.select %960, %958, %962 : vector<9x128xi1>, vector<9x128xf32>
    %c1_635 = arith.constant 1 : index
    %c5_636 = arith.constant 5 : index
    %c0_637 = arith.constant 0 : index
    %c0_638 = arith.constant 0 : index
    %964 = vector.load %arg6[%c1_635, %c5_636, %c0_637, %c0_638] : memref<2x9x9x128xf32, #tpu.memory_space<vmem>>, vector<1x1x9x128xf32>
    %965 = vector.shape_cast %964 : vector<1x1x9x128xf32> to vector<9x128xf32>
    %966 = vector.shape_cast %963 : vector<9x128xf32> to vector<1x1x9x128xf32>
    tpu.vector_store %arg6[%c1_635, %c5_636, %c0_637, %c0_638], %966 {strides = array<i32>} : memref<2x9x9x128xf32, #tpu.memory_space<vmem>>, vector<1x1x9x128xf32>,
    %c1_639 = arith.constant 1 : index
    %c6_640 = arith.constant 6 : index
    %c0_641 = arith.constant 0 : index
    %c0_642 = arith.constant 0 : index
    %967 = vector.load %arg6[%c1_639, %c6_640, %c0_641, %c0_642] : memref<2x9x9x128xf32, #tpu.memory_space<vmem>>, vector<1x1x9x128xf32>
    %968 = vector.shape_cast %967 : vector<1x1x9x128xf32> to vector<9x128xf32>
    %969 = vector.broadcast %753 : vector<1x128xf32> to vector<9x128xf32>
    %970 = arith.mulf %968, %969 : vector<9x128xf32>
    %971 = vector.broadcast %756 : vector<1x128xf32> to vector<9x128xf32>
    %972 = arith.addf %970, %971 : vector<9x128xf32>
    %cst_643 = arith.constant 0.000000e+00 : f32
    %973 = vector.broadcast %cst_643 : f32 to vector<9x128xf32>
    %974 = arith.cmpf ogt, %972, %973 : vector<9x128xf32>
    %cst_644 = arith.constant 2.000000e-01 : f32
    %975 = vector.broadcast %cst_644 : f32 to vector<9x128xf32>
    %976 = arith.mulf %975, %972 : vector<9x128xf32>
    %977 = arith.select %974, %972, %976 : vector<9x128xi1>, vector<9x128xf32>
    %c1_645 = arith.constant 1 : index
    %c6_646 = arith.constant 6 : index
    %c0_647 = arith.constant 0 : index
    %c0_648 = arith.constant 0 : index
    %978 = vector.load %arg6[%c1_645, %c6_646, %c0_647, %c0_648] : memref<2x9x9x128xf32, #tpu.memory_space<vmem>>, vector<1x1x9x128xf32>
    %979 = vector.shape_cast %978 : vector<1x1x9x128xf32> to vector<9x128xf32>
    %980 = vector.shape_cast %977 : vector<9x128xf32> to vector<1x1x9x128xf32>
    tpu.vector_store %arg6[%c1_645, %c6_646, %c0_647, %c0_648], %980 {strides = array<i32>} : memref<2x9x9x128xf32, #tpu.memory_space<vmem>>, vector<1x1x9x128xf32>,
    %c1_649 = arith.constant 1 : index
    %c7_650 = arith.constant 7 : index
    %c0_651 = arith.constant 0 : index
    %c0_652 = arith.constant 0 : index
    %981 = vector.load %arg6[%c1_649, %c7_650, %c0_651, %c0_652] : memref<2x9x9x128xf32, #tpu.memory_space<vmem>>, vector<1x1x9x128xf32>
    %982 = vector.shape_cast %981 : vector<1x1x9x128xf32> to vector<9x128xf32>
    %983 = vector.broadcast %753 : vector<1x128xf32> to vector<9x128xf32>
    %984 = arith.mulf %982, %983 : vector<9x128xf32>
    %985 = vector.broadcast %756 : vector<1x128xf32> to vector<9x128xf32>
    %986 = arith.addf %984, %985 : vector<9x128xf32>
    %cst_653 = arith.constant 0.000000e+00 : f32
    %987 = vector.broadcast %cst_653 : f32 to vector<9x128xf32>
    %988 = arith.cmpf ogt, %986, %987 : vector<9x128xf32>
    %cst_654 = arith.constant 2.000000e-01 : f32
    %989 = vector.broadcast %cst_654 : f32 to vector<9x128xf32>
    %990 = arith.mulf %989, %986 : vector<9x128xf32>
    %991 = arith.select %988, %986, %990 : vector<9x128xi1>, vector<9x128xf32>
    %c1_655 = arith.constant 1 : index
    %c7_656 = arith.constant 7 : index
    %c0_657 = arith.constant 0 : index
    %c0_658 = arith.constant 0 : index
    %992 = vector.load %arg6[%c1_655, %c7_656, %c0_657, %c0_658] : memref<2x9x9x128xf32, #tpu.memory_space<vmem>>, vector<1x1x9x128xf32>
    %993 = vector.shape_cast %992 : vector<1x1x9x128xf32> to vector<9x128xf32>
    %994 = vector.shape_cast %991 : vector<9x128xf32> to vector<1x1x9x128xf32>
    tpu.vector_store %arg6[%c1_655, %c7_656, %c0_657, %c0_658], %994 {strides = array<i32>} : memref<2x9x9x128xf32, #tpu.memory_space<vmem>>, vector<1x1x9x128xf32>,
    %c1_659 = arith.constant 1 : index
    %c8_660 = arith.constant 8 : index
    %c0_661 = arith.constant 0 : index
    %c0_662 = arith.constant 0 : index
    %995 = vector.load %arg6[%c1_659, %c8_660, %c0_661, %c0_662] : memref<2x9x9x128xf32, #tpu.memory_space<vmem>>, vector<1x1x9x128xf32>
    %996 = vector.shape_cast %995 : vector<1x1x9x128xf32> to vector<9x128xf32>
    %997 = vector.broadcast %753 : vector<1x128xf32> to vector<9x128xf32>
    %998 = arith.mulf %996, %997 : vector<9x128xf32>
    %999 = vector.broadcast %756 : vector<1x128xf32> to vector<9x128xf32>
    %1000 = arith.addf %998, %999 : vector<9x128xf32>
    %cst_663 = arith.constant 0.000000e+00 : f32
    %1001 = vector.broadcast %cst_663 : f32 to vector<9x128xf32>
    %1002 = arith.cmpf ogt, %1000, %1001 : vector<9x128xf32>
    %cst_664 = arith.constant 2.000000e-01 : f32
    %1003 = vector.broadcast %cst_664 : f32 to vector<9x128xf32>
    %1004 = arith.mulf %1003, %1000 : vector<9x128xf32>
    %1005 = arith.select %1002, %1000, %1004 : vector<9x128xi1>, vector<9x128xf32>
    %c1_665 = arith.constant 1 : index
    %c8_666 = arith.constant 8 : index
    %c0_667 = arith.constant 0 : index
    %c0_668 = arith.constant 0 : index
    %1006 = vector.load %arg6[%c1_665, %c8_666, %c0_667, %c0_668] : memref<2x9x9x128xf32, #tpu.memory_space<vmem>>, vector<1x1x9x128xf32>
    %1007 = vector.shape_cast %1006 : vector<1x1x9x128xf32> to vector<9x128xf32>
    %1008 = vector.shape_cast %1005 : vector<9x128xf32> to vector<1x1x9x128xf32>
    tpu.vector_store %arg6[%c1_665, %c8_666, %c0_667, %c0_668], %1008 {strides = array<i32>} : memref<2x9x9x128xf32, #tpu.memory_space<vmem>>, vector<1x1x9x128xf32>,
    return
  }
  func.func @transform_0(%arg0: i32) -> (i32, i32, i32, i32) {
    %c0_i32 = arith.constant 0 : i32
    %c0_i32_0 = arith.constant 0 : i32
    %c0_i32_1 = arith.constant 0 : i32
    %c0_i32_2 = arith.constant 0 : i32
    %c0_i32_3 = arith.constant 0 : i32
    return %c0_i32, %c0_i32_0, %c0_i32_1, %c0_i32_2 : i32, i32, i32, i32
  }
  func.func @transform_1(%arg0: i32) -> (i32, i32, i32) {
    %c0_i32 = arith.constant 0 : i32
    %c0_i32_0 = arith.constant 0 : i32
    %c0_i32_1 = arith.constant 0 : i32
    return %c0_i32, %c0_i32_0, %arg0 : i32, i32, i32
  }
  func.func @transform_2(%arg0: i32) -> (i32, i32) {
    %c0_i32 = arith.constant 0 : i32
    %c0_i32_0 = arith.constant 0 : i32
    return %c0_i32, %arg0 : i32, i32
  }
  func.func @transform_3(%arg0: i32) -> (i32, i32) {
    %c0_i32 = arith.constant 0 : i32
    %c0_i32_0 = arith.constant 0 : i32
    return %c0_i32, %arg0 : i32, i32
  }
  func.func @transform_4(%arg0: i32) -> (i32, i32) {
    %c0_i32 = arith.constant 0 : i32
    %c0_i32_0 = arith.constant 0 : i32
    return %c0_i32, %arg0 : i32, i32
  }
  func.func @transform_5(%arg0: i32) -> (i32, i32, i32, i32) {
    %c0_i32 = arith.constant 0 : i32
    %c0_i32_0 = arith.constant 0 : i32
    %c0_i32_1 = arith.constant 0 : i32
    %c0_i32_2 = arith.constant 0 : i32
    return %c0_i32, %c0_i32_0, %c0_i32_1, %arg0 : i32, i32, i32, i32
  }
}

</mosaic_0001>

<bundles_post_ra>
// kernel: tpu_custom_call.1
= control target key start
LH: loop header
LB: loop body
LE: loop exit
PB: predicated region body
PF: predicated region fallthrough
CT: control target
= control target key end

     0   :  { %v6450_v0 = vmov 0.0   ;;  %vm6451_vm0 = vmmov 0   ;;  %vm307_vm1 = vcmask 1040384   ;;  %s9059_s1 = inlined_call_operand.vmem [shape: f32[4,128,128], index: 1, kind: input, shape index: {}]   ;;  %s9060_s0 = inlined_call_operand.vmem [shape: f32[2,10,10,128], index: 0, kind: input, shape index: {}]   ;;  %s9061_s2 = inlined_call_operand.vmem [shape: f32[1,128], index: 2, kind: input, shape index: {}]   ;;  %s9062_s5 = inlined_call_operand.vmem [shape: f32[2,9,9,128], index: 5, kind: output, shape index: {}]   ;;  %s9063_s3 = inlined_call_operand.vmem [shape: f32[1,128], index: 3, kind: input, shape index: {}]   ;;  %s9064_s4 = inlined_call_operand.vmem [shape: f32[1,128], index: 4, kind: input, shape index: {}]  }
   0x1   :  { %5003 = vmatprep.subr.bf16.mxu0 %v6450_v0  ;;  %5023 = vmatprep.subr.bf16.mxu1 %v6450_v0  ;;  %v37_v1 = vld [vmem:[%s9059_s1 + $0x80] sm:$0xff]  ;;  %v38_v2 = vld [vmem:[%s9059_s1 + $0x88] sm:$0xff]  ;;  %v39_v6 = vld [vmem:[%s9059_s1 + $0x90] sm:$0xff] }
   0x2   :  { %v21_v3 = vld [vmem:[%s9059_s1] sm:$0xff]  ;;  %v6493_v4 = vpack.c.bf16 %v38_v2, %v37_v1  ;;  %v22_v5 = vld [vmem:[%s9059_s1 + $0x8] sm:$0xff]  ;;  %v40_v7 = vld [vmem:[%s9059_s1 + $0x98] sm:$0xff]  ;;  %5019 = vmatprep.mubr.msk.bf16.mxu0 %vm6451_vm0, %v6450_v0  ;;  %5039 = vmatprep.mubr.msk.bf16.mxu1 %vm6451_vm0, %v6450_v0 }
   0x3   :  { %v6508_v8 = vpack.c.bf16 %v22_v5, %v21_v3  ;;  %v23_v9 = vld [vmem:[%s9059_s1 + $0x10] sm:$0xff]  ;;  %v24_v10 = vld [vmem:[%s9059_s1 + $0x18] sm:$0xff]  ;;  %v6517_v11 = vpack.c.bf16 %v40_v7, %v39_v6  ;;  %v41_v13 = vld [vmem:[%s9059_s1 + $0xa0] sm:$0xff] }
   0x4   :  { %5004 = vmatpush3.bf16.msra.mxu0 %v6493_v4  ;;  %v6521_v12 = vpack.c.bf16 %v24_v10, %v23_v9  ;;  %v42_v14 = vld [vmem:[%s9059_s1 + $0xa8] sm:$0xff]  ;;  %v25_v15 = vld [vmem:[%s9059_s1 + $0x20] sm:$0xff]  ;;  %v43_v19 = vld [vmem:[%s9059_s1 + $0xb0] sm:$0xff] }
   0x5   :  { %5024 = vmatpush3.bf16.msra.mxu1 %v6508_v8  ;;  %5005 = vmatprep.subr.bf16.mxu0 %v6450_v0  ;;  %v26_v16 = vld [vmem:[%s9059_s1 + $0x28] sm:$0xff]  ;;  %v6537_v17 = vpack.c.bf16 %v42_v14, %v41_v13  ;;  %v44_v20 = vld [vmem:[%s9059_s1 + $0xb8] sm:$0xff]  ;;  %v27_v21 = vld [vmem:[%s9059_s1 + $0x30] sm:$0xff] }
   0x6   :  { %5025 = vmatprep.subr.bf16.mxu1 %v6450_v0  ;;  %v6541_v18 = vpack.c.bf16 %v26_v16, %v25_v15  ;;  %v28_v22 = vld [vmem:[%s9059_s1 + $0x38] sm:$0xff]  ;;  %v6557_v23 = vpack.c.bf16 %v44_v20, %v43_v19  ;;  %v45_v25 = vld [vmem:[%s9059_s1 + $0xc0] sm:$0xff]  ;;  %v46_v26 = vld [vmem:[%s9059_s1 + $0xc8] sm:$0xff] }
   0x7   :  { %v6561_v24 = vpack.c.bf16 %v28_v22, %v27_v21  ;;  %v29_v27 = vld [vmem:[%s9059_s1 + $0x40] sm:$0xff]  ;;  %v30_v28 = vld [vmem:[%s9059_s1 + $0x48] sm:$0xff]  ;;  %v6577_v29 = vpack.c.bf16 %v46_v26, %v45_v25  ;;  %v47_v31 = vld [vmem:[%s9059_s1 + $0xd0] sm:$0xff] }
   0x8   :  { %5006 = vmatpush3.bf16.msra.mxu0 %v6517_v11  ;;  %v6581_v30 = vpack.c.bf16 %v30_v28, %v29_v27  ;;  %v48_v32 = vld [vmem:[%s9059_s1 + $0xd8] sm:$0xff]  ;;  %v31_v33 = vld [vmem:[%s9059_s1 + $0x50] sm:$0xff]  ;;  %v49_v37 = vld [vmem:[%s9059_s1 + $0xe0] sm:$0xff] }
   0x9   :  { %5026 = vmatpush3.bf16.msra.mxu1 %v6521_v12  ;;  %5007 = vmatprep.subr.bf16.mxu0 %v6450_v0  ;;  %v32_v34 = vld [vmem:[%s9059_s1 + $0x58] sm:$0xff]  ;;  %v6597_v35 = vpack.c.bf16 %v48_v32, %v47_v31  ;;  %v50_v38 = vld [vmem:[%s9059_s1 + $0xe8] sm:$0xff]  ;;  %v33_v39 = vld [vmem:[%s9059_s1 + $0x60] sm:$0xff] }
   0xa   :  { %5027 = vmatprep.subr.bf16.mxu1 %v6450_v0  ;;  %v6601_v36 = vpack.c.bf16 %v32_v34, %v31_v33  ;;  %v34_v40 = vld [vmem:[%s9059_s1 + $0x68] sm:$0xff]  ;;  %v6617_v41 = vpack.c.bf16 %v50_v38, %v49_v37  ;;  %v51_v43 = vld [vmem:[%s9059_s1 + $0xf0] sm:$0xff]  ;;  %v52_v44 = vld [vmem:[%s9059_s1 + $0xf8] sm:$0xff] }
   0xb   :  { %v6621_v42 = vpack.c.bf16 %v34_v40, %v33_v39  ;;  %v35_v45 = vld [vmem:[%s9059_s1 + $0x70] sm:$0xff]  ;;  %v36_v46 = vld [vmem:[%s9059_s1 + $0x78] sm:$0xff]  ;;  %v6637_v47 = vpack.c.bf16 %v52_v44, %v51_v43  ;;  %v121_v48 = vld [vmem:[%s9060_s0 + $0x1] sm:$0xff] }
   0xc   :  { %5008 = vmatpush3.bf16.msra.mxu0 %v6537_v17  ;;  %v122_v49 = vld [vmem:[%s9060_s0 + $0x9] sm:$0x1]  ;;  %v118_v50 = vld [vmem:[%s9060_s0] sm:$0xff]  ;;  %v6650_v51 = vpack.c.bf16 %v36_v46, %v35_v45  ;;  %v119_v52 = vld [vmem:[%s9060_s0 + $0x8] sm:$0x1] }
   0xd   :  { %5028 = vmatpush3.bf16.msra.mxu1 %v6541_v18  ;;  %5009 = vmatprep.subr.bf16.mxu0 %v6450_v0  ;;  %v53_v53 = vld [vmem:[%s9059_s1 + $0x100] sm:$0xff]  ;;  %v54_v54 = vld [vmem:[%s9059_s1 + $0x108] sm:$0xff]  ;;  %v123_v57 = vpack.c.bf16 %v122_v49, %v121_v48  ;;  %v120_v58 = vpack.c.bf16 %v119_v52, %v118_v50  ;;  %v55_v61 = vld [vmem:[%s9059_s1 + $0x110] sm:$0xff] }
   0xe   :  { %5029 = vmatprep.subr.bf16.mxu1 %v6450_v0  ;;  %v69_v55 = vld [vmem:[%s9059_s1 + $0x180] sm:$0xff]  ;;  %v70_v56 = vld [vmem:[%s9059_s1 + $0x188] sm:$0xff]  ;;  %v6669_v59 = vpack.c.bf16 %v54_v54, %v53_v53  ;;  %v56_v62 = vld [vmem:[%s9059_s1 + $0x118] sm:$0xff] }
   0xf   :  { %v6673_v60 = vpack.c.bf16 %v70_v56, %v69_v55  ;;  %v71_v63 = vld [vmem:[%s9059_s1 + $0x190] sm:$0xff]  ;;  %v72_v1 = vld [vmem:[%s9059_s1 + $0x198] sm:$0xff]  ;;  %v6689_v2 = vpack.c.bf16 %v56_v62, %v55_v61  ;;  %v57_v5 = vld [vmem:[%s9059_s1 + $0x120] sm:$0xff] }
  0x10   :  { %5010 = vmatpush3.bf16.msra.mxu0 %v6557_v23  ;;  %v6693_v3 = vpack.c.bf16 %v72_v1, %v71_v63  ;;  %v58_v6 = vld [vmem:[%s9059_s1 + $0x128] sm:$0xff]  ;;  %v73_v7 = vld [vmem:[%s9059_s1 + $0x1a0] sm:$0xff]  ;;  %v59_v14 = vld [vmem:[%s9059_s1 + $0x130] sm:$0xff] }
  0x11   :  { %5030 = vmatpush3.bf16.msra.mxu1 %v6561_v24  ;;  %5011 = vmatprep.subr.bf16.mxu0 %v6450_v0  ;;  %v74_v9 = vld [vmem:[%s9059_s1 + $0x1a8] sm:$0xff]  ;;  %v6713_v10 = vpack.c.bf16 %v58_v6, %v57_v5  ;;  %v60_v15 = vld [vmem:[%s9059_s1 + $0x138] sm:$0xff]  ;;  %v75_v16 = vld [vmem:[%s9059_s1 + $0x1b0] sm:$0xff] }
  0x12   :  { %5031 = vmatprep.subr.bf16.mxu1 %v6450_v0  ;;  %v6717_v13 = vpack.c.bf16 %v74_v9, %v73_v7  ;;  %v76_v19 = vld [vmem:[%s9059_s1 + $0x1b8] sm:$0xff]  ;;  %v6733_v20 = vpack.c.bf16 %v60_v15, %v59_v14  ;;  %v61_v22 = vld [vmem:[%s9059_s1 + $0x140] sm:$0xff]  ;;  %v62_v25 = vld [vmem:[%s9059_s1 + $0x148] sm:$0xff] }
  0x13   :  { %v6737_v21 = vpack.c.bf16 %v76_v19, %v75_v16  ;;  %v77_v26 = vld [vmem:[%s9059_s1 + $0x1c0] sm:$0xff]  ;;  %v78_v27 = vld [vmem:[%s9059_s1 + $0x1c8] sm:$0xff]  ;;  %v6753_v28 = vpack.c.bf16 %v62_v25, %v61_v22  ;;  %v63_v32 = vld [vmem:[%s9059_s1 + $0x150] sm:$0xff] }
  0x14   :  { %5012 = vmatpush3.bf16.msra.mxu0 %v6577_v29  ;;  %v6757_v31 = vpack.c.bf16 %v78_v27, %v77_v26  ;;  %v64_v33 = vld [vmem:[%s9059_s1 + $0x158] sm:$0xff]  ;;  %v79_v34 = vld [vmem:[%s9059_s1 + $0x1d0] sm:$0xff]  ;;  %v65_v40 = vld [vmem:[%s9059_s1 + $0x160] sm:$0xff] }
  0x15   :  { %5032 = vmatpush3.bf16.msra.mxu1 %v6581_v30  ;;  %5013 = vmatprep.subr.bf16.mxu0 %v6450_v0  ;;  %v80_v37 = vld [vmem:[%s9059_s1 + $0x1d8] sm:$0xff]  ;;  %v6773_v38 = vpack.c.bf16 %v64_v33, %v63_v32  ;;  %v66_v43 = vld [vmem:[%s9059_s1 + $0x168] sm:$0xff]  ;;  %v81_v44 = vld [vmem:[%s9059_s1 + $0x1e0] sm:$0xff] }
  0x16   :  { %5033 = vmatprep.subr.bf16.mxu1 %v6450_v0  ;;  %v6777_v39 = vpack.c.bf16 %v80_v37, %v79_v34  ;;  %v82_v45 = vld [vmem:[%s9059_s1 + $0x1e8] sm:$0xff]  ;;  %v6793_v46 = vpack.c.bf16 %v66_v43, %v65_v40  ;;  %v67_v49 = vld [vmem:[%s9059_s1 + $0x170] sm:$0xff]  ;;  %v68_v50 = vld [vmem:[%s9059_s1 + $0x178] sm:$0xff] }
  0x17   :  { %v6797_v48 = vpack.c.bf16 %v82_v45, %v81_v44  ;;  %v83_v52 = vld [vmem:[%s9059_s1 + $0x1f0] sm:$0xff]  ;;  %v84_v53 = vld [vmem:[%s9059_s1 + $0x1f8] sm:$0xff]  ;;  %v6813_v54 = vpack.c.bf16 %v68_v50, %v67_v49  ;;  %v4121_v9 = vld [vmem:[%s9060_s0 + $0x20] sm:$0xff] }
  0x18   :  { %5014 = vmatpush3.bf16.msra.mxu0 %v6597_v35  ;;  %v4112_v55 = vld [vmem:[%s9060_s0 + $0x10] sm:$0xff]  ;;  %v4113_v56 = vld [vmem:[%s9060_s0 + $0x18] sm:$0x1]  ;;  %v4115_v61 = vld [vmem:[%s9060_s0 + $0x19] sm:$0x1] }
  0x19   :  { %5034 = vmatpush3.bf16.msra.mxu1 %v6601_v36  ;;  %5015 = vmatprep.subr.bf16.mxu0 %v6450_v0  ;;  %v209_v62 = vpack.c.bf16 %v4113_v56, %v4112_v55  ;;  %v4120_v1 = vld [vmem:[%s9060_s0 + $0x19] sm:$0x1]  ;;  %v4118_v5 = vld [vmem:[%s9060_s0 + $0x18] sm:$0x1]  ;;  %v4122_v14 = vld [vmem:[%s9060_s0 + $0x28] sm:$0x1] }
  0x1a   :  { %5035 = vmatprep.subr.bf16.mxu1 %v6450_v0  ;;  %v332_v7 = vpack.c.bf16 %v4118_v5, %v4112_v55  ;;  %v4123_v15 = vld [vmem:[%s9060_s0 + $0x21] sm:$0xff]  ;;  %v4124_v16 = vld [vmem:[%s9060_s0 + $0x29] sm:$0x1]  ;;  %v421_v19 = vpack.c.bf16 %v4122_v14, %v4121_v9  ;;  %v4131_v33 = vld [vmem:[%s9060_s0 + $0x30] sm:$0xff] }
  0x1b   :  { %v467_v22 = vpack.c.bf16 %v4124_v16, %v4123_v15  ;;  %v4130_v25 = vld [vmem:[%s9060_s0 + $0x29] sm:$0x1]  ;;  %v4128_v26 = vld [vmem:[%s9060_s0 + $0x28] sm:$0x1]  ;;  %v4132_v34 = vld [vmem:[%s9060_s0 + $0x38] sm:$0x1] }
  0x1c   :  { %5016 = vmatpush3.bf16.msra.mxu0 %v6617_v41  ;;  %v541_v27 = vpack.c.bf16 %v4130_v25, %v4123_v15  ;;  %v538_v32 = vpack.c.bf16 %v4128_v26, %v4121_v9  ;;  %v4133_v37 = vld [vmem:[%s9060_s0 + $0x31] sm:$0xff]  ;;  %v4134_v40 = vld [vmem:[%s9060_s0 + $0x39] sm:$0x1]  ;;  %v627_v43 = vpack.c.bf16 %v4132_v34, %v4131_v33  ;;  %v4142_v9 = vld [vmem:[%s9060_s0 + $0x48] sm:$0x1] }
  0x1d   :  { %5036 = vmatpush3.bf16.msra.mxu1 %v6621_v42  ;;  %5017 = vmatprep.subr.bf16.mxu0 %v6450_v0  ;;  %v673_v44 = vpack.c.bf16 %v4134_v40, %v4133_v37  ;;  %v4140_v45 = vld [vmem:[%s9060_s0 + $0x39] sm:$0x1]  ;;  %v4138_v49 = vld [vmem:[%s9060_s0 + $0x38] sm:$0x1]  ;;  %v7100_v14 = vld [vmem:[%s9060_s0 + $0x41] sm:$0xff] }
  0x1e   :  { %5037 = vmatprep.subr.bf16.mxu1 %v6450_v0  ;;  %v747_v50 = vpack.c.bf16 %v4140_v45, %v4133_v37  ;;  %v4144_v15 = vld [vmem:[%s9060_s0 + $0x49] sm:$0x1] }
  0x20   :  { %5018 = vmatpush3.bf16.msra.mxu0 %v6637_v47 }
  0x21   :  { %5038 = vmatpush3.bf16.msra.mxu1 %v6650_v51  ;;  %5043 = vmatprep.subr.bf16.mxu0 %v6450_v0 }
  0x22   :  { %5063 = vmatprep.subr.bf16.mxu1 %v6450_v0 }
  0x23   :  { %5020 = vmatmul.mubr.bf16.vlgmr.msra.gmra.mrb[0].mxu0 %v123_v57  ;;  %v6823_v57 = vpack.c.bf16 %v84_v53, %v83_v52  ;;  %v744_v52 = vpack.c.bf16 %v4138_v49, %v4131_v33  ;;  %v7145_v49 = vld [vmem:[%s9061_s2] ss:$0 sm:$0xff] }
  0x24   :  { %5040 = vmatmul.mubr.bf16.vlgmr.msra.gmra.mrb[0].mxu1 %v120_v58  ;;  %5044 = vmatpush3.bf16.msra.mxu0 %v6669_v59  ;;  %v4114_v58 = vld [vmem:[%s9060_s0 + $0x11] sm:$0xff] }
  0x25   :  { %5064 = vmatpush3.bf16.msra.mxu1 %v6673_v60  ;;  %5045 = vmatprep.subr.bf16.mxu0 %v6450_v0  ;;  %v255_v63 = vpack.c.bf16 %v4115_v61, %v4114_v58  ;;  %v335_v6 = vpack.c.bf16 %v4120_v1, %v4114_v58 }
  0x26   :  { %5065 = vmatprep.subr.bf16.mxu1 %v6450_v0  ;;  %5059 = vmatprep.mubr.msk.bf16.mxu0 %vm6451_vm0, %v6450_v0 }
  0x27   :  { %5079 = vmatprep.mubr.msk.bf16.mxu1 %vm6451_vm0, %v6450_v0 }
  0x28   :  { %5046 = vmatpush3.bf16.msra.mxu0 %v6689_v2 }
  0x29   :  { %5066 = vmatpush3.bf16.msra.mxu1 %v6693_v3  ;;  %5047 = vmatprep.subr.bf16.mxu0 %v6450_v0 }
  0x2a   :  { %5067 = vmatprep.subr.bf16.mxu1 %v6450_v0 }
  0x2c   :  { %5048 = vmatpush3.bf16.msra.mxu0 %v6713_v10 }
  0x2d   :  { %5068 = vmatpush3.bf16.msra.mxu1 %v6717_v13  ;;  %5049 = vmatprep.subr.bf16.mxu0 %v6450_v0 }
  0x2e   :  { %5069 = vmatprep.subr.bf16.mxu1 %v6450_v0 }
  0x30   :  { %5050 = vmatpush3.bf16.msra.mxu0 %v6733_v20 }
  0x31   :  { %5070 = vmatpush3.bf16.msra.mxu1 %v6737_v21  ;;  %5051 = vmatprep.subr.bf16.mxu0 %v6450_v0 }
  0x32   :  { %5071 = vmatprep.subr.bf16.mxu1 %v6450_v0 }
  0x34   :  { %5052 = vmatpush3.bf16.msra.mxu0 %v6753_v28 }
  0x35   :  { %5072 = vmatpush3.bf16.msra.mxu1 %v6757_v31  ;;  %5053 = vmatprep.subr.bf16.mxu0 %v6450_v0 }
  0x36   :  { %5073 = vmatprep.subr.bf16.mxu1 %v6450_v0 }
  0x38   :  { %5054 = vmatpush3.bf16.msra.mxu0 %v6773_v38 }
  0x39   :  { %5074 = vmatpush3.bf16.msra.mxu1 %v6777_v39  ;;  %5055 = vmatprep.subr.bf16.mxu0 %v6450_v0 }
  0x3a   :  { %5075 = vmatprep.subr.bf16.mxu1 %v6450_v0 }
  0x3c   :  { %5056 = vmatpush3.bf16.msra.mxu0 %v6793_v46 }
  0x3d   :  { %5076 = vmatpush3.bf16.msra.mxu1 %v6797_v48  ;;  %5057 = vmatprep.subr.bf16.mxu0 %v6450_v0 }
  0x3e   :  { %5077 = vmatprep.subr.bf16.mxu1 %v6450_v0 }
  0x40   :  { %5058 = vmatpush3.bf16.msra.mxu0 %v6813_v54 }
  0x41   :  { %5078 = vmatpush3.bf16.msra.mxu1 %v6823_v57  ;;  %5083 = vmatprep.subr.bf16.mxu0 %v6450_v0 }
  0x42   :  { %5103 = vmatprep.subr.bf16.mxu1 %v6450_v0 }
  0x43   :  { %5060 = vmatmul.mubr.bf16.vlgmr.msra.gmra.mrb[4].mxu0 %v209_v62 }
  0x44   :  { %5080 = vmatmul.mubr.bf16.vlgmr.msra.gmra.mrb[4].mxu1 %v255_v63  ;;  %5084 = vmatpush3.bf16.msra.mxu0 %v6493_v4 }
  0x45   :  { %5104 = vmatpush3.bf16.msra.mxu1 %v6508_v8  ;;  %5085 = vmatprep.subr.bf16.mxu0 %v6450_v0 }
  0x46   :  { %5105 = vmatprep.subr.bf16.mxu1 %v6450_v0  ;;  %5099 = vmatprep.mubr.msk.bf16.mxu0 %vm6451_vm0, %v6450_v0 }
  0x47   :  { %5119 = vmatprep.mubr.msk.bf16.mxu1 %vm6451_vm0, %v6450_v0 }
  0x48   :  { %5086 = vmatpush3.bf16.msra.mxu0 %v6517_v11 }
  0x49   :  { %5106 = vmatpush3.bf16.msra.mxu1 %v6521_v12  ;;  %5087 = vmatprep.subr.bf16.mxu0 %v6450_v0 }
  0x4a   :  { %5107 = vmatprep.subr.bf16.mxu1 %v6450_v0 }
  0x4c   :  { %5088 = vmatpush3.bf16.msra.mxu0 %v6537_v17 }
  0x4d   :  { %5108 = vmatpush3.bf16.msra.mxu1 %v6541_v18  ;;  %5089 = vmatprep.subr.bf16.mxu0 %v6450_v0 }
  0x4e   :  { %5109 = vmatprep.subr.bf16.mxu1 %v6450_v0 }
  0x50   :  { %5090 = vmatpush3.bf16.msra.mxu0 %v6557_v23 }
  0x51   :  { %5110 = vmatpush3.bf16.msra.mxu1 %v6561_v24  ;;  %5091 = vmatprep.subr.bf16.mxu0 %v6450_v0 }
  0x52   :  { %5111 = vmatprep.subr.bf16.mxu1 %v6450_v0 }
  0x54   :  { %5092 = vmatpush3.bf16.msra.mxu0 %v6577_v29 }
  0x55   :  { %5112 = vmatpush3.bf16.msra.mxu1 %v6581_v30  ;;  %5093 = vmatprep.subr.bf16.mxu0 %v6450_v0 }
  0x56   :  { %5113 = vmatprep.subr.bf16.mxu1 %v6450_v0 }
  0x58   :  { %5094 = vmatpush3.bf16.msra.mxu0 %v6597_v35 }
  0x59   :  { %5114 = vmatpush3.bf16.msra.mxu1 %v6601_v36  ;;  %5095 = vmatprep.subr.bf16.mxu0 %v6450_v0 }
  0x5a   :  { %5115 = vmatprep.subr.bf16.mxu1 %v6450_v0 }
  0x5c   :  { %5096 = vmatpush3.bf16.msra.mxu0 %v6617_v41 }
  0x5d   :  { %5116 = vmatpush3.bf16.msra.mxu1 %v6621_v42  ;;  %5097 = vmatprep.subr.bf16.mxu0 %v6450_v0 }
  0x5e   :  { %5117 = vmatprep.subr.bf16.mxu1 %v6450_v0 }
  0x60   :  { %5098 = vmatpush3.bf16.msra.mxu0 %v6637_v47 }
  0x61   :  { %5118 = vmatpush3.bf16.msra.mxu1 %v6650_v51  ;;  %5123 = vmatprep.subr.bf16.mxu0 %v6450_v0 }
  0x62   :  { %5143 = vmatprep.subr.bf16.mxu1 %v6450_v0 }
  0x63   :  { %5100 = vmatmul.mubr.bf16.vlgmr.msra.gmra.mrb[8].mxu0 %v335_v6 }
  0x64   :  { %5120 = vmatmul.mubr.bf16.vlgmr.msra.gmra.mrb[8].mxu1 %v332_v7  ;;  %5124 = vmatpush3.bf16.msra.mxu0 %v6669_v59  ;;  %v7090_v7 = vld [vmem:[%s9060_s0 + $0x40] sm:$0xff] }
  0x65   :  { %5144 = vmatpush3.bf16.msra.mxu1 %v6673_v60  ;;  %5125 = vmatprep.subr.bf16.mxu0 %v6450_v0  ;;  %v833_v16 = vpack.c.bf16 %v4142_v9, %v7090_v7 }
  0x66   :  { %5145 = vmatprep.subr.bf16.mxu1 %v6450_v0  ;;  %5139 = vmatprep.mubr.msk.bf16.mxu0 %vm6451_vm0, %v6450_v0 }
  0x67   :  { %5159 = vmatprep.mubr.msk.bf16.mxu1 %vm6451_vm0, %v6450_v0 }
  0x68   :  { %5126 = vmatpush3.bf16.msra.mxu0 %v6689_v2 }
  0x69   :  { %5146 = vmatpush3.bf16.msra.mxu1 %v6693_v3  ;;  %5127 = vmatprep.subr.bf16.mxu0 %v6450_v0 }
  0x6a   :  { %5147 = vmatprep.subr.bf16.mxu1 %v6450_v0 }
  0x6c   :  { %5128 = vmatpush3.bf16.msra.mxu0 %v6713_v10 }
  0x6d   :  { %5148 = vmatpush3.bf16.msra.mxu1 %v6717_v13  ;;  %5129 = vmatprep.subr.bf16.mxu0 %v6450_v0 }
  0x6e   :  { %5149 = vmatprep.subr.bf16.mxu1 %v6450_v0 }
  0x70   :  { %5130 = vmatpush3.bf16.msra.mxu0 %v6733_v20 }
  0x71   :  { %5150 = vmatpush3.bf16.msra.mxu1 %v6737_v21  ;;  %5131 = vmatprep.subr.bf16.mxu0 %v6450_v0 }
  0x72   :  { %5151 = vmatprep.subr.bf16.mxu1 %v6450_v0 }
  0x74   :  { %5132 = vmatpush3.bf16.msra.mxu0 %v6753_v28 }
  0x75   :  { %5152 = vmatpush3.bf16.msra.mxu1 %v6757_v31  ;;  %5133 = vmatprep.subr.bf16.mxu0 %v6450_v0 }
  0x76   :  { %5153 = vmatprep.subr.bf16.mxu1 %v6450_v0 }
  0x78   :  { %5134 = vmatpush3.bf16.msra.mxu0 %v6773_v38 }
  0x79   :  { %5154 = vmatpush3.bf16.msra.mxu1 %v6777_v39  ;;  %5135 = vmatprep.subr.bf16.mxu0 %v6450_v0 }
  0x7a   :  { %5155 = vmatprep.subr.bf16.mxu1 %v6450_v0 }
  0x7c   :  { %5136 = vmatpush3.bf16.msra.mxu0 %v6793_v46 }
  0x7d   :  { %5156 = vmatpush3.bf16.msra.mxu1 %v6797_v48  ;;  %5137 = vmatprep.subr.bf16.mxu0 %v6450_v0 }
  0x7e   :  { %5157 = vmatprep.subr.bf16.mxu1 %v6450_v0 }
  0x80   :  { %5138 = vmatpush3.bf16.msra.mxu0 %v6813_v54 }
  0x81   :  { %5158 = vmatpush3.bf16.msra.mxu1 %v6823_v57  ;;  %5163 = vmatprep.subr.bf16.mxu0 %v6450_v0 }
  0x82   :  { %5183 = vmatprep.subr.bf16.mxu1 %v6450_v0 }
  0x83   :  { %5140 = vmatmul.mubr.bf16.vlgmr.msra.gmra.mrb[12].mxu0 %v421_v19  ;;  %v879_v19 = vpack.c.bf16 %v4144_v15, %v7100_v14  ;;  %v7202_v15 = vld [vmem:[%s9060_s0 + $0x50] sm:$0xff] }
  0x84   :  { %5160 = vmatmul.mubr.bf16.vlgmr.msra.gmra.mrb[12].mxu1 %v467_v22  ;;  %5164 = vmatpush3.bf16.msra.mxu0 %v6493_v4 }
  0x85   :  { %5184 = vmatpush3.bf16.msra.mxu1 %v6508_v8  ;;  %5165 = vmatprep.subr.bf16.mxu0 %v6450_v0 }
  0x86   :  { %5185 = vmatprep.subr.bf16.mxu1 %v6450_v0  ;;  %5179 = vmatprep.mubr.msk.bf16.mxu0 %vm6451_vm0, %v6450_v0 }
  0x87   :  { %5199 = vmatprep.mubr.msk.bf16.mxu1 %vm6451_vm0, %v6450_v0 }
  0x88   :  { %5166 = vmatpush3.bf16.msra.mxu0 %v6517_v11 }
  0x89   :  { %5186 = vmatpush3.bf16.msra.mxu1 %v6521_v12  ;;  %5167 = vmatprep.subr.bf16.mxu0 %v6450_v0 }
  0x8a   :  { %5187 = vmatprep.subr.bf16.mxu1 %v6450_v0 }
  0x8c   :  { %5168 = vmatpush3.bf16.msra.mxu0 %v6537_v17 }
  0x8d   :  { %5188 = vmatpush3.bf16.msra.mxu1 %v6541_v18  ;;  %5169 = vmatprep.subr.bf16.mxu0 %v6450_v0 }
  0x8e   :  { %5189 = vmatprep.subr.bf16.mxu1 %v6450_v0 }
  0x90   :  { %5170 = vmatpush3.bf16.msra.mxu0 %v6557_v23 }
  0x91   :  { %5190 = vmatpush3.bf16.msra.mxu1 %v6561_v24  ;;  %5171 = vmatprep.subr.bf16.mxu0 %v6450_v0 }
  0x92   :  { %5191 = vmatprep.subr.bf16.mxu1 %v6450_v0 }
  0x94   :  { %5172 = vmatpush3.bf16.msra.mxu0 %v6577_v29 }
  0x95   :  { %5192 = vmatpush3.bf16.msra.mxu1 %v6581_v30  ;;  %5173 = vmatprep.subr.bf16.mxu0 %v6450_v0 }
  0x96   :  { %5193 = vmatprep.subr.bf16.mxu1 %v6450_v0 }
  0x98   :  { %5174 = vmatpush3.bf16.msra.mxu0 %v6597_v35 }
  0x99   :  { %5194 = vmatpush3.bf16.msra.mxu1 %v6601_v36  ;;  %5175 = vmatprep.subr.bf16.mxu0 %v6450_v0 }
  0x9a   :  { %5195 = vmatprep.subr.bf16.mxu1 %v6450_v0 }
  0x9c   :  { %5176 = vmatpush3.bf16.msra.mxu0 %v6617_v41 }
  0x9d   :  { %5196 = vmatpush3.bf16.msra.mxu1 %v6621_v42  ;;  %5177 = vmatprep.subr.bf16.mxu0 %v6450_v0 }
  0x9e   :  { %5197 = vmatprep.subr.bf16.mxu1 %v6450_v0 }
  0xa0   :  { %5178 = vmatpush3.bf16.msra.mxu0 %v6637_v47 }
  0xa1   :  { %5198 = vmatpush3.bf16.msra.mxu1 %v6650_v51  ;;  %5203 = vmatprep.subr.bf16.mxu0 %v6450_v0 }
  0xa2   :  { %5223 = vmatprep.subr.bf16.mxu1 %v6450_v0 }
  0xa3   :  { %5180 = vmatmul.mubr.bf16.vlgmr.msra.gmra.mrb[16].mxu0 %v541_v27 }
  0xa4   :  { %5200 = vmatmul.mubr.bf16.vlgmr.msra.gmra.mrb[16].mxu1 %v538_v32  ;;  %5204 = vmatpush3.bf16.msra.mxu0 %v6669_v59 }
  0xa5   :  { %5224 = vmatpush3.bf16.msra.mxu1 %v6673_v60  ;;  %5205 = vmatprep.subr.bf16.mxu0 %v6450_v0 }
  0xa6   :  { %5225 = vmatprep.subr.bf16.mxu1 %v6450_v0  ;;  %5219 = vmatprep.mubr.msk.bf16.mxu0 %vm6451_vm0, %v6450_v0 }
  0xa7   :  { %5239 = vmatprep.mubr.msk.bf16.mxu1 %vm6451_vm0, %v6450_v0 }
  0xa8   :  { %5206 = vmatpush3.bf16.msra.mxu0 %v6689_v2 }
  0xa9   :  { %5226 = vmatpush3.bf16.msra.mxu1 %v6693_v3  ;;  %5207 = vmatprep.subr.bf16.mxu0 %v6450_v0 }
  0xaa   :  { %5227 = vmatprep.subr.bf16.mxu1 %v6450_v0 }
  0xac   :  { %5208 = vmatpush3.bf16.msra.mxu0 %v6713_v10 }
  0xad   :  { %5228 = vmatpush3.bf16.msra.mxu1 %v6717_v13  ;;  %5209 = vmatprep.subr.bf16.mxu0 %v6450_v0 }
  0xae   :  { %5229 = vmatprep.subr.bf16.mxu1 %v6450_v0 }
  0xb0   :  { %5210 = vmatpush3.bf16.msra.mxu0 %v6733_v20 }
  0xb1   :  { %5230 = vmatpush3.bf16.msra.mxu1 %v6737_v21  ;;  %5211 = vmatprep.subr.bf16.mxu0 %v6450_v0 }
  0xb2   :  { %5231 = vmatprep.subr.bf16.mxu1 %v6450_v0 }
  0xb4   :  { %5212 = vmatpush3.bf16.msra.mxu0 %v6753_v28 }
  0xb5   :  { %5232 = vmatpush3.bf16.msra.mxu1 %v6757_v31  ;;  %5213 = vmatprep.subr.bf16.mxu0 %v6450_v0 }
  0xb6   :  { %5233 = vmatprep.subr.bf16.mxu1 %v6450_v0 }
  0xb8   :  { %5214 = vmatpush3.bf16.msra.mxu0 %v6773_v38 }
  0xb9   :  { %5234 = vmatpush3.bf16.msra.mxu1 %v6777_v39  ;;  %5215 = vmatprep.subr.bf16.mxu0 %v6450_v0 }
  0xba   :  { %5235 = vmatprep.subr.bf16.mxu1 %v6450_v0 }
  0xbc   :  { %5216 = vmatpush3.bf16.msra.mxu0 %v6793_v46 }
  0xbd   :  { %5236 = vmatpush3.bf16.msra.mxu1 %v6797_v48  ;;  %5217 = vmatprep.subr.bf16.mxu0 %v6450_v0 }
  0xbe   :  { %5237 = vmatprep.subr.bf16.mxu1 %v6450_v0 }
  0xc0   :  { %5218 = vmatpush3.bf16.msra.mxu0 %v6813_v54 }
  0xc1   :  { %5238 = vmatpush3.bf16.msra.mxu1 %v6823_v57  ;;  %5243 = vmatprep.subr.bf16.mxu0 %v6450_v0 }
  0xc2   :  { %5263 = vmatprep.subr.bf16.mxu1 %v6450_v0 }
  0xc3   :  { %5220 = vmatmul.mubr.bf16.vlgmr.msra.gmra.mrb[20].mxu0 %v627_v43 }
  0xc4   :  { %5240 = vmatmul.mubr.bf16.vlgmr.msra.gmra.mrb[20].mxu1 %v673_v44  ;;  %5244 = vmatpush3.bf16.msra.mxu0 %v6493_v4 }
  0xc5   :  { %5264 = vmatpush3.bf16.msra.mxu1 %v6508_v8  ;;  %5245 = vmatprep.subr.bf16.mxu0 %v6450_v0 }
  0xc6   :  { %5265 = vmatprep.subr.bf16.mxu1 %v6450_v0  ;;  %5259 = vmatprep.mubr.msk.bf16.mxu0 %vm6451_vm0, %v6450_v0 }
  0xc7   :  { %5279 = vmatprep.mubr.msk.bf16.mxu1 %vm6451_vm0, %v6450_v0 }
  0xc8   :  { %5246 = vmatpush3.bf16.msra.mxu0 %v6517_v11 }
  0xc9   :  { %5266 = vmatpush3.bf16.msra.mxu1 %v6521_v12  ;;  %5247 = vmatprep.subr.bf16.mxu0 %v6450_v0 }
  0xca   :  { %5267 = vmatprep.subr.bf16.mxu1 %v6450_v0 }
  0xcc   :  { %5248 = vmatpush3.bf16.msra.mxu0 %v6537_v17 }
  0xcd   :  { %5268 = vmatpush3.bf16.msra.mxu1 %v6541_v18  ;;  %5249 = vmatprep.subr.bf16.mxu0 %v6450_v0 }
  0xce   :  { %5269 = vmatprep.subr.bf16.mxu1 %v6450_v0 }
  0xd0   :  { %5250 = vmatpush3.bf16.msra.mxu0 %v6557_v23 }
  0xd1   :  { %5270 = vmatpush3.bf16.msra.mxu1 %v6561_v24  ;;  %5251 = vmatprep.subr.bf16.mxu0 %v6450_v0 }
  0xd2   :  { %5271 = vmatprep.subr.bf16.mxu1 %v6450_v0 }
  0xd4   :  { %5252 = vmatpush3.bf16.msra.mxu0 %v6577_v29 }
  0xd5   :  { %5272 = vmatpush3.bf16.msra.mxu1 %v6581_v30  ;;  %5253 = vmatprep.subr.bf16.mxu0 %v6450_v0 }
  0xd6   :  { %5273 = vmatprep.subr.bf16.mxu1 %v6450_v0 }
  0xd8   :  { %5254 = vmatpush3.bf16.msra.mxu0 %v6597_v35 }
  0xd9   :  { %5274 = vmatpush3.bf16.msra.mxu1 %v6601_v36  ;;  %5255 = vmatprep.subr.bf16.mxu0 %v6450_v0 }
  0xda   :  { %5275 = vmatprep.subr.bf16.mxu1 %v6450_v0 }
  0xdc   :  { %5256 = vmatpush3.bf16.msra.mxu0 %v6617_v41 }
  0xdd   :  { %5276 = vmatpush3.bf16.msra.mxu1 %v6621_v42  ;;  %5257 = vmatprep.subr.bf16.mxu0 %v6450_v0 }
  0xde   :  { %5277 = vmatprep.subr.bf16.mxu1 %v6450_v0 }
  0xe0   :  { %5258 = vmatpush3.bf16.msra.mxu0 %v6637_v47 }
  0xe1   :  { %5278 = vmatpush3.bf16.msra.mxu1 %v6650_v51  ;;  %5283 = vmatprep.subr.bf16.mxu0 %v6450_v0 }
  0xe2   :  { %5303 = vmatprep.subr.bf16.mxu1 %v6450_v0 }
  0xe3   :  { %5260 = vmatmul.mubr.bf16.vlgmr.msra.gmra.mrb[24].mxu0 %v747_v50  ;;  %v4150_v50 = vld [vmem:[%s9060_s0 + $0x49] sm:$0x1] }
  0xe4   :  { %5280 = vmatmul.mubr.bf16.vlgmr.msra.gmra.mrb[24].mxu1 %v744_v52  ;;  %5284 = vmatpush3.bf16.msra.mxu0 %v6669_v59 }
  0xe5   :  { %5304 = vmatpush3.bf16.msra.mxu1 %v6673_v60  ;;  %5285 = vmatprep.subr.bf16.mxu0 %v6450_v0 }
  0xe6   :  { %5305 = vmatprep.subr.bf16.mxu1 %v6450_v0  ;;  %5299 = vmatprep.mubr.msk.bf16.mxu0 %vm6451_vm0, %v6450_v0 }
  0xe7   :  { %5319 = vmatprep.mubr.msk.bf16.mxu1 %vm6451_vm0, %v6450_v0 }
  0xe8   :  { %5286 = vmatpush3.bf16.msra.mxu0 %v6689_v2 }
  0xe9   :  { %5306 = vmatpush3.bf16.msra.mxu1 %v6693_v3  ;;  %5287 = vmatprep.subr.bf16.mxu0 %v6450_v0 }
  0xea   :  { %5307 = vmatprep.subr.bf16.mxu1 %v6450_v0 }
  0xec   :  { %5288 = vmatpush3.bf16.msra.mxu0 %v6713_v10 }
  0xed   :  { %5308 = vmatpush3.bf16.msra.mxu1 %v6717_v13  ;;  %5289 = vmatprep.subr.bf16.mxu0 %v6450_v0 }
  0xee   :  { %5309 = vmatprep.subr.bf16.mxu1 %v6450_v0 }
  0xf0   :  { %5290 = vmatpush3.bf16.msra.mxu0 %v6733_v20 }
  0xf1   :  { %5310 = vmatpush3.bf16.msra.mxu1 %v6737_v21  ;;  %5291 = vmatprep.subr.bf16.mxu0 %v6450_v0 }
  0xf2   :  { %5311 = vmatprep.subr.bf16.mxu1 %v6450_v0 }
  0xf4   :  { %5292 = vmatpush3.bf16.msra.mxu0 %v6753_v28 }
  0xf5   :  { %5312 = vmatpush3.bf16.msra.mxu1 %v6757_v31  ;;  %5293 = vmatprep.subr.bf16.mxu0 %v6450_v0 }
  0xf6   :  { %v158_v53 = vpop.f32.mrb[0].mxu0  ;;  %5313 = vmatprep.subr.bf16.mxu1 %v6450_v0 }
  0xf7   :  { %v199_v55 = vpop.f32.mrb[0].mxu1  ;;  %v5021_v56 = vpop.f32.mrb[1].mxu0 }
  0xf8   :  { %v200_v58 = vadd.f32 %v199_v55, %v158_v53  ;;  %v5041_v61 = vpop.f32.mrb[1].mxu1  ;;  %v161_v62 = vpop.f32.mrb[2].mxu0  ;;  %5294 = vmatpush3.bf16.msra.mxu0 %v6773_v38  ;;  %v4148_v53 = vld [vmem:[%s9060_s0 + $0x48] sm:$0x1]  ;;  %v953_v55 = vpack.c.bf16 %v4150_v50, %v7100_v14 }
  0xf9   :  { %v202_v63 = vpop.f32.mrb[2].mxu1  ;;  %5314 = vmatpush3.bf16.msra.mxu1 %v6777_v39  ;;  %v5022_v1 = vpop.f32.mrb[3].mxu0  ;;  %5295 = vmatprep.subr.bf16.mxu0 %v6450_v0  ;;  %v950_v56 = vpack.c.bf16 %v4148_v53, %v7090_v7 }
  0xfa   :  { %v203_v5 = vadd.f32 %v202_v63, %v161_v62  ;;  %v5042_v6 = vpop.f32.mrb[3].mxu1  ;;  %5315 = vmatprep.subr.bf16.mxu1 %v6450_v0 }
  0xfc   :  { %5296 = vmatpush3.bf16.msra.mxu0 %v6793_v46 }
  0xfd   :  { %5316 = vmatpush3.bf16.msra.mxu1 %v6797_v48  ;;  %5297 = vmatprep.subr.bf16.mxu0 %v6450_v0 }
  0xfe   :  { %5317 = vmatprep.subr.bf16.mxu1 %v6450_v0 }
 0x100   :  { %5298 = vmatpush3.bf16.msra.mxu0 %v6813_v54 }
 0x101   :  { %5318 = vmatpush3.bf16.msra.mxu1 %v6823_v57  ;;  %5323 = vmatprep.subr.bf16.mxu0 %v6450_v0 }
 0x102   :  { %5343 = vmatprep.subr.bf16.mxu1 %v6450_v0 }
 0x103   :  { %5300 = vmatmul.mubr.bf16.vlgmr.msra.gmra.mrb[28].mxu0 %v833_v16  ;;  %v4152_v16 = vld [vmem:[%s9060_s0 + $0x58] sm:$0x1] }
 0x104   :  { %5320 = vmatmul.mubr.bf16.vlgmr.msra.gmra.mrb[28].mxu1 %v879_v19  ;;  %5324 = vmatpush3.bf16.msra.mxu0 %v6493_v4  ;;  %v7212_v19 = vld [vmem:[%s9060_s0 + $0x51] sm:$0xff] }
 0x105   :  { %5344 = vmatpush3.bf16.msra.mxu1 %v6508_v8  ;;  %5325 = vmatprep.subr.bf16.mxu0 %v6450_v0 }
 0x106   :  { %5345 = vmatprep.subr.bf16.mxu1 %v6450_v0  ;;  %5339 = vmatprep.mubr.msk.bf16.mxu0 %vm6451_vm0, %v6450_v0 }
 0x107   :  { %5359 = vmatprep.mubr.msk.bf16.mxu1 %vm6451_vm0, %v6450_v0 }
 0x108   :  { %5326 = vmatpush3.bf16.msra.mxu0 %v6517_v11 }
 0x109   :  { %5346 = vmatpush3.bf16.msra.mxu1 %v6521_v12  ;;  %5327 = vmatprep.subr.bf16.mxu0 %v6450_v0 }
 0x10a   :  { %5347 = vmatprep.subr.bf16.mxu1 %v6450_v0 }
 0x10c   :  { %5328 = vmatpush3.bf16.msra.mxu0 %v6537_v17 }
 0x10d   :  { %5348 = vmatpush3.bf16.msra.mxu1 %v6541_v18  ;;  %5329 = vmatprep.subr.bf16.mxu0 %v6450_v0 }
 0x10e   :  { %5349 = vmatprep.subr.bf16.mxu1 %v6450_v0 }
 0x110   :  { %5330 = vmatpush3.bf16.msra.mxu0 %v6557_v23 }
 0x111   :  { %5350 = vmatpush3.bf16.msra.mxu1 %v6561_v24  ;;  %5331 = vmatprep.subr.bf16.mxu0 %v6450_v0 }
 0x112   :  { %5351 = vmatprep.subr.bf16.mxu1 %v6450_v0 }
 0x114   :  { %5332 = vmatpush3.bf16.msra.mxu0 %v6577_v29 }
 0x115   :  { %5352 = vmatpush3.bf16.msra.mxu1 %v6581_v30  ;;  %5333 = vmatprep.subr.bf16.mxu0 %v6450_v0 }
 0x116   :  { %v244_v22 = vpop.f32.mrb[4].mxu0  ;;  %5353 = vmatprep.subr.bf16.mxu1 %v6450_v0 }
 0x117   :  { %v251_v25 = vadd.f32 %v244_v22, %v200_v58  ;;  %v290_v26 = vpop.f32.mrb[4].mxu1  ;;  %v5061_v27 = vpop.f32.mrb[5].mxu0  ;;  %v4154_v22 = vld [vmem:[%s9060_s0 + $0x59] sm:$0x1] }
 0x118   :  { %v5081_v32 = vpop.f32.mrb[5].mxu1  ;;  %v247_v33 = vpop.f32.mrb[6].mxu0  ;;  %5334 = vmatpush3.bf16.msra.mxu0 %v6597_v35 }
 0x119   :  { %v7137_v34 = vadd.f32 %v290_v26, %v251_v25  ;;  %v252_v37 = vadd.f32 %v247_v33, %v203_v5  ;;  %v293_v40 = vpop.f32.mrb[6].mxu1  ;;  %5354 = vmatpush3.bf16.msra.mxu1 %v6601_v36  ;;  %v5062_v43 = vpop.f32.mrb[7].mxu0  ;;  %5335 = vmatprep.subr.bf16.mxu0 %v6450_v0  ;;  %v1039_v25 = vpack.c.bf16 %v4152_v16, %v7202_v15 }
 0x11a   :  { %v5082_v44 = vpop.f32.mrb[7].mxu1  ;;  %5355 = vmatprep.subr.bf16.mxu1 %v6450_v0  ;;  %v1085_v26 = vpack.c.bf16 %v4154_v22, %v7212_v19  ;;  %v4158_v22 = vld [vmem:[%s9060_s0 + $0x58] sm:$0x1] }
 0x11b   :  { %v298_v45 = vadd.f32 %v293_v40, %v252_v37  ;;  %v7244_v32 = vadd.f32 %v7145_v49, %v7137_v34 }
 0x11c   :  { %5336 = vmatpush3.bf16.msra.mxu0 %v6617_v41 }
 0x11d   :  { %v7152_v52 = vadd.f32 %v7145_v49, %v298_v45  ;;  %5356 = vmatpush3.bf16.msra.mxu1 %v6621_v42  ;;  %5337 = vmatprep.subr.bf16.mxu0 %v6450_v0  ;;  %v317_v40 = vmul.f32 %v7244_v32, %v7244_v32 }
 0x11e   :  { %5357 = vmatprep.subr.bf16.mxu1 %v6450_v0 }
 0x11f   :  { %329 = vst [vmem:[%s9062_s5 + $0x8] sm:$0x1] %v7152_v52  ;;  %v318_v27 = vmul.f32 %v7152_v52, %v7152_v52  ;;  %v308_v33 = vsel %vm307_vm1, %v7152_v52, 0.0 }
 0x120   :  { %5338 = vmatpush3.bf16.msra.mxu0 %v6637_v47  ;;  %v309_v43 = vadd.f32 %v308_v33, %v7244_v32 }
 0x121   :  { %5358 = vmatpush3.bf16.msra.mxu1 %v6650_v51  ;;  %5363 = vmatprep.subr.bf16.mxu0 %v6450_v0  ;;  %v319_v37 = vsel %vm307_vm1, %v318_v27, 0.0 }
 0x122   :  { %5383 = vmatprep.subr.bf16.mxu1 %v6450_v0  ;;  %v320_v34 = vadd.f32 %v319_v37, %v317_v40  ;;  %v310_v53 = vrot.slane %v309_v43, 4 }
 0x123   :  { %5340 = vmatmul.mubr.bf16.vlgmr.msra.gmra.mrb[32].mxu0 %v953_v55 }
 0x124   :  { %5360 = vmatmul.mubr.bf16.vlgmr.msra.gmra.mrb[32].mxu1 %v950_v56  ;;  %5364 = vmatpush3.bf16.msra.mxu0 %v6669_v59 }
 0x125   :  { %5384 = vmatpush3.bf16.msra.mxu1 %v6673_v60  ;;  %5365 = vmatprep.subr.bf16.mxu0 %v6450_v0 }
 0x126   :  { %5385 = vmatprep.subr.bf16.mxu1 %v6450_v0  ;;  %5379 = vmatprep.mubr.msk.bf16.mxu0 %vm6451_vm0, %v6450_v0 }
 0x127   :  { %5399 = vmatprep.mubr.msk.bf16.mxu1 %vm6451_vm0, %v6450_v0 }
 0x128   :  { %5366 = vmatpush3.bf16.msra.mxu0 %v6689_v2 }
 0x129   :  { %5386 = vmatpush3.bf16.msra.mxu1 %v6693_v3  ;;  %5367 = vmatprep.subr.bf16.mxu0 %v6450_v0 }
 0x12a   :  { %5387 = vmatprep.subr.bf16.mxu1 %v6450_v0 }
 0x12c   :  { %5368 = vmatpush3.bf16.msra.mxu0 %v6713_v10 }
 0x12d   :  { %5388 = vmatpush3.bf16.msra.mxu1 %v6717_v13  ;;  %5369 = vmatprep.subr.bf16.mxu0 %v6450_v0 }
 0x12e   :  { %5389 = vmatprep.subr.bf16.mxu1 %v6450_v0 }
 0x130   :  { %5370 = vmatpush3.bf16.msra.mxu0 %v6733_v20 }
 0x131   :  { %5390 = vmatpush3.bf16.msra.mxu1 %v6737_v21  ;;  %5371 = vmatprep.subr.bf16.mxu0 %v6450_v0 }
 0x132   :  { %5391 = vmatprep.subr.bf16.mxu1 %v6450_v0 }
 0x134   :  { %5372 = vmatpush3.bf16.msra.mxu0 %v6753_v28 }
 0x135   :  { %5392 = vmatpush3.bf16.msra.mxu1 %v6757_v31  ;;  %5373 = vmatprep.subr.bf16.mxu0 %v6450_v0 }
 0x136   :  { %v370_v58 = vpop.f32.mrb[8].mxu0  ;;  %5393 = vmatprep.subr.bf16.mxu1 %v6450_v0 }
 0x137   :  { %v411_v61 = vpop.f32.mrb[8].mxu1  ;;  %v5101_v62 = vpop.f32.mrb[9].mxu0 }
 0x138   :  { %v412_v63 = vadd.f32 %v411_v61, %v370_v58  ;;  %v5121_v1 = vpop.f32.mrb[9].mxu1  ;;  %v373_v5 = vpop.f32.mrb[10].mxu0  ;;  %5374 = vmatpush3.bf16.msra.mxu0 %v6773_v38 }
 0x139   :  { %v414_v6 = vpop.f32.mrb[10].mxu1  ;;  %5394 = vmatpush3.bf16.msra.mxu1 %v6777_v39  ;;  %v5102_v7 = vpop.f32.mrb[11].mxu0  ;;  %5375 = vmatprep.subr.bf16.mxu0 %v6450_v0 }
 0x13a   :  { %v415_v9 = vadd.f32 %v414_v6, %v373_v5  ;;  %v5122_v14 = vpop.f32.mrb[11].mxu1  ;;  %5395 = vmatprep.subr.bf16.mxu1 %v6450_v0  ;;  %v321_v5 = vrot.slane %v320_v34, 4  ;;  %v311_v7 = vadd.f32 %v310_v53, %v309_v43 }
 0x13c   :  { %5376 = vmatpush3.bf16.msra.mxu0 %v6793_v46  ;;  %v312_v37 = vrot.slane %v311_v7, 2 }
 0x13d   :  { %5396 = vmatpush3.bf16.msra.mxu1 %v6797_v48  ;;  %5377 = vmatprep.subr.bf16.mxu0 %v6450_v0 }
 0x13e   :  { %5397 = vmatprep.subr.bf16.mxu1 %v6450_v0 }
 0x140   :  { %5378 = vmatpush3.bf16.msra.mxu0 %v6813_v54 }
 0x141   :  { %5398 = vmatpush3.bf16.msra.mxu1 %v6823_v57  ;;  %5403 = vmatprep.subr.bf16.mxu0 %v6450_v0 }
 0x142   :  { %5423 = vmatprep.subr.bf16.mxu1 %v6450_v0 }
 0x143   :  { %5380 = vmatmul.mubr.bf16.vlgmr.msra.gmra.mrb[36].mxu0 %v1039_v25  ;;  %v322_v25 = vadd.f32 %v321_v5, %v320_v34  ;;  %v1156_v34 = vpack.c.bf16 %v4158_v22, %v7202_v15 }
 0x144   :  { %5400 = vmatmul.mubr.bf16.vlgmr.msra.gmra.mrb[36].mxu1 %v1085_v26  ;;  %5404 = vmatpush3.bf16.msra.mxu0 %v6493_v4 }
 0x145   :  { %5424 = vmatpush3.bf16.msra.mxu1 %v6508_v8  ;;  %5405 = vmatprep.subr.bf16.mxu0 %v6450_v0 }
 0x146   :  { %5425 = vmatprep.subr.bf16.mxu1 %v6450_v0  ;;  %5419 = vmatprep.mubr.msk.bf16.mxu0 %vm6451_vm0, %v6450_v0 }
 0x147   :  { %5439 = vmatprep.mubr.msk.bf16.mxu1 %vm6451_vm0, %v6450_v0 }
 0x148   :  { %5406 = vmatpush3.bf16.msra.mxu0 %v6517_v11 }
 0x149   :  { %5426 = vmatpush3.bf16.msra.mxu1 %v6521_v12  ;;  %5407 = vmatprep.subr.bf16.mxu0 %v6450_v0 }
 0x14a   :  { %5427 = vmatprep.subr.bf16.mxu1 %v6450_v0 }
 0x14c   :  { %5408 = vmatpush3.bf16.msra.mxu0 %v6537_v17 }
 0x14d   :  { %5428 = vmatpush3.bf16.msra.mxu1 %v6541_v18  ;;  %5409 = vmatprep.subr.bf16.mxu0 %v6450_v0 }
 0x14e   :  { %5429 = vmatprep.subr.bf16.mxu1 %v6450_v0 }
 0x150   :  { %5410 = vmatpush3.bf16.msra.mxu0 %v6557_v23 }
 0x151   :  { %5430 = vmatpush3.bf16.msra.mxu1 %v6561_v24  ;;  %5411 = vmatprep.subr.bf16.mxu0 %v6450_v0 }
 0x152   :  { %5431 = vmatprep.subr.bf16.mxu1 %v6450_v0 }
 0x154   :  { %5412 = vmatpush3.bf16.msra.mxu0 %v6577_v29 }
 0x155   :  { %5432 = vmatpush3.bf16.msra.mxu1 %v6581_v30  ;;  %5413 = vmatprep.subr.bf16.mxu0 %v6450_v0 }
 0x156   :  { %v456_v44 = vpop.f32.mrb[12].mxu0  ;;  %5433 = vmatprep.subr.bf16.mxu1 %v6450_v0 }
 0x157   :  { %v463_v45 = vadd.f32 %v456_v44, %v412_v63  ;;  %v502_v50 = vpop.f32.mrb[12].mxu1  ;;  %v5141_v52 = vpop.f32.mrb[13].mxu0 }
 0x158   :  { %v5161_v55 = vpop.f32.mrb[13].mxu1  ;;  %v459_v56 = vpop.f32.mrb[14].mxu0  ;;  %5414 = vmatpush3.bf16.msra.mxu0 %v6597_v35 }
 0x159   :  { %v509_v58 = vadd.f32 %v502_v50, %v463_v45  ;;  %v464_v61 = vadd.f32 %v459_v56, %v415_v9  ;;  %v505_v62 = vpop.f32.mrb[14].mxu1  ;;  %5434 = vmatpush3.bf16.msra.mxu1 %v6601_v36  ;;  %v5142_v1 = vpop.f32.mrb[15].mxu0  ;;  %5415 = vmatprep.subr.bf16.mxu0 %v6450_v0  ;;  %v4160_v9 = vld [vmem:[%s9060_s0 + $0x59] sm:$0x1]  ;;  %v323_v45 = vrot.slane %v322_v25, 2 }
 0x15a   :  { %v5162_v6 = vpop.f32.mrb[15].mxu1  ;;  %5435 = vmatprep.subr.bf16.mxu1 %v6450_v0  ;;  %v1159_v33 = vpack.c.bf16 %v4160_v9, %v7212_v19  ;;  %v313_v19 = vadd.f32 %v312_v37, %v311_v7 }
 0x15b   :  { %v510_v63 = vadd.f32 %v505_v62, %v464_v61  ;;  %v7265_v14 = vadd.f32 %v7145_v49, %v509_v58  ;;  %v324_v15 = vadd.f32 %v323_v45, %v322_v25 }
 0x15c   :  { %5416 = vmatpush3.bf16.msra.mxu0 %v6617_v41  ;;  %v314_v61 = vrot.slane %v313_v19, 1 }
 0x15d   :  { %v512_v16 = vadd.f32 %v7145_v49, %v510_v63  ;;  %5436 = vmatpush3.bf16.msra.mxu1 %v6621_v42  ;;  %5417 = vmatprep.subr.bf16.mxu0 %v6450_v0  ;;  %v522_v40 = vmul.f32 %v7265_v14, %v7265_v14  ;;  %v325_v5 = vrot.slane %v324_v15, 1 }
 0x15e   :  { %5437 = vmatprep.subr.bf16.mxu1 %v6450_v0  ;;  %v315_v7 = vadd.f32 %v314_v61, %v313_v19 }
 0x15f   :  { %v513_v26 = vsel %vm307_vm1, %v512_v16, 0.0  ;;  %v523_v27 = vmul.f32 %v512_v16, %v512_v16  ;;  %4126 = vst [vmem:[%s9062_s5 + $0x18] sm:$0x1] %v512_v16  ;;  %v326_v22 = vadd.f32 %v325_v5, %v324_v15  ;;  %v7338_v15 = vld [vmem:[%s9060_s0 + $0x61] sm:$0xff] }
 0x160   :  { %v514_v43 = vadd.f32 %v513_v26, %v7265_v14  ;;  %5418 = vmatpush3.bf16.msra.mxu0 %v6637_v47 }
 0x161   :  { %v524_v44 = vsel %vm307_vm1, %v523_v27, 0.0  ;;  %5438 = vmatpush3.bf16.msra.mxu1 %v6650_v51  ;;  %5443 = vmatprep.subr.bf16.mxu0 %v6450_v0 }
 0x162   :  { %v515_v50 = vrot.slane %v514_v43, 4  ;;  %v525_v52 = vadd.f32 %v524_v44, %v522_v40  ;;  %5463 = vmatprep.subr.bf16.mxu1 %v6450_v0 }
 0x163   :  { %5420 = vmatmul.mubr.bf16.vlgmr.msra.gmra.mrb[40].mxu0 %v1159_v33 }
 0x164   :  { %v516_v53 = vadd.f32 %v515_v50, %v514_v43  ;;  %v526_v55 = vrot.slane %v525_v52, 4  ;;  %5440 = vmatmul.mubr.bf16.vlgmr.msra.gmra.mrb[40].mxu1 %v1156_v34  ;;  %5444 = vmatpush3.bf16.msra.mxu0 %v6669_v59 }
 0x165   :  { %5464 = vmatpush3.bf16.msra.mxu1 %v6673_v60  ;;  %5445 = vmatprep.subr.bf16.mxu0 %v6450_v0 }
 0x166   :  { %v517_v56 = vrot.slane %v516_v53, 2  ;;  %v527_v58 = vadd.f32 %v526_v55, %v525_v52  ;;  %5465 = vmatprep.subr.bf16.mxu1 %v6450_v0  ;;  %5459 = vmatprep.mubr.msk.bf16.mxu0 %vm6451_vm0, %v6450_v0  ;;  %v4162_v55 = vld [vmem:[%s9060_s0 + $0x68] sm:$0x1] }
 0x167   :  { %5479 = vmatprep.mubr.msk.bf16.mxu1 %vm6451_vm0, %v6450_v0 }
 0x168   :  { %v518_v62 = vadd.f32 %v517_v56, %v516_v53  ;;  %v528_v1 = vrot.slane %v527_v58, 2  ;;  %5446 = vmatpush3.bf16.msra.mxu0 %v6689_v2  ;;  %v7328_v53 = vld [vmem:[%s9060_s0 + $0x60] sm:$0xff]  ;;  %v4164_v56 = vld [vmem:[%s9060_s0 + $0x69] sm:$0x1] }
 0x169   :  { %5466 = vmatpush3.bf16.msra.mxu1 %v6693_v3  ;;  %5447 = vmatprep.subr.bf16.mxu0 %v6450_v0  ;;  %v1291_v61 = vpack.c.bf16 %v4164_v56, %v7338_v15 }
 0x16a   :  { %v519_v6 = vrot.slane %v518_v62, 1  ;;  %v529_v63 = vadd.f32 %v528_v1, %v527_v58  ;;  %5467 = vmatprep.subr.bf16.mxu1 %v6450_v0  ;;  %v1245_v58 = vpack.c.bf16 %v4162_v55, %v7328_v53 }
 0x16c   :  { %v520_v9 = vadd.f32 %v519_v6, %v518_v62  ;;  %v530_v16 = vrot.slane %v529_v63, 1  ;;  %5448 = vmatpush3.bf16.msra.mxu0 %v6713_v10 }
 0x16d   :  { %5468 = vmatpush3.bf16.msra.mxu1 %v6717_v13  ;;  %5449 = vmatprep.subr.bf16.mxu0 %v6450_v0 }
 0x16e   :  { %v7307_v25 = vadd.f32 %v520_v9, %v315_v7  ;;  %v531_v26 = vadd.f32 %v530_v16, %v529_v63  ;;  %5469 = vmatprep.subr.bf16.mxu1 %v6450_v0 }
 0x170   :  { %v7310_v27 = vadd.f32 %v531_v26, %v326_v22  ;;  %5450 = vmatpush3.bf16.msra.mxu0 %v6733_v20 }
 0x171   :  { %5470 = vmatpush3.bf16.msra.mxu1 %v6737_v21  ;;  %5451 = vmatprep.subr.bf16.mxu0 %v6450_v0 }
 0x172   :  { %5471 = vmatprep.subr.bf16.mxu1 %v6450_v0 }
 0x174   :  { %5452 = vmatpush3.bf16.msra.mxu0 %v6753_v28 }
 0x175   :  { %5472 = vmatpush3.bf16.msra.mxu1 %v6757_v31  ;;  %5453 = vmatprep.subr.bf16.mxu0 %v6450_v0 }
 0x176   :  { %v576_v33 = vpop.f32.mrb[16].mxu0  ;;  %5473 = vmatprep.subr.bf16.mxu1 %v6450_v0 }
 0x177   :  { %v617_v37 = vpop.f32.mrb[16].mxu1  ;;  %v5181_v40 = vpop.f32.mrb[17].mxu0 }
 0x178   :  { %v618_v43 = vadd.f32 %v617_v37, %v576_v33  ;;  %v5201_v34 = vpop.f32.mrb[17].mxu1  ;;  %v579_v44 = vpop.f32.mrb[18].mxu0  ;;  %5454 = vmatpush3.bf16.msra.mxu0 %v6773_v38 }
 0x179   :  { %v620_v45 = vpop.f32.mrb[18].mxu1  ;;  %5474 = vmatpush3.bf16.msra.mxu1 %v6777_v39  ;;  %v5182_v50 = vpop.f32.mrb[19].mxu0  ;;  %5455 = vmatprep.subr.bf16.mxu0 %v6450_v0 }
 0x17a   :  { %v621_v52 = vadd.f32 %v620_v45, %v579_v44  ;;  %v5202_v19 = vpop.f32.mrb[19].mxu1  ;;  %5475 = vmatprep.subr.bf16.mxu1 %v6450_v0  ;;  %v4168_v44 = vld [vmem:[%s9060_s0 + $0x68] sm:$0x1] }
 0x17b   :  { %v1362_v56 = vpack.c.bf16 %v4168_v44, %v7328_v53 }
 0x17c   :  { %5456 = vmatpush3.bf16.msra.mxu0 %v6793_v46 }
 0x17d   :  { %5476 = vmatpush3.bf16.msra.mxu1 %v6797_v48  ;;  %5457 = vmatprep.subr.bf16.mxu0 %v6450_v0 }
 0x17e   :  { %5477 = vmatprep.subr.bf16.mxu1 %v6450_v0 }
 0x180   :  { %5458 = vmatpush3.bf16.msra.mxu0 %v6813_v54 }
 0x181   :  { %5478 = vmatpush3.bf16.msra.mxu1 %v6823_v57  ;;  %5483 = vmatprep.subr.bf16.mxu0 %v6450_v0 }
 0x182   :  { %5503 = vmatprep.subr.bf16.mxu1 %v6450_v0 }
 0x183   :  { %5460 = vmatmul.mubr.bf16.vlgmr.msra.gmra.mrb[44].mxu0 %v1245_v58 }
 0x184   :  { %5480 = vmatmul.mubr.bf16.vlgmr.msra.gmra.mrb[44].mxu1 %v1291_v61  ;;  %5484 = vmatpush3.bf16.msra.mxu0 %v6493_v4 }
 0x185   :  { %5504 = vmatpush3.bf16.msra.mxu1 %v6508_v8  ;;  %5485 = vmatprep.subr.bf16.mxu0 %v6450_v0 }
 0x186   :  { %5505 = vmatprep.subr.bf16.mxu1 %v6450_v0  ;;  %5499 = vmatprep.mubr.msk.bf16.mxu0 %vm6451_vm0, %v6450_v0 }
 0x187   :  { %5519 = vmatprep.mubr.msk.bf16.mxu1 %vm6451_vm0, %v6450_v0 }
 0x188   :  { %5486 = vmatpush3.bf16.msra.mxu0 %v6517_v11 }
 0x189   :  { %5506 = vmatpush3.bf16.msra.mxu1 %v6521_v12  ;;  %5487 = vmatprep.subr.bf16.mxu0 %v6450_v0 }
 0x18a   :  { %5507 = vmatprep.subr.bf16.mxu1 %v6450_v0 }
 0x18c   :  { %5488 = vmatpush3.bf16.msra.mxu0 %v6537_v17 }
 0x18d   :  { %5508 = vmatpush3.bf16.msra.mxu1 %v6541_v18  ;;  %5489 = vmatprep.subr.bf16.mxu0 %v6450_v0 }
 0x18e   :  { %5509 = vmatprep.subr.bf16.mxu1 %v6450_v0 }
 0x190   :  { %5490 = vmatpush3.bf16.msra.mxu0 %v6557_v23 }
 0x191   :  { %5510 = vmatpush3.bf16.msra.mxu1 %v6561_v24  ;;  %5491 = vmatprep.subr.bf16.mxu0 %v6450_v0 }
 0x192   :  { %5511 = vmatprep.subr.bf16.mxu1 %v6450_v0 }
 0x194   :  { %5492 = vmatpush3.bf16.msra.mxu0 %v6577_v29 }
 0x195   :  { %5512 = vmatpush3.bf16.msra.mxu1 %v6581_v30  ;;  %5493 = vmatprep.subr.bf16.mxu0 %v6450_v0 }
 0x196   :  { %v662_v62 = vpop.f32.mrb[20].mxu0  ;;  %5513 = vmatprep.subr.bf16.mxu1 %v6450_v0 }
 0x197   :  { %v669_v1 = vadd.f32 %v662_v62, %v618_v43  ;;  %v708_v5 = vpop.f32.mrb[20].mxu1  ;;  %v5221_v6 = vpop.f32.mrb[21].mxu0  ;;  %v4170_v43 = vld [vmem:[%s9060_s0 + $0x69] sm:$0x1] }
 0x198   :  { %v5241_v63 = vpop.f32.mrb[21].mxu1  ;;  %v665_v7 = vpop.f32.mrb[22].mxu0  ;;  %5494 = vmatpush3.bf16.msra.mxu0 %v6597_v35 }
 0x199   :  { %v715_v9 = vadd.f32 %v708_v5, %v669_v1  ;;  %v670_v16 = vadd.f32 %v665_v7, %v621_v52  ;;  %v711_v22 = vpop.f32.mrb[22].mxu1  ;;  %5514 = vmatpush3.bf16.msra.mxu1 %v6601_v36  ;;  %v5222_v26 = vpop.f32.mrb[23].mxu0  ;;  %5495 = vmatprep.subr.bf16.mxu0 %v6450_v0  ;;  %v1365_v52 = vpack.c.bf16 %v4170_v43, %v7338_v15 }
 0x19a   :  { %v5242_v33 = vpop.f32.mrb[23].mxu1  ;;  %5515 = vmatprep.subr.bf16.mxu1 %v6450_v0 }
 0x19b   :  { %v716_v37 = vadd.f32 %v711_v22, %v670_v16  ;;  %v7379_v40 = vadd.f32 %v7145_v49, %v715_v9 }
 0x19c   :  { %5496 = vmatpush3.bf16.msra.mxu0 %v6617_v41 }
 0x19d   :  { %v718_v34 = vadd.f32 %v7145_v49, %v716_v37  ;;  %5516 = vmatpush3.bf16.msra.mxu1 %v6621_v42  ;;  %5497 = vmatprep.subr.bf16.mxu0 %v6450_v0  ;;  %v728_v19 = vmul.f32 %v7379_v40, %v7379_v40 }
 0x19e   :  { %5517 = vmatprep.subr.bf16.mxu1 %v6450_v0 }
 0x19f   :  { %v719_v45 = vsel %vm307_vm1, %v718_v34, 0.0  ;;  %v729_v50 = vmul.f32 %v718_v34, %v718_v34  ;;  %4136 = vst [vmem:[%s9062_s5 + $0x28] sm:$0x1] %v718_v34 }
 0x1a0   :  { %v720_v55 = vadd.f32 %v719_v45, %v7379_v40  ;;  %5498 = vmatpush3.bf16.msra.mxu0 %v6637_v47 }
 0x1a1   :  { %v730_v58 = vsel %vm307_vm1, %v729_v50, 0.0  ;;  %5518 = vmatpush3.bf16.msra.mxu1 %v6650_v51  ;;  %5523 = vmatprep.subr.bf16.mxu0 %v6450_v0 }
 0x1a2   :  { %v721_v61 = vrot.slane %v720_v55, 4  ;;  %v731_v62 = vadd.f32 %v730_v58, %v728_v19  ;;  %5543 = vmatprep.subr.bf16.mxu1 %v6450_v0  ;;  %v4172_v58 = vld [vmem:[%s9060_s0 + $0x78] sm:$0x1] }
 0x1a3   :  { %5500 = vmatmul.mubr.bf16.vlgmr.msra.gmra.mrb[48].mxu0 %v1365_v52 }
 0x1a4   :  { %v722_v15 = vadd.f32 %v721_v61, %v720_v55  ;;  %v732_v1 = vrot.slane %v731_v62, 4  ;;  %5520 = vmatmul.mubr.bf16.vlgmr.msra.gmra.mrb[48].mxu1 %v1362_v56  ;;  %5524 = vmatpush3.bf16.msra.mxu0 %v6669_v59  ;;  %v7444_v56 = vld [vmem:[%s9060_s0 + $0x70] sm:$0xff] }
 0x1a5   :  { %5544 = vmatpush3.bf16.msra.mxu1 %v6673_v60  ;;  %5525 = vmatprep.subr.bf16.mxu0 %v6450_v0  ;;  %v7454_v61 = vld [vmem:[%s9060_s0 + $0x71] sm:$0xff] }
 0x1a6   :  { %v723_v53 = vrot.slane %v722_v15, 2  ;;  %v733_v5 = vadd.f32 %v732_v1, %v731_v62  ;;  %5545 = vmatprep.subr.bf16.mxu1 %v6450_v0  ;;  %5539 = vmatprep.mubr.msk.bf16.mxu0 %vm6451_vm0, %v6450_v0  ;;  %v4174_v62 = vld [vmem:[%s9060_s0 + $0x79] sm:$0x1] }
 0x1a7   :  { %5559 = vmatprep.mubr.msk.bf16.mxu1 %vm6451_vm0, %v6450_v0  ;;  %v1497_v1 = vpack.c.bf16 %v4174_v62, %v7454_v61 }
 0x1a8   :  { %v724_v6 = vadd.f32 %v723_v53, %v722_v15  ;;  %v734_v63 = vrot.slane %v733_v5, 2  ;;  %5526 = vmatpush3.bf16.msra.mxu0 %v6689_v2  ;;  %v1451_v15 = vpack.c.bf16 %v4172_v58, %v7444_v56 }
 0x1a9   :  { %5546 = vmatpush3.bf16.msra.mxu1 %v6693_v3  ;;  %5527 = vmatprep.subr.bf16.mxu0 %v6450_v0 }
 0x1aa   :  { %v725_v7 = vrot.slane %v724_v6, 1  ;;  %v735_v9 = vadd.f32 %v734_v63, %v733_v5  ;;  %5547 = vmatprep.subr.bf16.mxu1 %v6450_v0 }
 0x1ac   :  { %v726_v16 = vadd.f32 %v725_v7, %v724_v6  ;;  %v736_v22 = vrot.slane %v735_v9, 1  ;;  %5528 = vmatpush3.bf16.msra.mxu0 %v6713_v10 }
 0x1ad   :  { %5548 = vmatpush3.bf16.msra.mxu1 %v6717_v13  ;;  %5529 = vmatprep.subr.bf16.mxu0 %v6450_v0 }
 0x1ae   :  { %v7422_v26 = vadd.f32 %v726_v16, %v7307_v25  ;;  %v737_v33 = vadd.f32 %v736_v22, %v735_v9  ;;  %5549 = vmatprep.subr.bf16.mxu1 %v6450_v0 }
 0x1b0   :  { %v7426_v37 = vadd.f32 %v737_v33, %v7310_v27  ;;  %5530 = vmatpush3.bf16.msra.mxu0 %v6733_v20 }
 0x1b1   :  { %5550 = vmatpush3.bf16.msra.mxu1 %v6737_v21  ;;  %5531 = vmatprep.subr.bf16.mxu0 %v6450_v0 }
 0x1b2   :  { %5551 = vmatprep.subr.bf16.mxu1 %v6450_v0 }
 0x1b4   :  { %5532 = vmatpush3.bf16.msra.mxu0 %v6753_v28 }
 0x1b5   :  { %5552 = vmatpush3.bf16.msra.mxu1 %v6757_v31  ;;  %5533 = vmatprep.subr.bf16.mxu0 %v6450_v0 }
 0x1b6   :  { %v782_v25 = vpop.f32.mrb[24].mxu0  ;;  %5553 = vmatprep.subr.bf16.mxu1 %v6450_v0 }
 0x1b7   :  { %v823_v43 = vpop.f32.mrb[24].mxu1  ;;  %v5261_v27 = vpop.f32.mrb[25].mxu0 }
 0x1b8   :  { %v824_v34 = vadd.f32 %v823_v43, %v782_v25  ;;  %v5281_v44 = vpop.f32.mrb[25].mxu1  ;;  %v785_v45 = vpop.f32.mrb[26].mxu0  ;;  %5534 = vmatpush3.bf16.msra.mxu0 %v6773_v38 }
 0x1b9   :  { %v826_v50 = vpop.f32.mrb[26].mxu1  ;;  %5554 = vmatpush3.bf16.msra.mxu1 %v6777_v39  ;;  %v5262_v52 = vpop.f32.mrb[27].mxu0  ;;  %5535 = vmatprep.subr.bf16.mxu0 %v6450_v0  ;;  %v4180_v44 = vld [vmem:[%s9060_s0 + $0x79] sm:$0x1] }
 0x1ba   :  { %v827_v19 = vadd.f32 %v826_v50, %v785_v45  ;;  %v5282_v55 = vpop.f32.mrb[27].mxu1  ;;  %5555 = vmatprep.subr.bf16.mxu1 %v6450_v0  ;;  %v4178_v50 = vld [vmem:[%s9060_s0 + $0x78] sm:$0x1] }
 0x1bb   :  { %v1571_v55 = vpack.c.bf16 %v4180_v44, %v7454_v61 }
 0x1bc   :  { %5536 = vmatpush3.bf16.msra.mxu0 %v6793_v46 }
 0x1bd   :  { %5556 = vmatpush3.bf16.msra.mxu1 %v6797_v48  ;;  %5537 = vmatprep.subr.bf16.mxu0 %v6450_v0 }
 0x1be   :  { %5557 = vmatprep.subr.bf16.mxu1 %v6450_v0 }
 0x1c0   :  { %5538 = vmatpush3.bf16.msra.mxu0 %v6813_v54 }
 0x1c1   :  { %5558 = vmatpush3.bf16.msra.mxu1 %v6823_v57  ;;  %5563 = vmatprep.subr.bf16.mxu0 %v6450_v0 }
 0x1c2   :  { %5583 = vmatprep.subr.bf16.mxu1 %v6450_v0 }
 0x1c3   :  { %5540 = vmatmul.mubr.bf16.vlgmr.msra.gmra.mrb[52].mxu0 %v1451_v15  ;;  %v1568_v15 = vpack.c.bf16 %v4178_v50, %v7444_v56 }
 0x1c4   :  { %5560 = vmatmul.mubr.bf16.vlgmr.msra.gmra.mrb[52].mxu1 %v1497_v1  ;;  %5564 = vmatpush3.bf16.msra.mxu0 %v6493_v4 }
 0x1c5   :  { %5584 = vmatpush3.bf16.msra.mxu1 %v6508_v8  ;;  %5565 = vmatprep.subr.bf16.mxu0 %v6450_v0 }
 0x1c6   :  { %5585 = vmatprep.subr.bf16.mxu1 %v6450_v0  ;;  %5579 = vmatprep.mubr.msk.bf16.mxu0 %vm6451_vm0, %v6450_v0 }
 0x1c7   :  { %5599 = vmatprep.mubr.msk.bf16.mxu1 %vm6451_vm0, %v6450_v0 }
 0x1c8   :  { %5566 = vmatpush3.bf16.msra.mxu0 %v6517_v11 }
 0x1c9   :  { %5586 = vmatpush3.bf16.msra.mxu1 %v6521_v12  ;;  %5567 = vmatprep.subr.bf16.mxu0 %v6450_v0 }
 0x1ca   :  { %5587 = vmatprep.subr.bf16.mxu1 %v6450_v0 }
 0x1cc   :  { %5568 = vmatpush3.bf16.msra.mxu0 %v6537_v17 }
 0x1cd   :  { %5588 = vmatpush3.bf16.msra.mxu1 %v6541_v18  ;;  %5569 = vmatprep.subr.bf16.mxu0 %v6450_v0 }
 0x1ce   :  { %5589 = vmatprep.subr.bf16.mxu1 %v6450_v0 }
 0x1d0   :  { %5570 = vmatpush3.bf16.msra.mxu0 %v6557_v23 }
 0x1d1   :  { %5590 = vmatpush3.bf16.msra.mxu1 %v6561_v24  ;;  %5571 = vmatprep.subr.bf16.mxu0 %v6450_v0 }
 0x1d2   :  { %5591 = vmatprep.subr.bf16.mxu1 %v6450_v0 }
 0x1d4   :  { %5572 = vmatpush3.bf16.msra.mxu0 %v6577_v29 }
 0x1d5   :  { %5592 = vmatpush3.bf16.msra.mxu1 %v6581_v30  ;;  %5573 = vmatprep.subr.bf16.mxu0 %v6450_v0 }
 0x1d6   :  { %v868_v53 = vpop.f32.mrb[28].mxu0  ;;  %5593 = vmatprep.subr.bf16.mxu1 %v6450_v0 }
 0x1d7   :  { %v875_v5 = vadd.f32 %v868_v53, %v824_v34  ;;  %v914_v6 = vpop.f32.mrb[28].mxu1  ;;  %v5301_v63 = vpop.f32.mrb[29].mxu0 }
 0x1d8   :  { %v5321_v7 = vpop.f32.mrb[29].mxu1  ;;  %v871_v9 = vpop.f32.mrb[30].mxu0  ;;  %5574 = vmatpush3.bf16.msra.mxu0 %v6597_v35 }
 0x1d9   :  { %v921_v16 = vadd.f32 %v914_v6, %v875_v5  ;;  %v876_v22 = vadd.f32 %v871_v9, %v827_v19  ;;  %v917_v33 = vpop.f32.mrb[30].mxu1  ;;  %5594 = vmatpush3.bf16.msra.mxu1 %v6601_v36  ;;  %v5302_v25 = vpop.f32.mrb[31].mxu0  ;;  %5575 = vmatprep.subr.bf16.mxu0 %v6450_v0 }
 0x1da   :  { %v5322_v43 = vpop.f32.mrb[31].mxu1  ;;  %5595 = vmatprep.subr.bf16.mxu1 %v6450_v0 }
 0x1db   :  { %v922_v27 = vadd.f32 %v917_v33, %v876_v22  ;;  %v7495_v34 = vadd.f32 %v7145_v49, %v921_v16 }
 0x1dc   :  { %5576 = vmatpush3.bf16.msra.mxu0 %v6617_v41 }
 0x1dd   :  { %v924_v45 = vadd.f32 %v7145_v49, %v922_v27  ;;  %5596 = vmatpush3.bf16.msra.mxu1 %v6621_v42  ;;  %5577 = vmatprep.subr.bf16.mxu0 %v6450_v0  ;;  %v934_v58 = vmul.f32 %v7495_v34, %v7495_v34 }
 0x1de   :  { %5597 = vmatprep.subr.bf16.mxu1 %v6450_v0 }
 0x1df   :  { %v925_v52 = vsel %vm307_vm1, %v924_v45, 0.0  ;;  %v935_v19 = vmul.f32 %v924_v45, %v924_v45  ;;  %4146 = vst [vmem:[%s9062_s5 + $0x38] sm:$0x1] %v924_v45 }
 0x1e0   :  { %v926_v62 = vadd.f32 %v925_v52, %v7495_v34  ;;  %5578 = vmatpush3.bf16.msra.mxu0 %v6637_v47 }
 0x1e1   :  { %v936_v1 = vsel %vm307_vm1, %v935_v19, 0.0  ;;  %5598 = vmatpush3.bf16.msra.mxu1 %v6650_v51  ;;  %5603 = vmatprep.subr.bf16.mxu0 %v6450_v0 }
 0x1e2   :  { %v927_v53 = vrot.slane %v926_v62, 4  ;;  %v937_v5 = vadd.f32 %v936_v1, %v934_v58  ;;  %5623 = vmatprep.subr.bf16.mxu1 %v6450_v0  ;;  %v7560_v1 = vld [vmem:[%s9060_s0 + $0x80] sm:$0xff] }
 0x1e3   :  { %5580 = vmatmul.mubr.bf16.vlgmr.msra.gmra.mrb[56].mxu0 %v1571_v55 }
 0x1e4   :  { %v928_v61 = vadd.f32 %v927_v53, %v926_v62  ;;  %v938_v6 = vrot.slane %v937_v5, 4  ;;  %5600 = vmatmul.mubr.bf16.vlgmr.msra.gmra.mrb[56].mxu1 %v1568_v15  ;;  %5604 = vmatpush3.bf16.msra.mxu0 %v6669_v59  ;;  %v4182_v53 = vld [vmem:[%s9060_s0 + $0x88] sm:$0x1] }
 0x1e5   :  { %5624 = vmatpush3.bf16.msra.mxu1 %v6673_v60  ;;  %5605 = vmatprep.subr.bf16.mxu0 %v6450_v0 }
 0x1e6   :  { %v929_v56 = vrot.slane %v928_v61, 2  ;;  %v939_v63 = vadd.f32 %v938_v6, %v937_v5  ;;  %5625 = vmatprep.subr.bf16.mxu1 %v6450_v0  ;;  %5619 = vmatprep.mubr.msk.bf16.mxu0 %vm6451_vm0, %v6450_v0  ;;  %v7570_v5 = vld [vmem:[%s9060_s0 + $0x81] sm:$0xff]  ;;  %v1657_v6 = vpack.c.bf16 %v4182_v53, %v7560_v1 }
 0x1e7   :  { %5639 = vmatprep.mubr.msk.bf16.mxu1 %vm6451_vm0, %v6450_v0 }
 0x1e8   :  { %v930_v7 = vadd.f32 %v929_v56, %v928_v61  ;;  %v940_v9 = vrot.slane %v939_v63, 2  ;;  %5606 = vmatpush3.bf16.msra.mxu0 %v6689_v2  ;;  %v4184_v61 = vld [vmem:[%s9060_s0 + $0x89] sm:$0x1] }
 0x1e9   :  { %5626 = vmatpush3.bf16.msra.mxu1 %v6693_v3  ;;  %5607 = vmatprep.subr.bf16.mxu0 %v6450_v0  ;;  %v1703_v56 = vpack.c.bf16 %v4184_v61, %v7570_v5 }
 0x1ea   :  { %v931_v16 = vrot.slane %v930_v7, 1  ;;  %v941_v22 = vadd.f32 %v940_v9, %v939_v63  ;;  %5627 = vmatprep.subr.bf16.mxu1 %v6450_v0 }
 0x1ec   :  { %v932_v33 = vadd.f32 %v931_v16, %v930_v7  ;;  %v942_v25 = vrot.slane %v941_v22, 1  ;;  %5608 = vmatpush3.bf16.msra.mxu0 %v6713_v10 }
 0x1ed   :  { %5628 = vmatpush3.bf16.msra.mxu1 %v6717_v13  ;;  %5609 = vmatprep.subr.bf16.mxu0 %v6450_v0 }
 0x1ee   :  { %v7538_v43 = vadd.f32 %v932_v33, %v7422_v26  ;;  %v943_v27 = vadd.f32 %v942_v25, %v941_v22  ;;  %5629 = vmatprep.subr.bf16.mxu1 %v6450_v0 }
 0x1f0   :  { %v7542_v44 = vadd.f32 %v943_v27, %v7426_v37  ;;  %5610 = vmatpush3.bf16.msra.mxu0 %v6733_v20 }
 0x1f1   :  { %5630 = vmatpush3.bf16.msra.mxu1 %v6737_v21  ;;  %5611 = vmatprep.subr.bf16.mxu0 %v6450_v0 }
 0x1f2   :  { %5631 = vmatprep.subr.bf16.mxu1 %v6450_v0 }
 0x1f4   :  { %5612 = vmatpush3.bf16.msra.mxu0 %v6753_v28 }
 0x1f5   :  { %5632 = vmatpush3.bf16.msra.mxu1 %v6757_v31  ;;  %5613 = vmatprep.subr.bf16.mxu0 %v6450_v0 }
 0x1f6   :  { %v988_v26 = vpop.f32.mrb[32].mxu0  ;;  %5633 = vmatprep.subr.bf16.mxu1 %v6450_v0 }
 0x1f7   :  { %v1029_v45 = vpop.f32.mrb[32].mxu1  ;;  %v5341_v37 = vpop.f32.mrb[33].mxu0 }
 0x1f8   :  { %v1030_v50 = vadd.f32 %v1029_v45, %v988_v26  ;;  %v5361_v52 = vpop.f32.mrb[33].mxu1  ;;  %v991_v19 = vpop.f32.mrb[34].mxu0  ;;  %5614 = vmatpush3.bf16.msra.mxu0 %v6773_v38 }
 0x1f9   :  { %v1032_v55 = vpop.f32.mrb[34].mxu1  ;;  %5634 = vmatpush3.bf16.msra.mxu1 %v6777_v39  ;;  %v5342_v58 = vpop.f32.mrb[35].mxu0  ;;  %5615 = vmatprep.subr.bf16.mxu0 %v6450_v0 }
 0x1fa   :  { %v1033_v62 = vadd.f32 %v1032_v55, %v991_v19  ;;  %v5362_v15 = vpop.f32.mrb[35].mxu1  ;;  %5635 = vmatprep.subr.bf16.mxu1 %v6450_v0  ;;  %v4190_v19 = vld [vmem:[%s9060_s0 + $0x89] sm:$0x1]  ;;  %v4188_v58 = vld [vmem:[%s9060_s0 + $0x88] sm:$0x1] }
 0x1fb   :  { %v1777_v53 = vpack.c.bf16 %v4190_v19, %v7570_v5 }
 0x1fc   :  { %5616 = vmatpush3.bf16.msra.mxu0 %v6793_v46 }
 0x1fd   :  { %5636 = vmatpush3.bf16.msra.mxu1 %v6797_v48  ;;  %5617 = vmatprep.subr.bf16.mxu0 %v6450_v0 }
 0x1fe   :  { %5637 = vmatprep.subr.bf16.mxu1 %v6450_v0 }
 0x200   :  { %5618 = vmatpush3.bf16.msra.mxu0 %v6813_v54 }
 0x201   :  { %5638 = vmatpush3.bf16.msra.mxu1 %v6823_v57  ;;  %5643 = vmatprep.subr.bf16.mxu0 %v6450_v0 }
 0x202   :  { %5663 = vmatprep.subr.bf16.mxu1 %v6450_v0 }
 0x203   :  { %5620 = vmatmul.mubr.bf16.vlgmr.msra.gmra.mrb[60].mxu0 %v1657_v6  ;;  %v1774_v6 = vpack.c.bf16 %v4188_v58, %v7560_v1 }
 0x204   :  { %5640 = vmatmul.mubr.bf16.vlgmr.msra.gmra.mrb[60].mxu1 %v1703_v56  ;;  %5644 = vmatpush3.bf16.msra.mxu0 %v6493_v4 }
 0x205   :  { %5664 = vmatpush3.bf16.msra.mxu1 %v6508_v8  ;;  %5645 = vmatprep.subr.bf16.mxu0 %v6450_v0 }
 0x206   :  { %5665 = vmatprep.subr.bf16.mxu1 %v6450_v0  ;;  %5659 = vmatprep.mubr.msk.bf16.mxu0 %vm6451_vm0, %v6450_v0 }
 0x207   :  { %5679 = vmatprep.mubr.msk.bf16.mxu1 %vm6451_vm0, %v6450_v0 }
 0x208   :  { %5646 = vmatpush3.bf16.msra.mxu0 %v6517_v11 }
 0x209   :  { %5666 = vmatpush3.bf16.msra.mxu1 %v6521_v12  ;;  %5647 = vmatprep.subr.bf16.mxu0 %v6450_v0 }
 0x20a   :  { %5667 = vmatprep.subr.bf16.mxu1 %v6450_v0 }
 0x20c   :  { %5648 = vmatpush3.bf16.msra.mxu0 %v6537_v17 }
 0x20d   :  { %5668 = vmatpush3.bf16.msra.mxu1 %v6541_v18  ;;  %5649 = vmatprep.subr.bf16.mxu0 %v6450_v0 }
 0x20e   :  { %5669 = vmatprep.subr.bf16.mxu1 %v6450_v0 }
 0x210   :  { %5650 = vmatpush3.bf16.msra.mxu0 %v6557_v23 }
 0x211   :  { %5670 = vmatpush3.bf16.msra.mxu1 %v6561_v24  ;;  %5651 = vmatprep.subr.bf16.mxu0 %v6450_v0 }
 0x212   :  { %5671 = vmatprep.subr.bf16.mxu1 %v6450_v0 }
 0x214   :  { %5652 = vmatpush3.bf16.msra.mxu0 %v6577_v29 }
 0x215   :  { %5672 = vmatpush3.bf16.msra.mxu1 %v6581_v30  ;;  %5653 = vmatprep.subr.bf16.mxu0 %v6450_v0 }
 0x216   :  { %v1074_v63 = vpop.f32.mrb[36].mxu0  ;;  %5673 = vmatprep.subr.bf16.mxu1 %v6450_v0 }
 0x217   :  { %v1081_v7 = vadd.f32 %v1074_v63, %v1030_v50  ;;  %v1120_v9 = vpop.f32.mrb[36].mxu1  ;;  %v5381_v16 = vpop.f32.mrb[37].mxu0 }
 0x218   :  { %v5401_v22 = vpop.f32.mrb[37].mxu1  ;;  %v1077_v33 = vpop.f32.mrb[38].mxu0  ;;  %5654 = vmatpush3.bf16.msra.mxu0 %v6597_v35 }
 0x219   :  { %v1127_v25 = vadd.f32 %v1120_v9, %v1081_v7  ;;  %v1082_v27 = vadd.f32 %v1077_v33, %v1033_v62  ;;  %v1123_v26 = vpop.f32.mrb[38].mxu1  ;;  %5674 = vmatpush3.bf16.msra.mxu1 %v6601_v36  ;;  %v5382_v45 = vpop.f32.mrb[39].mxu0  ;;  %5655 = vmatprep.subr.bf16.mxu0 %v6450_v0 }
 0x21a   :  { %v5402_v37 = vpop.f32.mrb[39].mxu1  ;;  %5675 = vmatprep.subr.bf16.mxu1 %v6450_v0 }
 0x21b   :  { %v1128_v52 = vadd.f32 %v1123_v26, %v1082_v27  ;;  %v7611_v50 = vadd.f32 %v7145_v49, %v1127_v25 }
 0x21c   :  { %5656 = vmatpush3.bf16.msra.mxu0 %v6617_v41 }
 0x21d   :  { %v1130_v55 = vadd.f32 %v7145_v49, %v1128_v52  ;;  %5676 = vmatpush3.bf16.msra.mxu1 %v6621_v42  ;;  %5657 = vmatprep.subr.bf16.mxu0 %v6450_v0  ;;  %v1140_v49 = vmul.f32 %v7611_v50, %v7611_v50 }
 0x21e   :  { %5677 = vmatprep.subr.bf16.mxu1 %v6450_v0 }
 0x21f   :  { %v1131_v62 = vsel %vm307_vm1, %v1130_v55, 0.0  ;;  %v1141_v15 = vmul.f32 %v1130_v55, %v1130_v55  ;;  %4156 = vst [vmem:[%s9062_s5 + $0x48] sm:$0x1] %v1130_v55 }
 0x220   :  { %v1132_v61 = vadd.f32 %v1131_v62, %v7611_v50  ;;  %5658 = vmatpush3.bf16.msra.mxu0 %v6637_v47 }
 0x221   :  { %v1142_v56 = vsel %vm307_vm1, %v1141_v15, 0.0  ;;  %5678 = vmatpush3.bf16.msra.mxu1 %v6650_v51  ;;  %5683 = vmatprep.subr.bf16.mxu0 %v6450_v0 }
 0x222   :  { %v1133_v63 = vrot.slane %v1132_v61, 4  ;;  %v1143_v7 = vadd.f32 %v1142_v56, %v1140_v49  ;;  %5703 = vmatprep.subr.bf16.mxu1 %v6450_v0  ;;  %v4191_v56 = vld [vmem:[%s9060_s0 + $0x90] sm:$0xff] }
 0x223   :  { %5660 = vmatmul.mubr.bf16.vlgmr.msra.gmra.mrb[64].mxu0 %v1777_v53 }
 0x224   :  { %v1134_v5 = vadd.f32 %v1133_v63, %v1132_v61  ;;  %v1144_v9 = vrot.slane %v1143_v7, 4  ;;  %5680 = vmatmul.mubr.bf16.vlgmr.msra.gmra.mrb[64].mxu1 %v1774_v6  ;;  %5684 = vmatpush3.bf16.msra.mxu0 %v6669_v59  ;;  %v4192_v63 = vld [vmem:[%s9060_s0 + $0x98] sm:$0x1] }
 0x225   :  { %5704 = vmatpush3.bf16.msra.mxu1 %v6673_v60  ;;  %5685 = vmatprep.subr.bf16.mxu0 %v6450_v0 }
 0x226   :  { %v1135_v1 = vrot.slane %v1134_v5, 2  ;;  %v1145_v16 = vadd.f32 %v1144_v9, %v1143_v7  ;;  %5705 = vmatprep.subr.bf16.mxu1 %v6450_v0  ;;  %5699 = vmatprep.mubr.msk.bf16.mxu0 %vm6451_vm0, %v6450_v0  ;;  %v4193_v7 = vld [vmem:[%s9060_s0 + $0x91] sm:$0xff]  ;;  %v1863_v9 = vpack.c.bf16 %v4192_v63, %v4191_v56  ;;  %v4198_v56 = vld [vmem:[%s9060_s0 + $0xa8] sm:$0x1] }
 0x227   :  { %5719 = vmatprep.mubr.msk.bf16.mxu1 %vm6451_vm0, %v6450_v0 }
 0x228   :  { %v1136_v22 = vadd.f32 %v1135_v1, %v1134_v5  ;;  %v1146_v33 = vrot.slane %v1145_v16, 2  ;;  %5686 = vmatpush3.bf16.msra.mxu0 %v6689_v2  ;;  %v4194_v5 = vld [vmem:[%s9060_s0 + $0x99] sm:$0x1] }
 0x229   :  { %5706 = vmatpush3.bf16.msra.mxu1 %v6693_v3  ;;  %5687 = vmatprep.subr.bf16.mxu0 %v6450_v0  ;;  %v1909_v1 = vpack.c.bf16 %v4194_v5, %v4193_v7 }
 0x22a   :  { %v1137_v25 = vrot.slane %v1136_v22, 1  ;;  %v1147_v27 = vadd.f32 %v1146_v33, %v1145_v16  ;;  %5707 = vmatprep.subr.bf16.mxu1 %v6450_v0 }
 0x22c   :  { %v1138_v26 = vadd.f32 %v1137_v25, %v1136_v22  ;;  %v1148_v45 = vrot.slane %v1147_v27, 1  ;;  %5688 = vmatpush3.bf16.msra.mxu0 %v6713_v10 }
 0x22d   :  { %5708 = vmatpush3.bf16.msra.mxu1 %v6717_v13  ;;  %5689 = vmatprep.subr.bf16.mxu0 %v6450_v0 }
 0x22e   :  { %v7654_v37 = vadd.f32 %v1138_v26, %v7538_v43  ;;  %v1149_v52 = vadd.f32 %v1148_v45, %v1147_v27  ;;  %5709 = vmatprep.subr.bf16.mxu1 %v6450_v0 }
 0x230   :  { %v7658_v19 = vadd.f32 %v1149_v52, %v7542_v44  ;;  %5690 = vmatpush3.bf16.msra.mxu0 %v6733_v20 }
 0x231   :  { %5710 = vmatpush3.bf16.msra.mxu1 %v6737_v21  ;;  %5691 = vmatprep.subr.bf16.mxu0 %v6450_v0 }
 0x232   :  { %5711 = vmatprep.subr.bf16.mxu1 %v6450_v0 }
 0x234   :  { %5692 = vmatpush3.bf16.msra.mxu0 %v6753_v28 }
 0x235   :  { %5712 = vmatpush3.bf16.msra.mxu1 %v6757_v31  ;;  %5693 = vmatprep.subr.bf16.mxu0 %v6450_v0 }
 0x236   :  { %v1194_v43 = vpop.f32.mrb[40].mxu0  ;;  %5713 = vmatprep.subr.bf16.mxu1 %v6450_v0 }
 0x237   :  { %v1235_v55 = vpop.f32.mrb[40].mxu1  ;;  %v5421_v44 = vpop.f32.mrb[41].mxu0 }
 0x238   :  { %v1236_v58 = vadd.f32 %v1235_v55, %v1194_v43  ;;  %v5441_v62 = vpop.f32.mrb[41].mxu1  ;;  %v1197_v15 = vpop.f32.mrb[42].mxu0  ;;  %5694 = vmatpush3.bf16.msra.mxu0 %v6773_v38 }
 0x239   :  { %v1238_v53 = vpop.f32.mrb[42].mxu1  ;;  %5714 = vmatpush3.bf16.msra.mxu1 %v6777_v39  ;;  %v5422_v49 = vpop.f32.mrb[43].mxu0  ;;  %5695 = vmatprep.subr.bf16.mxu0 %v6450_v0 }
 0x23a   :  { %v1239_v61 = vadd.f32 %v1238_v53, %v1197_v15  ;;  %v5442_v6 = vpop.f32.mrb[43].mxu1  ;;  %5715 = vmatprep.subr.bf16.mxu1 %v6450_v0  ;;  %v4199_v53 = vld [vmem:[%s9060_s0 + $0xa1] sm:$0xff]  ;;  %v4200_v49 = vld [vmem:[%s9060_s0 + $0xa9] sm:$0x1] }
 0x23b   :  { %v4197_v6 = vld [vmem:[%s9060_s0 + $0xa0] sm:$0xff]  ;;  %v1984_v5 = vpack.c.bf16 %v4200_v49, %v4199_v53 }
 0x23c   :  { %5696 = vmatpush3.bf16.msra.mxu0 %v6793_v46 }
 0x23d   :  { %5716 = vmatpush3.bf16.msra.mxu1 %v6797_v48  ;;  %5697 = vmatprep.subr.bf16.mxu0 %v6450_v0 }
 0x23e   :  { %5717 = vmatprep.subr.bf16.mxu1 %v6450_v0 }
 0x240   :  { %5698 = vmatpush3.bf16.msra.mxu0 %v6813_v54 }
 0x241   :  { %5718 = vmatpush3.bf16.msra.mxu1 %v6823_v57  ;;  %5723 = vmatprep.subr.bf16.mxu0 %v6450_v0 }
 0x242   :  { %5743 = vmatprep.subr.bf16.mxu1 %v6450_v0 }
 0x243   :  { %5700 = vmatmul.mubr.bf16.vlgmr.msra.gmra.mrb[68].mxu0 %v1863_v9 }
 0x244   :  { %5720 = vmatmul.mubr.bf16.vlgmr.msra.gmra.mrb[68].mxu1 %v1909_v1  ;;  %5724 = vmatpush3.bf16.msra.mxu0 %v6493_v4 }
 0x245   :  { %5744 = vmatpush3.bf16.msra.mxu1 %v6508_v8  ;;  %5725 = vmatprep.subr.bf16.mxu0 %v6450_v0 }
 0x246   :  { %5745 = vmatprep.subr.bf16.mxu1 %v6450_v0  ;;  %5739 = vmatprep.mubr.msk.bf16.mxu0 %vm6451_vm0, %v6450_v0 }
 0x247   :  { %5759 = vmatprep.mubr.msk.bf16.mxu1 %vm6451_vm0, %v6450_v0 }
 0x248   :  { %5726 = vmatpush3.bf16.msra.mxu0 %v6517_v11 }
 0x249   :  { %5746 = vmatpush3.bf16.msra.mxu1 %v6521_v12  ;;  %5727 = vmatprep.subr.bf16.mxu0 %v6450_v0 }
 0x24a   :  { %5747 = vmatprep.subr.bf16.mxu1 %v6450_v0 }
 0x24c   :  { %5728 = vmatpush3.bf16.msra.mxu0 %v6537_v17 }
 0x24d   :  { %5748 = vmatpush3.bf16.msra.mxu1 %v6541_v18  ;;  %5729 = vmatprep.subr.bf16.mxu0 %v6450_v0 }
 0x24e   :  { %5749 = vmatprep.subr.bf16.mxu1 %v6450_v0 }
 0x250   :  { %5730 = vmatpush3.bf16.msra.mxu0 %v6557_v23 }
 0x251   :  { %5750 = vmatpush3.bf16.msra.mxu1 %v6561_v24  ;;  %5731 = vmatprep.subr.bf16.mxu0 %v6450_v0 }
 0x252   :  { %5751 = vmatprep.subr.bf16.mxu1 %v6450_v0 }
 0x254   :  { %5732 = vmatpush3.bf16.msra.mxu0 %v6577_v29 }
 0x255   :  { %5752 = vmatpush3.bf16.msra.mxu1 %v6581_v30  ;;  %5733 = vmatprep.subr.bf16.mxu0 %v6450_v0 }
 0x256   :  { %v1280_v16 = vpop.f32.mrb[44].mxu0  ;;  %5753 = vmatprep.subr.bf16.mxu1 %v6450_v0 }
 0x257   :  { %v1287_v22 = vadd.f32 %v1280_v16, %v1236_v58  ;;  %v1326_v33 = vpop.f32.mrb[44].mxu1  ;;  %v5461_v25 = vpop.f32.mrb[45].mxu0  ;;  %v7723_v58 = vld [vmem:[%s9061_s2] ss:$0 sm:$0xff]  ;;  %v1981_v16 = vpack.c.bf16 %v4198_v56, %v4197_v6 }
 0x258   :  { %v5481_v27 = vpop.f32.mrb[45].mxu1  ;;  %v1283_v26 = vpop.f32.mrb[46].mxu0  ;;  %5734 = vmatpush3.bf16.msra.mxu0 %v6597_v35 }
 0x259   :  { %v1333_v45 = vadd.f32 %v1326_v33, %v1287_v22  ;;  %v1288_v52 = vadd.f32 %v1283_v26, %v1239_v61  ;;  %v1329_v43 = vpop.f32.mrb[46].mxu1  ;;  %5754 = vmatpush3.bf16.msra.mxu1 %v6601_v36  ;;  %v5462_v55 = vpop.f32.mrb[47].mxu0  ;;  %5735 = vmatprep.subr.bf16.mxu0 %v6450_v0 }
 0x25a   :  { %v5482_v44 = vpop.f32.mrb[47].mxu1  ;;  %5755 = vmatprep.subr.bf16.mxu1 %v6450_v0 }
 0x25b   :  { %v1334_v62 = vadd.f32 %v1329_v43, %v1288_v52  ;;  %v7726_v15 = vadd.f32 %v7723_v58, %v1333_v45 }
 0x25c   :  { %5736 = vmatpush3.bf16.msra.mxu0 %v6617_v41 }
 0x25d   :  { %v1336_v61 = vadd.f32 %v7723_v58, %v1334_v62  ;;  %5756 = vmatpush3.bf16.msra.mxu1 %v6621_v42  ;;  %5737 = vmatprep.subr.bf16.mxu0 %v6450_v0  ;;  %v1346_v9 = vmul.f32 %v7726_v15, %v7726_v15 }
 0x25e   :  { %5757 = vmatprep.subr.bf16.mxu1 %v6450_v0 }
 0x25f   :  { %v1337_v63 = vsel %vm307_vm1, %v1336_v61, 0.0  ;;  %v1347_v7 = vmul.f32 %v1336_v61, %v1336_v61  ;;  %4166 = vst [vmem:[%s9062_s5 + $0x58] sm:$0x1] %v1336_v61 }
 0x260   :  { %v1338_v1 = vadd.f32 %v1337_v63, %v7726_v15  ;;  %5738 = vmatpush3.bf16.msra.mxu0 %v6637_v47 }
 0x261   :  { %v1348_v22 = vsel %vm307_vm1, %v1347_v7, 0.0  ;;  %5758 = vmatpush3.bf16.msra.mxu1 %v6650_v51  ;;  %5763 = vmatprep.subr.bf16.mxu0 %v6450_v0 }
 0x262   :  { %v1339_v33 = vrot.slane %v1338_v1, 4  ;;  %v1349_v25 = vadd.f32 %v1348_v22, %v1346_v9  ;;  %5783 = vmatprep.subr.bf16.mxu1 %v6450_v0 }
 0x263   :  { %5740 = vmatmul.mubr.bf16.vlgmr.msra.gmra.mrb[72].mxu0 %v1984_v5 }
 0x264   :  { %v1340_v27 = vadd.f32 %v1339_v33, %v1338_v1  ;;  %v1350_v26 = vrot.slane %v1349_v25, 4  ;;  %5760 = vmatmul.mubr.bf16.vlgmr.msra.gmra.mrb[72].mxu1 %v1981_v16  ;;  %5764 = vmatpush3.bf16.msra.mxu0 %v6669_v59 }
 0x265   :  { %5784 = vmatpush3.bf16.msra.mxu1 %v6673_v60  ;;  %5765 = vmatprep.subr.bf16.mxu0 %v6450_v0 }
 0x266   :  { %v1341_v45 = vrot.slane %v1340_v27, 2  ;;  %v1351_v52 = vadd.f32 %v1350_v26, %v1349_v25  ;;  %5785 = vmatprep.subr.bf16.mxu1 %v6450_v0  ;;  %5779 = vmatprep.mubr.msk.bf16.mxu0 %vm6451_vm0, %v6450_v0  ;;  %v7795_v25 = vld [vmem:[%s9060_s0 + $0xb0] sm:$0xff] }
 0x267   :  { %5799 = vmatprep.mubr.msk.bf16.mxu1 %vm6451_vm0, %v6450_v0  ;;  %v7805_v26 = vld [vmem:[%s9060_s0 + $0xb1] sm:$0xff] }
 0x268   :  { %v1342_v43 = vadd.f32 %v1341_v45, %v1340_v27  ;;  %v1352_v55 = vrot.slane %v1351_v52, 2  ;;  %5766 = vmatpush3.bf16.msra.mxu0 %v6689_v2  ;;  %v4202_v27 = vld [vmem:[%s9060_s0 + $0xb8] sm:$0x1]  ;;  %v4204_v45 = vld [vmem:[%s9060_s0 + $0xb9] sm:$0x1] }
 0x269   :  { %5786 = vmatpush3.bf16.msra.mxu1 %v6693_v3  ;;  %5767 = vmatprep.subr.bf16.mxu0 %v6450_v0 }
 0x26a   :  { %v1343_v44 = vrot.slane %v1342_v43, 1  ;;  %v1353_v62 = vadd.f32 %v1352_v55, %v1351_v52  ;;  %5787 = vmatprep.subr.bf16.mxu1 %v6450_v0  ;;  %v2070_v52 = vpack.c.bf16 %v4202_v27, %v7795_v25 }
 0x26c   :  { %v1344_v53 = vadd.f32 %v1343_v44, %v1342_v43  ;;  %v1354_v49 = vrot.slane %v1353_v62, 1  ;;  %5768 = vmatpush3.bf16.msra.mxu0 %v6713_v10  ;;  %v2116_v43 = vpack.c.bf16 %v4204_v45, %v7805_v26 }
 0x26d   :  { %5788 = vmatpush3.bf16.msra.mxu1 %v6717_v13  ;;  %5769 = vmatprep.subr.bf16.mxu0 %v6450_v0 }
 0x26e   :  { %v7773_v61 = vadd.f32 %v1344_v53, %v7654_v37  ;;  %v1355_v6 = vadd.f32 %v1354_v49, %v1353_v62  ;;  %5789 = vmatprep.subr.bf16.mxu1 %v6450_v0 }
 0x270   :  { %v7777_v56 = vadd.f32 %v1355_v6, %v7658_v19  ;;  %5770 = vmatpush3.bf16.msra.mxu0 %v6733_v20 }
 0x271   :  { %5790 = vmatpush3.bf16.msra.mxu1 %v6737_v21  ;;  %5771 = vmatprep.subr.bf16.mxu0 %v6450_v0 }
 0x272   :  { %5791 = vmatprep.subr.bf16.mxu1 %v6450_v0 }
 0x274   :  { %5772 = vmatpush3.bf16.msra.mxu0 %v6753_v28 }
 0x275   :  { %5792 = vmatpush3.bf16.msra.mxu1 %v6757_v31  ;;  %5773 = vmatprep.subr.bf16.mxu0 %v6450_v0 }
 0x276   :  { %v1400_v37 = vpop.f32.mrb[48].mxu0  ;;  %5793 = vmatprep.subr.bf16.mxu1 %v6450_v0 }
 0x277   :  { %v1441_v63 = vpop.f32.mrb[48].mxu1  ;;  %v5501_v19 = vpop.f32.mrb[49].mxu0 }
 0x278   :  { %v1442_v7 = vadd.f32 %v1441_v63, %v1400_v37  ;;  %v5521_v5 = vpop.f32.mrb[49].mxu1  ;;  %v1403_v9 = vpop.f32.mrb[50].mxu0  ;;  %5774 = vmatpush3.bf16.msra.mxu0 %v6773_v38 }
 0x279   :  { %v1444_v1 = vpop.f32.mrb[50].mxu1  ;;  %5794 = vmatpush3.bf16.msra.mxu1 %v6777_v39  ;;  %v5502_v16 = vpop.f32.mrb[51].mxu0  ;;  %5775 = vmatprep.subr.bf16.mxu0 %v6450_v0 }
 0x27a   :  { %v1445_v22 = vadd.f32 %v1444_v1, %v1403_v9  ;;  %v5522_v33 = vpop.f32.mrb[51].mxu1  ;;  %5795 = vmatprep.subr.bf16.mxu1 %v6450_v0  ;;  %v4210_v16 = vld [vmem:[%s9060_s0 + $0xb9] sm:$0x1] }
 0x27b   :  { %v4208_v33 = vld [vmem:[%s9060_s0 + $0xb8] sm:$0x1] }
 0x27c   :  { %5776 = vmatpush3.bf16.msra.mxu0 %v6793_v46 }
 0x27d   :  { %5796 = vmatpush3.bf16.msra.mxu1 %v6797_v48  ;;  %5777 = vmatprep.subr.bf16.mxu0 %v6450_v0 }
 0x27e   :  { %5797 = vmatprep.subr.bf16.mxu1 %v6450_v0 }
 0x280   :  { %5778 = vmatpush3.bf16.msra.mxu0 %v6813_v54 }
 0x281   :  { %5798 = vmatpush3.bf16.msra.mxu1 %v6823_v57  ;;  %5803 = vmatprep.subr.bf16.mxu0 %v6450_v0 }
 0x282   :  { %5823 = vmatprep.subr.bf16.mxu1 %v6450_v0 }
 0x283   :  { %5780 = vmatmul.mubr.bf16.vlgmr.msra.gmra.mrb[76].mxu0 %v2070_v52  ;;  %v2190_v52 = vpack.c.bf16 %v4210_v16, %v7805_v26 }
 0x284   :  { %5800 = vmatmul.mubr.bf16.vlgmr.msra.gmra.mrb[76].mxu1 %v2116_v43  ;;  %5804 = vmatpush3.bf16.msra.mxu0 %v6493_v4 }
 0x285   :  { %5824 = vmatpush3.bf16.msra.mxu1 %v6508_v8  ;;  %5805 = vmatprep.subr.bf16.mxu0 %v6450_v0 }
 0x286   :  { %5825 = vmatprep.subr.bf16.mxu1 %v6450_v0  ;;  %5819 = vmatprep.mubr.msk.bf16.mxu0 %vm6451_vm0, %v6450_v0 }
 0x287   :  { %5839 = vmatprep.mubr.msk.bf16.mxu1 %vm6451_vm0, %v6450_v0 }
 0x288   :  { %5806 = vmatpush3.bf16.msra.mxu0 %v6517_v11 }
 0x289   :  { %5826 = vmatpush3.bf16.msra.mxu1 %v6521_v12  ;;  %5807 = vmatprep.subr.bf16.mxu0 %v6450_v0 }
 0x28a   :  { %5827 = vmatprep.subr.bf16.mxu1 %v6450_v0 }
 0x28c   :  { %5808 = vmatpush3.bf16.msra.mxu0 %v6537_v17 }
 0x28d   :  { %5828 = vmatpush3.bf16.msra.mxu1 %v6541_v18  ;;  %5809 = vmatprep.subr.bf16.mxu0 %v6450_v0 }
 0x28e   :  { %5829 = vmatprep.subr.bf16.mxu1 %v6450_v0 }
 0x290   :  { %5810 = vmatpush3.bf16.msra.mxu0 %v6557_v23 }
 0x291   :  { %5830 = vmatpush3.bf16.msra.mxu1 %v6561_v24  ;;  %5811 = vmatprep.subr.bf16.mxu0 %v6450_v0 }
 0x292   :  { %5831 = vmatprep.subr.bf16.mxu1 %v6450_v0 }
 0x294   :  { %5812 = vmatpush3.bf16.msra.mxu0 %v6577_v29 }
 0x295   :  { %5832 = vmatpush3.bf16.msra.mxu1 %v6581_v30  ;;  %5813 = vmatprep.subr.bf16.mxu0 %v6450_v0 }
 0x296   :  { %v1486_v55 = vpop.f32.mrb[52].mxu0  ;;  %5833 = vmatprep.subr.bf16.mxu1 %v6450_v0 }
 0x297   :  { %v1493_v44 = vadd.f32 %v1486_v55, %v1442_v7  ;;  %v1532_v62 = vpop.f32.mrb[52].mxu1  ;;  %v5541_v53 = vpop.f32.mrb[53].mxu0 }
 0x298   :  { %v5561_v49 = vpop.f32.mrb[53].mxu1  ;;  %v1489_v6 = vpop.f32.mrb[54].mxu0  ;;  %5814 = vmatpush3.bf16.msra.mxu0 %v6597_v35 }
 0x299   :  { %v1539_v37 = vadd.f32 %v1532_v62, %v1493_v44  ;;  %v1494_v63 = vadd.f32 %v1489_v6, %v1445_v22  ;;  %v1535_v19 = vpop.f32.mrb[54].mxu1  ;;  %5834 = vmatpush3.bf16.msra.mxu1 %v6601_v36  ;;  %v5542_v5 = vpop.f32.mrb[55].mxu0  ;;  %5815 = vmatprep.subr.bf16.mxu0 %v6450_v0  ;;  %v2187_v44 = vpack.c.bf16 %v4208_v33, %v7795_v25 }
 0x29a   :  { %v5562_v9 = vpop.f32.mrb[55].mxu1  ;;  %5835 = vmatprep.subr.bf16.mxu1 %v6450_v0 }
 0x29b   :  { %v1540_v1 = vadd.f32 %v1535_v19, %v1494_v63  ;;  %v7846_v7 = vadd.f32 %v7723_v58, %v1539_v37 }
 0x29c   :  { %5816 = vmatpush3.bf16.msra.mxu0 %v6617_v41 }
 0x29d   :  { %v1542_v22 = vadd.f32 %v7723_v58, %v1540_v1  ;;  %5836 = vmatpush3.bf16.msra.mxu1 %v6621_v42  ;;  %5817 = vmatprep.subr.bf16.mxu0 %v6450_v0  ;;  %v1552_v43 = vmul.f32 %v7846_v7, %v7846_v7 }
 0x29e   :  { %5837 = vmatprep.subr.bf16.mxu1 %v6450_v0 }
 0x29f   :  { %v1543_v27 = vsel %vm307_vm1, %v1542_v22, 0.0  ;;  %v1553_v45 = vmul.f32 %v1542_v22, %v1542_v22  ;;  %4176 = vst [vmem:[%s9062_s5 + $0x68] sm:$0x1] %v1542_v22 }
 0x2a0   :  { %v1544_v55 = vadd.f32 %v1543_v27, %v7846_v7  ;;  %5818 = vmatpush3.bf16.msra.mxu0 %v6637_v47 }
 0x2a1   :  { %v1554_v62 = vsel %vm307_vm1, %v1553_v45, 0.0  ;;  %5838 = vmatpush3.bf16.msra.mxu1 %v6650_v51  ;;  %5843 = vmatprep.subr.bf16.mxu0 %v6450_v0 }
 0x2a2   :  { %v1545_v53 = vrot.slane %v1544_v55, 4  ;;  %v1555_v49 = vadd.f32 %v1554_v62, %v1552_v43  ;;  %5863 = vmatprep.subr.bf16.mxu1 %v6450_v0 }
 0x2a3   :  { %5820 = vmatmul.mubr.bf16.vlgmr.msra.gmra.mrb[80].mxu0 %v2190_v52 }
 0x2a4   :  { %v1546_v26 = vadd.f32 %v1545_v53, %v1544_v55  ;;  %v1556_v6 = vrot.slane %v1555_v49, 4  ;;  %5840 = vmatmul.mubr.bf16.vlgmr.msra.gmra.mrb[80].mxu1 %v2187_v44  ;;  %5844 = vmatpush3.bf16.msra.mxu0 %v6669_v59 }
 0x2a5   :  { %5864 = vmatpush3.bf16.msra.mxu1 %v6673_v60  ;;  %5845 = vmatprep.subr.bf16.mxu0 %v6450_v0 }
 0x2a6   :  { %v1547_v25 = vrot.slane %v1546_v26, 2  ;;  %v1557_v37 = vadd.f32 %v1556_v6, %v1555_v49  ;;  %5865 = vmatprep.subr.bf16.mxu1 %v6450_v0  ;;  %5859 = vmatprep.mubr.msk.bf16.mxu0 %vm6451_vm0, %v6450_v0  ;;  %v4212_v6 = vld [vmem:[%s9060_s0 + $0xc8] sm:$0x1] }
 0x2a7   :  { %5879 = vmatprep.mubr.msk.bf16.mxu1 %vm6451_vm0, %v6450_v0 }
 0x2a8   :  { %v1548_v63 = vadd.f32 %v1547_v25, %v1546_v26  ;;  %v1558_v19 = vrot.slane %v1557_v37, 2  ;;  %5846 = vmatpush3.bf16.msra.mxu0 %v6689_v2  ;;  %v7911_v26 = vld [vmem:[%s9060_s0 + $0xc0] sm:$0xff] }
 0x2a9   :  { %5866 = vmatpush3.bf16.msra.mxu1 %v6693_v3  ;;  %5847 = vmatprep.subr.bf16.mxu0 %v6450_v0  ;;  %v7921_v25 = vld [vmem:[%s9060_s0 + $0xc1] sm:$0xff] }
 0x2aa   :  { %v1549_v5 = vrot.slane %v1548_v63, 1  ;;  %v1559_v9 = vadd.f32 %v1558_v19, %v1557_v37  ;;  %5867 = vmatprep.subr.bf16.mxu1 %v6450_v0  ;;  %v4214_v37 = vld [vmem:[%s9060_s0 + $0xc9] sm:$0x1] }
 0x2ab   :  { %v2322_v19 = vpack.c.bf16 %v4214_v37, %v7921_v25 }
 0x2ac   :  { %v1550_v1 = vadd.f32 %v1549_v5, %v1548_v63  ;;  %v1560_v16 = vrot.slane %v1559_v9, 1  ;;  %5848 = vmatpush3.bf16.msra.mxu0 %v6713_v10  ;;  %v2276_v63 = vpack.c.bf16 %v4212_v6, %v7911_v26  ;;  %v4218_v6 = vld [vmem:[%s9060_s0 + $0xc8] sm:$0x1] }
 0x2ad   :  { %5868 = vmatpush3.bf16.msra.mxu1 %v6717_v13  ;;  %5849 = vmatprep.subr.bf16.mxu0 %v6450_v0 }
 0x2ae   :  { %v7889_v22 = vadd.f32 %v1550_v1, %v7773_v61  ;;  %v1561_v33 = vadd.f32 %v1560_v16, %v1559_v9  ;;  %5869 = vmatprep.subr.bf16.mxu1 %v6450_v0 }
 0x2b0   :  { %v7893_v27 = vadd.f32 %v1561_v33, %v7777_v56  ;;  %5850 = vmatpush3.bf16.msra.mxu0 %v6733_v20 }
 0x2b1   :  { %5870 = vmatpush3.bf16.msra.mxu1 %v6737_v21  ;;  %5851 = vmatprep.subr.bf16.mxu0 %v6450_v0 }
 0x2b2   :  { %5871 = vmatprep.subr.bf16.mxu1 %v6450_v0 }
 0x2b4   :  { %5852 = vmatpush3.bf16.msra.mxu0 %v6753_v28 }
 0x2b5   :  { %5872 = vmatpush3.bf16.msra.mxu1 %v6757_v31  ;;  %5853 = vmatprep.subr.bf16.mxu0 %v6450_v0 }
 0x2b6   :  { %v1606_v61 = vpop.f32.mrb[56].mxu0  ;;  %5873 = vmatprep.subr.bf16.mxu1 %v6450_v0 }
 0x2b7   :  { %v1647_v45 = vpop.f32.mrb[56].mxu1  ;;  %v5581_v56 = vpop.f32.mrb[57].mxu0 }
 0x2b8   :  { %v1648_v52 = vadd.f32 %v1647_v45, %v1606_v61  ;;  %v5601_v43 = vpop.f32.mrb[57].mxu1  ;;  %v1609_v55 = vpop.f32.mrb[58].mxu0  ;;  %5854 = vmatpush3.bf16.msra.mxu0 %v6773_v38 }
 0x2b9   :  { %v1650_v44 = vpop.f32.mrb[58].mxu1  ;;  %5874 = vmatpush3.bf16.msra.mxu1 %v6777_v39  ;;  %v5582_v62 = vpop.f32.mrb[59].mxu0  ;;  %5855 = vmatprep.subr.bf16.mxu0 %v6450_v0 }
 0x2ba   :  { %v1651_v53 = vadd.f32 %v1650_v44, %v1609_v55  ;;  %v5602_v49 = vpop.f32.mrb[59].mxu1  ;;  %5875 = vmatprep.subr.bf16.mxu1 %v6450_v0 }
 0x2bb   :  { %v4220_v49 = vld [vmem:[%s9060_s0 + $0xc9] sm:$0x1] }
 0x2bc   :  { %5856 = vmatpush3.bf16.msra.mxu0 %v6793_v46 }
 0x2bd   :  { %5876 = vmatpush3.bf16.msra.mxu1 %v6797_v48  ;;  %5857 = vmatprep.subr.bf16.mxu0 %v6450_v0 }
 0x2be   :  { %5877 = vmatprep.subr.bf16.mxu1 %v6450_v0 }
 0x2c0   :  { %5858 = vmatpush3.bf16.msra.mxu0 %v6813_v54 }
 0x2c1   :  { %5878 = vmatpush3.bf16.msra.mxu1 %v6823_v57  ;;  %5883 = vmatprep.subr.bf16.mxu0 %v6450_v0 }
 0x2c2   :  { %5903 = vmatprep.subr.bf16.mxu1 %v6450_v0 }
 0x2c3   :  { %5860 = vmatmul.mubr.bf16.vlgmr.msra.gmra.mrb[84].mxu0 %v2276_v63 }
 0x2c4   :  { %5880 = vmatmul.mubr.bf16.vlgmr.msra.gmra.mrb[84].mxu1 %v2322_v19  ;;  %5884 = vmatpush3.bf16.msra.mxu0 %v6493_v4  ;;  %v2396_v19 = vpack.c.bf16 %v4220_v49, %v7921_v25 }
 0x2c5   :  { %5904 = vmatpush3.bf16.msra.mxu1 %v6508_v8  ;;  %5885 = vmatprep.subr.bf16.mxu0 %v6450_v0 }
 0x2c6   :  { %5905 = vmatprep.subr.bf16.mxu1 %v6450_v0  ;;  %5899 = vmatprep.mubr.msk.bf16.mxu0 %vm6451_vm0, %v6450_v0 }
 0x2c7   :  { %5919 = vmatprep.mubr.msk.bf16.mxu1 %vm6451_vm0, %v6450_v0 }
 0x2c8   :  { %5886 = vmatpush3.bf16.msra.mxu0 %v6517_v11 }
 0x2c9   :  { %5906 = vmatpush3.bf16.msra.mxu1 %v6521_v12  ;;  %5887 = vmatprep.subr.bf16.mxu0 %v6450_v0 }
 0x2ca   :  { %5907 = vmatprep.subr.bf16.mxu1 %v6450_v0 }
 0x2cc   :  { %5888 = vmatpush3.bf16.msra.mxu0 %v6537_v17 }
 0x2cd   :  { %5908 = vmatpush3.bf16.msra.mxu1 %v6541_v18  ;;  %5889 = vmatprep.subr.bf16.mxu0 %v6450_v0 }
 0x2ce   :  { %5909 = vmatprep.subr.bf16.mxu1 %v6450_v0 }
 0x2d0   :  { %5890 = vmatpush3.bf16.msra.mxu0 %v6557_v23 }
 0x2d1   :  { %5910 = vmatpush3.bf16.msra.mxu1 %v6561_v24  ;;  %5891 = vmatprep.subr.bf16.mxu0 %v6450_v0 }
 0x2d2   :  { %5911 = vmatprep.subr.bf16.mxu1 %v6450_v0 }
 0x2d4   :  { %5892 = vmatpush3.bf16.msra.mxu0 %v6577_v29 }
 0x2d5   :  { %5912 = vmatpush3.bf16.msra.mxu1 %v6581_v30  ;;  %5893 = vmatprep.subr.bf16.mxu0 %v6450_v0 }
 0x2d6   :  { %v1692_v5 = vpop.f32.mrb[60].mxu0  ;;  %5913 = vmatprep.subr.bf16.mxu1 %v6450_v0 }
 0x2d7   :  { %v1699_v9 = vadd.f32 %v1692_v5, %v1648_v52  ;;  %v1738_v1 = vpop.f32.mrb[60].mxu1  ;;  %v5621_v16 = vpop.f32.mrb[61].mxu0 }
 0x2d8   :  { %v5641_v33 = vpop.f32.mrb[61].mxu1  ;;  %v1695_v61 = vpop.f32.mrb[62].mxu0  ;;  %5894 = vmatpush3.bf16.msra.mxu0 %v6597_v35 }
 0x2d9   :  { %v1745_v45 = vadd.f32 %v1738_v1, %v1699_v9  ;;  %v1700_v56 = vadd.f32 %v1695_v61, %v1651_v53  ;;  %v1741_v43 = vpop.f32.mrb[62].mxu1  ;;  %5914 = vmatpush3.bf16.msra.mxu1 %v6601_v36  ;;  %v5622_v55 = vpop.f32.mrb[63].mxu0  ;;  %5895 = vmatprep.subr.bf16.mxu0 %v6450_v0  ;;  %v2393_v1 = vpack.c.bf16 %v4218_v6, %v7911_v26 }
 0x2da   :  { %v5642_v44 = vpop.f32.mrb[63].mxu1  ;;  %5915 = vmatprep.subr.bf16.mxu1 %v6450_v0 }
 0x2db   :  { %v1746_v62 = vadd.f32 %v1741_v43, %v1700_v56  ;;  %v7962_v52 = vadd.f32 %v7723_v58, %v1745_v45 }
 0x2dc   :  { %5896 = vmatpush3.bf16.msra.mxu0 %v6617_v41 }
 0x2dd   :  { %v1748_v53 = vadd.f32 %v7723_v58, %v1746_v62  ;;  %5916 = vmatpush3.bf16.msra.mxu1 %v6621_v42  ;;  %5897 = vmatprep.subr.bf16.mxu0 %v6450_v0  ;;  %v1758_v5 = vmul.f32 %v7962_v52, %v7962_v52 }
 0x2de   :  { %5917 = vmatprep.subr.bf16.mxu1 %v6450_v0 }
 0x2df   :  { %v1749_v37 = vsel %vm307_vm1, %v1748_v53, 0.0  ;;  %v1759_v63 = vmul.f32 %v1748_v53, %v1748_v53  ;;  %4186 = vst [vmem:[%s9062_s5 + $0x78] sm:$0x1] %v1748_v53 }
 0x2e0   :  { %v1750_v9 = vadd.f32 %v1749_v37, %v7962_v52  ;;  %5898 = vmatpush3.bf16.msra.mxu0 %v6637_v47 }
 0x2e1   :  { %v1760_v16 = vsel %vm307_vm1, %v1759_v63, 0.0  ;;  %5918 = vmatpush3.bf16.msra.mxu1 %v6650_v51  ;;  %5923 = vmatprep.subr.bf16.mxu0 %v6450_v0 }
 0x2e2   :  { %v1751_v33 = vrot.slane %v1750_v9, 4  ;;  %v1761_v61 = vadd.f32 %v1760_v16, %v1758_v5  ;;  %5943 = vmatprep.subr.bf16.mxu1 %v6450_v0 }
 0x2e3   :  { %5900 = vmatmul.mubr.bf16.vlgmr.msra.gmra.mrb[88].mxu0 %v2396_v19 }
 0x2e4   :  { %v1752_v25 = vadd.f32 %v1751_v33, %v1750_v9  ;;  %v1762_v45 = vrot.slane %v1761_v61, 4  ;;  %5920 = vmatmul.mubr.bf16.vlgmr.msra.gmra.mrb[88].mxu1 %v2393_v1  ;;  %5924 = vmatpush3.bf16.msra.mxu0 %v6669_v59 }
 0x2e5   :  { %5944 = vmatpush3.bf16.msra.mxu1 %v6673_v60  ;;  %5925 = vmatprep.subr.bf16.mxu0 %v6450_v0 }
 0x2e6   :  { %v1753_v26 = vrot.slane %v1752_v25, 2  ;;  %v1763_v56 = vadd.f32 %v1762_v45, %v1761_v61  ;;  %5945 = vmatprep.subr.bf16.mxu1 %v6450_v0  ;;  %5939 = vmatprep.mubr.msk.bf16.mxu0 %vm6451_vm0, %v6450_v0  ;;  %v8027_v45 = vld [vmem:[%s9060_s0 + $0xd0] sm:$0xff] }
 0x2e7   :  { %5959 = vmatprep.mubr.msk.bf16.mxu1 %vm6451_vm0, %v6450_v0 }
 0x2e8   :  { %v1754_v43 = vadd.f32 %v1753_v26, %v1752_v25  ;;  %v1764_v55 = vrot.slane %v1763_v56, 2  ;;  %5926 = vmatpush3.bf16.msra.mxu0 %v6689_v2  ;;  %v4222_v26 = vld [vmem:[%s9060_s0 + $0xd8] sm:$0x1] }
 0x2e9   :  { %5946 = vmatpush3.bf16.msra.mxu1 %v6693_v3  ;;  %5927 = vmatprep.subr.bf16.mxu0 %v6450_v0 }
 0x2ea   :  { %v1755_v44 = vrot.slane %v1754_v43, 1  ;;  %v1765_v62 = vadd.f32 %v1764_v55, %v1763_v56  ;;  %5947 = vmatprep.subr.bf16.mxu1 %v6450_v0  ;;  %v8037_v56 = vld [vmem:[%s9060_s0 + $0xd1] sm:$0xff]  ;;  %v2482_v55 = vpack.c.bf16 %v4222_v26, %v8027_v45  ;;  %v4230_v26 = vld [vmem:[%s9060_s0 + $0xd9] sm:$0x1] }
 0x2ec   :  { %v1756_v49 = vadd.f32 %v1755_v44, %v1754_v43  ;;  %v1766_v53 = vrot.slane %v1765_v62, 1  ;;  %5928 = vmatpush3.bf16.msra.mxu0 %v6713_v10  ;;  %v4224_v43 = vld [vmem:[%s9060_s0 + $0xd9] sm:$0x1] }
 0x2ed   :  { %5948 = vmatpush3.bf16.msra.mxu1 %v6717_v13  ;;  %5929 = vmatprep.subr.bf16.mxu0 %v6450_v0  ;;  %v2528_v44 = vpack.c.bf16 %v4224_v43, %v8037_v56  ;;  %v4228_v43 = vld [vmem:[%s9060_s0 + $0xd8] sm:$0x1] }
 0x2ee   :  { %v8005_v6 = vadd.f32 %v1756_v49, %v7889_v22  ;;  %v1767_v37 = vadd.f32 %v1766_v53, %v1765_v62  ;;  %5949 = vmatprep.subr.bf16.mxu1 %v6450_v0 }
 0x2f0   :  { %v8009_v63 = vadd.f32 %v1767_v37, %v7893_v27  ;;  %5930 = vmatpush3.bf16.msra.mxu0 %v6733_v20 }
 0x2f1   :  { %5950 = vmatpush3.bf16.msra.mxu1 %v6737_v21  ;;  %5931 = vmatprep.subr.bf16.mxu0 %v6450_v0 }
 0x2f2   :  { %5951 = vmatprep.subr.bf16.mxu1 %v6450_v0 }
 0x2f4   :  { %5932 = vmatpush3.bf16.msra.mxu0 %v6753_v28 }
 0x2f5   :  { %5952 = vmatpush3.bf16.msra.mxu1 %v6757_v31  ;;  %5933 = vmatprep.subr.bf16.mxu0 %v6450_v0 }
 0x2f6   :  { %v1812_v22 = vpop.f32.mrb[64].mxu0  ;;  %5953 = vmatprep.subr.bf16.mxu1 %v6450_v0 }
 0x2f7   :  { %v1853_v19 = vpop.f32.mrb[64].mxu1  ;;  %v5661_v27 = vpop.f32.mrb[65].mxu0 }
 0x2f8   :  { %v1854_v5 = vadd.f32 %v1853_v19, %v1812_v22  ;;  %v5681_v9 = vpop.f32.mrb[65].mxu1  ;;  %v1815_v1 = vpop.f32.mrb[66].mxu0  ;;  %5934 = vmatpush3.bf16.msra.mxu0 %v6773_v38 }
 0x2f9   :  { %v1856_v16 = vpop.f32.mrb[66].mxu1  ;;  %5954 = vmatpush3.bf16.msra.mxu1 %v6777_v39  ;;  %v5662_v33 = vpop.f32.mrb[67].mxu0  ;;  %5935 = vmatprep.subr.bf16.mxu0 %v6450_v0 }
 0x2fa   :  { %v1857_v61 = vadd.f32 %v1856_v16, %v1815_v1  ;;  %v5682_v25 = vpop.f32.mrb[67].mxu1  ;;  %5955 = vmatprep.subr.bf16.mxu1 %v6450_v0 }
 0x2fc   :  { %5936 = vmatpush3.bf16.msra.mxu0 %v6793_v46 }
 0x2fd   :  { %5956 = vmatpush3.bf16.msra.mxu1 %v6797_v48  ;;  %5937 = vmatprep.subr.bf16.mxu0 %v6450_v0 }
 0x2fe   :  { %5957 = vmatprep.subr.bf16.mxu1 %v6450_v0 }
 0x300   :  { %5938 = vmatpush3.bf16.msra.mxu0 %v6813_v54 }
 0x301   :  { %5958 = vmatpush3.bf16.msra.mxu1 %v6823_v57  ;;  %5963 = vmatprep.subr.bf16.mxu0 %v6450_v0 }
 0x302   :  { %5983 = vmatprep.subr.bf16.mxu1 %v6450_v0 }
 0x303   :  { %5940 = vmatmul.mubr.bf16.vlgmr.msra.gmra.mrb[92].mxu0 %v2482_v55 }
 0x304   :  { %5960 = vmatmul.mubr.bf16.vlgmr.msra.gmra.mrb[92].mxu1 %v2528_v44  ;;  %5964 = vmatpush3.bf16.msra.mxu0 %v6493_v4 }
 0x305   :  { %5984 = vmatpush3.bf16.msra.mxu1 %v6508_v8  ;;  %5965 = vmatprep.subr.bf16.mxu0 %v6450_v0 }
 0x306   :  { %5985 = vmatprep.subr.bf16.mxu1 %v6450_v0  ;;  %5979 = vmatprep.mubr.msk.bf16.mxu0 %vm6451_vm0, %v6450_v0 }
 0x307   :  { %5999 = vmatprep.mubr.msk.bf16.mxu1 %vm6451_vm0, %v6450_v0 }
 0x308   :  { %5966 = vmatpush3.bf16.msra.mxu0 %v6517_v11 }
 0x309   :  { %5986 = vmatpush3.bf16.msra.mxu1 %v6521_v12  ;;  %5967 = vmatprep.subr.bf16.mxu0 %v6450_v0 }
 0x30a   :  { %5987 = vmatprep.subr.bf16.mxu1 %v6450_v0 }
 0x30c   :  { %5968 = vmatpush3.bf16.msra.mxu0 %v6537_v17 }
 0x30d   :  { %5988 = vmatpush3.bf16.msra.mxu1 %v6541_v18  ;;  %5969 = vmatprep.subr.bf16.mxu0 %v6450_v0 }
 0x30e   :  { %5989 = vmatprep.subr.bf16.mxu1 %v6450_v0 }
 0x310   :  { %5970 = vmatpush3.bf16.msra.mxu0 %v6557_v23 }
 0x311   :  { %5990 = vmatpush3.bf16.msra.mxu1 %v6561_v24  ;;  %5971 = vmatprep.subr.bf16.mxu0 %v6450_v0 }
 0x312   :  { %5991 = vmatprep.subr.bf16.mxu1 %v6450_v0 }
 0x314   :  { %5972 = vmatpush3.bf16.msra.mxu0 %v6577_v29 }
 0x315   :  { %5992 = vmatpush3.bf16.msra.mxu1 %v6581_v30  ;;  %5973 = vmatprep.subr.bf16.mxu0 %v6450_v0 }
 0x316   :  { %v1898_v62 = vpop.f32.mrb[68].mxu0  ;;  %5993 = vmatprep.subr.bf16.mxu1 %v6450_v0 }
 0x317   :  { %v1905_v49 = vadd.f32 %v1898_v62, %v1854_v5  ;;  %v1944_v53 = vpop.f32.mrb[68].mxu1  ;;  %v5701_v37 = vpop.f32.mrb[69].mxu0  ;;  %v2602_v62 = vpack.c.bf16 %v4230_v26, %v8037_v56 }
 0x318   :  { %v5721_v22 = vpop.f32.mrb[69].mxu1  ;;  %v1901_v19 = vpop.f32.mrb[70].mxu0  ;;  %5974 = vmatpush3.bf16.msra.mxu0 %v6597_v35  ;;  %v2599_v37 = vpack.c.bf16 %v4228_v43, %v8027_v45 }
 0x319   :  { %v1951_v27 = vadd.f32 %v1944_v53, %v1905_v49  ;;  %v1906_v9 = vadd.f32 %v1901_v19, %v1857_v61  ;;  %v1947_v1 = vpop.f32.mrb[70].mxu1  ;;  %5994 = vmatpush3.bf16.msra.mxu1 %v6601_v36  ;;  %v5702_v16 = vpop.f32.mrb[71].mxu0  ;;  %5975 = vmatprep.subr.bf16.mxu0 %v6450_v0 }
 0x31a   :  { %v5722_v33 = vpop.f32.mrb[71].mxu1  ;;  %5995 = vmatprep.subr.bf16.mxu1 %v6450_v0 }
 0x31b   :  { %v1952_v25 = vadd.f32 %v1947_v1, %v1906_v9  ;;  %v8078_v5 = vadd.f32 %v7723_v58, %v1951_v27 }
 0x31c   :  { %5976 = vmatpush3.bf16.msra.mxu0 %v6617_v41 }
 0x31d   :  { %v1954_v61 = vadd.f32 %v7723_v58, %v1952_v25  ;;  %5996 = vmatpush3.bf16.msra.mxu1 %v6621_v42  ;;  %5977 = vmatprep.subr.bf16.mxu0 %v6450_v0  ;;  %v1964_v49 = vmul.f32 %v8078_v5, %v8078_v5 }
 0x31e   :  { %5997 = vmatprep.subr.bf16.mxu1 %v6450_v0 }
 0x31f   :  { %v1955_v55 = vsel %vm307_vm1, %v1954_v61, 0.0  ;;  %v1965_v44 = vmul.f32 %v1954_v61, %v1954_v61  ;;  %4196 = vst [vmem:[%s9062_s5 + $0x88] sm:$0x1] %v1954_v61 }
 0x320   :  { %v1956_v53 = vadd.f32 %v1955_v55, %v8078_v5  ;;  %5978 = vmatpush3.bf16.msra.mxu0 %v6637_v47 }
 0x321   :  { %v1966_v22 = vsel %vm307_vm1, %v1965_v44, 0.0  ;;  %5998 = vmatpush3.bf16.msra.mxu1 %v6650_v51  ;;  %6003 = vmatprep.subr.bf16.mxu0 %v6450_v0 }
 0x322   :  { %v1957_v19 = vrot.slane %v1956_v53, 4  ;;  %v1967_v27 = vadd.f32 %v1966_v22, %v1964_v49  ;;  %6023 = vmatprep.subr.bf16.mxu1 %v6450_v0 }
 0x323   :  { %5980 = vmatmul.mubr.bf16.vlgmr.msra.gmra.mrb[96].mxu0 %v2602_v62 }
 0x324   :  { %v1958_v56 = vadd.f32 %v1957_v19, %v1956_v53  ;;  %v1968_v9 = vrot.slane %v1967_v27, 4  ;;  %6000 = vmatmul.mubr.bf16.vlgmr.msra.gmra.mrb[96].mxu1 %v2599_v37  ;;  %6004 = vmatpush3.bf16.msra.mxu0 %v6669_v59 }
 0x325   :  { %6024 = vmatpush3.bf16.msra.mxu1 %v6673_v60  ;;  %6005 = vmatprep.subr.bf16.mxu0 %v6450_v0 }
 0x326   :  { %v1959_v45 = vrot.slane %v1958_v56, 2  ;;  %v1969_v1 = vadd.f32 %v1968_v9, %v1967_v27  ;;  %6025 = vmatprep.subr.bf16.mxu1 %v6450_v0  ;;  %6019 = vmatprep.mubr.msk.bf16.mxu0 %vm6451_vm0, %v6450_v0 }
 0x327   :  { %6039 = vmatprep.mubr.msk.bf16.mxu1 %vm6451_vm0, %v6450_v0 }
 0x328   :  { %v1960_v16 = vadd.f32 %v1959_v45, %v1958_v56  ;;  %v1970_v33 = vrot.slane %v1969_v1, 2  ;;  %6006 = vmatpush3.bf16.msra.mxu0 %v6689_v2  ;;  %v8143_v45 = vld [vmem:[%s9060_s0 + $0xe0] sm:$0xff] }
 0x329   :  { %6026 = vmatpush3.bf16.msra.mxu1 %v6693_v3  ;;  %6007 = vmatprep.subr.bf16.mxu0 %v6450_v0 }
 0x32a   :  { %v1961_v25 = vrot.slane %v1960_v16, 1  ;;  %v1971_v26 = vadd.f32 %v1970_v33, %v1969_v1  ;;  %6027 = vmatprep.subr.bf16.mxu1 %v6450_v0  ;;  %v4232_v1 = vld [vmem:[%s9060_s0 + $0xe8] sm:$0x1]  ;;  %v4234_v33 = vld [vmem:[%s9060_s0 + $0xe9] sm:$0x1] }
 0x32c   :  { %v1962_v61 = vadd.f32 %v1961_v25, %v1960_v16  ;;  %v1972_v43 = vrot.slane %v1971_v26, 1  ;;  %6008 = vmatpush3.bf16.msra.mxu0 %v6713_v10  ;;  %v8153_v16 = vld [vmem:[%s9060_s0 + $0xe1] sm:$0xff]  ;;  %v2688_v25 = vpack.c.bf16 %v4232_v1, %v8143_v45 }
 0x32d   :  { %6028 = vmatpush3.bf16.msra.mxu1 %v6717_v13  ;;  %6009 = vmatprep.subr.bf16.mxu0 %v6450_v0 }
 0x32e   :  { %v8121_v55 = vadd.f32 %v1962_v61, %v8005_v6  ;;  %v1973_v44 = vadd.f32 %v1972_v43, %v1971_v26  ;;  %6029 = vmatprep.subr.bf16.mxu1 %v6450_v0  ;;  %v2734_v26 = vpack.c.bf16 %v4234_v33, %v8153_v16  ;;  %v4240_v33 = vld [vmem:[%s9060_s0 + $0xe9] sm:$0x1] }
 0x330   :  { %v8125_v62 = vadd.f32 %v1973_v44, %v8009_v63  ;;  %6010 = vmatpush3.bf16.msra.mxu0 %v6733_v20 }
 0x331   :  { %6030 = vmatpush3.bf16.msra.mxu1 %v6737_v21  ;;  %6011 = vmatprep.subr.bf16.mxu0 %v6450_v0 }
 0x332   :  { %6031 = vmatprep.subr.bf16.mxu1 %v6450_v0 }
 0x334   :  { %6012 = vmatpush3.bf16.msra.mxu0 %v6753_v28 }
 0x335   :  { %6032 = vmatpush3.bf16.msra.mxu1 %v6757_v31  ;;  %6013 = vmatprep.subr.bf16.mxu0 %v6450_v0 }
 0x336   :  { %v2019_v6 = vpop.f32.mrb[72].mxu0  ;;  %6033 = vmatprep.subr.bf16.mxu1 %v6450_v0 }
 0x337   :  { %v2060_v49 = vpop.f32.mrb[72].mxu1  ;;  %v5741_v63 = vpop.f32.mrb[73].mxu0 }
 0x338   :  { %v2061_v53 = vadd.f32 %v2060_v49, %v2019_v6  ;;  %v5761_v37 = vpop.f32.mrb[73].mxu1  ;;  %v2022_v22 = vpop.f32.mrb[74].mxu0  ;;  %6014 = vmatpush3.bf16.msra.mxu0 %v6773_v38 }
 0x339   :  { %v2063_v19 = vpop.f32.mrb[74].mxu1  ;;  %6034 = vmatpush3.bf16.msra.mxu1 %v6777_v39  ;;  %v5742_v27 = vpop.f32.mrb[75].mxu0  ;;  %6015 = vmatprep.subr.bf16.mxu0 %v6450_v0 }
 0x33a   :  { %v2064_v56 = vadd.f32 %v2063_v19, %v2022_v22  ;;  %v5762_v9 = vpop.f32.mrb[75].mxu1  ;;  %6035 = vmatprep.subr.bf16.mxu1 %v6450_v0 }
 0x33c   :  { %6016 = vmatpush3.bf16.msra.mxu0 %v6793_v46 }
 0x33d   :  { %6036 = vmatpush3.bf16.msra.mxu1 %v6797_v48  ;;  %6017 = vmatprep.subr.bf16.mxu0 %v6450_v0 }
 0x33e   :  { %6037 = vmatprep.subr.bf16.mxu1 %v6450_v0 }
 0x340   :  { %6018 = vmatpush3.bf16.msra.mxu0 %v6813_v54 }
 0x341   :  { %6038 = vmatpush3.bf16.msra.mxu1 %v6823_v57  ;;  %6043 = vmatprep.subr.bf16.mxu0 %v6450_v0 }
 0x342   :  { %6063 = vmatprep.subr.bf16.mxu1 %v6450_v0 }
 0x343   :  { %6020 = vmatmul.mubr.bf16.vlgmr.msra.gmra.mrb[100].mxu0 %v2688_v25 }
 0x344   :  { %6040 = vmatmul.mubr.bf16.vlgmr.msra.gmra.mrb[100].mxu1 %v2734_v26  ;;  %6044 = vmatpush3.bf16.msra.mxu0 %v6493_v4 }
 0x345   :  { %6064 = vmatpush3.bf16.msra.mxu1 %v6508_v8  ;;  %6045 = vmatprep.subr.bf16.mxu0 %v6450_v0 }
 0x346   :  { %6065 = vmatprep.subr.bf16.mxu1 %v6450_v0  ;;  %6059 = vmatprep.mubr.msk.bf16.mxu0 %vm6451_vm0, %v6450_v0 }
 0x347   :  { %6079 = vmatprep.mubr.msk.bf16.mxu1 %vm6451_vm0, %v6450_v0 }
 0x348   :  { %6046 = vmatpush3.bf16.msra.mxu0 %v6517_v11 }
 0x349   :  { %6066 = vmatpush3.bf16.msra.mxu1 %v6521_v12  ;;  %6047 = vmatprep.subr.bf16.mxu0 %v6450_v0 }
 0x34a   :  { %6067 = vmatprep.subr.bf16.mxu1 %v6450_v0 }
 0x34c   :  { %6048 = vmatpush3.bf16.msra.mxu0 %v6537_v17 }
 0x34d   :  { %6068 = vmatpush3.bf16.msra.mxu1 %v6541_v18  ;;  %6049 = vmatprep.subr.bf16.mxu0 %v6450_v0 }
 0x34e   :  { %6069 = vmatprep.subr.bf16.mxu1 %v6450_v0 }
 0x350   :  { %6050 = vmatpush3.bf16.msra.mxu0 %v6557_v23 }
 0x351   :  { %6070 = vmatpush3.bf16.msra.mxu1 %v6561_v24  ;;  %6051 = vmatprep.subr.bf16.mxu0 %v6450_v0 }
 0x352   :  { %6071 = vmatprep.subr.bf16.mxu1 %v6450_v0 }
 0x354   :  { %6052 = vmatpush3.bf16.msra.mxu0 %v6577_v29 }
 0x355   :  { %6072 = vmatpush3.bf16.msra.mxu1 %v6581_v30  ;;  %6053 = vmatprep.subr.bf16.mxu0 %v6450_v0 }
 0x356   :  { %v2105_v61 = vpop.f32.mrb[76].mxu0  ;;  %6073 = vmatprep.subr.bf16.mxu1 %v6450_v0 }
 0x357   :  { %v2112_v43 = vadd.f32 %v2105_v61, %v2061_v53  ;;  %v2151_v44 = vpop.f32.mrb[76].mxu1  ;;  %v5781_v6 = vpop.f32.mrb[77].mxu0 }
 0x358   :  { %v5801_v49 = vpop.f32.mrb[77].mxu1  ;;  %v2108_v63 = vpop.f32.mrb[78].mxu0  ;;  %6054 = vmatpush3.bf16.msra.mxu0 %v6597_v35 }
 0x359   :  { %v2158_v37 = vadd.f32 %v2151_v44, %v2112_v43  ;;  %v2113_v22 = vadd.f32 %v2108_v63, %v2064_v56  ;;  %v2154_v19 = vpop.f32.mrb[78].mxu1  ;;  %6074 = vmatpush3.bf16.msra.mxu1 %v6601_v36  ;;  %v5782_v27 = vpop.f32.mrb[79].mxu0  ;;  %6055 = vmatprep.subr.bf16.mxu0 %v6450_v0  ;;  %v8203_v56 = vld [vmem:[%s9061_s2] ss:$0 sm:$0xff]  ;;  %v2808_v43 = vpack.c.bf16 %v4240_v33, %v8153_v16 }
 0x35a   :  { %v5802_v9 = vpop.f32.mrb[79].mxu1  ;;  %6075 = vmatprep.subr.bf16.mxu1 %v6450_v0 }
 0x35b   :  { %v2159_v1 = vadd.f32 %v2154_v19, %v2113_v22  ;;  %v8194_v53 = vadd.f32 %v7723_v58, %v2158_v37  ;;  %v4238_v58 = vld [vmem:[%s9060_s0 + $0xe8] sm:$0x1] }
 0x35c   :  { %6056 = vmatpush3.bf16.msra.mxu0 %v6617_v41  ;;  %v2805_v49 = vpack.c.bf16 %v4238_v58, %v8143_v45 }
 0x35d   :  { %v2161_v25 = vadd.f32 %v8203_v56, %v2159_v1  ;;  %6076 = vmatpush3.bf16.msra.mxu1 %v6621_v42  ;;  %6057 = vmatprep.subr.bf16.mxu0 %v6450_v0  ;;  %v2171_v44 = vmul.f32 %v8194_v53, %v8194_v53 }
 0x35e   :  { %6077 = vmatprep.subr.bf16.mxu1 %v6450_v0 }
 0x35f   :  { %v2162_v26 = vsel %vm307_vm1, %v2161_v25, 0.0  ;;  %v2172_v61 = vmul.f32 %v2161_v25, %v2161_v25  ;;  %4206 = vst [vmem:[%s9062_s5 + $0x98] sm:$0x1] %v2161_v25 }
 0x360   :  { %v2163_v6 = vadd.f32 %v2162_v26, %v8194_v53  ;;  %6058 = vmatpush3.bf16.msra.mxu0 %v6637_v47 }
 0x361   :  { %v2173_v63 = vsel %vm307_vm1, %v2172_v61, 0.0  ;;  %6078 = vmatpush3.bf16.msra.mxu1 %v6650_v51  ;;  %6083 = vmatprep.subr.bf16.mxu0 %v6450_v0 }
 0x362   :  { %v2164_v37 = vrot.slane %v2163_v6, 4  ;;  %v2174_v22 = vadd.f32 %v2173_v63, %v2171_v44  ;;  %6103 = vmatprep.subr.bf16.mxu1 %v6450_v0 }
 0x363   :  { %6060 = vmatmul.mubr.bf16.vlgmr.msra.gmra.mrb[104].mxu0 %v2808_v43 }
 0x364   :  { %v2165_v16 = vadd.f32 %v2164_v37, %v2163_v6  ;;  %v2175_v19 = vrot.slane %v2174_v22, 4  ;;  %6080 = vmatmul.mubr.bf16.vlgmr.msra.gmra.mrb[104].mxu1 %v2805_v49  ;;  %6084 = vmatpush3.bf16.msra.mxu0 %v6669_v59 }
 0x365   :  { %6104 = vmatpush3.bf16.msra.mxu1 %v6673_v60  ;;  %6085 = vmatprep.subr.bf16.mxu0 %v6450_v0 }
 0x366   :  { %v2166_v45 = vrot.slane %v2165_v16, 2  ;;  %v2176_v27 = vadd.f32 %v2175_v19, %v2174_v22  ;;  %6105 = vmatprep.subr.bf16.mxu1 %v6450_v0  ;;  %6099 = vmatprep.mubr.msk.bf16.mxu0 %vm6451_vm0, %v6450_v0 }
 0x367   :  { %6119 = vmatprep.mubr.msk.bf16.mxu1 %vm6451_vm0, %v6450_v0 }
 0x368   :  { %v2167_v9 = vadd.f32 %v2166_v45, %v2165_v16  ;;  %v2177_v1 = vrot.slane %v2176_v27, 2  ;;  %6086 = vmatpush3.bf16.msra.mxu0 %v6689_v2 }
 0x369   :  { %6106 = vmatpush3.bf16.msra.mxu1 %v6693_v3  ;;  %6087 = vmatprep.subr.bf16.mxu0 %v6450_v0 }
 0x36a   :  { %v2168_v33 = vrot.slane %v2167_v9, 1  ;;  %v2178_v25 = vadd.f32 %v2177_v1, %v2176_v27  ;;  %6107 = vmatprep.subr.bf16.mxu1 %v6450_v0  ;;  %v8264_v27 = vld [vmem:[%s9060_s0 + $0xf0] sm:$0xff] }
 0x36b   :  { %v8274_v1 = vld [vmem:[%s9060_s0 + $0xf1] sm:$0xff] }
 0x36c   :  { %v2169_v58 = vadd.f32 %v2168_v33, %v2167_v9  ;;  %v2179_v26 = vrot.slane %v2178_v25, 1  ;;  %6088 = vmatpush3.bf16.msra.mxu0 %v6713_v10  ;;  %v4242_v9 = vld [vmem:[%s9060_s0 + $0xf8] sm:$0x1]  ;;  %v4244_v33 = vld [vmem:[%s9060_s0 + $0xf9] sm:$0x1] }
 0x36d   :  { %6108 = vmatpush3.bf16.msra.mxu1 %v6717_v13  ;;  %6089 = vmatprep.subr.bf16.mxu0 %v6450_v0 }
 0x36e   :  { %v8242_v61 = vadd.f32 %v2169_v58, %v8121_v55  ;;  %v2180_v43 = vadd.f32 %v2179_v26, %v2178_v25  ;;  %6109 = vmatprep.subr.bf16.mxu1 %v6450_v0  ;;  %v2894_v25 = vpack.c.bf16 %v4242_v9, %v8264_v27  ;;  %v2940_v58 = vpack.c.bf16 %v4244_v33, %v8274_v1 }
 0x370   :  { %v8246_v44 = vadd.f32 %v2180_v43, %v8125_v62  ;;  %6090 = vmatpush3.bf16.msra.mxu0 %v6733_v20 }
 0x371   :  { %6110 = vmatpush3.bf16.msra.mxu1 %v6737_v21  ;;  %6091 = vmatprep.subr.bf16.mxu0 %v6450_v0 }
 0x372   :  { %6111 = vmatprep.subr.bf16.mxu1 %v6450_v0 }
 0x374   :  { %6092 = vmatpush3.bf16.msra.mxu0 %v6753_v28 }
 0x375   :  { %6112 = vmatpush3.bf16.msra.mxu1 %v6757_v31  ;;  %6093 = vmatprep.subr.bf16.mxu0 %v6450_v0 }
 0x376   :  { %v2225_v55 = vpop.f32.mrb[80].mxu0  ;;  %6113 = vmatprep.subr.bf16.mxu1 %v6450_v0 }
 0x377   :  { %v2266_v6 = vpop.f32.mrb[80].mxu1  ;;  %v5821_v62 = vpop.f32.mrb[81].mxu0 }
 0x378   :  { %v2267_v49 = vadd.f32 %v2266_v6, %v2225_v55  ;;  %v5841_v63 = vpop.f32.mrb[81].mxu1  ;;  %v2228_v37 = vpop.f32.mrb[82].mxu0  ;;  %6094 = vmatpush3.bf16.msra.mxu0 %v6773_v38 }
 0x379   :  { %v2269_v22 = vpop.f32.mrb[82].mxu1  ;;  %6114 = vmatpush3.bf16.msra.mxu1 %v6777_v39  ;;  %v5822_v16 = vpop.f32.mrb[83].mxu0  ;;  %6095 = vmatprep.subr.bf16.mxu0 %v6450_v0 }
 0x37a   :  { %v2270_v19 = vadd.f32 %v2269_v22, %v2228_v37  ;;  %v5842_v45 = vpop.f32.mrb[83].mxu1  ;;  %6115 = vmatprep.subr.bf16.mxu1 %v6450_v0 }
 0x37c   :  { %6096 = vmatpush3.bf16.msra.mxu0 %v6793_v46 }
 0x37d   :  { %6116 = vmatpush3.bf16.msra.mxu1 %v6797_v48  ;;  %6097 = vmatprep.subr.bf16.mxu0 %v6450_v0 }
 0x37e   :  { %6117 = vmatprep.subr.bf16.mxu1 %v6450_v0 }
 0x380   :  { %6098 = vmatpush3.bf16.msra.mxu0 %v6813_v54 }
 0x381   :  { %6118 = vmatpush3.bf16.msra.mxu1 %v6823_v57  ;;  %6123 = vmatprep.subr.bf16.mxu0 %v6450_v0 }
 0x382   :  { %6143 = vmatprep.subr.bf16.mxu1 %v6450_v0 }
 0x383   :  { %6100 = vmatmul.mubr.bf16.vlgmr.msra.gmra.mrb[108].mxu0 %v2894_v25  ;;  %v4250_v25 = vld [vmem:[%s9060_s0 + $0xf9] sm:$0x1] }
 0x384   :  { %6120 = vmatmul.mubr.bf16.vlgmr.msra.gmra.mrb[108].mxu1 %v2940_v58  ;;  %6124 = vmatpush3.bf16.msra.mxu0 %v6493_v4  ;;  %v4248_v58 = vld [vmem:[%s9060_s0 + $0xf8] sm:$0x1] }
 0x385   :  { %6144 = vmatpush3.bf16.msra.mxu1 %v6508_v8  ;;  %6125 = vmatprep.subr.bf16.mxu0 %v6450_v0 }
 0x386   :  { %6145 = vmatprep.subr.bf16.mxu1 %v6450_v0  ;;  %6139 = vmatprep.mubr.msk.bf16.mxu0 %vm6451_vm0, %v6450_v0 }
 0x387   :  { %6159 = vmatprep.mubr.msk.bf16.mxu1 %vm6451_vm0, %v6450_v0 }
 0x388   :  { %6126 = vmatpush3.bf16.msra.mxu0 %v6517_v11 }
 0x389   :  { %6146 = vmatpush3.bf16.msra.mxu1 %v6521_v12  ;;  %6127 = vmatprep.subr.bf16.mxu0 %v6450_v0 }
 0x38a   :  { %6147 = vmatprep.subr.bf16.mxu1 %v6450_v0 }
 0x38c   :  { %6128 = vmatpush3.bf16.msra.mxu0 %v6537_v17 }
 0x38d   :  { %6148 = vmatpush3.bf16.msra.mxu1 %v6541_v18  ;;  %6129 = vmatprep.subr.bf16.mxu0 %v6450_v0 }
 0x38e   :  { %6149 = vmatprep.subr.bf16.mxu1 %v6450_v0 }
 0x390   :  { %6130 = vmatpush3.bf16.msra.mxu0 %v6557_v23 }
 0x391   :  { %6150 = vmatpush3.bf16.msra.mxu1 %v6561_v24  ;;  %6131 = vmatprep.subr.bf16.mxu0 %v6450_v0 }
 0x392   :  { %6151 = vmatprep.subr.bf16.mxu1 %v6450_v0 }
 0x394   :  { %6132 = vmatpush3.bf16.msra.mxu0 %v6577_v29 }
 0x395   :  { %6152 = vmatpush3.bf16.msra.mxu1 %v6581_v30  ;;  %6133 = vmatprep.subr.bf16.mxu0 %v6450_v0 }
 0x396   :  { %v2311_v26 = vpop.f32.mrb[84].mxu0  ;;  %6153 = vmatprep.subr.bf16.mxu1 %v6450_v0 }
 0x397   :  { %v2318_v43 = vadd.f32 %v2311_v26, %v2267_v49  ;;  %v2357_v55 = vpop.f32.mrb[84].mxu1  ;;  %v5861_v6 = vpop.f32.mrb[85].mxu0 }
 0x398   :  { %v5881_v62 = vpop.f32.mrb[85].mxu1  ;;  %v2314_v63 = vpop.f32.mrb[86].mxu0  ;;  %6134 = vmatpush3.bf16.msra.mxu0 %v6597_v35 }
 0x399   :  { %v2364_v37 = vadd.f32 %v2357_v55, %v2318_v43  ;;  %v2319_v22 = vadd.f32 %v2314_v63, %v2270_v19  ;;  %v2360_v16 = vpop.f32.mrb[86].mxu1  ;;  %6154 = vmatpush3.bf16.msra.mxu1 %v6601_v36  ;;  %v5862_v45 = vpop.f32.mrb[87].mxu0  ;;  %6135 = vmatprep.subr.bf16.mxu0 %v6450_v0  ;;  %v3014_v55 = vpack.c.bf16 %v4250_v25, %v8274_v1 }
 0x39a   :  { %v5882_v9 = vpop.f32.mrb[87].mxu1  ;;  %6155 = vmatprep.subr.bf16.mxu1 %v6450_v0  ;;  %v3011_v63 = vpack.c.bf16 %v4248_v58, %v8264_v27 }
 0x39b   :  { %v2365_v33 = vadd.f32 %v2360_v16, %v2319_v22  ;;  %v8315_v49 = vadd.f32 %v8203_v56, %v2364_v37 }
 0x39c   :  { %6136 = vmatpush3.bf16.msra.mxu0 %v6617_v41 }
 0x39d   :  { %v2367_v19 = vadd.f32 %v8203_v56, %v2365_v33  ;;  %6156 = vmatpush3.bf16.msra.mxu1 %v6621_v42  ;;  %6137 = vmatprep.subr.bf16.mxu0 %v6450_v0  ;;  %v2377_v6 = vmul.f32 %v8315_v49, %v8315_v49 }
 0x39e   :  { %6157 = vmatprep.subr.bf16.mxu1 %v6450_v0 }
 0x39f   :  { %v2368_v26 = vsel %vm307_vm1, %v2367_v19, 0.0  ;;  %v2378_v43 = vmul.f32 %v2367_v19, %v2367_v19  ;;  %4216 = vst [vmem:[%s9062_s5 + $0xa8] sm:$0x1] %v2367_v19 }
 0x3a0   :  { %v2369_v62 = vadd.f32 %v2368_v26, %v8315_v49  ;;  %6138 = vmatpush3.bf16.msra.mxu0 %v6637_v47 }
 0x3a1   :  { %v2379_v37 = vsel %vm307_vm1, %v2378_v43, 0.0  ;;  %6158 = vmatpush3.bf16.msra.mxu1 %v6650_v51  ;;  %6163 = vmatprep.subr.bf16.mxu0 %v6450_v0 }
 0x3a2   :  { %v2370_v22 = vrot.slane %v2369_v62, 4  ;;  %v2380_v16 = vadd.f32 %v2379_v37, %v2377_v6  ;;  %6183 = vmatprep.subr.bf16.mxu1 %v6450_v0 }
 0x3a3   :  { %6140 = vmatmul.mubr.bf16.vlgmr.msra.gmra.mrb[112].mxu0 %v3014_v55 }
 0x3a4   :  { %v2371_v1 = vadd.f32 %v2370_v22, %v2369_v62  ;;  %v2381_v45 = vrot.slane %v2380_v16, 4  ;;  %6160 = vmatmul.mubr.bf16.vlgmr.msra.gmra.mrb[112].mxu1 %v3011_v63  ;;  %6164 = vmatpush3.bf16.msra.mxu0 %v6669_v59 }
 0x3a5   :  { %6184 = vmatpush3.bf16.msra.mxu1 %v6673_v60  ;;  %6165 = vmatprep.subr.bf16.mxu0 %v6450_v0 }
 0x3a6   :  { %v2372_v27 = vrot.slane %v2371_v1, 2  ;;  %v2382_v9 = vadd.f32 %v2381_v45, %v2380_v16  ;;  %6185 = vmatprep.subr.bf16.mxu1 %v6450_v0  ;;  %6179 = vmatprep.mubr.msk.bf16.mxu0 %vm6451_vm0, %v6450_v0 }
 0x3a7   :  { %6199 = vmatprep.mubr.msk.bf16.mxu1 %vm6451_vm0, %v6450_v0 }
 0x3a8   :  { %v2373_v33 = vadd.f32 %v2372_v27, %v2371_v1  ;;  %v2383_v25 = vrot.slane %v2382_v9, 2  ;;  %6166 = vmatpush3.bf16.msra.mxu0 %v6689_v2 }
 0x3a9   :  { %6186 = vmatpush3.bf16.msra.mxu1 %v6693_v3  ;;  %6167 = vmatprep.subr.bf16.mxu0 %v6450_v0 }
 0x3aa   :  { %v2374_v19 = vrot.slane %v2373_v33, 1  ;;  %v2384_v58 = vadd.f32 %v2383_v25, %v2382_v9  ;;  %6187 = vmatprep.subr.bf16.mxu1 %v6450_v0  ;;  %v4252_v25 = vld [vmem:[%s9060_s0 + $0x108] sm:$0x1] }
 0x3ac   :  { %v2375_v26 = vadd.f32 %v2374_v19, %v2373_v33  ;;  %v2385_v43 = vrot.slane %v2384_v58, 1  ;;  %6168 = vmatpush3.bf16.msra.mxu0 %v6713_v10  ;;  %v8380_v33 = vld [vmem:[%s9060_s0 + $0x100] sm:$0xff] }
 0x3ad   :  { %6188 = vmatpush3.bf16.msra.mxu1 %v6717_v13  ;;  %6169 = vmatprep.subr.bf16.mxu0 %v6450_v0  ;;  %v8390_v19 = vld [vmem:[%s9060_s0 + $0x101] sm:$0xff] }
 0x3ae   :  { %v8358_v55 = vadd.f32 %v2375_v26, %v8242_v61  ;;  %v2386_v6 = vadd.f32 %v2385_v43, %v2384_v58  ;;  %6189 = vmatprep.subr.bf16.mxu1 %v6450_v0  ;;  %v4254_v58 = vld [vmem:[%s9060_s0 + $0x109] sm:$0x1]  ;;  %v3100_v26 = vpack.c.bf16 %v4252_v25, %v8380_v33 }
 0x3af   :  { %v3146_v43 = vpack.c.bf16 %v4254_v58, %v8390_v19 }
 0x3b0   :  { %v8362_v62 = vadd.f32 %v2386_v6, %v8246_v44  ;;  %6170 = vmatpush3.bf16.msra.mxu0 %v6733_v20 }
 0x3b1   :  { %6190 = vmatpush3.bf16.msra.mxu1 %v6737_v21  ;;  %6171 = vmatprep.subr.bf16.mxu0 %v6450_v0 }
 0x3b2   :  { %6191 = vmatprep.subr.bf16.mxu1 %v6450_v0 }
 0x3b4   :  { %6172 = vmatpush3.bf16.msra.mxu0 %v6753_v28 }
 0x3b5   :  { %6192 = vmatpush3.bf16.msra.mxu1 %v6757_v31  ;;  %6173 = vmatprep.subr.bf16.mxu0 %v6450_v0 }
 0x3b6   :  { %v2431_v61 = vpop.f32.mrb[88].mxu0  ;;  %6193 = vmatprep.subr.bf16.mxu1 %v6450_v0 }
 0x3b7   :  { %v2472_v63 = vpop.f32.mrb[88].mxu1  ;;  %v5901_v44 = vpop.f32.mrb[89].mxu0 }
 0x3b8   :  { %v2473_v37 = vadd.f32 %v2472_v63, %v2431_v61  ;;  %v5921_v22 = vpop.f32.mrb[89].mxu1  ;;  %v2434_v16 = vpop.f32.mrb[90].mxu0  ;;  %6174 = vmatpush3.bf16.msra.mxu0 %v6773_v38 }
 0x3b9   :  { %v2475_v1 = vpop.f32.mrb[90].mxu1  ;;  %6194 = vmatpush3.bf16.msra.mxu1 %v6777_v39  ;;  %v5902_v45 = vpop.f32.mrb[91].mxu0  ;;  %6175 = vmatprep.subr.bf16.mxu0 %v6450_v0 }
 0x3ba   :  { %v2476_v27 = vadd.f32 %v2475_v1, %v2434_v16  ;;  %v5922_v9 = vpop.f32.mrb[91].mxu1  ;;  %6195 = vmatprep.subr.bf16.mxu1 %v6450_v0 }
 0x3bc   :  { %6176 = vmatpush3.bf16.msra.mxu0 %v6793_v46 }
 0x3bd   :  { %6196 = vmatpush3.bf16.msra.mxu1 %v6797_v48  ;;  %6177 = vmatprep.subr.bf16.mxu0 %v6450_v0 }
 0x3be   :  { %6197 = vmatprep.subr.bf16.mxu1 %v6450_v0 }
 0x3c0   :  { %6178 = vmatpush3.bf16.msra.mxu0 %v6813_v54 }
 0x3c1   :  { %6198 = vmatpush3.bf16.msra.mxu1 %v6823_v57  ;;  %6203 = vmatprep.subr.bf16.mxu0 %v6450_v0 }
 0x3c2   :  { %6223 = vmatprep.subr.bf16.mxu1 %v6450_v0 }
 0x3c3   :  { %6180 = vmatmul.mubr.bf16.vlgmr.msra.gmra.mrb[116].mxu0 %v3100_v26 }
 0x3c4   :  { %6200 = vmatmul.mubr.bf16.vlgmr.msra.gmra.mrb[116].mxu1 %v3146_v43  ;;  %6204 = vmatpush3.bf16.msra.mxu0 %v6493_v4  ;;  %v4260_v43 = vld [vmem:[%s9060_s0 + $0x109] sm:$0x1] }
 0x3c5   :  { %6224 = vmatpush3.bf16.msra.mxu1 %v6508_v8  ;;  %6205 = vmatprep.subr.bf16.mxu0 %v6450_v0 }
 0x3c6   :  { %6225 = vmatprep.subr.bf16.mxu1 %v6450_v0  ;;  %6219 = vmatprep.mubr.msk.bf16.mxu0 %vm6451_vm0, %v6450_v0 }
 0x3c7   :  { %6239 = vmatprep.mubr.msk.bf16.mxu1 %vm6451_vm0, %v6450_v0 }
 0x3c8   :  { %6206 = vmatpush3.bf16.msra.mxu0 %v6517_v11 }
 0x3c9   :  { %6226 = vmatpush3.bf16.msra.mxu1 %v6521_v12  ;;  %6207 = vmatprep.subr.bf16.mxu0 %v6450_v0 }
 0x3ca   :  { %6227 = vmatprep.subr.bf16.mxu1 %v6450_v0 }
 0x3cc   :  { %6208 = vmatpush3.bf16.msra.mxu0 %v6537_v17 }
 0x3cd   :  { %6228 = vmatpush3.bf16.msra.mxu1 %v6541_v18  ;;  %6209 = vmatprep.subr.bf16.mxu0 %v6450_v0 }
 0x3ce   :  { %6229 = vmatprep.subr.bf16.mxu1 %v6450_v0 }
 0x3d0   :  { %6210 = vmatpush3.bf16.msra.mxu0 %v6557_v23 }
 0x3d1   :  { %6230 = vmatpush3.bf16.msra.mxu1 %v6561_v24  ;;  %6211 = vmatprep.subr.bf16.mxu0 %v6450_v0 }
 0x3d2   :  { %6231 = vmatprep.subr.bf16.mxu1 %v6450_v0 }
 0x3d4   :  { %6212 = vmatpush3.bf16.msra.mxu0 %v6577_v29 }
 0x3d5   :  { %6232 = vmatpush3.bf16.msra.mxu1 %v6581_v30  ;;  %6213 = vmatprep.subr.bf16.mxu0 %v6450_v0 }
 0x3d6   :  { %v2517_v6 = vpop.f32.mrb[92].mxu0  ;;  %6233 = vmatprep.subr.bf16.mxu1 %v6450_v0 }
 0x3d7   :  { %v2524_v61 = vadd.f32 %v2517_v6, %v2473_v37  ;;  %v2563_v63 = vpop.f32.mrb[92].mxu1  ;;  %v5941_v44 = vpop.f32.mrb[93].mxu0  ;;  %v4258_v6 = vld [vmem:[%s9060_s0 + $0x108] sm:$0x1] }
 0x3d8   :  { %v5961_v22 = vpop.f32.mrb[93].mxu1  ;;  %v2520_v16 = vpop.f32.mrb[94].mxu0  ;;  %6214 = vmatpush3.bf16.msra.mxu0 %v6597_v35  ;;  %v3220_v44 = vpack.c.bf16 %v4260_v43, %v8390_v19 }
 0x3d9   :  { %v2570_v1 = vadd.f32 %v2563_v63, %v2524_v61  ;;  %v2525_v45 = vadd.f32 %v2520_v16, %v2476_v27  ;;  %v2566_v9 = vpop.f32.mrb[94].mxu1  ;;  %6234 = vmatpush3.bf16.msra.mxu1 %v6601_v36  ;;  %v5942_v25 = vpop.f32.mrb[95].mxu0  ;;  %6215 = vmatprep.subr.bf16.mxu0 %v6450_v0 }
 0x3da   :  { %v5962_v58 = vpop.f32.mrb[95].mxu1  ;;  %6235 = vmatprep.subr.bf16.mxu1 %v6450_v0 }
 0x3db   :  { %v2571_v26 = vadd.f32 %v2566_v9, %v2525_v45  ;;  %v8431_v37 = vadd.f32 %v8203_v56, %v2570_v1  ;;  %v3217_v1 = vpack.c.bf16 %v4258_v6, %v8380_v33 }
 0x3dc   :  { %6216 = vmatpush3.bf16.msra.mxu0 %v6617_v41 }
 0x3dd   :  { %v2573_v27 = vadd.f32 %v8203_v56, %v2571_v26  ;;  %6236 = vmatpush3.bf16.msra.mxu1 %v6621_v42  ;;  %6217 = vmatprep.subr.bf16.mxu0 %v6450_v0  ;;  %v2583_v22 = vmul.f32 %v8431_v37, %v8431_v37 }
 0x3de   :  { %6237 = vmatprep.subr.bf16.mxu1 %v6450_v0 }
 0x3df   :  { %v2574_v61 = vsel %vm307_vm1, %v2573_v27, 0.0  ;;  %v2584_v63 = vmul.f32 %v2573_v27, %v2573_v27  ;;  %4226 = vst [vmem:[%s9062_s5 + $0xb8] sm:$0x1] %v2573_v27 }
 0x3e0   :  { %v2575_v16 = vadd.f32 %v2574_v61, %v8431_v37  ;;  %6218 = vmatpush3.bf16.msra.mxu0 %v6637_v47 }
 0x3e1   :  { %v2585_v45 = vsel %vm307_vm1, %v2584_v63, 0.0  ;;  %6238 = vmatpush3.bf16.msra.mxu1 %v6650_v51  ;;  %6243 = vmatprep.subr.bf16.mxu0 %v6450_v0 }
 0x3e2   :  { %v2576_v9 = vrot.slane %v2575_v16, 4  ;;  %v2586_v25 = vadd.f32 %v2585_v45, %v2583_v22  ;;  %6263 = vmatprep.subr.bf16.mxu1 %v6450_v0 }
 0x3e3   :  { %6220 = vmatmul.mubr.bf16.vlgmr.msra.gmra.mrb[120].mxu0 %v3220_v44 }
 0x3e4   :  { %v2577_v19 = vadd.f32 %v2576_v9, %v2575_v16  ;;  %v2587_v58 = vrot.slane %v2586_v25, 4  ;;  %6240 = vmatmul.mubr.bf16.vlgmr.msra.gmra.mrb[120].mxu1 %v3217_v1  ;;  %6244 = vmatpush3.bf16.msra.mxu0 %v6669_v59 }
 0x3e5   :  { %6264 = vmatpush3.bf16.msra.mxu1 %v6673_v60  ;;  %6245 = vmatprep.subr.bf16.mxu0 %v6450_v0 }
 0x3e6   :  { %v2578_v33 = vrot.slane %v2577_v19, 2  ;;  %v2588_v26 = vadd.f32 %v2587_v58, %v2586_v25  ;;  %6265 = vmatprep.subr.bf16.mxu1 %v6450_v0  ;;  %6259 = vmatprep.mubr.msk.bf16.mxu0 %vm6451_vm0, %v6450_v0 }
 0x3e7   :  { %6279 = vmatprep.mubr.msk.bf16.mxu1 %vm6451_vm0, %v6450_v0 }
 0x3e8   :  { %v2579_v43 = vadd.f32 %v2578_v33, %v2577_v19  ;;  %v2589_v27 = vrot.slane %v2588_v26, 2  ;;  %6246 = vmatpush3.bf16.msra.mxu0 %v6689_v2 }
 0x3e9   :  { %6266 = vmatpush3.bf16.msra.mxu1 %v6693_v3  ;;  %6247 = vmatprep.subr.bf16.mxu0 %v6450_v0 }
 0x3ea   :  { %v2580_v6 = vrot.slane %v2579_v43, 1  ;;  %v2590_v61 = vadd.f32 %v2589_v27, %v2588_v26  ;;  %6267 = vmatprep.subr.bf16.mxu1 %v6450_v0  ;;  %v8496_v27 = vld [vmem:[%s9060_s0 + $0x110] sm:$0xff] }
 0x3ec   :  { %v2581_v63 = vadd.f32 %v2580_v6, %v2579_v43  ;;  %v2591_v44 = vrot.slane %v2590_v61, 1  ;;  %6248 = vmatpush3.bf16.msra.mxu0 %v6713_v10  ;;  %v4262_v6 = vld [vmem:[%s9060_s0 + $0x118] sm:$0x1] }
 0x3ed   :  { %6268 = vmatpush3.bf16.msra.mxu1 %v6717_v13  ;;  %6249 = vmatprep.subr.bf16.mxu0 %v6450_v0 }
 0x3ee   :  { %v8474_v22 = vadd.f32 %v2581_v63, %v8358_v55  ;;  %v2592_v16 = vadd.f32 %v2591_v44, %v2590_v61  ;;  %6269 = vmatprep.subr.bf16.mxu1 %v6450_v0  ;;  %v8506_v61 = vld [vmem:[%s9060_s0 + $0x111] sm:$0xff]  ;;  %v4264_v63 = vld [vmem:[%s9060_s0 + $0x119] sm:$0x1]  ;;  %v3306_v44 = vpack.c.bf16 %v4262_v6, %v8496_v27 }
 0x3f0   :  { %v8478_v1 = vadd.f32 %v2592_v16, %v8362_v62  ;;  %6250 = vmatpush3.bf16.msra.mxu0 %v6733_v20  ;;  %v3352_v16 = vpack.c.bf16 %v4264_v63, %v8506_v61 }
 0x3f1   :  { %6270 = vmatpush3.bf16.msra.mxu1 %v6737_v21  ;;  %6251 = vmatprep.subr.bf16.mxu0 %v6450_v0 }
 0x3f2   :  { %6271 = vmatprep.subr.bf16.mxu1 %v6450_v0 }
 0x3f4   :  { %6252 = vmatpush3.bf16.msra.mxu0 %v6753_v28 }
 0x3f5   :  { %6272 = vmatpush3.bf16.msra.mxu1 %v6757_v31  ;;  %6253 = vmatprep.subr.bf16.mxu0 %v6450_v0 }
 0x3f6   :  { %v2637_v55 = vpop.f32.mrb[96].mxu0  ;;  %6273 = vmatprep.subr.bf16.mxu1 %v6450_v0 }
 0x3f7   :  { %v2678_v45 = vpop.f32.mrb[96].mxu1  ;;  %v5981_v62 = vpop.f32.mrb[97].mxu0 }
 0x3f8   :  { %v2679_v9 = vadd.f32 %v2678_v45, %v2637_v55  ;;  %v6001_v25 = vpop.f32.mrb[97].mxu1  ;;  %v2640_v19 = vpop.f32.mrb[98].mxu0  ;;  %6254 = vmatpush3.bf16.msra.mxu0 %v6773_v38 }
 0x3f9   :  { %v2681_v58 = vpop.f32.mrb[98].mxu1  ;;  %6274 = vmatpush3.bf16.msra.mxu1 %v6777_v39  ;;  %v5982_v33 = vpop.f32.mrb[99].mxu0  ;;  %6255 = vmatprep.subr.bf16.mxu0 %v6450_v0 }
 0x3fa   :  { %v2682_v26 = vadd.f32 %v2681_v58, %v2640_v19  ;;  %v6002_v43 = vpop.f32.mrb[99].mxu1  ;;  %6275 = vmatprep.subr.bf16.mxu1 %v6450_v0 }
 0x3fc   :  { %6256 = vmatpush3.bf16.msra.mxu0 %v6793_v46 }
 0x3fd   :  { %6276 = vmatpush3.bf16.msra.mxu1 %v6797_v48  ;;  %6257 = vmatprep.subr.bf16.mxu0 %v6450_v0 }
 0x3fe   :  { %6277 = vmatprep.subr.bf16.mxu1 %v6450_v0 }
 0x400   :  { %6258 = vmatpush3.bf16.msra.mxu0 %v6813_v54 }
 0x401   :  { %6278 = vmatpush3.bf16.msra.mxu1 %v6823_v57  ;;  %6283 = vmatprep.subr.bf16.mxu0 %v6450_v0 }
 0x402   :  { %6303 = vmatprep.subr.bf16.mxu1 %v6450_v0 }
 0x403   :  { %6260 = vmatmul.mubr.bf16.vlgmr.msra.gmra.mrb[124].mxu0 %v3306_v44 }
 0x404   :  { %6280 = vmatmul.mubr.bf16.vlgmr.msra.gmra.mrb[124].mxu1 %v3352_v16  ;;  %6284 = vmatpush3.bf16.msra.mxu0 %v6493_v4 }
 0x405   :  { %6304 = vmatpush3.bf16.msra.mxu1 %v6508_v8  ;;  %6285 = vmatprep.subr.bf16.mxu0 %v6450_v0 }
 0x406   :  { %6305 = vmatprep.subr.bf16.mxu1 %v6450_v0  ;;  %6299 = vmatprep.mubr.msk.bf16.mxu0 %vm6451_vm0, %v6450_v0 }
 0x407   :  { %6319 = vmatprep.mubr.msk.bf16.mxu1 %vm6451_vm0, %v6450_v0 }
 0x408   :  { %6286 = vmatpush3.bf16.msra.mxu0 %v6517_v11 }
 0x409   :  { %6306 = vmatpush3.bf16.msra.mxu1 %v6521_v12  ;;  %6287 = vmatprep.subr.bf16.mxu0 %v6450_v0 }
 0x40a   :  { %6307 = vmatprep.subr.bf16.mxu1 %v6450_v0 }
 0x40c   :  { %6288 = vmatpush3.bf16.msra.mxu0 %v6537_v17 }
 0x40d   :  { %6308 = vmatpush3.bf16.msra.mxu1 %v6541_v18  ;;  %6289 = vmatprep.subr.bf16.mxu0 %v6450_v0 }
 0x40e   :  { %6309 = vmatprep.subr.bf16.mxu1 %v6450_v0 }
 0x410   :  { %6290 = vmatpush3.bf16.msra.mxu0 %v6557_v23 }
 0x411   :  { %6310 = vmatpush3.bf16.msra.mxu1 %v6561_v24  ;;  %6291 = vmatprep.subr.bf16.mxu0 %v6450_v0 }
 0x412   :  { %6311 = vmatprep.subr.bf16.mxu1 %v6450_v0 }
 0x414   :  { %6292 = vmatpush3.bf16.msra.mxu0 %v6577_v29 }
 0x415   :  { %6312 = vmatpush3.bf16.msra.mxu1 %v6581_v30  ;;  %6293 = vmatprep.subr.bf16.mxu0 %v6450_v0 }
 0x416   :  { %v2723_v55 = vpop.f32.mrb[100].mxu0  ;;  %6313 = vmatprep.subr.bf16.mxu1 %v6450_v0 }
 0x417   :  { %v2730_v45 = vadd.f32 %v2723_v55, %v2679_v9  ;;  %v2769_v62 = vpop.f32.mrb[100].mxu1  ;;  %v6021_v25 = vpop.f32.mrb[101].mxu0  ;;  %v4270_v55 = vld [vmem:[%s9060_s0 + $0x119] sm:$0x1] }
 0x418   :  { %v6041_v19 = vpop.f32.mrb[101].mxu1  ;;  %v2726_v58 = vpop.f32.mrb[102].mxu0  ;;  %6294 = vmatpush3.bf16.msra.mxu0 %v6597_v35 }
 0x419   :  { %v2776_v33 = vadd.f32 %v2769_v62, %v2730_v45  ;;  %v2731_v43 = vadd.f32 %v2726_v58, %v2682_v26  ;;  %v2772_v6 = vpop.f32.mrb[102].mxu1  ;;  %6314 = vmatpush3.bf16.msra.mxu1 %v6601_v36  ;;  %v6022_v63 = vpop.f32.mrb[103].mxu0  ;;  %6295 = vmatprep.subr.bf16.mxu0 %v6450_v0  ;;  %v4268_v45 = vld [vmem:[%s9060_s0 + $0x118] sm:$0x1]  ;;  %v3426_v19 = vpack.c.bf16 %v4270_v55, %v8506_v61 }
 0x41a   :  { %v6042_v44 = vpop.f32.mrb[103].mxu1  ;;  %6315 = vmatprep.subr.bf16.mxu1 %v6450_v0 }
 0x41b   :  { %v2777_v16 = vadd.f32 %v2772_v6, %v2731_v43  ;;  %v8547_v9 = vadd.f32 %v8203_v56, %v2776_v33  ;;  %v3423_v43 = vpack.c.bf16 %v4268_v45, %v8496_v27 }
 0x41c   :  { %6296 = vmatpush3.bf16.msra.mxu0 %v6617_v41 }
 0x41d   :  { %v2779_v26 = vadd.f32 %v8203_v56, %v2777_v16  ;;  %6316 = vmatpush3.bf16.msra.mxu1 %v6621_v42  ;;  %6297 = vmatprep.subr.bf16.mxu0 %v6450_v0  ;;  %v2789_v58 = vmul.f32 %v8547_v9, %v8547_v9 }
 0x41e   :  { %6317 = vmatprep.subr.bf16.mxu1 %v6450_v0 }
 0x41f   :  { %v2780_v62 = vsel %vm307_vm1, %v2779_v26, 0.0  ;;  %v2790_v25 = vmul.f32 %v2779_v26, %v2779_v26  ;;  %4236 = vst [vmem:[%s9062_s5 + $0xc8] sm:$0x1] %v2779_v26 }
 0x420   :  { %v2781_v33 = vadd.f32 %v2780_v62, %v8547_v9  ;;  %6298 = vmatpush3.bf16.msra.mxu0 %v6637_v47 }
 0x421   :  { %v2791_v6 = vsel %vm307_vm1, %v2790_v25, 0.0  ;;  %6318 = vmatpush3.bf16.msra.mxu1 %v6650_v51  ;;  %6323 = vmatprep.subr.bf16.mxu0 %v6450_v0 }
 0x422   :  { %v2782_v63 = vrot.slane %v2781_v33, 4  ;;  %v2792_v44 = vadd.f32 %v2791_v6, %v2789_v58  ;;  %6343 = vmatprep.subr.bf16.mxu1 %v6450_v0 }
 0x423   :  { %6300 = vmatmul.mubr.bf16.vlgmr.msra.gmra.mrb[128].mxu0 %v3426_v19 }
 0x424   :  { %v2783_v61 = vadd.f32 %v2782_v63, %v2781_v33  ;;  %v2793_v16 = vrot.slane %v2792_v44, 4  ;;  %6320 = vmatmul.mubr.bf16.vlgmr.msra.gmra.mrb[128].mxu1 %v3423_v43  ;;  %6324 = vmatpush3.bf16.msra.mxu0 %v6669_v59 }
 0x425   :  { %6344 = vmatpush3.bf16.msra.mxu1 %v6673_v60  ;;  %6325 = vmatprep.subr.bf16.mxu0 %v6450_v0 }
 0x426   :  { %v2784_v27 = vrot.slane %v2783_v61, 2  ;;  %v2794_v55 = vadd.f32 %v2793_v16, %v2792_v44  ;;  %6345 = vmatprep.subr.bf16.mxu1 %v6450_v0  ;;  %6339 = vmatprep.mubr.msk.bf16.mxu0 %vm6451_vm0, %v6450_v0 }
 0x427   :  { %6359 = vmatprep.mubr.msk.bf16.mxu1 %vm6451_vm0, %v6450_v0 }
 0x428   :  { %v2785_v26 = vadd.f32 %v2784_v27, %v2783_v61  ;;  %v2795_v45 = vrot.slane %v2794_v55, 2  ;;  %6326 = vmatpush3.bf16.msra.mxu0 %v6689_v2 }
 0x429   :  { %6346 = vmatpush3.bf16.msra.mxu1 %v6693_v3  ;;  %6327 = vmatprep.subr.bf16.mxu0 %v6450_v0 }
 0x42a   :  { %v2786_v62 = vrot.slane %v2785_v26, 1  ;;  %v2796_v25 = vadd.f32 %v2795_v45, %v2794_v55  ;;  %6347 = vmatprep.subr.bf16.mxu1 %v6450_v0 }
 0x42c   :  { %v2787_v19 = vadd.f32 %v2786_v62, %v2785_v26  ;;  %v2797_v58 = vrot.slane %v2796_v25, 1  ;;  %6328 = vmatpush3.bf16.msra.mxu0 %v6713_v10  ;;  %v8612_v62 = vld [vmem:[%s9060_s0 + $0x120] sm:$0xff] }
 0x42d   :  { %6348 = vmatpush3.bf16.msra.mxu1 %v6717_v13  ;;  %6329 = vmatprep.subr.bf16.mxu0 %v6450_v0 }
 0x42e   :  { %v8590_v33 = vadd.f32 %v2787_v19, %v8474_v22  ;;  %v2798_v43 = vadd.f32 %v2797_v58, %v2796_v25  ;;  %6349 = vmatprep.subr.bf16.mxu1 %v6450_v0  ;;  %v4272_v25 = vld [vmem:[%s9060_s0 + $0x128] sm:$0x1]  ;;  %v4274_v58 = vld [vmem:[%s9060_s0 + $0x129] sm:$0x1] }
 0x42f   :  { %v8622_v19 = vld [vmem:[%s9060_s0 + $0x121] sm:$0xff] }
 0x430   :  { %v8594_v6 = vadd.f32 %v2798_v43, %v8478_v1  ;;  %6330 = vmatpush3.bf16.msra.mxu0 %v6733_v20  ;;  %v3512_v43 = vpack.c.bf16 %v4272_v25, %v8612_v62 }
 0x431   :  { %6350 = vmatpush3.bf16.msra.mxu1 %v6737_v21  ;;  %6331 = vmatprep.subr.bf16.mxu0 %v6450_v0 }
 0x432   :  { %6351 = vmatprep.subr.bf16.mxu1 %v6450_v0 }
 0x434   :  { %6332 = vmatpush3.bf16.msra.mxu0 %v6753_v28 }
 0x435   :  { %6352 = vmatpush3.bf16.msra.mxu1 %v6757_v31  ;;  %6333 = vmatprep.subr.bf16.mxu0 %v6450_v0 }
 0x436   :  { %v2843_v22 = vpop.f32.mrb[104].mxu0  ;;  %6353 = vmatprep.subr.bf16.mxu1 %v6450_v0 }
 0x437   :  { %v2884_v63 = vpop.f32.mrb[104].mxu1  ;;  %v6061_v1 = vpop.f32.mrb[105].mxu0 }
 0x438   :  { %v2885_v44 = vadd.f32 %v2884_v63, %v2843_v22  ;;  %v6081_v61 = vpop.f32.mrb[105].mxu1  ;;  %v2846_v16 = vpop.f32.mrb[106].mxu0  ;;  %6334 = vmatpush3.bf16.msra.mxu0 %v6773_v38  ;;  %v3558_v22 = vpack.c.bf16 %v4274_v58, %v8622_v19 }
 0x439   :  { %v2887_v27 = vpop.f32.mrb[106].mxu1  ;;  %6354 = vmatpush3.bf16.msra.mxu1 %v6777_v39  ;;  %v6062_v55 = vpop.f32.mrb[107].mxu0  ;;  %6335 = vmatprep.subr.bf16.mxu0 %v6450_v0 }
 0x43a   :  { %v2888_v26 = vadd.f32 %v2887_v27, %v2846_v16  ;;  %v6082_v45 = vpop.f32.mrb[107].mxu1  ;;  %6355 = vmatprep.subr.bf16.mxu1 %v6450_v0 }
 0x43c   :  { %6336 = vmatpush3.bf16.msra.mxu0 %v6793_v46 }
 0x43d   :  { %6356 = vmatpush3.bf16.msra.mxu1 %v6797_v48  ;;  %6337 = vmatprep.subr.bf16.mxu0 %v6450_v0 }
 0x43e   :  { %6357 = vmatprep.subr.bf16.mxu1 %v6450_v0 }
 0x440   :  { %6338 = vmatpush3.bf16.msra.mxu0 %v6813_v54 }
 0x441   :  { %6358 = vmatpush3.bf16.msra.mxu1 %v6823_v57  ;;  %6363 = vmatprep.subr.bf16.mxu0 %v6450_v0 }
 0x442   :  { %6383 = vmatprep.subr.bf16.mxu1 %v6450_v0 }
 0x443   :  { %6340 = vmatmul.mubr.bf16.vlgmr.msra.gmra.mrb[132].mxu0 %v3512_v43 }
 0x444   :  { %6360 = vmatmul.mubr.bf16.vlgmr.msra.gmra.mrb[132].mxu1 %v3558_v22  ;;  %6364 = vmatpush3.bf16.msra.mxu0 %v6493_v4 }
 0x445   :  { %6384 = vmatpush3.bf16.msra.mxu1 %v6508_v8  ;;  %6365 = vmatprep.subr.bf16.mxu0 %v6450_v0 }
 0x446   :  { %6385 = vmatprep.subr.bf16.mxu1 %v6450_v0  ;;  %6379 = vmatprep.mubr.msk.bf16.mxu0 %vm6451_vm0, %v6450_v0 }
 0x447   :  { %6399 = vmatprep.mubr.msk.bf16.mxu1 %vm6451_vm0, %v6450_v0 }
 0x448   :  { %6366 = vmatpush3.bf16.msra.mxu0 %v6517_v11 }
 0x449   :  { %6386 = vmatpush3.bf16.msra.mxu1 %v6521_v12  ;;  %6367 = vmatprep.subr.bf16.mxu0 %v6450_v0 }
 0x44a   :  { %6387 = vmatprep.subr.bf16.mxu1 %v6450_v0 }
 0x44c   :  { %6368 = vmatpush3.bf16.msra.mxu0 %v6537_v17 }
 0x44d   :  { %6388 = vmatpush3.bf16.msra.mxu1 %v6541_v18  ;;  %6369 = vmatprep.subr.bf16.mxu0 %v6450_v0 }
 0x44e   :  { %6389 = vmatprep.subr.bf16.mxu1 %v6450_v0 }
 0x450   :  { %6370 = vmatpush3.bf16.msra.mxu0 %v6557_v23 }
 0x451   :  { %6390 = vmatpush3.bf16.msra.mxu1 %v6561_v24  ;;  %6371 = vmatprep.subr.bf16.mxu0 %v6450_v0 }
 0x452   :  { %6391 = vmatprep.subr.bf16.mxu1 %v6450_v0 }
 0x454   :  { %6372 = vmatpush3.bf16.msra.mxu0 %v6577_v29 }
 0x455   :  { %6392 = vmatpush3.bf16.msra.mxu1 %v6581_v30  ;;  %6373 = vmatprep.subr.bf16.mxu0 %v6450_v0 }
 0x456   :  { %v2929_v4 = vpop.f32.mrb[108].mxu0  ;;  %6393 = vmatprep.subr.bf16.mxu1 %v6450_v0 }
 0x457   :  { %v2936_v8 = vadd.f32 %v2929_v4, %v2885_v44  ;;  %v2975_v11 = vpop.f32.mrb[108].mxu1  ;;  %v6101_v12 = vpop.f32.mrb[109].mxu0 }
 0x458   :  { %v6121_v17 = vpop.f32.mrb[109].mxu1  ;;  %v2932_v18 = vpop.f32.mrb[110].mxu0  ;;  %6374 = vmatpush3.bf16.msra.mxu0 %v6597_v35  ;;  %v4280_v35 = vld [vmem:[%s9060_s0 + $0x129] sm:$0x1] }
 0x459   :  { %v2982_v23 = vadd.f32 %v2975_v11, %v2936_v8  ;;  %v2937_v24 = vadd.f32 %v2932_v18, %v2888_v26  ;;  %v2978_v63 = vpop.f32.mrb[110].mxu1  ;;  %6394 = vmatpush3.bf16.msra.mxu1 %v6601_v36  ;;  %v6102_v29 = vpop.f32.mrb[111].mxu0  ;;  %6375 = vmatprep.subr.bf16.mxu0 %v6450_v0  ;;  %v4278_v36 = vld [vmem:[%s9060_s0 + $0x128] sm:$0x1]  ;;  %v4281_v17 = vld [vmem:[%s9060_s0 + $0x130] sm:$0xff] }
 0x45a   :  { %v6122_v30 = vpop.f32.mrb[111].mxu1  ;;  %6395 = vmatprep.subr.bf16.mxu1 %v6450_v0  ;;  %v3629_v55 = vpack.c.bf16 %v4278_v36, %v8612_v62 }
 0x45b   :  { %v2983_v1 = vadd.f32 %v2978_v63, %v2937_v24  ;;  %v8663_v44 = vadd.f32 %v8203_v56, %v2982_v23 }
 0x45c   :  { %6376 = vmatpush3.bf16.msra.mxu0 %v6617_v41  ;;  %v3632_v41 = vpack.c.bf16 %v4280_v35, %v8622_v19 }
 0x45d   :  { %v2985_v61 = vadd.f32 %v8203_v56, %v2983_v1  ;;  %6396 = vmatpush3.bf16.msra.mxu1 %v6621_v42  ;;  %6377 = vmatprep.subr.bf16.mxu0 %v6450_v0  ;;  %v2995_v42 = vmul.f32 %v8663_v44, %v8663_v44 }
 0x45e   :  { %6397 = vmatprep.subr.bf16.mxu1 %v6450_v0 }
 0x45f   :  { %v2986_v16 = vsel %vm307_vm1, %v2985_v61, 0.0  ;;  %v2996_v27 = vmul.f32 %v2985_v61, %v2985_v61  ;;  %4246 = vst [vmem:[%s9062_s5 + $0xd8] sm:$0x1] %v2985_v61 }
 0x460   :  { %v2987_v56 = vadd.f32 %v2986_v16, %v8663_v44  ;;  %6378 = vmatpush3.bf16.msra.mxu0 %v6637_v47 }
 0x461   :  { %v2997_v26 = vsel %vm307_vm1, %v2996_v27, 0.0  ;;  %6398 = vmatpush3.bf16.msra.mxu1 %v6650_v51  ;;  %6403 = vmatprep.subr.bf16.mxu0 %v6450_v0 }
 0x462   :  { %v2988_v45 = vrot.slane %v2987_v56, 4  ;;  %v2998_v25 = vadd.f32 %v2997_v26, %v2995_v42  ;;  %6423 = vmatprep.subr.bf16.mxu1 %v6450_v0 }
 0x463   :  { %6380 = vmatmul.mubr.bf16.vlgmr.msra.gmra.mrb[136].mxu0 %v3632_v41 }
 0x464   :  { %v2989_v19 = vadd.f32 %v2988_v45, %v2987_v56  ;;  %v2999_v58 = vrot.slane %v2998_v25, 4  ;;  %6400 = vmatmul.mubr.bf16.vlgmr.msra.gmra.mrb[136].mxu1 %v3629_v55  ;;  %6404 = vmatpush3.bf16.msra.mxu0 %v6669_v59 }
 0x465   :  { %6424 = vmatpush3.bf16.msra.mxu1 %v6673_v60  ;;  %6405 = vmatprep.subr.bf16.mxu0 %v6450_v0 }
 0x466   :  { %v2990_v47 = vrot.slane %v2989_v19, 2  ;;  %v3000_v62 = vadd.f32 %v2999_v58, %v2998_v25  ;;  %6425 = vmatprep.subr.bf16.mxu1 %v6450_v0  ;;  %6419 = vmatprep.mubr.msk.bf16.mxu0 %vm6451_vm0, %v6450_v0 }
 0x467   :  { %6439 = vmatprep.mubr.msk.bf16.mxu1 %vm6451_vm0, %v6450_v0 }
 0x468   :  { %v2991_v51 = vadd.f32 %v2990_v47, %v2989_v19  ;;  %v3001_v43 = vrot.slane %v3000_v62, 2  ;;  %6406 = vmatpush3.bf16.msra.mxu0 %v6689_v2 }
 0x469   :  { %6426 = vmatpush3.bf16.msra.mxu1 %v6693_v3  ;;  %6407 = vmatprep.subr.bf16.mxu0 %v6450_v0 }
 0x46a   :  { %v2992_v59 = vrot.slane %v2991_v51, 1  ;;  %v3002_v60 = vadd.f32 %v3001_v43, %v3000_v62  ;;  %6427 = vmatprep.subr.bf16.mxu1 %v6450_v0 }
 0x46c   :  { %v2993_v22 = vadd.f32 %v2992_v59, %v2991_v51  ;;  %v3003_v4 = vrot.slane %v3002_v60, 1  ;;  %6408 = vmatpush3.bf16.msra.mxu0 %v6713_v10 }
 0x46d   :  { %6428 = vmatpush3.bf16.msra.mxu1 %v6717_v13  ;;  %6409 = vmatprep.subr.bf16.mxu0 %v6450_v0 }
 0x46e   :  { %v8706_v8 = vadd.f32 %v2993_v22, %v8590_v33  ;;  %v3004_v2 = vadd.f32 %v3003_v4, %v3002_v60  ;;  %6429 = vmatprep.subr.bf16.mxu1 %v6450_v0 }
 0x470   :  { %v8710_v3 = vadd.f32 %v3004_v2, %v8594_v6  ;;  %6410 = vmatpush3.bf16.msra.mxu0 %v6733_v20 }
 0x471   :  { %6430 = vmatpush3.bf16.msra.mxu1 %v6737_v21  ;;  %6411 = vmatprep.subr.bf16.mxu0 %v6450_v0 }
 0x472   :  { %6431 = vmatprep.subr.bf16.mxu1 %v6450_v0 }
 0x474   :  { %6412 = vmatpush3.bf16.msra.mxu0 %v6753_v28 }
 0x475   :  { %6432 = vmatpush3.bf16.msra.mxu1 %v6757_v31  ;;  %6413 = vmatprep.subr.bf16.mxu0 %v6450_v0 }
 0x476   :  { %v3049_v10 = vpop.f32.mrb[112].mxu0  ;;  %6433 = vmatprep.subr.bf16.mxu1 %v6450_v0 }
 0x477   :  { %v3090_v13 = vpop.f32.mrb[112].mxu1  ;;  %v6141_v33 = vpop.f32.mrb[113].mxu0 }
 0x478   :  { %v3091_v6 = vadd.f32 %v3090_v13, %v3049_v10  ;;  %v6161_v11 = vpop.f32.mrb[113].mxu1  ;;  %v3052_v20 = vpop.f32.mrb[114].mxu0  ;;  %6414 = vmatpush3.bf16.msra.mxu0 %v6773_v38  ;;  %v4282_v38 = vld [vmem:[%s9060_s0 + $0x138] sm:$0x1] }
 0x479   :  { %v3093_v21 = vpop.f32.mrb[114].mxu1  ;;  %6434 = vmatpush3.bf16.msra.mxu1 %v6777_v39  ;;  %v6142_v12 = vpop.f32.mrb[115].mxu0  ;;  %6415 = vmatprep.subr.bf16.mxu0 %v6450_v0  ;;  %v4283_v39 = vld [vmem:[%s9060_s0 + $0x131] sm:$0xff]  ;;  %v3718_v18 = vpack.c.bf16 %v4282_v38, %v4281_v17 }
 0x47a   :  { %v3094_v28 = vadd.f32 %v3093_v21, %v3052_v20  ;;  %v6162_v31 = vpop.f32.mrb[115].mxu1  ;;  %6435 = vmatprep.subr.bf16.mxu1 %v6450_v0 }
 0x47c   :  { %6416 = vmatpush3.bf16.msra.mxu0 %v6793_v46  ;;  %v4284_v46 = vld [vmem:[%s9060_s0 + $0x139] sm:$0x1] }
 0x47d   :  { %6436 = vmatpush3.bf16.msra.mxu1 %v6797_v48  ;;  %6417 = vmatprep.subr.bf16.mxu0 %v6450_v0  ;;  %v3764_v23 = vpack.c.bf16 %v4284_v46, %v4283_v39 }
 0x47e   :  { %6437 = vmatprep.subr.bf16.mxu1 %v6450_v0 }
 0x480   :  { %6418 = vmatpush3.bf16.msra.mxu0 %v6813_v54  ;;  %v8745_v54 = vld [vmem:[%s9061_s2] ss:$0 sm:$0xff] }
 0x481   :  { %6438 = vmatpush3.bf16.msra.mxu1 %v6823_v57 }
 0x483   :  { %6420 = vmatmul.mubr.bf16.vlgmr.msra.gmra.mrb[140].mxu0 %v3718_v18 }
 0x484   :  { %6440 = vmatmul.mubr.bf16.vlgmr.msra.gmra.mrb[140].mxu1 %v3764_v23 }
 0x496   :  { %v3135_v48 = vpop.f32.mrb[116].mxu0 }
 0x497   :  { %v3142_v24 = vadd.f32 %v3135_v48, %v3091_v6  ;;  %v3181_v63 = vpop.f32.mrb[116].mxu1  ;;  %v6181_v29 = vpop.f32.mrb[117].mxu0 }
 0x498   :  { %v6201_v30 = vpop.f32.mrb[117].mxu1  ;;  %v3138_v1 = vpop.f32.mrb[118].mxu0 }
 0x499   :  { %v3188_v35 = vadd.f32 %v3181_v63, %v3142_v24  ;;  %v3143_v61 = vadd.f32 %v3138_v1, %v3094_v28  ;;  %v3184_v36 = vpop.f32.mrb[118].mxu1  ;;  %v6182_v16 = vpop.f32.mrb[119].mxu0 }
 0x49a   :  { %v6202_v27 = vpop.f32.mrb[119].mxu1 }
 0x49b   :  { %v3189_v0 = vadd.f32 %v3184_v36, %v3143_v61  ;;  %v8748_v57 = vadd.f32 %v8745_v54, %v3188_v35 }
 0x49d   :  { %v3191_v41 = vadd.f32 %v8745_v54, %v3189_v0  ;;  %v3201_v55 = vmul.f32 %v8748_v57, %v8748_v57 }
 0x49f   :  { %v3192_v42 = vsel %vm307_vm1, %v3191_v41, 0.0  ;;  %v3202_v56 = vmul.f32 %v3191_v41, %v3191_v41  ;;  %4256 = vst [vmem:[%s9062_s5 + $0xe8] sm:$0x1] %v3191_v41 }
 0x4a0   :  { %v3193_v26 = vadd.f32 %v3192_v42, %v8748_v57 }
 0x4a1   :  { %v3203_v45 = vsel %vm307_vm1, %v3202_v56, 0.0 }
 0x4a2   :  { %v3194_v25 = vrot.slane %v3193_v26, 4  ;;  %v3204_v19 = vadd.f32 %v3203_v45, %v3201_v55 }
 0x4a4   :  { %v3195_v58 = vadd.f32 %v3194_v25, %v3193_v26  ;;  %v3205_v47 = vrot.slane %v3204_v19, 4 }
 0x4a6   :  { %v3196_v62 = vrot.slane %v3195_v58, 2  ;;  %v3206_v51 = vadd.f32 %v3205_v47, %v3204_v19 }
 0x4a8   :  { %v3197_v43 = vadd.f32 %v3196_v62, %v3195_v58  ;;  %v3207_v59 = vrot.slane %v3206_v51, 2 }
 0x4aa   :  { %v3198_v60 = vrot.slane %v3197_v43, 1  ;;  %v3208_v22 = vadd.f32 %v3207_v59, %v3206_v51 }
 0x4ac   :  { %v3199_v4 = vadd.f32 %v3198_v60, %v3197_v43  ;;  %v3209_v2 = vrot.slane %v3208_v22, 1 }
 0x4ae   :  { %v3200_v10 = vadd.f32 %v3199_v4, %v8706_v8  ;;  %v3210_v13 = vadd.f32 %v3209_v2, %v3208_v22 }
 0x4b0   :  { %v3211_v33 = vadd.f32 %v3210_v13, %v8710_v3 }
 0x4b6   :  { %v3255_v6 = vpop.f32.mrb[120].mxu0 }
 0x4b7   :  { %v3296_v11 = vpop.f32.mrb[120].mxu1  ;;  %v6221_v20 = vpop.f32.mrb[121].mxu0 }
 0x4b8   :  { %v3297_v21 = vadd.f32 %v3296_v11, %v3255_v6  ;;  %v6241_v12 = vpop.f32.mrb[121].mxu1  ;;  %v3258_v28 = vpop.f32.mrb[122].mxu0 }
 0x4b9   :  { %v3299_v31 = vpop.f32.mrb[122].mxu1  ;;  %v6222_v17 = vpop.f32.mrb[123].mxu0 }
 0x4ba   :  { %v3300_v38 = vadd.f32 %v3299_v31, %v3258_v28  ;;  %v6242_v39 = vpop.f32.mrb[123].mxu1 }
 0x4d6   :  { %v3341_v46 = vpop.f32.mrb[124].mxu0 }
 0x4d7   :  { %v3348_v18 = vadd.f32 %v3341_v46, %v3297_v21  ;;  %v3387_v23 = vpop.f32.mrb[124].mxu1  ;;  %v6261_v48 = vpop.f32.mrb[125].mxu0 }
 0x4d8   :  { %v6281_v24 = vpop.f32.mrb[125].mxu1  ;;  %v3344_v63 = vpop.f32.mrb[126].mxu0 }
 0x4d9   :  { %v3394_v8 = vadd.f32 %v3387_v23, %v3348_v18  ;;  %v3349_v29 = vadd.f32 %v3344_v63, %v3300_v38  ;;  %v3390_v30 = vpop.f32.mrb[126].mxu1  ;;  %v6262_v3 = vpop.f32.mrb[127].mxu0 }
 0x4da   :  { %v6282_v1 = vpop.f32.mrb[127].mxu1 }
 0x4db   :  { %v3395_v35 = vadd.f32 %v3390_v30, %v3349_v29  ;;  %v8762_v61 = vadd.f32 %v8745_v54, %v3394_v8 }
 0x4dd   :  { %v3397_v36 = vadd.f32 %v8745_v54, %v3395_v35  ;;  %v3407_v0 = vmul.f32 %v8762_v61, %v8762_v61 }
 0x4df   :  { %v3398_v16 = vsel %vm307_vm1, %v3397_v36, 0.0  ;;  %v3408_v27 = vmul.f32 %v3397_v36, %v3397_v36  ;;  %4266 = vst [vmem:[%s9062_s5 + $0xf8] sm:$0x1] %v3397_v36 }
 0x4e0   :  { %v3399_v41 = vadd.f32 %v3398_v16, %v8762_v61 }
 0x4e1   :  { %v3409_v42 = vsel %vm307_vm1, %v3408_v27, 0.0 }
 0x4e2   :  { %v3400_v56 = vrot.slane %v3399_v41, 4  ;;  %v3410_v55 = vadd.f32 %v3409_v42, %v3407_v0 }
 0x4e4   :  { %v3401_v26 = vadd.f32 %v3400_v56, %v3399_v41  ;;  %v3411_v45 = vrot.slane %v3410_v55, 4 }
 0x4e6   :  { %v3402_v25 = vrot.slane %v3401_v26, 2  ;;  %v3412_v19 = vadd.f32 %v3411_v45, %v3410_v55 }
 0x4e8   :  { %v3403_v58 = vadd.f32 %v3402_v25, %v3401_v26  ;;  %v3413_v47 = vrot.slane %v3412_v19, 2 }
 0x4ea   :  { %v3404_v62 = vrot.slane %v3403_v58, 1  ;;  %v3414_v51 = vadd.f32 %v3413_v47, %v3412_v19 }
 0x4ec   :  { %v3405_v43 = vadd.f32 %v3404_v62, %v3403_v58  ;;  %v3415_v59 = vrot.slane %v3414_v51, 1 }
 0x4ee   :  { %v3406_v60 = vadd.f32 %v3405_v43, %v3200_v10  ;;  %v3416_v22 = vadd.f32 %v3415_v59, %v3414_v51 }
 0x4f0   :  { %v3417_v4 = vadd.f32 %v3416_v22, %v3211_v33 }
 0x4f6   :  { %v3461_v2 = vpop.f32.mrb[128].mxu0 }
 0x4f7   :  { %v3502_v13 = vpop.f32.mrb[128].mxu1  ;;  %v6301_v6 = vpop.f32.mrb[129].mxu0 }
 0x4f8   :  { %v3503_v11 = vadd.f32 %v3502_v13, %v3461_v2  ;;  %v6321_v20 = vpop.f32.mrb[129].mxu1  ;;  %v3464_v21 = vpop.f32.mrb[130].mxu0 }
 0x4f9   :  { %v3505_v12 = vpop.f32.mrb[130].mxu1  ;;  %v6302_v28 = vpop.f32.mrb[131].mxu0 }
 0x4fa   :  { %v3506_v31 = vadd.f32 %v3505_v12, %v3464_v21  ;;  %v6322_v17 = vpop.f32.mrb[131].mxu1 }
 0x516   :  { %v3547_v38 = vpop.f32.mrb[132].mxu0 }
 0x517   :  { %v3554_v39 = vadd.f32 %v3547_v38, %v3503_v11  ;;  %v3593_v46 = vpop.f32.mrb[132].mxu1  ;;  %v6341_v18 = vpop.f32.mrb[133].mxu0 }
 0x518   :  { %v6361_v23 = vpop.f32.mrb[133].mxu1  ;;  %v3550_v48 = vpop.f32.mrb[134].mxu0 }
 0x519   :  { %v3600_v24 = vadd.f32 %v3593_v46, %v3554_v39  ;;  %v3555_v10 = vadd.f32 %v3550_v48, %v3506_v31  ;;  %v3596_v63 = vpop.f32.mrb[134].mxu1  ;;  %v6342_v33 = vpop.f32.mrb[135].mxu0 }
 0x51a   :  { %v6362_v8 = vpop.f32.mrb[135].mxu1 }
 0x51b   :  { %v3601_v29 = vadd.f32 %v3596_v63, %v3555_v10  ;;  %v8774_v30 = vadd.f32 %v8745_v54, %v3600_v24 }
 0x51d   :  { %v3603_v3 = vadd.f32 %v8745_v54, %v3601_v29  ;;  %v3613_v36 = vmul.f32 %v8774_v30, %v8774_v30 }
 0x51f   :  { %v3604_v1 = vsel %vm307_vm1, %v3603_v3, 0.0  ;;  %v3614_v35 = vmul.f32 %v3603_v3, %v3603_v3  ;;  %4276 = vst [vmem:[%s9062_s5 + $0x108] sm:$0x1] %v3603_v3 }
 0x520   :  { %v3605_v16 = vadd.f32 %v3604_v1, %v8774_v30 }
 0x521   :  { %v3615_v27 = vsel %vm307_vm1, %v3614_v35, 0.0 }
 0x522   :  { %v3606_v0 = vrot.slane %v3605_v16, 4  ;;  %v3616_v41 = vadd.f32 %v3615_v27, %v3613_v36 }
 0x524   :  { %v3607_v42 = vadd.f32 %v3606_v0, %v3605_v16  ;;  %v3617_v56 = vrot.slane %v3616_v41, 4 }
 0x526   :  { %v3608_v55 = vrot.slane %v3607_v42, 2  ;;  %v3618_v26 = vadd.f32 %v3617_v56, %v3616_v41 }
 0x528   :  { %v3609_v45 = vadd.f32 %v3608_v55, %v3607_v42  ;;  %v3619_v25 = vrot.slane %v3618_v26, 2 }
 0x52a   :  { %v3610_v19 = vrot.slane %v3609_v45, 1  ;;  %v3620_v58 = vadd.f32 %v3619_v25, %v3618_v26 }
 0x52c   :  { %v3611_v47 = vadd.f32 %v3610_v19, %v3609_v45  ;;  %v3621_v62 = vrot.slane %v3620_v58, 1 }
 0x52e   :  { %v3612_v51 = vadd.f32 %v3611_v47, %v3406_v60  ;;  %v3622_v43 = vadd.f32 %v3621_v62, %v3620_v58 }
 0x530   :  { %v3623_v59 = vadd.f32 %v3622_v43, %v3417_v4 }
 0x536   :  { %v3667_v22 = vpop.f32.mrb[136].mxu0 }
 0x537   :  { %v3708_v2 = vpop.f32.mrb[136].mxu1  ;;  %v6381_v13 = vpop.f32.mrb[137].mxu0 }
 0x538   :  { %v3709_v6 = vadd.f32 %v3708_v2, %v3667_v22  ;;  %v6401_v11 = vpop.f32.mrb[137].mxu1  ;;  %v3670_v20 = vpop.f32.mrb[138].mxu0 }
 0x539   :  { %v3711_v21 = vpop.f32.mrb[138].mxu1  ;;  %v6382_v12 = vpop.f32.mrb[139].mxu0  ;;  %v3847_v11 = vlaneseq }
 0x53a   :  { %v3712_v28 = vadd.f32 %v3711_v21, %v3670_v20  ;;  %v6402_v31 = vpop.f32.mrb[139].mxu1  ;;  %v3837_v21 = vld [vmem:[%s9063_s3] sm:$0x1] }
 0x53b   :  { %v3848_v20 = vshrl.u32 %v3847_v11, 7 }
 0x53d   :  { %v3849_v12 = vsub.s32 0, %v3848_v20 }
 0x556   :  { %v3753_v17 = vpop.f32.mrb[140].mxu0 }
 0x557   :  { %v3760_v38 = vadd.f32 %v3753_v17, %v3709_v6  ;;  %v3799_v39 = vpop.f32.mrb[140].mxu1  ;;  %v6421_v46 = vpop.f32.mrb[141].mxu0 }
 0x558   :  { %v6441_v18 = vpop.f32.mrb[141].mxu1  ;;  %v3756_v23 = vpop.f32.mrb[142].mxu0  ;;  %v4292_v46 = vld [vmem:[%s9062_s5 + $0x28] sm:$0x1] }
 0x559   :  { %v3806_v48 = vadd.f32 %v3799_v39, %v3760_v38  ;;  %v3761_v60 = vadd.f32 %v3756_v23, %v3712_v28  ;;  %v3802_v24 = vpop.f32.mrb[142].mxu1  ;;  %v6422_v4 = vpop.f32.mrb[143].mxu0  ;;  %v3845_v38 = vld [vmem:[%s9062_s5 + $0x8] sm:$0x1]  ;;  %v4288_v39 = vld [vmem:[%s9062_s5 + $0x18] sm:$0x1] }
 0x55a   :  { %v6442_v10 = vpop.f32.mrb[143].mxu1  ;;  %v4300_v4 = vld [vmem:[%s9062_s5 + $0x48] sm:$0x1] }
 0x55b   :  { %v3807_v63 = vadd.f32 %v3802_v24, %v3761_v60  ;;  %v8786_v33 = vadd.f32 %v8745_v54, %v3806_v48  ;;  %v4296_v24 = vld [vmem:[%s9062_s5 + $0x38] sm:$0x1] }
 0x55d   :  { %v3809_v8 = vadd.f32 %v8745_v54, %v3807_v63  ;;  %v3819_v1 = vmul.f32 %v8786_v33, %v8786_v33 }
 0x55f   :  { %v3810_v29 = vsel %vm307_vm1, %v3809_v8, 0.0  ;;  %v3820_v3 = vmul.f32 %v3809_v8, %v3809_v8  ;;  %4286 = vst [vmem:[%s9062_s5 + $0x118] sm:$0x1] %v3809_v8 }
 0x560   :  { %v3811_v35 = vadd.f32 %v3810_v29, %v8786_v33  ;;  %v4308_v29 = vld [vmem:[%s9062_s5 + $0x68] sm:$0x1] }
 0x561   :  { %v3821_v36 = vsel %vm307_vm1, %v3820_v3, 0.0 }
 0x562   :  { %v3812_v16 = vrot.slane %v3811_v35, 4  ;;  %v3822_v27 = vadd.f32 %v3821_v36, %v3819_v1 }
 0x564   :  { %v3813_v0 = vadd.f32 %v3812_v16, %v3811_v35  ;;  %v3823_v41 = vrot.slane %v3822_v27, 4 }
 0x566   :  { %v3814_v42 = vrot.slane %v3813_v0, 2  ;;  %v3824_v54 = vadd.f32 %v3823_v41, %v3822_v27 }
 0x568   :  { %v3815_v56 = vadd.f32 %v3814_v42, %v3813_v0  ;;  %v3825_v55 = vrot.slane %v3824_v54, 2 }
 0x56a   :  { %v3816_v26 = vrot.slane %v3815_v56, 1  ;;  %v3826_v45 = vadd.f32 %v3825_v55, %v3824_v54 }
 0x56c   :  { %v3817_v25 = vadd.f32 %v3816_v26, %v3815_v56  ;;  %v3827_v19 = vrot.slane %v3826_v45, 1 }
 0x56e   :  { %v3818_v58 = vadd.f32 %v3817_v25, %v3612_v51  ;;  %v3828_v47 = vadd.f32 %v3827_v19, %v3826_v45  ;;  %v3841_v51 = vld [vmem:[%s9064_s4] sm:$0x1] }
 0x570   :  { %v3829_v62 = vadd.f32 %v3828_v47, %v3623_v59  ;;  %v3833_v43 = vmul.f32 0.0061728396, %v3818_v58 }
 0x572   :  { %v3834_v22 = vmul.f32 0.0061728396, %v3829_v62  ;;  %v3835_v2 = vmul.f32 %v3833_v43, %v3833_v43 }
 0x574   :  { %v3836_v13 = vsub.f32 %v3834_v22, %v3835_v2 }
 0x576   :  { %v3838_v6 = vadd.f32 1e-05, %v3836_v13 }
 0x578   :  { %6445 = vrsqrt.f32 %v3838_v6 }
 0x582   :  { %v6446_v28 = vpop.eup %6445 }
 0x583   :  { %v3840_v31 = vmul.f32 %v6446_v28, %v3837_v21 }
 0x585   :  { %v3842_v59 = vmul.f32 %v3840_v31, %v3833_v43  ;;  %v8803_v17 = vrot.slane %v3840_v31, %v3849_v12 }
 0x587   :  { %v3843_v18 = vsub.f32 %v3841_v51, %v3842_v59  ;;  %v3852_v23 = vmul.f32 %v8803_v17, %v7244_v32  ;;  %v3853_v48 = vmul.f32 %v8803_v17, %v3845_v38  ;;  %v3872_v60 = vmul.f32 %v8803_v17, %v7265_v14  ;;  %v4304_v14 = vld [vmem:[%s9062_s5 + $0x58] sm:$0x1] }
 0x588   :  { %v3873_v10 = vmul.f32 %v4288_v39, %v8803_v17  ;;  %v3886_v63 = vmul.f32 %v8803_v17, %v7379_v40  ;;  %v3887_v32 = vmul.f32 %v4292_v46, %v8803_v17  ;;  %v3900_v8 = vmul.f32 %v8803_v17, %v7495_v34 }
 0x589   :  { %v8837_v3 = vrot.slane %v3843_v18, %v3849_v12  ;;  %v3901_v1 = vmul.f32 %v4296_v24, %v8803_v17  ;;  %v3914_v40 = vmul.f32 %v8803_v17, %v7611_v50  ;;  %v3915_v35 = vmul.f32 %v4300_v4, %v8803_v17  ;;  %v4312_v18 = vld [vmem:[%s9062_s5 + $0x78] sm:$0x1]  ;;  %v4316_v4 = vld [vmem:[%s9062_s5 + $0x88] sm:$0x1] }
 0x58a   :  { %v3928_v34 = vmul.f32 %v8803_v17, %v7726_v15  ;;  %v3929_v36 = vmul.f32 %v4304_v14, %v8803_v17  ;;  %v3942_v16 = vmul.f32 %v8803_v17, %v7846_v7  ;;  %v3943_v27 = vmul.f32 %v4308_v29, %v8803_v17 }
 0x58b   :  { %v3860_v0 = vadd.f32 %v8837_v3, %v3852_v23  ;;  %v3861_v41 = vadd.f32 %v8837_v3, %v3853_v48  ;;  %v3874_v42 = vadd.f32 %v3872_v60, %v8837_v3  ;;  %v3875_v50 = vadd.f32 %v3873_v10, %v8837_v3 }
 0x58c   :  { %v3888_v54 = vadd.f32 %v3886_v63, %v8837_v3  ;;  %v3889_v56 = vadd.f32 %v3887_v32, %v8837_v3  ;;  %v3902_v15 = vadd.f32 %v3900_v8, %v8837_v3  ;;  %v3903_v55 = vadd.f32 %v3901_v1, %v8837_v3  ;;  %v4320_v1 = vld [vmem:[%s9062_s5 + $0x98] sm:$0x1] }
 0x58d   :  { %vm3862_vm2 = vcmp.gt.f32.partialorder %v3860_v0, 0.0  ;;  %vm3863_vm3 = vcmp.gt.f32.partialorder %v3861_v41, 0.0  ;;  %v3864_v7 = vmul.f32 0.2, %v3860_v0  ;;  %v3865_v26 = vmul.f32 0.2, %v3861_v41 }
 0x58e   :  { %vm3876_vm4 = vcmp.gt.f32.partialorder %v3874_v42, 0.0  ;;  %vm3877_vm5 = vcmp.gt.f32.partialorder %v3875_v50, 0.0  ;;  %v3878_v45 = vmul.f32 0.2, %v3874_v42  ;;  %v3879_v25 = vmul.f32 0.2, %v3875_v50 }
 0x58f   :  { %v3866_v19 = vsel %vm3862_vm2, %v3860_v0, %v3864_v7  ;;  %v3867_v58 = vsel %vm3863_vm3, %v3861_v41, %v3865_v26  ;;  %vm3890_vm6 = vcmp.gt.f32.partialorder %v3888_v54, 0.0  ;;  %vm3891_vm7 = vcmp.gt.f32.partialorder %v3889_v56, 0.0 }
 0x590   :  { %3868 = vst [vmem:[%s9062_s5] sm:$0xff] %v3866_v19  ;;  %3869 = vst [vmem:[%s9062_s5 + $0x8] sm:$0x1] %v3867_v58  ;;  %v3880_v47 = vsel %vm3876_vm4, %v3874_v42, %v3878_v45  ;;  %v3881_v62 = vsel %vm3877_vm5, %v3875_v50, %v3879_v25  ;;  %v3892_v43 = vmul.f32 0.2, %v3888_v54  ;;  %v3893_v22 = vmul.f32 0.2, %v3889_v56 }
 0x591   :  { %4289 = vst [vmem:[%s9062_s5 + $0x10] sm:$0xff] %v3880_v47  ;;  %4290 = vst [vmem:[%s9062_s5 + $0x18] sm:$0x1] %v3881_v62  ;;  %vm3904_vm8 = vcmp.gt.f32.partialorder %v3902_v15, 0.0  ;;  %vm3905_vm9 = vcmp.gt.f32.partialorder %v3903_v55, 0.0  ;;  %v3916_v20 = vadd.f32 %v3914_v40, %v8837_v3  ;;  %v3917_v21 = vadd.f32 %v3915_v35, %v8837_v3 }
 0x592   :  { %v3906_v2 = vmul.f32 0.2, %v3902_v15  ;;  %v3907_v13 = vmul.f32 0.2, %v3903_v55  ;;  %v3894_v6 = vsel %vm3890_vm6, %v3888_v54, %v3892_v43  ;;  %v3895_v11 = vsel %vm3891_vm7, %v3889_v56, %v3893_v22  ;;  %v4324_v42 = vld [vmem:[%s9062_s5 + $0xa8] sm:$0x1] }
 0x593   :  { %4293 = vst [vmem:[%s9062_s5 + $0x20] sm:$0xff] %v3894_v6  ;;  %4294 = vst [vmem:[%s9062_s5 + $0x28] sm:$0x1] %v3895_v11  ;;  %v3930_v31 = vadd.f32 %v3928_v34, %v8837_v3  ;;  %v3931_v51 = vadd.f32 %v3929_v36, %v8837_v3  ;;  %vm3918_vm10 = vcmp.gt.f32.partialorder %v3916_v20, 0.0  ;;  %vm3919_vm11 = vcmp.gt.f32.partialorder %v3917_v21, 0.0 }
 0x594   :  { %v3908_v12 = vsel %vm3904_vm8, %v3902_v15, %v3906_v2  ;;  %v3909_v28 = vsel %vm3905_vm9, %v3903_v55, %v3907_v13  ;;  %v3920_v59 = vmul.f32 0.2, %v3916_v20  ;;  %v3921_v38 = vmul.f32 0.2, %v3917_v21  ;;  %v4332_v2 = vld [vmem:[%s9062_s5 + $0xc8] sm:$0x1] }
 0x595   :  { %4297 = vst [vmem:[%s9062_s5 + $0x30] sm:$0xff] %v3908_v12  ;;  %4298 = vst [vmem:[%s9062_s5 + $0x38] sm:$0x1] %v3909_v28  ;;  %vm3932_vm12 = vcmp.gt.f32.partialorder %v3930_v31, 0.0  ;;  %vm3933_vm13 = vcmp.gt.f32.partialorder %v3931_v51, 0.0  ;;  %v3944_v60 = vadd.f32 %v3942_v16, %v8837_v3  ;;  %v3945_v24 = vadd.f32 %v3943_v27, %v8837_v3 }
 0x596   :  { %v3934_v39 = vmul.f32 0.2, %v3930_v31  ;;  %v3935_v46 = vmul.f32 0.2, %v3931_v51  ;;  %v3922_v23 = vsel %vm3918_vm10, %v3916_v20, %v3920_v59  ;;  %v3923_v48 = vsel %vm3919_vm11, %v3917_v21, %v3921_v38  ;;  %v4336_v28 = vld [vmem:[%s9062_s5 + $0xd8] sm:$0x1] }
 0x597   :  { %4301 = vst [vmem:[%s9062_s5 + $0x40] sm:$0xff] %v3922_v23  ;;  %4302 = vst [vmem:[%s9062_s5 + $0x48] sm:$0x1] %v3923_v48  ;;  %v3956_v32 = vmul.f32 %v8803_v17, %v7962_v52  ;;  %v3957_v8 = vmul.f32 %v4312_v18, %v8803_v17  ;;  %vm3946_vm14 = vcmp.gt.f32.partialorder %v3944_v60, 0.0  ;;  %vm3947_vm15 = vcmp.gt.f32.partialorder %v3945_v24, 0.0 }
 0x598   :  { %v3936_v10 = vsel %vm3932_vm12, %v3930_v31, %v3934_v39  ;;  %v3937_v63 = vsel %vm3933_vm13, %v3931_v51, %v3935_v46  ;;  %v3948_v14 = vmul.f32 0.2, %v3944_v60  ;;  %v3949_v29 = vmul.f32 0.2, %v3945_v24  ;;  %v4340_v48 = vld [vmem:[%s9062_s5 + $0xe8] sm:$0x1] }
 0x599   :  { %4305 = vst [vmem:[%s9062_s5 + $0x50] sm:$0xff] %v3936_v10  ;;  %4306 = vst [vmem:[%s9062_s5 + $0x58] sm:$0x1] %v3937_v63  ;;  %v3958_v52 = vadd.f32 %v3956_v32, %v8837_v3  ;;  %v3959_v40 = vadd.f32 %v3957_v8, %v8837_v3  ;;  %v3970_v35 = vmul.f32 %v8803_v17, %v8078_v5 }
 0x59a   :  { %v3971_v34 = vmul.f32 %v4316_v4, %v8803_v17  ;;  %v3950_v36 = vsel %vm3946_vm14, %v3944_v60, %v3948_v14  ;;  %v3951_v16 = vsel %vm3947_vm15, %v3945_v24, %v3949_v29  ;;  %v3984_v27 = vmul.f32 %v8803_v17, %v8194_v53 }
 0x59b   :  { %v3985_v0 = vmul.f32 %v4320_v1, %v8803_v17  ;;  %4309 = vst [vmem:[%s9062_s5 + $0x60] sm:$0xff] %v3950_v36  ;;  %4310 = vst [vmem:[%s9062_s5 + $0x68] sm:$0x1] %v3951_v16  ;;  %vm3960_vm0 = vcmp.gt.f32.partialorder %v3958_v52, 0.0  ;;  %vm3961_vm1 = vcmp.gt.f32.partialorder %v3959_v40, 0.0  ;;  %v3972_v53 = vadd.f32 %v3970_v35, %v8837_v3 }
 0x59c   :  { %v3962_v5 = vmul.f32 0.2, %v3958_v52  ;;  %v3963_v41 = vmul.f32 0.2, %v3959_v40  ;;  %v3973_v50 = vadd.f32 %v3971_v34, %v8837_v3  ;;  %v3986_v54 = vadd.f32 %v3984_v27, %v8837_v3  ;;  %v4348_v16 = vld [vmem:[%s9062_s5 + $0x108] sm:$0x1] }
 0x59d   :  { %v3987_v56 = vadd.f32 %v3985_v0, %v8837_v3  ;;  %v3998_v7 = vmul.f32 %v8803_v17, %v8315_v49  ;;  %v3999_v26 = vmul.f32 %v4324_v42, %v8803_v17  ;;  %vm3974_vm2 = vcmp.gt.f32.partialorder %v3972_v53, 0.0  ;;  %v4328_v49 = vld [vmem:[%s9062_s5 + $0xb8] sm:$0x1] }
 0x59e   :  { %v3964_v15 = vsel %vm3960_vm0, %v3958_v52, %v3962_v5  ;;  %v3965_v55 = vsel %vm3961_vm1, %v3959_v40, %v3963_v41  ;;  %vm3975_vm3 = vcmp.gt.f32.partialorder %v3973_v50, 0.0  ;;  %v3976_v45 = vmul.f32 0.2, %v3972_v53 }
 0x59f   :  { %4313 = vst [vmem:[%s9062_s5 + $0x70] sm:$0xff] %v3964_v15  ;;  %4314 = vst [vmem:[%s9062_s5 + $0x78] sm:$0x1] %v3965_v55  ;;  %v3977_v25 = vmul.f32 0.2, %v3973_v50  ;;  %vm3988_vm4 = vcmp.gt.f32.partialorder %v3986_v54, 0.0  ;;  %v4000_v43 = vadd.f32 %v3998_v7, %v8837_v3  ;;  %v4001_v22 = vadd.f32 %v3999_v26, %v8837_v3 }
 0x5a0   :  { %vm3989_vm5 = vcmp.gt.f32.partialorder %v3987_v56, 0.0  ;;  %v3990_v19 = vmul.f32 0.2, %v3986_v54  ;;  %v3991_v58 = vmul.f32 0.2, %v3987_v56  ;;  %v3978_v47 = vsel %vm3974_vm2, %v3972_v53, %v3976_v45 }
 0x5a1   :  { %v3979_v62 = vsel %vm3975_vm3, %v3973_v50, %v3977_v25  ;;  %4317 = vst [vmem:[%s9062_s5 + $0x80] sm:$0xff] %v3978_v47  ;;  %v4012_v11 = vmul.f32 %v8803_v17, %v8431_v37  ;;  %v4013_v20 = vmul.f32 %v4328_v49, %v8803_v17  ;;  %vm4002_vm6 = vcmp.gt.f32.partialorder %v4000_v43, 0.0  ;;  %v4352_v15 = vld [vmem:[%s9062_s5 + $0x118] sm:$0x1] }
 0x5a2   :  { %4318 = vst [vmem:[%s9062_s5 + $0x88] sm:$0x1] %v3979_v62  ;;  %v3992_v13 = vsel %vm3988_vm4, %v3986_v54, %v3990_v19  ;;  %v3993_v6 = vsel %vm3989_vm5, %v3987_v56, %v3991_v58  ;;  %vm4003_vm7 = vcmp.gt.f32.partialorder %v4001_v22, 0.0  ;;  %v4004_v21 = vmul.f32 0.2, %v4000_v43 }
 0x5a3   :  { %4321 = vst [vmem:[%s9062_s5 + $0x90] sm:$0xff] %v3992_v13  ;;  %4322 = vst [vmem:[%s9062_s5 + $0x98] sm:$0x1] %v3993_v6  ;;  %v4005_v12 = vmul.f32 0.2, %v4001_v22  ;;  %v4014_v37 = vadd.f32 %v4012_v11, %v8837_v3  ;;  %v4015_v31 = vadd.f32 %v4013_v20, %v8837_v3  ;;  %v4026_v51 = vmul.f32 %v8803_v17, %v8547_v9 }
 0x5a4   :  { %v4027_v59 = vmul.f32 %v4332_v2, %v8803_v17  ;;  %v4006_v38 = vsel %vm4002_vm6, %v4000_v43, %v4004_v21  ;;  %v4040_v46 = vmul.f32 %v8803_v17, %v8663_v44  ;;  %v4041_v18 = vmul.f32 %v4336_v28, %v8803_v17 }
 0x5a5   :  { %v4007_v39 = vsel %vm4003_vm7, %v4001_v22, %v4005_v12  ;;  %4325 = vst [vmem:[%s9062_s5 + $0xa0] sm:$0xff] %v4006_v38  ;;  %vm4016_vm8 = vcmp.gt.f32.partialorder %v4014_v37, 0.0  ;;  %vm4017_vm9 = vcmp.gt.f32.partialorder %v4015_v31, 0.0  ;;  %v4018_v9 = vmul.f32 0.2, %v4014_v37 }
 0x5a6   :  { %4326 = vst [vmem:[%s9062_s5 + $0xa8] sm:$0x1] %v4007_v39  ;;  %v4019_v23 = vmul.f32 0.2, %v4015_v31  ;;  %v4028_v44 = vadd.f32 %v4026_v51, %v8837_v3  ;;  %v4029_v60 = vadd.f32 %v4027_v59, %v8837_v3  ;;  %v4042_v24 = vadd.f32 %v4040_v46, %v8837_v3 }
 0x5a7   :  { %v4043_v4 = vadd.f32 %v4041_v18, %v8837_v3  ;;  %v4020_v10 = vsel %vm4016_vm8, %v4014_v37, %v4018_v9  ;;  %v4054_v32 = vmul.f32 %v8803_v17, %v8748_v57  ;;  %v4055_v8 = vmul.f32 %v4340_v48, %v8803_v17  ;;  %v4344_v57 = vld [vmem:[%s9062_s5 + $0xf8] sm:$0x1] }
 0x5a8   :  { %v4021_v63 = vsel %vm4017_vm9, %v4015_v31, %v4019_v23  ;;  %4329 = vst [vmem:[%s9062_s5 + $0xb0] sm:$0xff] %v4020_v10  ;;  %vm4030_vm10 = vcmp.gt.f32.partialorder %v4028_v44, 0.0  ;;  %vm4031_vm11 = vcmp.gt.f32.partialorder %v4029_v60, 0.0  ;;  %v4032_v14 = vmul.f32 0.2, %v4028_v44 }
 0x5a9   :  { %4330 = vst [vmem:[%s9062_s5 + $0xb8] sm:$0x1] %v4021_v63  ;;  %v4033_v29 = vmul.f32 0.2, %v4029_v60  ;;  %vm4044_vm12 = vcmp.gt.f32.partialorder %v4042_v24, 0.0  ;;  %vm4045_vm13 = vcmp.gt.f32.partialorder %v4043_v4, 0.0  ;;  %v4056_v34 = vadd.f32 %v4054_v32, %v8837_v3 }
 0x5aa   :  { %v4046_v1 = vmul.f32 0.2, %v4042_v24  ;;  %v4047_v52 = vmul.f32 0.2, %v4043_v4  ;;  %v4034_v40 = vsel %vm4030_vm10, %v4028_v44, %v4032_v14  ;;  %v4057_v36 = vadd.f32 %v4055_v8, %v8837_v3 }
 0x5ab   :  { %v4035_v35 = vsel %vm4031_vm11, %v4029_v60, %v4033_v29  ;;  %4333 = vst [vmem:[%s9062_s5 + $0xc0] sm:$0xff] %v4034_v40  ;;  %v4068_v5 = vmul.f32 %v8803_v17, %v8762_v61  ;;  %v4069_v41 = vmul.f32 %v4344_v57, %v8803_v17  ;;  %vm4058_vm14 = vcmp.gt.f32.partialorder %v4056_v34, 0.0 }
 0x5ac   :  { %4334 = vst [vmem:[%s9062_s5 + $0xc8] sm:$0x1] %v4035_v35  ;;  %v4048_v27 = vsel %vm4044_vm12, %v4042_v24, %v4046_v1  ;;  %v4049_v0 = vsel %vm4045_vm13, %v4043_v4, %v4047_v52  ;;  %vm4059_vm15 = vcmp.gt.f32.partialorder %v4057_v36, 0.0  ;;  %v4060_v42 = vmul.f32 0.2, %v4056_v34 }
 0x5ad   :  { %4337 = vst [vmem:[%s9062_s5 + $0xd0] sm:$0xff] %v4048_v27  ;;  %4338 = vst [vmem:[%s9062_s5 + $0xd8] sm:$0x1] %v4049_v0  ;;  %v4061_v53 = vmul.f32 0.2, %v4057_v36  ;;  %v4070_v50 = vadd.f32 %v4068_v5, %v8837_v3  ;;  %v4071_v54 = vadd.f32 %v4069_v41, %v8837_v3  ;;  %v4082_v61 = vmul.f32 %v8803_v17, %v8774_v30 }
 0x5ae   :  { %v4083_v56 = vmul.f32 %v4348_v16, %v8803_v17  ;;  %v4062_v55 = vsel %vm4058_vm14, %v4056_v34, %v4060_v42  ;;  %v4096_v26 = vmul.f32 %v8803_v17, %v8786_v33  ;;  %v4097_v45 = vmul.f32 %v4352_v15, %v8803_v17 }
 0x5af   :  { %v4063_v7 = vsel %vm4059_vm15, %v4057_v36, %v4061_v53  ;;  %4341 = vst [vmem:[%s9062_s5 + $0xe0] sm:$0xff] %v4062_v55  ;;  %vm4072_vm0 = vcmp.gt.f32.partialorder %v4070_v50, 0.0  ;;  %vm4073_vm1 = vcmp.gt.f32.partialorder %v4071_v54, 0.0  ;;  %v4074_v30 = vmul.f32 0.2, %v4070_v50 }
 0x5b0   :  { %4342 = vst [vmem:[%s9062_s5 + $0xe8] sm:$0x1] %v4063_v7  ;;  %v4075_v25 = vmul.f32 0.2, %v4071_v54  ;;  %v4084_v19 = vadd.f32 %v4082_v61, %v8837_v3  ;;  %v4085_v58 = vadd.f32 %v4083_v56, %v8837_v3  ;;  %v4098_v33 = vadd.f32 %v4096_v26, %v8837_v3 }
 0x5b1   :  { %v4099_v17 = vadd.f32 %v4097_v45, %v8837_v3  ;;  %v4076_v49 = vsel %vm4072_vm0, %v4070_v50, %v4074_v30 }
 0x5b2   :  { %v4077_v47 = vsel %vm4073_vm1, %v4071_v54, %v4075_v25  ;;  %4345 = vst [vmem:[%s9062_s5 + $0xf0] sm:$0xff] %v4076_v49  ;;  %vm4086_vm2 = vcmp.gt.f32.partialorder %v4084_v19, 0.0  ;;  %vm4087_vm3 = vcmp.gt.f32.partialorder %v4085_v58, 0.0  ;;  %v4088_v62 = vmul.f32 0.2, %v4084_v19 }
 0x5b3   :  { %4346 = vst [vmem:[%s9062_s5 + $0xf8] sm:$0x1] %v4077_v47  ;;  %v4089_v43 = vmul.f32 0.2, %v4085_v58  ;;  %vm4100_vm4 = vcmp.gt.f32.partialorder %v4098_v33, 0.0  ;;  %vm4101_vm5 = vcmp.gt.f32.partialorder %v4099_v17, 0.0 }
 0x5b4   :  { %v4102_v22 = vmul.f32 0.2, %v4098_v33  ;;  %v4103_v2 = vmul.f32 0.2, %v4099_v17  ;;  %v4090_v13 = vsel %vm4086_vm2, %v4084_v19, %v4088_v62 }
 0x5b5   :  { %v4091_v3 = vsel %vm4087_vm3, %v4085_v58, %v4089_v43  ;;  %4349 = vst [vmem:[%s9062_s5 + $0x100] sm:$0xff] %v4090_v13 }
 0x5b6   :  { %4350 = vst [vmem:[%s9062_s5 + $0x108] sm:$0x1] %v4091_v3  ;;  %v4104_v6 = vsel %vm4100_vm4, %v4098_v33, %v4102_v22  ;;  %v4105_v11 = vsel %vm4101_vm5, %v4099_v17, %v4103_v2 }
 0x5b7   :  { %4353 = vst [vmem:[%s9062_s5 + $0x110] sm:$0xff] %v4104_v6  ;;  %4354 = vst [vmem:[%s9062_s5 + $0x118] sm:$0x1] %v4105_v11 }

</bundles_post_ra>
